<compile_context>
chip_gen: v5e
topology: v5e:2x2
jax: 0.10.0
libtpu: 0.0.40
codegen_flags: <defaults>
</compile_context>

<pallas_src>
import functools

import numpy as np
import jax
import jax.numpy as jnp
from jax.experimental import pallas as pl
from jax.experimental.pallas import tpu as pltpu


# ----------------------------------------------------------------------------
# Model dimensions (synthetic stand-in, lane-padded internals)
# ----------------------------------------------------------------------------
CIN = 1               # input channels
H1, H2 = 32, 64       # encoder/decoder hidden channels (num_hiddens stand-in)
EMBED_DIM = 64        # embedding_dim (reference repo uses 60; kept lane-friendly)
NUM_EMBED = 128       # num_embeddings

LANE = 128            # pad every channel axis to a full lane width
H1P = LANE            # padded H1
H2P = LANE            # padded H2
DP = LANE             # padded embedding dim
OUTP = LANE           # padded decoder-output lane width (real width = 16)

# packing tricks below rely on these
assert NUM_EMBED == LANE and 2 * EMBED_DIM == LANE


# ----------------------------------------------------------------------------
# Fused forward kernel (one row tile = bblk batch elements x T2 latent steps)
# ----------------------------------------------------------------------------
def _fused_vqvae_kernel(
    si_ref,                                   # SMEM (1,) int32  sample_index
    x_ref,                                    # (rows, 16*CIN)   f32
    w1_ref, b1_ref,                           # (16*CIN, 4*H1P) bf16, (1, 4*H1P) f32
    w2_ref, b2_ref,                           # (4*H1P, H2P)    bf16, (1, H2P)   f32
    w3p_ref, w3c_ref, w3n_ref, b3_ref,        # 3x (H2P, DP)    bf16, (1, DP)    f32
    cbt_ref, cb_ref, esq_ref,                 # (DP,K) f32, (K,DP) f32, (1,K) f32
    wd1_ref, bd1_ref,                         # (DP, 4*H1P)     bf16, (1, 4*H1P) f32
    wd2_ref, bd2_ref,                         # (4*H1P, OUTP)   bf16, (1, OUTP)  f32
    zzq_ref, rec_ref,                         # outputs: (rows, 128) f32 each
    *, t2):
    f32, bf16 = jnp.float32, jnp.bfloat16
    rows = x_ref.shape[0]

    row_idx = jax.lax.broadcasted_iota(jnp.int32, (rows, LANE), 0)
    lane_idx = jax.lax.broadcasted_iota(jnp.int32, (rows, LANE), 1)
    tpos = row_idx % t2                       # time position inside each batch element

    # ------------------------- encoder -------------------------
    # enc1 (k=4,s=4) and enc2 (k=4,s=4) as two lane-dense block-diagonal matmuls
    # (stride==kernel im2col was done wrapper-side as a free reshape).
    x16 = x_ref[...].astype(bf16)                                     # (rows, 16)
    h1 = jnp.dot(x16, w1_ref[...], preferred_element_type=f32) + b1_ref[...]
    h1 = jnp.where(h1 > 0, h1, 0.2 * h1)        # LeakyReLU(0.2) (WaveGAN slope), f32

    h2 = jnp.dot(h1.astype(bf16), w2_ref[...], preferred_element_type=f32) + b2_ref[...]
    h2 = jnp.where(h2 > 0, h2, 0.2 * h2)                              # (rows, H2P)

    # enc3: Conv1d(k=3, s=1, pad=1).  +-1 time shifts via XLU sublane roll +
    # boundary masks (the tpos masks also zero rolls that cross batch elements
    # packed into the same tile).  Three K=128 matmuls accumulate directly into
    # z -- no (rows, 3*H2P) concatenate, no O(T2^2) shift matrices.
    h2_prev = jnp.where(tpos == 0, 0.0, pltpu.roll(h2, shift=1, axis=0))
    h2_next = jnp.where(tpos == t2 - 1, 0.0, pltpu.roll(h2, shift=rows - 1, axis=0))
    z = (jnp.dot(h2_prev.astype(bf16), w3p_ref[...], preferred_element_type=f32)
         + jnp.dot(h2.astype(bf16), w3c_ref[...], preferred_element_type=f32)
         + jnp.dot(h2_next.astype(bf16), w3n_ref[...], preferred_element_type=f32)
         + b3_ref[...])                         # (rows, DP); lanes >= EMBED_DIM are 0

    # ------------------------- VQ (f32 distances / first-index argmin) --------
    scores = jnp.dot(z, cbt_ref[...], preferred_element_type=f32)     # (rows, K)
    d = esq_ref[...] - 2.0 * scores             # argmin_k ||z-e_k||^2 (up to +||z||^2)
    dmin = jnp.min(d, axis=-1, keepdims=True)
    # first index attaining the minimum (torch .min tie-break); exact-equality
    # tie-break is valid because the whole f32 distance row is one pass.
    idx = jnp.min(jnp.where(d == dmin, lane_idx, d.shape[1]),
                  axis=-1, keepdims=True)                              # (rows, 1)
    onehot = (lane_idx == idx).astype(f32)
    zq = jnp.dot(onehot, cb_ref[...], preferred_element_type=f32)      # (rows, DP)

    # z occupies lanes [0,64), z_q lanes [64,128) of ONE output slab
    # (both have exact zeros in their padded lanes, so a lane-roll + add packs them).
    zzq_ref[...] = z + pltpu.roll(zq, shift=EMBED_DIM, axis=1)

    # ---------------- sample_index mask (runtime SMEM scalar) ----------------
    # equivalent to torch.cat((z_q[:, :sample_index], zeros), dim=1)
    zq_m = jnp.where(tpos < si_ref[0], zq, 0.0)

    # ------------------------- decoder -------------------------
    # dec1: ConvTranspose1d(D->H1, k=4, s=4) + ReLU   (taps in 128-lane blocks)
    hd1 = jnp.dot(zq_m.astype(bf16), wd1_ref[...], preferred_element_type=f32) + bd1_ref[...]
    hd1 = jnp.maximum(hd1, 0.0)                                        # (rows, 4*H1P)
    # dec2: ConvTranspose1d(H1->1, k=4, s=4) + tanh as a block-diagonal matmul;
    # lanes [0,16) are the 16 audio samples per latent step, lanes >=16 are tanh(0)=0.
    out = jnp.dot(hd1.astype(bf16), wd2_ref[...], preferred_element_type=f32) + bd2_ref[...]
    rec = jnp.tanh(out)
    # stash the VQ indices (exact small ints, < NUM_EMBED=128 so exact in f32)
    # in lane 16 of the reconstruction slab -> only 2 output slabs total.
    rec_ref[...] = jnp.where(lane_idx == 16, idx.astype(f32), rec)


# ----------------------------------------------------------------------------
# Parameters: synthetic PyTorch-layout weights + one-time kernel repacking
# ----------------------------------------------------------------------------
def init_params(key):
    """Deterministic synthetic weights in the PyTorch layouts."""
    ks = jax.random.split(key, 6)

    def w(k, shape, scale=0.05):
        return scale * jax.random.normal(k, shape, jnp.float32)

    return dict(
        # encoder (WaveGANDiscriminator stand-in): two k=4,s=4 convs + k=3 conv
        enc1_w=w(ks[0], (H1, CIN, 4)),       enc1_b=jnp.zeros((H1,), jnp.float32),
        enc2_w=w(ks[1], (H2, H1, 4)),        enc2_b=jnp.zeros((H2,), jnp.float32),
        enc3_w=w(ks[2], (EMBED_DIM, H2, 3)), enc3_b=jnp.zeros((EMBED_DIM,), jnp.float32),
        # VQ codebook
        codebook=w(ks[3], (NUM_EMBED, EMBED_DIM), 1.0),
        # decoder (WaveGANGenerator stand-in): two k=4,s=4 transposed convs
        dec1_w=w(ks[4], (EMBED_DIM, H1, 4)), dec1_b=jnp.zeros((H1,), jnp.float32),
        dec2_w=w(ks[5], (H1, 1, 4)),         dec2_b=jnp.zeros((1,), jnp.float32),
    )
    # TODO(synk): exact WaveGANDiscriminator / WaveGANGenerator layer stacks
    # (kernel 25, phase shuffle, speaker conditioning) are not in the provided
    # source; a structurally equivalent strided conv/deconv stack is used.


def pack_params(p):
    """One-time host-side repacking into padded, matmul-friendly layouts
    (bf16 weights, f32 biases/codebook).  No per-call casts/reshapes."""
    f32 = np.float32
    e1, e1b = np.asarray(p["enc1_w"], f32), np.asarray(p["enc1_b"], f32)
    e2, e2b = np.asarray(p["enc2_w"], f32), np.asarray(p["enc2_b"], f32)
    e3, e3b = np.asarray(p["enc3_w"], f32), np.asarray(p["enc3_b"], f32)
    cb = np.asarray(p["codebook"], f32)
    d1, d1b = np.asarray(p["dec1_w"], f32), np.asarray(p["dec1_b"], f32)
    d2, d2b = np.asarray(p["dec2_w"], f32), np.asarray(p["dec2_b"], f32)

    # enc1: x.reshape(rows, 16*CIN) @ block-diagonal (16*CIN, 4*H1P)
    w1 = np.zeros((16 * CIN, 4 * H1P), f32)
    b1 = np.zeros((4 * H1P,), f32)
    for j in range(4):                    # which of the 4 T1-steps inside a T2-step
        for k in range(4):                # conv tap
            for ci in range(CIN):
                w1[(4 * j + k) * CIN + ci, j * H1P: j * H1P + H1] = e1[:, ci, k]
        b1[j * H1P: j * H1P + H1] = e1b

    # enc2: h1 (rows, 4*H1P) @ (4*H1P, H2P)
    w2 = np.zeros((4 * H1P, H2P), f32)
    b2 = np.zeros((H2P,), f32)
    for k in range(4):
        w2[k * H1P: k * H1P + H1, :H2] = e2[:, :, k].T
    b2[:H2] = e2b

    # enc3: three separate (H2P, DP) tap matrices (prev / center / next)
    w3 = np.zeros((3, H2P, DP), f32)
    b3 = np.zeros((DP,), f32)
    for k in range(3):
        w3[k, :H2, :EMBED_DIM] = e3[:, :, k].T
    b3[:EMBED_DIM] = e3b

    # codebook zero-padded on D; also pre-transposed copy for the score matmul
    cbp = np.zeros((NUM_EMBED, DP), f32)
    cbp[:, :EMBED_DIM] = cb
    cbt = np.ascontiguousarray(cbp.T)                  # (DP, K)
    e_sq = np.sum(cbp * cbp, axis=1)[None, :]          # (1, K)

    # dec1: z (rows, DP) @ (DP, 4*H1P), taps in 128-lane blocks
    wd1 = np.zeros((DP, 4 * H1P), f32)
    bd1 = np.zeros((4 * H1P,), f32)
    for j in range(4):
        wd1[:EMBED_DIM, j * H1P: j * H1P + H1] = d1[:, :, j]
        bd1[j * H1P: j * H1P + H1] = d1b

    # dec2: block-diagonal (4*H1P, OUTP); real output occupies lanes [0,16)
    wd2 = np.zeros((4 * H1P, OUTP), f32)
    bd2 = np.zeros((OUTP,), f32)
    for j in range(4):
        wd2[j * H1P: j * H1P + H1, j * 4: j * 4 + 4] = d2[:, 0, :]
        bd2[j * 4: j * 4 + 4] = d2b[0]

    bf16 = jnp.bfloat16
    return dict(
        w1=jnp.asarray(w1, bf16), b1=jnp.asarray(b1[None, :], jnp.float32),
        w2=jnp.asarray(w2, bf16), b2=jnp.asarray(b2[None, :], jnp.float32),
        w3p=jnp.asarray(w3[0], bf16), w3c=jnp.asarray(w3[1], bf16),
        w3n=jnp.asarray(w3[2], bf16), b3=jnp.asarray(b3[None, :], jnp.float32),
        codebook_p=jnp.asarray(cbp, jnp.float32),
        codebook_t=jnp.asarray(cbt, jnp.float32),
        e_sq=jnp.asarray(e_sq, jnp.float32),
        wd1=jnp.asarray(wd1, bf16), bd1=jnp.asarray(bd1[None, :], jnp.float32),
        wd2=jnp.asarray(wd2, bf16), bd2=jnp.asarray(bd2[None, :], jnp.float32),
    )


# ----------------------------------------------------------------------------
# Row-tile heuristic: fill the MXU (M ~ 256 rows) but keep >= 2 grid steps
# when B allows so v7x's two TensorCores both get work.
# ----------------------------------------------------------------------------
def _pick_batch_block(B, T2, row_target=256):
    bblk = 1
    for cand in range(1, B + 1):
        if B % cand == 0 and cand * T2 <= row_target:
            bblk = cand
    if B // bblk == 1 and B > 1:
        for cand in range(bblk - 1, 0, -1):
            if B % cand == 0:
                bblk = cand
                break
    return bblk
    # TODO(synk): for very long audio (T2*H-activations past the VMEM limit)
    # add a time-tiling grid axis with a +-1-row halo for the k=3 conv.


# ----------------------------------------------------------------------------
# Jitted pallas_call wrapper.  sample_index is a traced scalar array, so new
# random values between calls hit the jit cache (no Mosaic recompiles).
# ----------------------------------------------------------------------------
@functools.partial(jax.jit, static_argnames=("t2", "bblk"))
def _vqvae_forward_jit(si_arr, x, params, *, t2, bblk):
    B = x.shape[0]
    rows = B * t2
    rows_blk = bblk * t2
    num_tiles = rows // rows_blk

    # free, contiguous regroup: 16 consecutive samples per latent step.
    # (kept at 16 lanes; input bytes are tiny compared to weights/outputs)
    x2d = x.astype(jnp.float32).reshape(rows, 16 * CIN)

    kernel = functools.partial(_fused_vqvae_kernel, t2=t2)
    tile = lambda i, si: (i, 0)     # row-tiled operands
    rep = lambda i, si: (0, 0)      # grid-invariant weights

    grid_spec = pltpu.PrefetchScalarGridSpec(
        num_scalar_prefetch=1,
        grid=(num_tiles,),
        in_specs=[
            pl.BlockSpec((rows_blk, 16 * CIN), tile),
            pl.BlockSpec((16 * CIN, 4 * H1P), rep),
            pl.BlockSpec((1, 4 * H1P), rep),
            pl.BlockSpec((4 * H1P, H2P), rep),
            pl.BlockSpec((1, H2P), rep),
            pl.BlockSpec((H2P, DP), rep),
            pl.BlockSpec((H2P, DP), rep),
            pl.BlockSpec((H2P, DP), rep),
            pl.BlockSpec((1, DP), rep),
            pl.BlockSpec((DP, NUM_EMBED), rep),
            pl.BlockSpec((NUM_EMBED, DP), rep),
            pl.BlockSpec((1, NUM_EMBED), rep),
            pl.BlockSpec((DP, 4 * H1P), rep),
            pl.BlockSpec((1, 4 * H1P), rep),
            pl.BlockSpec((4 * H1P, OUTP), rep),
            pl.BlockSpec((1, OUTP), rep),
        ],
        out_specs=(
            pl.BlockSpec((rows_blk, LANE), tile),
            pl.BlockSpec((rows_blk, LANE), tile),
        ),
    )

    param_bytes = sum(int(v.size) * v.dtype.itemsize for v in params.values())
    flops_per_row = 2 * (16 * CIN * 4 * H1P + 4 * H1P * H2P + 3 * H2P * DP
                         + DP * NUM_EMBED + NUM_EMBED * DP
                         + DP * 4 * H1P + 4 * H1P * OUTP)
    cost = pl.CostEstimate(
        flops=rows * flops_per_row,
        transcendentals=rows * OUTP,
        bytes_accessed=int(rows * 16 * CIN * 4 + num_tiles * param_bytes
                           + 2 * rows * LANE * 4),
    )

    zzq, recidx = pl.pallas_call(
        kernel,
        out_shape=(jax.ShapeDtypeStruct((rows, LANE), jnp.float32),   # z | z_q packed
                   jax.ShapeDtypeStruct((rows, LANE), jnp.float32)),  # recon + idx
        grid_spec=grid_spec,
        compiler_params=pltpu.CompilerParams(
            dimension_semantics=("parallel",)),   # row tiles split across TCs
        cost_estimate=cost,
    )(si_arr, x2d, params["w1"], params["b1"], params["w2"], params["b2"],
      params["w3p"], params["w3c"], params["w3n"], params["b3"],
      params["codebook_t"], params["codebook_p"], params["e_sq"],
      params["wd1"], params["bd1"], params["wd2"], params["bd2"])

    zzq = zzq.reshape(B, t2, LANE)
    recidx = recidx.reshape(B, t2, LANE)
    z = zzq[:, :, :EMBED_DIM]
    z_q_x = zzq[:, :, EMBED_DIM:2 * EMBED_DIM]
    indices = recidx[:, :, 16].astype(jnp.int32)
    # reconstructed_x.view(-1, 1, output_features_size)  (NCW in torch)
    reconstructed_x = recidx[:, :, :16].reshape(B, 1, t2 * 16)
    return reconstructed_x, z, z_q_x, indices


# ----------------------------------------------------------------------------
# Forward (mirrors ConvolutionalVQVAE.forward)
# ----------------------------------------------------------------------------
def forward(params, x, speaker_dic=None, speaker_id=None, full=False, designate=None):
    # x: (B, T, Cin) float (torch permutes to NCW; we stay channels-last)
    B, T, Cin = x.shape
    assert Cin == CIN and T % 16 == 0
    T2 = T // 16
    assert T2 % 8 == 0, "need T % 128 == 0 for aligned sublane tiles"

    # sample_index bookkeeping: fresh host-side draw per call, passed to the
    # kernel as a runtime SMEM scalar (no recompiles, value may change freely).
    area = T2
    sample_index = area
    if not full:
        sample_index = int(np.random.randint(area) + 1)
    if designate is not None:
        sample_index = int(designate)
    si_arr = jnp.asarray([sample_index], jnp.int32)

    bblk = _pick_batch_block(B, T2)
    reconstructed_x, z, z_q_x, indices = _vqvae_forward_jit(
        si_arr, x, params, t2=T2, bblk=bblk)

    # TODO(synk): speaker_dic / speaker_id conditioning of WaveGANGenerator is
    # not specified in the provided source and is not applied.
    # NOTE: masked (zeroed) timesteps still run through the decoder, matching
    # the torch behaviour (output = tanh(relu(bias)-path), not forced zero).
    return reconstructed_x, z, z_q_x, sample_index, indices


# ----------------------------------------------------------------------------
# Main
# ----------------------------------------------------------------------------
if __name__ == "__main__":
    np.random.seed(0)
    B, T = 2, 4096                           # small audio-like input (T2 = 256)
    x = jax.random.normal(jax.random.PRNGKey(0), (B, T, CIN), jnp.float32)

    params = pack_params(init_params(jax.random.PRNGKey(0)))

    recon, z, z_q_x, sample_index, indices = forward(
        params, x, speaker_dic=None, speaker_id=None, full=False, designate=10)
    # second call with a different sample_index hits the jit cache (no recompile)
    recon_full, *_ = forward(params, x, full=True)

    jax.block_until_ready((recon, z, z_q_x, indices, recon_full))
    assert recon.shape == (B, 1, T)
    assert recon_full.shape == (B, 1, T)
    assert z.shape == (B, T // 16, EMBED_DIM)
    assert z_q_x.shape == (B, T // 16, EMBED_DIM)
    assert indices.shape == (B, T // 16)
    assert indices.dtype == jnp.int32
    assert bool(jnp.all(jnp.isfinite(recon)))
    assert bool(jnp.all((indices >= 0) & (indices < NUM_EMBED)))
    print("KERNEL_OK")
</pallas_src>

<mosaic_0001>
module attributes {stable_mosaic.version = 11 : i64} {
  func.func @_fused_vqvae_kernel(%arg0: i32, %arg1: memref<1xi32, #tpu.memory_space<smem>>, %arg2: memref<256x16xf32, #tpu.memory_space<vmem>>, %arg3: memref<16x512xbf16, #tpu.memory_space<vmem>>, %arg4: memref<1x512xf32, #tpu.memory_space<vmem>>, %arg5: memref<512x128xbf16, #tpu.memory_space<vmem>>, %arg6: memref<1x128xf32, #tpu.memory_space<vmem>>, %arg7: memref<128x128xbf16, #tpu.memory_space<vmem>>, %arg8: memref<128x128xbf16, #tpu.memory_space<vmem>>, %arg9: memref<128x128xbf16, #tpu.memory_space<vmem>>, %arg10: memref<1x128xf32, #tpu.memory_space<vmem>>, %arg11: memref<128x128xf32, #tpu.memory_space<vmem>>, %arg12: memref<128x128xf32, #tpu.memory_space<vmem>>, %arg13: memref<1x128xf32, #tpu.memory_space<vmem>>, %arg14: memref<128x512xbf16, #tpu.memory_space<vmem>>, %arg15: memref<1x512xf32, #tpu.memory_space<vmem>>, %arg16: memref<512x128xbf16, #tpu.memory_space<vmem>>, %arg17: memref<1x128xf32, #tpu.memory_space<vmem>>, %arg18: memref<256x128xf32, #tpu.memory_space<vmem>>, %arg19: memref<256x128xf32, #tpu.memory_space<vmem>>) attributes {dimension_semantics = [#tpu.dimension_semantics<parallel>], iteration_bounds = array<i64: 2>, scalar_prefetch = 1 : i64, scratch_operands = 0 : i64, tpu.core_type = #tpu.core_type<tc>, window_params = [{transform_indices = @transform_0, window_bounds = array<i64: 256, 16>}, {pipeline_mode = #tpu.pipeline_mode<synchronous>, transform_indices = @transform_1, window_bounds = array<i64: 16, 512>}, {pipeline_mode = #tpu.pipeline_mode<synchronous>, transform_indices = @transform_2, window_bounds = array<i64: 1, 512>}, {pipeline_mode = #tpu.pipeline_mode<synchronous>, transform_indices = @transform_3, window_bounds = array<i64: 512, 128>}, {pipeline_mode = #tpu.pipeline_mode<synchronous>, transform_indices = @transform_4, window_bounds = array<i64: 1, 128>}, {pipeline_mode = #tpu.pipeline_mode<synchronous>, transform_indices = @transform_5, window_bounds = array<i64: 128, 128>}, {pipeline_mode = #tpu.pipeline_mode<synchronous>, transform_indices = @transform_6, window_bounds = array<i64: 128, 128>}, {pipeline_mode = #tpu.pipeline_mode<synchronous>, transform_indices = @transform_7, window_bounds = array<i64: 128, 128>}, {pipeline_mode = #tpu.pipeline_mode<synchronous>, transform_indices = @transform_8, window_bounds = array<i64: 1, 128>}, {pipeline_mode = #tpu.pipeline_mode<synchronous>, transform_indices = @transform_9, window_bounds = array<i64: 128, 128>}, {pipeline_mode = #tpu.pipeline_mode<synchronous>, transform_indices = @transform_10, window_bounds = array<i64: 128, 128>}, {pipeline_mode = #tpu.pipeline_mode<synchronous>, transform_indices = @transform_11, window_bounds = array<i64: 1, 128>}, {pipeline_mode = #tpu.pipeline_mode<synchronous>, transform_indices = @transform_12, window_bounds = array<i64: 128, 512>}, {pipeline_mode = #tpu.pipeline_mode<synchronous>, transform_indices = @transform_13, window_bounds = array<i64: 1, 512>}, {pipeline_mode = #tpu.pipeline_mode<synchronous>, transform_indices = @transform_14, window_bounds = array<i64: 512, 128>}, {pipeline_mode = #tpu.pipeline_mode<synchronous>, transform_indices = @transform_15, window_bounds = array<i64: 1, 128>}, {transform_indices = @transform_16, window_bounds = array<i64: 256, 128>}, {transform_indices = @transform_17, window_bounds = array<i64: 256, 128>}]} {
    %0 = tpu.iota {dimensions = array<i32: 0>} : vector<256x128xi32>
    %1 = tpu.iota {dimensions = array<i32: 1>} : vector<256x128xi32>
    %c256_i32 = arith.constant 256 : i32
    %c0_i32 = arith.constant 0 : i32
    %2 = arith.cmpi eq, %c256_i32, %c0_i32 : i32
    %c1_i32 = arith.constant 1 : i32
    %3 = arith.select %2, %c1_i32, %c256_i32 : i32
    %4 = vector.broadcast %3 : i32 to vector<256x128xi32>
    %5 = arith.remsi %0, %4 : vector<256x128xi32>
    %c0_i32_0 = arith.constant 0 : i32
    %6 = vector.broadcast %c0_i32_0 : i32 to vector<256x128xi32>
    %7 = arith.cmpi ne, %5, %6 : vector<256x128xi32>
    %c0_i32_1 = arith.constant 0 : i32
    %8 = vector.broadcast %c0_i32_1 : i32 to vector<256x128xi32>
    %9 = arith.cmpi slt, %5, %8 : vector<256x128xi32>
    %c0_i32_2 = arith.constant 0 : i32
    %10 = arith.cmpi slt, %3, %c0_i32_2 : i32
    %11 = vector.broadcast %10 : i1 to vector<256x128xi1>
    %12 = vector.broadcast %11 : vector<256x128xi1> to vector<256x128xi1>
    %13 = arith.xori %9, %12 : vector<256x128xi1>
    %14 = arith.andi %13, %7 : vector<256x128xi1>
    %15 = vector.broadcast %3 : i32 to vector<256x128xi32>
    %16 = arith.addi %5, %15 : vector<256x128xi32>
    %17 = arith.select %14, %16, %5 : vector<256x128xi1>, vector<256x128xi32>
    %c0 = arith.constant 0 : index
    %c0_3 = arith.constant 0 : index
    %18 = vector.load %arg2[%c0, %c0_3] : memref<256x16xf32, #tpu.memory_space<vmem>>, vector<256x16xf32>
    %19 = arith.truncf %18 : vector<256x16xf32> to vector<256x16xbf16>
    %c0_4 = arith.constant 0 : index
    %c0_5 = arith.constant 0 : index
    %20 = vector.load %arg3[%c0_4, %c0_5] : memref<16x512xbf16, #tpu.memory_space<vmem>>, vector<16x512xbf16>
    %cst = arith.constant dense<0.000000e+00> : vector<256x512xf32>
    %21 = tpu.matmul %19, %20, %cst {dimension_numbers = #tpu.dot_dimension_numbers<[1], [0], [0], [1], [0, 0, 1, 1], [], []>} : vector<256x16xbf16>, vector<16x512xbf16>, vector<256x512xf32> -> vector<256x512xf32>
    %c0_6 = arith.constant 0 : index
    %c0_7 = arith.constant 0 : index
    %22 = vector.load %arg4[%c0_6, %c0_7] : memref<1x512xf32, #tpu.memory_space<vmem>>, vector<1x512xf32>
    %23 = vector.broadcast %22 : vector<1x512xf32> to vector<256x512xf32>
    %24 = arith.addf %21, %23 : vector<256x512xf32>
    %cst_8 = arith.constant 0.000000e+00 : f32
    %25 = vector.broadcast %cst_8 : f32 to vector<256x512xf32>
    %26 = arith.cmpf ogt, %24, %25 : vector<256x512xf32>
    %cst_9 = arith.constant 2.000000e-01 : f32
    %27 = vector.broadcast %cst_9 : f32 to vector<256x512xf32>
    %28 = arith.mulf %27, %24 : vector<256x512xf32>
    %29 = arith.select %26, %24, %28 : vector<256x512xi1>, vector<256x512xf32>
    %30 = arith.truncf %29 : vector<256x512xf32> to vector<256x512xbf16>
    %c0_10 = arith.constant 0 : index
    %c0_11 = arith.constant 0 : index
    %31 = vector.load %arg5[%c0_10, %c0_11] : memref<512x128xbf16, #tpu.memory_space<vmem>>, vector<512x128xbf16>
    %cst_12 = arith.constant dense<0.000000e+00> : vector<256x128xf32>
    %32 = tpu.matmul %30, %31, %cst_12 {dimension_numbers = #tpu.dot_dimension_numbers<[1], [0], [0], [1], [0, 0, 1, 1], [], []>} : vector<256x512xbf16>, vector<512x128xbf16>, vector<256x128xf32> -> vector<256x128xf32>
    %c0_13 = arith.constant 0 : index
    %c0_14 = arith.constant 0 : index
    %33 = vector.load %arg6[%c0_13, %c0_14] : memref<1x128xf32, #tpu.memory_space<vmem>>, vector<1x128xf32>
    %34 = vector.broadcast %33 : vector<1x128xf32> to vector<256x128xf32>
    %35 = arith.addf %32, %34 : vector<256x128xf32>
    %cst_15 = arith.constant 0.000000e+00 : f32
    %36 = vector.broadcast %cst_15 : f32 to vector<256x128xf32>
    %37 = arith.cmpf ogt, %35, %36 : vector<256x128xf32>
    %cst_16 = arith.constant 2.000000e-01 : f32
    %38 = vector.broadcast %cst_16 : f32 to vector<256x128xf32>
    %39 = arith.mulf %38, %35 : vector<256x128xf32>
    %40 = arith.select %37, %35, %39 : vector<256x128xi1>, vector<256x128xf32>
    %c0_i32_17 = arith.constant 0 : i32
    %41 = vector.broadcast %c0_i32_17 : i32 to vector<256x128xi32>
    %42 = arith.cmpi eq, %17, %41 : vector<256x128xi32>
    %c1_i32_18 = arith.constant 1 : i32
    %43 = tpu.dynamic_rotate %40 by %c1_i32_18 dim 0 : vector<256x128xf32>, i32 -> vector<256x128xf32>
    %cst_19 = arith.constant 0.000000e+00 : f32
    %44 = vector.broadcast %cst_19 : f32 to vector<256x128xf32>
    %45 = arith.select %42, %44, %43 : vector<256x128xi1>, vector<256x128xf32>
    %c255_i32 = arith.constant 255 : i32
    %46 = vector.broadcast %c255_i32 : i32 to vector<256x128xi32>
    %47 = arith.cmpi eq, %17, %46 : vector<256x128xi32>
    %c255_i32_20 = arith.constant 255 : i32
    %48 = tpu.dynamic_rotate %40 by %c255_i32_20 dim 0 : vector<256x128xf32>, i32 -> vector<256x128xf32>
    %cst_21 = arith.constant 0.000000e+00 : f32
    %49 = vector.broadcast %cst_21 : f32 to vector<256x128xf32>
    %50 = arith.select %47, %49, %48 : vector<256x128xi1>, vector<256x128xf32>
    %51 = arith.truncf %45 : vector<256x128xf32> to vector<256x128xbf16>
    %c0_22 = arith.constant 0 : index
    %c0_23 = arith.constant 0 : index
    %52 = vector.load %arg7[%c0_22, %c0_23] : memref<128x128xbf16, #tpu.memory_space<vmem>>, vector<128x128xbf16>
    %cst_24 = arith.constant dense<0.000000e+00> : vector<256x128xf32>
    %53 = tpu.matmul %51, %52, %cst_24 {dimension_numbers = #tpu.dot_dimension_numbers<[1], [0], [0], [1], [0, 0, 1, 1], [], []>} : vector<256x128xbf16>, vector<128x128xbf16>, vector<256x128xf32> -> vector<256x128xf32>
    %54 = arith.truncf %40 : vector<256x128xf32> to vector<256x128xbf16>
    %c0_25 = arith.constant 0 : index
    %c0_26 = arith.constant 0 : index
    %55 = vector.load %arg8[%c0_25, %c0_26] : memref<128x128xbf16, #tpu.memory_space<vmem>>, vector<128x128xbf16>
    %cst_27 = arith.constant dense<0.000000e+00> : vector<256x128xf32>
    %56 = tpu.matmul %54, %55, %cst_27 {dimension_numbers = #tpu.dot_dimension_numbers<[1], [0], [0], [1], [0, 0, 1, 1], [], []>} : vector<256x128xbf16>, vector<128x128xbf16>, vector<256x128xf32> -> vector<256x128xf32>
    %57 = arith.addf %53, %56 : vector<256x128xf32>
    %58 = arith.truncf %50 : vector<256x128xf32> to vector<256x128xbf16>
    %c0_28 = arith.constant 0 : index
    %c0_29 = arith.constant 0 : index
    %59 = vector.load %arg9[%c0_28, %c0_29] : memref<128x128xbf16, #tpu.memory_space<vmem>>, vector<128x128xbf16>
    %cst_30 = arith.constant dense<0.000000e+00> : vector<256x128xf32>
    %60 = tpu.matmul %58, %59, %cst_30 {dimension_numbers = #tpu.dot_dimension_numbers<[1], [0], [0], [1], [0, 0, 1, 1], [], []>} : vector<256x128xbf16>, vector<128x128xbf16>, vector<256x128xf32> -> vector<256x128xf32>
    %61 = arith.addf %57, %60 : vector<256x128xf32>
    %c0_31 = arith.constant 0 : index
    %c0_32 = arith.constant 0 : index
    %62 = vector.load %arg10[%c0_31, %c0_32] : memref<1x128xf32, #tpu.memory_space<vmem>>, vector<1x128xf32>
    %63 = vector.broadcast %62 : vector<1x128xf32> to vector<256x128xf32>
    %64 = arith.addf %61, %63 : vector<256x128xf32>
    %c0_33 = arith.constant 0 : index
    %c0_34 = arith.constant 0 : index
    %65 = vector.load %arg11[%c0_33, %c0_34] : memref<128x128xf32, #tpu.memory_space<vmem>>, vector<128x128xf32>
    %cst_35 = arith.constant dense<0.000000e+00> : vector<256x128xf32>
    %66 = tpu.matmul %64, %65, %cst_35 {dimension_numbers = #tpu.dot_dimension_numbers<[1], [0], [0], [1], [0, 0, 1, 1], [], []>} : vector<256x128xf32>, vector<128x128xf32>, vector<256x128xf32> -> vector<256x128xf32>
    %c0_36 = arith.constant 0 : index
    %c0_37 = arith.constant 0 : index
    %67 = vector.load %arg13[%c0_36, %c0_37] : memref<1x128xf32, #tpu.memory_space<vmem>>, vector<1x128xf32>
    %cst_38 = arith.constant 2.000000e+00 : f32
    %68 = vector.broadcast %cst_38 : f32 to vector<256x128xf32>
    %69 = arith.mulf %68, %66 : vector<256x128xf32>
    %70 = vector.broadcast %67 : vector<1x128xf32> to vector<256x128xf32>
    %71 = arith.subf %70, %69 : vector<256x128xf32>
    %cst_39 = arith.constant dense<0x7F800000> : vector<256xf32>
    %72 = vector.multi_reduction <minimumf>, %71, %cst_39 [1] : vector<256x128xf32> to vector<256xf32>
    %73 = vector.shape_cast %72 : vector<256xf32> to vector<256x1xf32>
    %74 = vector.broadcast %73 : vector<256x1xf32> to vector<256x128xf32>
    %75 = arith.cmpf oeq, %71, %74 : vector<256x128xf32>
    %c128_i32 = arith.constant 128 : i32
    %76 = vector.broadcast %c128_i32 : i32 to vector<256x128xi32>
    %77 = arith.select %75, %1, %76 : vector<256x128xi1>, vector<256x128xi32>
    %cst_40 = arith.constant dense<2147483647> : vector<256xi32>
    %78 = vector.multi_reduction <minsi>, %77, %cst_40 [1] : vector<256x128xi32> to vector<256xi32>
    %79 = vector.shape_cast %78 : vector<256xi32> to vector<256x1xi32>
    %80 = vector.broadcast %79 : vector<256x1xi32> to vector<256x128xi32>
    %81 = arith.cmpi eq, %1, %80 : vector<256x128xi32>
    %82 = arith.extui %81 : vector<256x128xi1> to vector<256x128xi32>
    %83 = arith.sitofp %82 : vector<256x128xi32> to vector<256x128xf32>
    %c0_41 = arith.constant 0 : index
    %c0_42 = arith.constant 0 : index
    %84 = vector.load %arg12[%c0_41, %c0_42] : memref<128x128xf32, #tpu.memory_space<vmem>>, vector<128x128xf32>
    %cst_43 = arith.constant dense<0.000000e+00> : vector<256x128xf32>
    %85 = tpu.matmul %83, %84, %cst_43 {dimension_numbers = #tpu.dot_dimension_numbers<[1], [0], [0], [1], [0, 0, 1, 1], [], []>} : vector<256x128xf32>, vector<128x128xf32>, vector<256x128xf32> -> vector<256x128xf32>
    %c64_i32 = arith.constant 64 : i32
    %86 = tpu.dynamic_rotate %85 by %c64_i32 dim 1 : vector<256x128xf32>, i32 -> vector<256x128xf32>
    %87 = arith.addf %64, %86 : vector<256x128xf32>
    %c0_44 = arith.constant 0 : index
    %c0_45 = arith.constant 0 : index
    %88 = vector.load %arg18[%c0_44, %c0_45] : memref<256x128xf32, #tpu.memory_space<vmem>>, vector<256x128xf32>
    tpu.vector_store %arg18[%c0_44, %c0_45], %87 {strides = array<i32>} : memref<256x128xf32, #tpu.memory_space<vmem>>, vector<256x128xf32>,
    %c0_46 = arith.constant 0 : index
    %89 = memref.load %arg1[%c0_46] : memref<1xi32, #tpu.memory_space<smem>>
    %90 = vector.broadcast %89 : i32 to vector<256x128xi32>
    %91 = arith.cmpi slt, %17, %90 : vector<256x128xi32>
    %cst_47 = arith.constant 0.000000e+00 : f32
    %92 = vector.broadcast %cst_47 : f32 to vector<256x128xf32>
    %93 = arith.select %91, %85, %92 : vector<256x128xi1>, vector<256x128xf32>
    %94 = arith.truncf %93 : vector<256x128xf32> to vector<256x128xbf16>
    %c0_48 = arith.constant 0 : index
    %c0_49 = arith.constant 0 : index
    %95 = vector.load %arg14[%c0_48, %c0_49] : memref<128x512xbf16, #tpu.memory_space<vmem>>, vector<128x512xbf16>
    %cst_50 = arith.constant dense<0.000000e+00> : vector<256x512xf32>
    %96 = tpu.matmul %94, %95, %cst_50 {dimension_numbers = #tpu.dot_dimension_numbers<[1], [0], [0], [1], [0, 0, 1, 1], [], []>} : vector<256x128xbf16>, vector<128x512xbf16>, vector<256x512xf32> -> vector<256x512xf32>
    %c0_51 = arith.constant 0 : index
    %c0_52 = arith.constant 0 : index
    %97 = vector.load %arg15[%c0_51, %c0_52] : memref<1x512xf32, #tpu.memory_space<vmem>>, vector<1x512xf32>
    %98 = vector.broadcast %97 : vector<1x512xf32> to vector<256x512xf32>
    %99 = arith.addf %96, %98 : vector<256x512xf32>
    %cst_53 = arith.constant 0.000000e+00 : f32
    %100 = vector.broadcast %cst_53 : f32 to vector<256x512xf32>
    %101 = arith.maximumf %99, %100 : vector<256x512xf32>
    %102 = arith.truncf %101 : vector<256x512xf32> to vector<256x512xbf16>
    %c0_54 = arith.constant 0 : index
    %c0_55 = arith.constant 0 : index
    %103 = vector.load %arg16[%c0_54, %c0_55] : memref<512x128xbf16, #tpu.memory_space<vmem>>, vector<512x128xbf16>
    %cst_56 = arith.constant dense<0.000000e+00> : vector<256x128xf32>
    %104 = tpu.matmul %102, %103, %cst_56 {dimension_numbers = #tpu.dot_dimension_numbers<[1], [0], [0], [1], [0, 0, 1, 1], [], []>} : vector<256x512xbf16>, vector<512x128xbf16>, vector<256x128xf32> -> vector<256x128xf32>
    %c0_57 = arith.constant 0 : index
    %c0_58 = arith.constant 0 : index
    %105 = vector.load %arg17[%c0_57, %c0_58] : memref<1x128xf32, #tpu.memory_space<vmem>>, vector<1x128xf32>
    %106 = vector.broadcast %105 : vector<1x128xf32> to vector<256x128xf32>
    %107 = arith.addf %104, %106 : vector<256x128xf32>
    %108 = math.tanh %107 : vector<256x128xf32>
    %c16_i32 = arith.constant 16 : i32
    %109 = vector.broadcast %c16_i32 : i32 to vector<256x128xi32>
    %110 = arith.cmpi eq, %1, %109 : vector<256x128xi32>
    %111 = arith.sitofp %79 : vector<256x1xi32> to vector<256x1xf32>
    %112 = vector.shape_cast %111 : vector<256x1xf32> to vector<256x1xf32>
    %113 = vector.broadcast %112 : vector<256x1xf32> to vector<256x128xf32>
    %114 = arith.select %110, %113, %108 : vector<256x128xi1>, vector<256x128xf32>
    %c0_59 = arith.constant 0 : index
    %c0_60 = arith.constant 0 : index
    %115 = vector.load %arg19[%c0_59, %c0_60] : memref<256x128xf32, #tpu.memory_space<vmem>>, vector<256x128xf32>
    tpu.vector_store %arg19[%c0_59, %c0_60], %114 {strides = array<i32>} : memref<256x128xf32, #tpu.memory_space<vmem>>, vector<256x128xf32>,
    return
  }
  func.func @transform_0(%arg0: i32, %arg1: memref<1xi32, #tpu.memory_space<smem>>) -> (i32, i32) {
    %c0_i32 = arith.constant 0 : i32
    %c0_i32_0 = arith.constant 0 : i32
    return %arg0, %c0_i32 : i32, i32
  }
  func.func @transform_1(%arg0: i32, %arg1: memref<1xi32, #tpu.memory_space<smem>>) -> (i32, i32) {
    %c0_i32 = arith.constant 0 : i32
    %c0_i32_0 = arith.constant 0 : i32
    %c0_i32_1 = arith.constant 0 : i32
    return %c0_i32, %c0_i32_0 : i32, i32
  }
  func.func @transform_2(%arg0: i32, %arg1: memref<1xi32, #tpu.memory_space<smem>>) -> (i32, i32) {
    %c0_i32 = arith.constant 0 : i32
    %c0_i32_0 = arith.constant 0 : i32
    %c0_i32_1 = arith.constant 0 : i32
    return %c0_i32, %c0_i32_0 : i32, i32
  }
  func.func @transform_3(%arg0: i32, %arg1: memref<1xi32, #tpu.memory_space<smem>>) -> (i32, i32) {
    %c0_i32 = arith.constant 0 : i32
    %c0_i32_0 = arith.constant 0 : i32
    %c0_i32_1 = arith.constant 0 : i32
    return %c0_i32, %c0_i32_0 : i32, i32
  }
  func.func @transform_4(%arg0: i32, %arg1: memref<1xi32, #tpu.memory_space<smem>>) -> (i32, i32) {
    %c0_i32 = arith.constant 0 : i32
    %c0_i32_0 = arith.constant 0 : i32
    %c0_i32_1 = arith.constant 0 : i32
    return %c0_i32, %c0_i32_0 : i32, i32
  }
  func.func @transform_5(%arg0: i32, %arg1: memref<1xi32, #tpu.memory_space<smem>>) -> (i32, i32) {
    %c0_i32 = arith.constant 0 : i32
    %c0_i32_0 = arith.constant 0 : i32
    %c0_i32_1 = arith.constant 0 : i32
    return %c0_i32, %c0_i32_0 : i32, i32
  }
  func.func @transform_6(%arg0: i32, %arg1: memref<1xi32, #tpu.memory_space<smem>>) -> (i32, i32) {
    %c0_i32 = arith.constant 0 : i32
    %c0_i32_0 = arith.constant 0 : i32
    %c0_i32_1 = arith.constant 0 : i32
    return %c0_i32, %c0_i32_0 : i32, i32
  }
  func.func @transform_7(%arg0: i32, %arg1: memref<1xi32, #tpu.memory_space<smem>>) -> (i32, i32) {
    %c0_i32 = arith.constant 0 : i32
    %c0_i32_0 = arith.constant 0 : i32
    %c0_i32_1 = arith.constant 0 : i32
    return %c0_i32, %c0_i32_0 : i32, i32
  }
  func.func @transform_8(%arg0: i32, %arg1: memref<1xi32, #tpu.memory_space<smem>>) -> (i32, i32) {
    %c0_i32 = arith.constant 0 : i32
    %c0_i32_0 = arith.constant 0 : i32
    %c0_i32_1 = arith.constant 0 : i32
    return %c0_i32, %c0_i32_0 : i32, i32
  }
  func.func @transform_9(%arg0: i32, %arg1: memref<1xi32, #tpu.memory_space<smem>>) -> (i32, i32) {
    %c0_i32 = arith.constant 0 : i32
    %c0_i32_0 = arith.constant 0 : i32
    %c0_i32_1 = arith.constant 0 : i32
    return %c0_i32, %c0_i32_0 : i32, i32
  }
  func.func @transform_10(%arg0: i32, %arg1: memref<1xi32, #tpu.memory_space<smem>>) -> (i32, i32) {
    %c0_i32 = arith.constant 0 : i32
    %c0_i32_0 = arith.constant 0 : i32
    %c0_i32_1 = arith.constant 0 : i32
    return %c0_i32, %c0_i32_0 : i32, i32
  }
  func.func @transform_11(%arg0: i32, %arg1: memref<1xi32, #tpu.memory_space<smem>>) -> (i32, i32) {
    %c0_i32 = arith.constant 0 : i32
    %c0_i32_0 = arith.constant 0 : i32
    %c0_i32_1 = arith.constant 0 : i32
    return %c0_i32, %c0_i32_0 : i32, i32
  }
  func.func @transform_12(%arg0: i32, %arg1: memref<1xi32, #tpu.memory_space<smem>>) -> (i32, i32) {
    %c0_i32 = arith.constant 0 : i32
    %c0_i32_0 = arith.constant 0 : i32
    %c0_i32_1 = arith.constant 0 : i32
    return %c0_i32, %c0_i32_0 : i32, i32
  }
  func.func @transform_13(%arg0: i32, %arg1: memref<1xi32, #tpu.memory_space<smem>>) -> (i32, i32) {
    %c0_i32 = arith.constant 0 : i32
    %c0_i32_0 = arith.constant 0 : i32
    %c0_i32_1 = arith.constant 0 : i32
    return %c0_i32, %c0_i32_0 : i32, i32
  }
  func.func @transform_14(%arg0: i32, %arg1: memref<1xi32, #tpu.memory_space<smem>>) -> (i32, i32) {
    %c0_i32 = arith.constant 0 : i32
    %c0_i32_0 = arith.constant 0 : i32
    %c0_i32_1 = arith.constant 0 : i32
    return %c0_i32, %c0_i32_0 : i32, i32
  }
  func.func @transform_15(%arg0: i32, %arg1: memref<1xi32, #tpu.memory_space<smem>>) -> (i32, i32) {
    %c0_i32 = arith.constant 0 : i32
    %c0_i32_0 = arith.constant 0 : i32
    %c0_i32_1 = arith.constant 0 : i32
    return %c0_i32, %c0_i32_0 : i32, i32
  }
  func.func @transform_16(%arg0: i32, %arg1: memref<1xi32, #tpu.memory_space<smem>>) -> (i32, i32) {
    %c0_i32 = arith.constant 0 : i32
    %c0_i32_0 = arith.constant 0 : i32
    return %arg0, %c0_i32 : i32, i32
  }
  func.func @transform_17(%arg0: i32, %arg1: memref<1xi32, #tpu.memory_space<smem>>) -> (i32, i32) {
    %c0_i32 = arith.constant 0 : i32
    %c0_i32_0 = arith.constant 0 : i32
    return %arg0, %c0_i32 : i32, i32
  }
}

</mosaic_0001>

<bundles_post_ra>
// kernel: _vqvae_forward_jit.1
= control target key start
LH: loop header
LB: loop body
LE: loop exit
PB: predicated region body
PF: predicated region fallthrough
CT: control target
= control target key end

     0   :  { %s11966_s0 = inlined_call_operand.<no memory space> [shape: s32[1], index: 0, kind: input, shape index: {}]   ;;  %s11967_s1 = inlined_call_operand.vmem [shape: f32[512,16], index: 1, kind: input, shape index: {}]   ;;  %s11968_s2 = inlined_call_operand.hbm [shape: bf16[16,512], index: 2, kind: input, shape index: {}]   ;;  %s11969_s3 = inlined_call_operand.vmem [shape: f32[1,512], index: 3, kind: input, shape index: {}]   ;;  %s11970_s4 = inlined_call_operand.vmem [shape: bf16[512,128], index: 4, kind: input, shape index: {}]   ;;  %s11971_s5 = inlined_call_operand.vmem [shape: f32[1,128], index: 5, kind: input, shape index: {}]   ;;  %s11972_s6 = inlined_call_operand.vmem [shape: bf16[128,128], index: 6, kind: input, shape index: {}]   ;;  %s11973_s7 = inlined_call_operand.hbm [shape: bf16[128,128], index: 7, kind: input, shape index: {}]   ;;  %s11974_s8 = inlined_call_operand.hbm [shape: bf16[128,128], index: 8, kind: input, shape index: {}]   ;;  %s11975_s9 = inlined_call_operand.vmem [shape: f32[1,128], index: 9, kind: input, shape index: {}]   ;;  %s11976_s10 = inlined_call_operand.vmem [shape: f32[128,128], index: 10, kind: input, shape index: {}]   ;;  %s11977_s11 = inlined_call_operand.hbm [shape: f32[128,128], index: 11, kind: input, shape index: {}]   ;;  %s11978_s12 = inlined_call_operand.hbm [shape: f32[1,128], index: 12, kind: input, shape index: {}]   ;;  %s11979_s13 = inlined_call_operand.vmem [shape: bf16[128,512], index: 13, kind: input, shape index: {}]   ;;  %s11980_s14 = inlined_call_operand.vmem [shape: f32[1,512], index: 14, kind: input, shape index: {}]   ;;  %s11981_s15 = inlined_call_operand.hbm [shape: bf16[512,128], index: 15, kind: input, shape index: {}]   ;;  %s11982_s16 = inlined_call_operand.hbm [shape: f32[1,128], index: 16, kind: input, shape index: {}]   ;;  %s11983_s17 = inlined_call_operand.vmem [shape: f32[512,128], index: 17, kind: output, shape index: {0}]   ;;  %s11984_s18 = inlined_call_operand.vmem [shape: f32[512,128], index: 18, kind: output, shape index: {1}]  }
   0x1   :  { %12084 = sst [smem:[#allocation79_spill]] %s11966_s0 }
   0x2   :  { %12085 = sst [smem:[#allocation80_spill]] %s11967_s1 }
   0x3   :  { %12086 = sst [smem:[#allocation81_spill]] %s11968_s2 }
   0x4   :  { %12087 = sst [smem:[#allocation82_spill]] %s11973_s7 }
   0x5   :  { %12088 = sst [smem:[#allocation83_spill]] %s11977_s11 }
   0x6   :  { %12089 = sst [smem:[#allocation84_spill]] %s11979_s13 }
   0x7   :  { %12090 = sst [smem:[#allocation85_spill]] %s11980_s14 }
   0x8   :  { %12091 = sst [smem:[#allocation86_spill]] %s11983_s17 }
   0x9   :  { %12092 = sst [smem:[#allocation87_spill]] %s11984_s18 }
   0xa   :  { %s12093_s29 = sld [smem:[#allocation79_spill]] }
  0x10   :  { %24 = sst [smem:[#allocation3]] %s12093_s29 }
  0x11   :  { %25 = vsyncpa [#allocation5], 0 }
  0x12   :  { %26 = vsyncpa [#allocation7], 0 }
  0x13   :  { %27 = vsyncpa [#allocation10], 0 }
  0x14   :  { %28 = vsyncpa [#allocation13], 0  ;;  %s7927_s30 = smov 0  }
  0x15 LB: > { %s12094_s7 = sld [smem:[#allocation82_spill]]  ;;  %s11985_s20 = sadd.s32 4294967295, %s7811_s30   ;;  %s7811_s30 = sphi %s7927_s30, %s34_s30  }
  0x16   : > { %p6444_p0 = scmp.ge.s32.totalorder %s7811_s30, 1  ;;  %p432_p1 = scmp.lt.s32.totalorder %s7811_s30, 3 }
  0x17   : > { %p7940_p2 = scmp.eq.s32.totalorder %s11985_s20, 0  ;;  %s7813_s2 = smov [#allocation6]  }
  0x18   : > { %p7944_p3 = pnand %p6444_p0, %p432_p1  ;;  %s471_s23 = sshll.u32 %s7813_s2, 4  ;;  %s472_s23 = int_to_ptr.vmem [resolvable:$true] %s471_s23 }
  0x19   : > { %s12097_s11 = sld [smem:[#allocation83_spill]]  ;;  %s7814_s28 = smov [#allocation9]  }
  0x1a   : > { %p7450_p4 = pneg %p7944_p3  ;;  %s505_s29 = sshll.u32 %s7814_s28, 4  ;;  %s506_s29 = int_to_ptr.vmem [resolvable:$true] %s505_s29 }
  0x1b   : > { %s469_s1 = sshll.u32 %s12094_s7, 4  ;;  %s7815_s0 = smov 64   ;;  %s470_s1 = int_to_ptr.hbm [resolvable:$true] %s469_s1 }
  0x1c   : > { %p7955_p5 = pnand %p7940_p2, %p7450_p4  ;;  %s7816_s19 = smov 4  }
  0x1d   : > { %s535_s25 = sshll.u32 %s11981_s15, 4  ;;  %s7817_s20 = smov 128   ;;  %s536_s25 = int_to_ptr.hbm [resolvable:$true] %s535_s25 }
  0x1e   : > { %7456 = dma.hbm_to_vmem [thread:$0]  (!%p7955_p5), %s470_s1, 1024, %s472_s23, [#allocation7], %s7815_s0, %s7815_s0, %s7816_s19  }
  0x1f   : > { %s503_s26 = sshll.u32 %s12097_s11, 4  ;;  %s7818_s7 = smov 8   ;;  %s504_s26 = int_to_ptr.hbm [resolvable:$true] %s503_s26 }
  0x20   : > { %7462 = dma.hbm_to_vmem [thread:$0]  (!%p7955_p5), %s504_s26, 2048, %s506_s29, [#allocation10], %s7817_s20, %s7817_s20, %s7818_s7  }
  0x21   : > { %s7819_s11 = smov [#allocation12]   ;;  %s12099_s17 = sld [smem:[#allocation81_spill]] }
  0x22   : > { %s537_s28 = sshll.u32 %s7819_s11, 4  ;;  %s7820_s1 = smov [#allocation4]   ;;  %s538_s28 = int_to_ptr.vmem [resolvable:$true] %s537_s28 }
  0x23   : > { %7468 = dma.hbm_to_vmem [thread:$0]  (!%p7955_p5), %s536_s25, 4096, %s538_s28, [#allocation13], %s7815_s0, %s7815_s0, %s7816_s19  }
  0x24   : > { %s445_s23 = sshll.u32 %s7820_s1, 4  ;;  %s483_s20 = sshll.u32 %s11974_s8, 4  ;;  %s446_s23 = int_to_ptr.vmem [resolvable:$true] %s445_s23  ;;  %s484_s20 = int_to_ptr.hbm [resolvable:$true] %s483_s20 }
  0x25   : > { %s7821_s11 = smov 256   ;;  %s7822_s26 = smov 16  }
  0x26   : > { %s7823_s14 = smov [#allocation8]   ;;  %s518_s24 = sshll.u32 %s11978_s12, 4  ;;  %s519_s24 = int_to_ptr.hbm [resolvable:$true] %s518_s24 }
  0x27   : > { %s443_s13 = sshll.u32 %s12099_s17, 4  ;;  %s485_s17 = sshll.u32 %s7823_s14, 4  ;;  %s444_s13 = int_to_ptr.hbm [resolvable:$true] %s443_s13  ;;  %s486_s17 = int_to_ptr.vmem [resolvable:$true] %s485_s17 }
  0x28   : > { %7453 = dma.hbm_to_vmem [thread:$0]  (!%p7955_p5), %s444_s13, 512, %s446_s23, [#allocation5], %s7821_s11, %s7821_s11, %s7822_s26  }
  0x29   : > { %7459 = dma.hbm_to_vmem [thread:$0]  (!%p7955_p5), %s484_s20, 1024, %s486_s17, [#allocation7], %s7815_s0, %s7815_s0, %s7816_s19  }
  0x2a   : > { %s550_s1 = sshll.u32 %s11982_s16, 4  ;;  %s7824_s13 = smov [#allocation11]   ;;  %s551_s1 = int_to_ptr.hbm [resolvable:$true] %s550_s1 }
  0x2b   : > { %s520_s23 = sshll.u32 %s7824_s13, 4  ;;  %s7825_s2 = smov [#allocation14]   ;;  %s521_s23 = int_to_ptr.vmem [resolvable:$true] %s520_s23 }
  0x2c   : > { %7465 = dma.hbm_to_vmem [thread:$0]  (!%p7955_p5), %s519_s24, 16, %s521_s23, [#allocation10]  }
  0x2d   : > { %s552_s7 = sshll.u32 %s7825_s2, 4  ;;  %574 = sbr.rel (%p7944_p3) target bundleno = 2452 (0x994), region = 84  ;;  %s553_s7 = int_to_ptr.vmem [resolvable:$true] %s552_s7 }
  0x2e   : > { %7471 = dma.hbm_to_vmem [thread:$0]  (!%p7955_p5), %s551_s1, 16, %s553_s7, [#allocation13]  }
  0x32   : > { %7794 = dma.done.wait (%p7940_p2), [#allocation5], 512  }
  0x33   : > { %7796 = vsyncadd (%p7940_p2), [#allocation5], 4294966784 }
  0x34   : > { %7798 = dma.done.wait (%p7940_p2), [#allocation7], 2048  }
  0x35   : > { %7800 = vsyncadd (%p7940_p2), [#allocation7], 4294965248 }
  0x36   : > { %7802 = dma.done.wait (%p7940_p2), [#allocation10], 2064  }
  0x37   : > { %7804 = vsyncadd (%p7940_p2), [#allocation10], 4294965232 }
  0x38   : > { %7806 = dma.done.wait (%p7940_p2), [#allocation13], 4112  }
  0x39   : > { %7808 = vsyncadd (%p7940_p2), [#allocation13], 4294963184  ;;  %s12100_s22 = sadd.s32 4294967295, %s7811_s30   ;;  %s12101_s11 = sld [smem:[#allocation80_spill]]  ;;  %v6469_v0 = vld [vmem:[#allocation4] sm:$0xf] }
  0x3a   : > { %s6461_s27 = sshll.u32 %s12100_s22, 5  ;;  %v7295_v1 = vld [vmem:[#allocation4 + $0xc] sm:$0xf0]  ;;  %vm1182_vm0 = vcmask 130048   ;;  %v6477_v14 = vld [vmem:[#allocation4 + $0x8] sm:$0xf] }
  0x3b   : > { %p663_p6 = scmp.lt.s32.totalorder %s6461_s27, 63  ;;  %v6470_v3 = vor.u32 %v7295_v1, %v6469_v0  ;;  %v7296_v15 = vld [vmem:[#allocation4 + $0x14] sm:$0xf0]  ;;  %v7294_v18 = vld [vmem:[#allocation4 + $0xc] sm:$0xf]  ;;  %v7319_v63 = vld [vmem:[%s11970_s4 + $0xb0] sm:$0xff] }
  0x3c   : > { %v6478_v17 = vor.u32 %v7296_v15, %v6477_v14  ;;  %v6479_v19 = vld [vmem:[#allocation4 + $0x18] sm:$0xf0]  ;;  %v7293_v20 = vld [vmem:[#allocation4 + $0x4] sm:$0xf]  ;;  %v6471_v22 = vld [vmem:[#allocation4 + $0x10] sm:$0xf0] }
  0x3d   : > { %s12432_s27 = smov (!%p663_p6, %s6461_s27), 63  ;;  %1238 = vmatpush.bf16.msra.mxu0 %v6470_v3  ;;  %7419 = vmatpush.bf16.msra.mxu1 %v6470_v3  ;;  %v6482_v21 = vor.u32 %v7294_v18, %v6479_v19  ;;  %v6474_v23 = vor.u32 %v7293_v20, %v6471_v22  ;;  %v7320_v48 = vld [vmem:[%s11970_s4 + $0xb8] sm:$0xff]  ;;  %v7327_v0 = vld [vmem:[%s11970_s4 + $0xf0] sm:$0xff]  ;;  %v7297_v14 = vld [vmem:[%s11970_s4] sm:$0xff]  ;;  %s12276_s1 = sld [smem:[#allocation84_spill]] }
  0x3e   : > { %s8017_s0 = sshll.u32 %s12432_s27, 3  ;;  %7420 = vmatpush.bf16.msra.mxu2 %v6470_v3  ;;  %7421 = vmatpush.bf16.msra.mxu3 %v6470_v3  ;;  %v7328_v49 = vld [vmem:[%s11970_s4 + $0xf8] sm:$0xff]  ;;  %v7311_v1 = vld [vmem:[%s11970_s4 + $0x70] sm:$0xff]  ;;  %v8181_v15 = vld [vmem:[%s11969_s3] sm:$0xf]  ;;  %s7828_s14 = smov 64  }
  0x3f   : > { %s8023_s26 = scalar_lea.vmem %s12101_s11, %s8017_s0  ;;  %v7312_v50 = vld [vmem:[%s11970_s4 + $0x78] sm:$0xff]  ;;  %v7303_v3 = vld [vmem:[%s11970_s4 + $0x30] sm:$0xff]  ;;  %v7317_v22 = vld [vmem:[%s11970_s4 + $0xa0] sm:$0xff]  ;;  %s4706_s11 = sld [smem:[#allocation3]] }
  0x40   : > { %v1100_v2 = vld [vmem:[%s8023_s26] sm:$0xff]  ;;  %v1101_v4 = vld [vmem:[%s8023_s26 + $0x8] sm:$0xff]  ;;  %v1102_v24 = vld [vmem:[%s8023_s26 + $0x10] sm:$0xff]  ;;  %s12327_s22 = sld [smem:[#allocation86_spill]] }
  0x41   : > { %v1108_v5 = vld [vmem:[%s8023_s26 + $0x40] sm:$0xff]  ;;  %v1109_v6 = vld [vmem:[%s8023_s26 + $0x48] sm:$0xff]  ;;  %v8029_v7 = vpack.c.bf16 %v1101_v4, %v1100_v2  ;;  %1327 = vmatpush.bf16.msrb.mxu1 %v6474_v23  ;;  %v1103_v25 = vld [vmem:[%s8023_s26 + $0x18] sm:$0xff] }
  0x42   : > { %v8031_v8 = vpack.c.bf16 %v1109_v6, %v1108_v5  ;;  %v1116_v9 = vld [vmem:[%s8023_s26 + $0x80] sm:$0xff]  ;;  %v1117_v10 = vld [vmem:[%s8023_s26 + $0x88] sm:$0xff]  ;;  %1416 = vmatpush.bf16.msrb.mxu2 %v6478_v17  ;;  %1505 = vmatpush.bf16.msrb.mxu3 %v6482_v21  ;;  %v1110_v26 = vld [vmem:[%s8023_s26 + $0x50] sm:$0xff]  ;;  %v1133_v32 = vpack.c.bf16 %v1103_v25, %v1102_v24  ;;  %v8184_v17 = vperm.slane %v8181_v15, 0 }
  0x43   : > { %v1124_v11 = vld [vmem:[%s8023_s26 + $0xc0] sm:$0xff]  ;;  %v8036_v12 = vpack.c.bf16 %v1117_v10, %v1116_v9  ;;  %v1125_v13 = vld [vmem:[%s8023_s26 + $0xc8] sm:$0xff]  ;;  %6483 = vmatmul.msk.bf16.vlgmr.msra.gmra.mxu0 %vm1182_vm0, %v8029_v7  ;;  %v1111_v27 = vld [vmem:[%s8023_s26 + $0x58] sm:$0xff] }
  0x44   : > { %v8039_v16 = vpack.c.bf16 %v1125_v13, %v1124_v11  ;;  %6487 = vmatmul.msk.bf16.vlgmr.msra.gmra.mxu1 %vm1182_vm0, %v8031_v8  ;;  %v1118_v28 = vld [vmem:[%s8023_s26 + $0x90] sm:$0xff]  ;;  %v1119_v29 = vld [vmem:[%s8023_s26 + $0x98] sm:$0xff]  ;;  %v8057_v33 = vpack.c.bf16 %v1111_v27, %v1110_v26  ;;  %v1104_v36 = vld [vmem:[%s8023_s26 + $0x20] sm:$0xff] }
  0x45   : > { %6491 = vmatmul.msk.bf16.vlgmr.msra.gmra.mxu2 %vm1182_vm0, %v8036_v12  ;;  %v1126_v30 = vld [vmem:[%s8023_s26 + $0xd0] sm:$0xff]  ;;  %v1127_v31 = vld [vmem:[%s8023_s26 + $0xd8] sm:$0xff]  ;;  %v8059_v34 = vpack.c.bf16 %v1119_v29, %v1118_v28  ;;  %v1105_v37 = vld [vmem:[%s8023_s26 + $0x28] sm:$0xff]  ;;  %2384 = vmatpush.bf16.msra.mxu1 %v7312_v50 }
  0x46   : > { %6495 = vmatmul.msk.bf16.vlgmr.msra.gmra.mxu3 %vm1182_vm0, %v8039_v16  ;;  %v8061_v35 = vpack.c.bf16 %v1127_v31, %v1126_v30  ;;  %v1112_v38 = vld [vmem:[%s8023_s26 + $0x60] sm:$0xff]  ;;  %v1113_v39 = vld [vmem:[%s8023_s26 + $0x68] sm:$0xff]  ;;  %v1134_v44 = vpack.c.bf16 %v1105_v37, %v1104_v36  ;;  %2473 = vmatpush.bf16.msra.mxu2 %v7320_v48  ;;  %v1106_v51 = vld [vmem:[%s8023_s26 + $0x30] sm:$0xff]  ;;  %s11005_s27 = scalar_lea.vmem %s12327_s22, %s8017_s0 }
  0x47   : > { %v1120_v40 = vld [vmem:[%s8023_s26 + $0xa0] sm:$0xff]  ;;  %v1121_v41 = vld [vmem:[%s8023_s26 + $0xa8] sm:$0xff]  ;;  %v8078_v45 = vpack.c.bf16 %v1113_v39, %v1112_v38  ;;  %2562 = vmatpush.bf16.msra.mxu3 %v7328_v49  ;;  %v1107_v52 = vld [vmem:[%s8023_s26 + $0x38] sm:$0xff] }
  0x48   : > { %v1128_v42 = vld [vmem:[%s8023_s26 + $0xe0] sm:$0xff]  ;;  %v1129_v43 = vld [vmem:[%s8023_s26 + $0xe8] sm:$0xff]  ;;  %v8080_v46 = vpack.c.bf16 %v1121_v41, %v1120_v40  ;;  %v1114_v53 = vld [vmem:[%s8023_s26 + $0x70] sm:$0xff]  ;;  %v1135_v59 = vpack.c.bf16 %v1107_v52, %v1106_v51 }
  0x49   : > { %v8082_v47 = vpack.c.bf16 %v1129_v43, %v1128_v42  ;;  %v1115_v54 = vld [vmem:[%s8023_s26 + $0x78] sm:$0xff]  ;;  %v1122_v55 = vld [vmem:[%s8023_s26 + $0xb0] sm:$0xff]  ;;  %2385 = vmatpush.bf16.msra.mxu1 %v7311_v1  ;;  %v7302_v4 = vld [vmem:[%s11970_s4 + $0x28] sm:$0xff] }
  0x4a   : > { %v1123_v56 = vld [vmem:[%s8023_s26 + $0xb8] sm:$0xff]  ;;  %v1130_v57 = vld [vmem:[%s8023_s26 + $0xf0] sm:$0xff]  ;;  %v8108_v60 = vpack.c.bf16 %v1115_v54, %v1114_v53  ;;  %2474 = vmatpush.bf16.msra.mxu2 %v7319_v63  ;;  %v7301_v5 = vld [vmem:[%s11970_s4 + $0x20] sm:$0xff] }
  0x4b   : > { %v1131_v58 = vld [vmem:[%s8023_s26 + $0xf8] sm:$0xff]  ;;  %v8110_v61 = vpack.c.bf16 %v1123_v56, %v1122_v55  ;;  %2563 = vmatpush.bf16.msra.mxu3 %v7327_v0  ;;  %v7299_v9 = vld [vmem:[%s11970_s4 + $0x10] sm:$0xff]  ;;  %v7326_v10 = vld [vmem:[%s11970_s4 + $0xe8] sm:$0xff] }
  0x4c   : > { %v8112_v62 = vpack.c.bf16 %v1131_v58, %v1130_v57  ;;  %v7304_v2 = vld [vmem:[%s11970_s4 + $0x38] sm:$0xff]  ;;  %v7298_v11 = vld [vmem:[%s11970_s4 + $0x8] sm:$0xff]  ;;  %v7325_v23 = vld [vmem:[%s11970_s4 + $0xe0] sm:$0xff] }
  0x4d   : > { %2295 = vmatpush.bf16.msrb.mxu0 %v7304_v2  ;;  %v7300_v6 = vld [vmem:[%s11970_s4 + $0x18] sm:$0xff]  ;;  %v7310_v13 = vld [vmem:[%s11970_s4 + $0x68] sm:$0xff]  ;;  %v7309_v39 = vld [vmem:[%s11970_s4 + $0x60] sm:$0xff] }
  0x4e   : > { %2386 = vmatpush.bf16.msra.mxu1 %v7310_v13 }
  0x4f   : > { %2564 = vmatpush.bf16.msra.mxu3 %v7326_v10 }
  0x51   : > { %2296 = vmatpush.bf16.msrb.mxu0 %v7303_v3 }
  0x52   : > { %2387 = vmatpush.bf16.msra.mxu1 %v7309_v39 }
  0x53   : > { %6484 = vmatmul.msk.bf16.gmra.mxu0 %vm1182_vm0, %v1133_v32  ;;  %2565 = vmatpush.bf16.msra.mxu3 %v7325_v23 }
  0x54   : > { %6488 = vmatmul.msk.bf16.gmra.mxu1 %vm1182_vm0, %v8057_v33 }
  0x55   : > { %6492 = vmatmul.msk.bf16.gmra.mxu2 %vm1182_vm0, %v8059_v34  ;;  %2297 = vmatpush.bf16.msrb.mxu0 %v7302_v4 }
  0x56   : > { %6496 = vmatmul.msk.bf16.gmra.mxu3 %vm1182_vm0, %v8061_v35 }
  0x59   : > { %2298 = vmatpush.bf16.msrb.mxu0 %v7301_v5 }
  0x5d   : > { %2299 = vmatpush.bf16.msrb.mxu0 %v7300_v6 }
  0x61   : > { %2300 = vmatpush.bf16.msrb.mxu0 %v7299_v9 }
  0x63   : > { %6485 = vmatmul.msk.bf16.gmra.mxu0 %vm1182_vm0, %v1134_v44 }
  0x64   : > { %6489 = vmatmul.msk.bf16.gmra.mxu1 %vm1182_vm0, %v8078_v45 }
  0x65   : > { %6493 = vmatmul.msk.bf16.gmra.mxu2 %vm1182_vm0, %v8080_v46  ;;  %2301 = vmatpush.bf16.msrb.mxu0 %v7298_v11 }
  0x66   : > { %6497 = vmatmul.msk.bf16.gmra.mxu3 %vm1182_vm0, %v8082_v47 }
  0x69   : > { %2302 = vmatpush.bf16.msrb.mxu0 %v7297_v14 }
  0x73   : > { %6486 = vmatmul.msk.bf16.gmra.mxu0 %vm1182_vm0, %v1135_v59 }
  0x74   : > { %6490 = vmatmul.msk.bf16.gmra.mxu1 %vm1182_vm0, %v8108_v60 }
  0x75   : > { %6494 = vmatmul.msk.bf16.gmra.mxu2 %vm1182_vm0, %v8110_v61 }
  0x76   : > { %6498 = vmatmul.msk.bf16.gmra.mxu3 %vm1182_vm0, %v8112_v62 }
  0x84   : > { %6499 = vmatmul.msk.bf16.vlgmr.msrb.gmra.mxu1 %vm1182_vm0, %v8029_v7 }
  0x85   : > { %6515 = vmatmul.msk.bf16.vlgmr.msrb.gmra.mxu2 %vm1182_vm0, %v8029_v7 }
  0x86   : > { %6531 = vmatmul.msk.bf16.vlgmr.msrb.gmra.mxu3 %vm1182_vm0, %v8029_v7  ;;  %v7318_v7 = vld [vmem:[%s11970_s4 + $0xa8] sm:$0xff] }
  0x87   : > { %2475 = vmatpush.bf16.msra.mxu2 %v7318_v7 }
  0x8b   : > { %2476 = vmatpush.bf16.msra.mxu2 %v7317_v22 }
  0x94   : > { %6500 = vmatmul.msk.bf16.gmra.mxu1 %vm1182_vm0, %v1133_v32 }
  0x95   : > { %6516 = vmatmul.msk.bf16.gmra.mxu2 %vm1182_vm0, %v1133_v32 }
  0x96   : > { %6532 = vmatmul.msk.bf16.gmra.mxu3 %vm1182_vm0, %v1133_v32 }
  0xa4   : > { %6501 = vmatmul.msk.bf16.gmra.mxu1 %vm1182_vm0, %v1134_v44 }
  0xa5   : > { %6517 = vmatmul.msk.bf16.gmra.mxu2 %vm1182_vm0, %v1134_v44 }
  0xa6   : > { %6533 = vmatmul.msk.bf16.gmra.mxu3 %vm1182_vm0, %v1134_v44 }
  0xb4   : > { %6502 = vmatmul.msk.bf16.gmra.mxu1 %vm1182_vm0, %v1135_v59 }
  0xb5   : > { %6518 = vmatmul.msk.bf16.gmra.mxu2 %vm1182_vm0, %v1135_v59 }
  0xb6   : > { %6534 = vmatmul.msk.bf16.gmra.mxu3 %vm1182_vm0, %v1135_v59 }
  0xc0   : > { %v1240_v18 = vpop.f32.mrf.mxu0 }
  0xc1   : > { %v1260_v19 = vpop.f32.mrf.mxu1  ;;  %v1241_v21 = vadd.f32 %v1240_v18, %v8184_v17 }
  0xc2   : > { %v1261_v20 = vadd.f32 %v1260_v19, %v8184_v17 }
  0xc3   : > { %v1715_v24 = vmul.f32 0.2, %v1241_v21  ;;  %vm1587_vm1 = vcmp.gt.f32.partialorder %v1241_v21, 0.0 }
  0xc4   : > { %6503 = vmatmul.msk.bf16.gmra.mxu1 %vm1182_vm0, %v8031_v8  ;;  %v1747_v30 = vmul.f32 0.2, %v1261_v20  ;;  %vm1619_vm2 = vcmp.gt.f32.partialorder %v1261_v20, 0.0 }
  0xc5   : > { %6519 = vmatmul.msk.bf16.gmra.mxu2 %vm1182_vm0, %v8031_v8  ;;  %v1843_v38 = vsel %vm1587_vm1, %v1241_v21, %v1715_v24 }
  0xc6   : > { %6535 = vmatmul.msk.bf16.gmra.mxu3 %vm1182_vm0, %v8031_v8  ;;  %v8207_v41 = vsel %vm1619_vm2, %v1261_v20, %v1747_v30 }
  0xc8   : > { %v1280_v25 = vpop.f32.mrf.mxu2  ;;  %v1242_v29 = vpop.f32.mrf.mxu0 }
  0xc9   : > { %v1300_v26 = vpop.f32.mrf.mxu3  ;;  %v1281_v27 = vadd.f32 %v1280_v25, %v8184_v17  ;;  %v1262_v8 = vpop.f32.mrf.mxu1  ;;  %v1243_v31 = vadd.f32 %v1242_v29, %v8184_v17 }
  0xca   : > { %v1301_v28 = vadd.f32 %v1300_v26, %v8184_v17  ;;  %v1263_v32 = vadd.f32 %v1262_v8, %v8184_v17 }
  0xcb   : > { %vm1591_vm3 = vcmp.gt.f32.partialorder %v1243_v31, 0.0  ;;  %v1719_v36 = vmul.f32 0.2, %v1243_v31  ;;  %v1779_v48 = vmul.f32 0.2, %v1281_v27  ;;  %vm1651_vm5 = vcmp.gt.f32.partialorder %v1281_v27, 0.0 }
  0xcc   : > { %v1751_v37 = vmul.f32 0.2, %v1263_v32  ;;  %vm1623_vm4 = vcmp.gt.f32.partialorder %v1263_v32, 0.0  ;;  %v1811_v51 = vmul.f32 0.2, %v1301_v28  ;;  %vm1683_vm6 = vcmp.gt.f32.partialorder %v1301_v28, 0.0 }
  0xcd   : > { %v1847_v40 = vsel %vm1591_vm3, %v1243_v31, %v1719_v36  ;;  %v8219_v63 = vsel %vm1651_vm5, %v1281_v27, %v1779_v48 }
  0xce   : > { %v8209_v42 = vsel %vm1623_vm4, %v1263_v32, %v1751_v37  ;;  %v1971_v43 = vpack.c.bf16 %v1847_v40, %v1843_v38  ;;  %v8227_v1 = vsel %vm1683_vm6, %v1301_v28, %v1811_v51  ;;  %v7324_v51 = vld [vmem:[%s11970_s4 + $0xd8] sm:$0xff] }
  0xcf   : > { %v1987_v44 = vpack.c.bf16 %v8209_v42, %v8207_v41  ;;  %2566 = vmatpush.bf16.msra.mxu3 %v7324_v51 }
  0xd0   : > { %v1282_v49 = vpop.f32.mrf.mxu2  ;;  %v1245_v54 = vpop.f32.mrf.mxu0  ;;  %2303 = vmatmul.bf16.vlgmr.msrb.gmra.mxu0 %v1971_v43 }
  0xd1   : > { %v1302_v50 = vpop.f32.mrf.mxu3  ;;  %v1283_v52 = vadd.f32 %v1282_v49, %v8184_v17  ;;  %v1265_v55 = vpop.f32.mrf.mxu1  ;;  %v1246_v56 = vadd.f32 %v1245_v54, %v8184_v17 }
  0xd2   : > { %v1303_v53 = vadd.f32 %v1302_v50, %v8184_v17  ;;  %v1266_v57 = vadd.f32 %v1265_v55, %v8184_v17  ;;  %v7316_v50 = vld [vmem:[%s11970_s4 + $0x98] sm:$0xff] }
  0xd3   : > { %vm1655_vm7 = vcmp.gt.f32.partialorder %v1283_v52, 0.0  ;;  %v1783_v58 = vmul.f32 0.2, %v1283_v52  ;;  %v1723_v5 = vmul.f32 0.2, %v1246_v56  ;;  %vm1595_vm9 = vcmp.gt.f32.partialorder %v1246_v56, 0.0  ;;  %2477 = vmatpush.bf16.msra.mxu2 %v7316_v50 }
  0xd4   : > { %vm1687_vm8 = vcmp.gt.f32.partialorder %v1303_v53, 0.0  ;;  %v1815_v59 = vmul.f32 0.2, %v1303_v53  ;;  %6504 = vmatmul.msk.bf16.gmra.mxu1 %vm1182_vm0, %v8057_v33  ;;  %v1755_v13 = vmul.f32 0.2, %v1266_v57  ;;  %vm1627_vm10 = vcmp.gt.f32.partialorder %v1266_v57, 0.0 }
  0xd5   : > { %6520 = vmatmul.msk.bf16.gmra.mxu2 %vm1182_vm0, %v8057_v33  ;;  %v8225_v0 = vsel %vm1655_vm7, %v1283_v52, %v1783_v58  ;;  %v1851_v19 = vsel %vm1595_vm9, %v1246_v56, %v1723_v5 }
  0xd6   : > { %6536 = vmatmul.msk.bf16.gmra.mxu3 %vm1182_vm0, %v8057_v33  ;;  %v8229_v2 = vsel %vm1687_vm8, %v1303_v53, %v1815_v59  ;;  %v8239_v23 = vsel %vm1627_vm10, %v1266_v57, %v1755_v13  ;;  %v7308_v13 = vld [vmem:[%s11970_s4 + $0x58] sm:$0xff] }
  0xd7   : > { %2388 = vmatpush.bf16.msra.mxu1 %v7308_v13 }
  0xd8   : > { %v1285_v6 = vpop.f32.mrf.mxu2  ;;  %v1247_v10 = vpop.f32.mrf.mxu0 }
  0xd9   : > { %v1305_v7 = vpop.f32.mrf.mxu3  ;;  %v1286_v9 = vadd.f32 %v1285_v6, %v8184_v17  ;;  %v1267_v11 = vpop.f32.mrf.mxu1  ;;  %v1248_v14 = vadd.f32 %v1247_v10, %v8184_v17 }
  0xda   : > { %v1306_v33 = vadd.f32 %v1305_v7, %v8184_v17  ;;  %v1268_v18 = vadd.f32 %v1267_v11, %v8184_v17 }
  0xdb   : > { %v1727_v20 = vmul.f32 0.2, %v1248_v14  ;;  %vm1599_vm11 = vcmp.gt.f32.partialorder %v1248_v14, 0.0  ;;  %vm1659_vm13 = vcmp.gt.f32.partialorder %v1286_v9, 0.0  ;;  %v1787_v29 = vmul.f32 0.2, %v1286_v9 }
  0xdc   : > { %v1759_v21 = vmul.f32 0.2, %v1268_v18  ;;  %vm1631_vm12 = vcmp.gt.f32.partialorder %v1268_v18, 0.0  ;;  %vm1691_vm14 = vcmp.gt.f32.partialorder %v1306_v33, 0.0  ;;  %v1819_v36 = vmul.f32 0.2, %v1306_v33 }
  0xdd   : > { %v1855_v22 = vsel %vm1599_vm11, %v1248_v14, %v1727_v20  ;;  %v8256_v43 = vsel %vm1659_vm13, %v1286_v9, %v1787_v29 }
  0xde   : > { %v8241_v24 = vsel %vm1631_vm12, %v1268_v18, %v1759_v21  ;;  %v1975_v25 = vpack.c.bf16 %v1855_v22, %v1851_v19 }
  0xdf   : > { %v1991_v26 = vpack.c.bf16 %v8241_v24, %v8239_v23  ;;  %v7314_v23 = vld [vmem:[%s11970_s4 + $0x88] sm:$0xff] }
  0xe0   : > { %v1287_v27 = vpop.f32.mrf.mxu2  ;;  %v1250_v31 = vpop.f32.mrf.mxu0  ;;  %2308 = vmatmul.bf16.gmra.mxu0 %v1975_v25  ;;  %v7322_v24 = vld [vmem:[%s11970_s4 + $0xc8] sm:$0xff] }
  0xe1   : > { %v1307_v28 = vpop.f32.mrf.mxu3  ;;  %v1288_v8 = vadd.f32 %v1287_v27, %v8184_v17  ;;  %v1270_v32 = vpop.f32.mrf.mxu1  ;;  %v1251_v37 = vadd.f32 %v1250_v31, %v8184_v17 }
  0xe2   : > { %v1308_v30 = vadd.f32 %v1307_v28, %v8184_v17  ;;  %v1271_v38 = vadd.f32 %v1270_v32, %v8184_v17 }
  0xe3   : > { %vm1663_vm15 = vcmp.gt.f32.partialorder %v1288_v8, 0.0  ;;  %v1791_v39 = vmul.f32 0.2, %v1288_v8  ;;  %v1731_v53 = vmul.f32 0.2, %v1251_v37  ;;  %vm1603_vm2 = vcmp.gt.f32.partialorder %v1251_v37, 0.0 }
  0xe4   : > { %vm1695_vm1 = vcmp.gt.f32.partialorder %v1308_v30, 0.0  ;;  %v1823_v40 = vmul.f32 0.2, %v1308_v30  ;;  %6505 = vmatmul.msk.bf16.gmra.mxu1 %vm1182_vm0, %v8078_v45  ;;  %v1763_v6 = vmul.f32 0.2, %v1271_v38  ;;  %vm1635_vm3 = vcmp.gt.f32.partialorder %v1271_v38, 0.0 }
  0xe5   : > { %6521 = vmatmul.msk.bf16.gmra.mxu2 %vm1182_vm0, %v8078_v45  ;;  %v8258_v48 = vsel %vm1663_vm15, %v1288_v8, %v1791_v39 }
  0xe6   : > { %6537 = vmatmul.msk.bf16.gmra.mxu3 %vm1182_vm0, %v8078_v45  ;;  %v8260_v49 = vsel %vm1695_vm1, %v1308_v30, %v1823_v40  ;;  %v8271_v45 = vsel %vm1691_vm14, %v1306_v33, %v1819_v36  ;;  %v1859_v33 = vsel %vm1603_vm2, %v1251_v37, %v1731_v53  ;;  %v8282_v18 = vsel %vm1635_vm3, %v1271_v38, %v1763_v6 }
  0xe8   : > { %v1290_v55 = vpop.f32.mrf.mxu2  ;;  %v1252_v59 = vpop.f32.mrf.mxu0 }
  0xe9   : > { %v1310_v56 = vpop.f32.mrf.mxu3  ;;  %v1291_v57 = vadd.f32 %v1290_v55, %v8184_v17  ;;  %v1272_v5 = vpop.f32.mrf.mxu1  ;;  %v1253_v7 = vadd.f32 %v1252_v59, %v8184_v17 }
  0xea   : > { %v1311_v58 = vadd.f32 %v1310_v56, %v8184_v17  ;;  %v1273_v9 = vadd.f32 %v1272_v5, %v8184_v17 }
  0xeb   : > { %v1735_v10 = vmul.f32 0.2, %v1253_v7  ;;  %vm1607_vm4 = vcmp.gt.f32.partialorder %v1253_v7, 0.0  ;;  %v1795_v22 = vmul.f32 0.2, %v1291_v57  ;;  %vm1667_vm6 = vcmp.gt.f32.partialorder %v1291_v57, 0.0 }
  0xec   : > { %v1767_v11 = vmul.f32 0.2, %v1273_v9  ;;  %vm1639_vm5 = vcmp.gt.f32.partialorder %v1273_v9, 0.0  ;;  %v1827_v28 = vmul.f32 0.2, %v1311_v58  ;;  %vm1699_vm7 = vcmp.gt.f32.partialorder %v1311_v58, 0.0 }
  0xed   : > { %v1863_v14 = vsel %vm1607_vm4, %v1253_v7, %v1735_v10  ;;  %v8294_v39 = vsel %vm1667_vm6, %v1291_v57, %v1795_v22 }
  0xee   : > { %v8284_v19 = vsel %vm1639_vm5, %v1273_v9, %v1767_v11  ;;  %v1979_v20 = vpack.c.bf16 %v1863_v14, %v1859_v33  ;;  %v8302_v50 = vsel %vm1699_vm7, %v1311_v58, %v1827_v28 }
  0xef   : > { %v1995_v21 = vpack.c.bf16 %v8284_v19, %v8282_v18 }
  0xf0   : > { %v1292_v25 = vpop.f32.mrf.mxu2  ;;  %v1255_v30 = vpop.f32.mrf.mxu0  ;;  %2313 = vmatmul.bf16.gmra.mxu0 %v1979_v20 }
  0xf1   : > { %v1312_v27 = vpop.f32.mrf.mxu3  ;;  %v1293_v29 = vadd.f32 %v1292_v25, %v8184_v17  ;;  %v1275_v31 = vpop.f32.mrf.mxu1  ;;  %v1256_v32 = vadd.f32 %v1255_v30, %v8184_v17 }
  0xf2   : > { %v1313_v8 = vadd.f32 %v1312_v27, %v8184_v17  ;;  %v1276_v36 = vadd.f32 %v1275_v31, %v8184_v17 }
  0xf3   : > { %vm1671_vm8 = vcmp.gt.f32.partialorder %v1293_v29, 0.0  ;;  %v1799_v37 = vmul.f32 0.2, %v1293_v29  ;;  %v1739_v56 = vmul.f32 0.2, %v1256_v32  ;;  %vm1611_vm10 = vcmp.gt.f32.partialorder %v1256_v32, 0.0 }
  0xf4   : > { %vm1703_vm9 = vcmp.gt.f32.partialorder %v1313_v8, 0.0  ;;  %v1831_v38 = vmul.f32 0.2, %v1313_v8  ;;  %6506 = vmatmul.msk.bf16.gmra.mxu1 %vm1182_vm0, %v8108_v60  ;;  %v1771_v58 = vmul.f32 0.2, %v1276_v36  ;;  %vm1643_vm11 = vcmp.gt.f32.partialorder %v1276_v36, 0.0 }
  0xf5   : > { %6522 = vmatmul.msk.bf16.gmra.mxu2 %vm1182_vm0, %v8108_v60  ;;  %v8300_v40 = vsel %vm1671_vm8, %v1293_v29, %v1799_v37  ;;  %v1867_v10 = vsel %vm1611_vm10, %v1256_v32, %v1739_v56 }
  0xf6   : > { %6538 = vmatmul.msk.bf16.gmra.mxu3 %vm1182_vm0, %v8108_v60  ;;  %v8304_v51 = vsel %vm1703_vm9, %v1313_v8, %v1831_v38  ;;  %v8314_v20 = vsel %vm1643_vm11, %v1276_v36, %v1771_v58  ;;  %v8323_v36 = vperm.slane %v8181_v15, 1 }
  0xf8   : > { %v1295_v57 = vpop.f32.mrf.mxu2  ;;  %v1257_v6 = vpop.f32.mrf.mxu0 }
  0xf9   : > { %v1315_v59 = vpop.f32.mrf.mxu3  ;;  %v1296_v5 = vadd.f32 %v1295_v57, %v8184_v17  ;;  %v1277_v7 = vpop.f32.mrf.mxu1  ;;  %v1258_v9 = vadd.f32 %v1257_v6, %v8184_v17 }
  0xfa   : > { %v1316_v60 = vadd.f32 %v1315_v59, %v8184_v17  ;;  %v1278_v33 = vadd.f32 %v1277_v7, %v8184_v17  ;;  %v7323_v59 = vld [vmem:[%s11970_s4 + $0xd0] sm:$0xff] }
  0xfb   : > { %v1743_v11 = vmul.f32 0.2, %v1258_v9  ;;  %vm1615_vm12 = vcmp.gt.f32.partialorder %v1258_v9, 0.0  ;;  %v1803_v28 = vmul.f32 0.2, %v1296_v5  ;;  %vm1675_vm14 = vcmp.gt.f32.partialorder %v1296_v5, 0.0  ;;  %2567 = vmatpush.bf16.msra.mxu3 %v7323_v59 }
  0xfc   : > { %v1775_v13 = vmul.f32 0.2, %v1278_v33  ;;  %vm1647_vm13 = vcmp.gt.f32.partialorder %v1278_v33, 0.0  ;;  %v1835_v30 = vmul.f32 0.2, %v1316_v60  ;;  %vm1707_vm15 = vcmp.gt.f32.partialorder %v1316_v60, 0.0 }
  0xfd   : > { %v1871_v14 = vsel %vm1615_vm12, %v1258_v9, %v1743_v11  ;;  %v8327_v57 = vsel %vm1675_vm14, %v1296_v5, %v1803_v28 }
  0xfe   : > { %v8316_v22 = vsel %vm1647_vm13, %v1278_v33, %v1775_v13  ;;  %v1983_v25 = vpack.c.bf16 %v1871_v14, %v1867_v10  ;;  %v8341_v7 = vsel %vm1707_vm15, %v1316_v60, %v1835_v30  ;;  %v8351_v33 = vperm.slane %v8181_v15, 2 }
  0xff   : > { %v1999_v27 = vpack.c.bf16 %v8316_v22, %v8314_v20  ;;  %v8354_v60 = vperm.slane %v8181_v15, 3  ;;  %2568 = vmatpush.bf16.msra.mxu3 %v7322_v24  ;;  %v7313_v20 = vld [vmem:[%s11970_s4 + $0x80] sm:$0xff] }
 0x100   : > { %v1297_v29 = vpop.f32.mrf.mxu2  ;;  %2318 = vmatmul.bf16.gmra.mxu0 %v1983_v25 }
 0x101   : > { %v1317_v8 = vpop.f32.mrf.mxu3  ;;  %v1298_v31 = vadd.f32 %v1297_v29, %v8184_v17  ;;  %v1329_v37 = vpop.f32.mrf.mxu1 }
 0x102   : > { %v1318_v32 = vadd.f32 %v1317_v8, %v8184_v17  ;;  %v7315_v17 = vld [vmem:[%s11970_s4 + $0x90] sm:$0xff]  ;;  %v1330_v58 = vadd.f32 %v1329_v37, %v8323_v36 }
 0x103   : > { %vm1679_vm1 = vcmp.gt.f32.partialorder %v1298_v31, 0.0  ;;  %v1807_v38 = vmul.f32 0.2, %v1298_v31  ;;  %2478 = vmatpush.bf16.msra.mxu2 %v7315_v17  ;;  %v7307_v8 = vld [vmem:[%s11970_s4 + $0x50] sm:$0xff] }
 0x104   : > { %vm1711_vm2 = vcmp.gt.f32.partialorder %v1318_v32, 0.0  ;;  %v1839_v56 = vmul.f32 0.2, %v1318_v32  ;;  %6507 = vmatmul.msk.bf16.gmra.mxu1 %vm1182_vm0, %v8036_v12  ;;  %v1716_v14 = vmul.f32 0.2, %v1330_v58  ;;  %vm1588_vm3 = vcmp.gt.f32.partialorder %v1330_v58, 0.0 }
 0x105   : > { %6523 = vmatmul.msk.bf16.gmra.mxu2 %vm1182_vm0, %v8036_v12  ;;  %v8339_v6 = vsel %vm1679_vm1, %v1298_v31, %v1807_v38  ;;  %2389 = vmatpush.bf16.msra.mxu1 %v7307_v8 }
 0x106   : > { %6539 = vmatmul.msk.bf16.gmra.mxu3 %vm1182_vm0, %v8036_v12  ;;  %v8343_v5 = vsel %vm1711_vm2, %v1318_v32, %v1839_v56  ;;  %v8362_v31 = vsel %vm1588_vm3, %v1330_v58, %v1716_v14 }
 0x107   : > { %2479 = vmatpush.bf16.msra.mxu2 %v7314_v23 }
 0x108   : > { %v1418_v10 = vpop.f32.mrf.mxu2 }
 0x109   : > { %v1507_v11 = vpop.f32.mrf.mxu3  ;;  %v1331_v13 = vpop.f32.mrf.mxu1  ;;  %v1419_v28 = vadd.f32 %v1418_v10, %v8351_v33 }
 0x10a   : > { %v1332_v25 = vadd.f32 %v1331_v13, %v8323_v36  ;;  %v1508_v30 = vadd.f32 %v1507_v11, %v8354_v60 }
 0x10b   : > { %v1717_v37 = vmul.f32 0.2, %v1419_v28  ;;  %vm1589_vm5 = vcmp.gt.f32.partialorder %v1419_v28, 0.0  ;;  %2480 = vmatpush.bf16.msra.mxu2 %v7313_v20 }
 0x10c   : > { %vm1592_vm4 = vcmp.gt.f32.partialorder %v1332_v25, 0.0  ;;  %v1720_v29 = vmul.f32 0.2, %v1332_v25  ;;  %v1718_v17 = vmul.f32 0.2, %v1508_v30  ;;  %vm1590_vm6 = vcmp.gt.f32.partialorder %v1508_v30, 0.0 }
 0x10d   : > { %v8373_v14 = vsel %vm1589_vm5, %v1419_v28, %v1717_v37 }
 0x10e   : > { %v8364_v32 = vsel %vm1592_vm4, %v1332_v25, %v1720_v29  ;;  %v8377_v25 = vsel %vm1590_vm6, %v1508_v30, %v1718_v17 }
 0x110   : > { %v1420_v38 = vpop.f32.mrf.mxu2  ;;  %2323 = vmatmul.bf16.gmra.mxu0 %v1987_v44 }
 0x111   : > { %v1509_v56 = vpop.f32.mrf.mxu3  ;;  %v1421_v59 = vadd.f32 %v1420_v38, %v8351_v33  ;;  %v1334_v13 = vpop.f32.mrf.mxu1 }
 0x112   : > { %v1510_v10 = vadd.f32 %v1509_v56, %v8354_v60  ;;  %v1335_v44 = vadd.f32 %v1334_v13, %v8323_v36 }
 0x113   : > { %vm1593_vm7 = vcmp.gt.f32.partialorder %v1421_v59, 0.0  ;;  %v1721_v58 = vmul.f32 0.2, %v1421_v59 }
 0x114   : > { %vm1594_vm8 = vcmp.gt.f32.partialorder %v1510_v10, 0.0  ;;  %v1722_v11 = vmul.f32 0.2, %v1510_v10  ;;  %6508 = vmatmul.msk.bf16.gmra.mxu1 %vm1182_vm0, %v8059_v34  ;;  %v1724_v38 = vmul.f32 0.2, %v1335_v44  ;;  %vm1596_vm9 = vcmp.gt.f32.partialorder %v1335_v44, 0.0 }
 0x115   : > { %v8379_v29 = vsel %vm1593_vm7, %v1421_v59, %v1721_v58  ;;  %6524 = vmatmul.msk.bf16.gmra.mxu2 %vm1182_vm0, %v8059_v34 }
 0x116   : > { %v8381_v8 = vsel %vm1594_vm8, %v1510_v10, %v1722_v11  ;;  %6540 = vmatmul.msk.bf16.gmra.mxu3 %vm1182_vm0, %v8059_v34  ;;  %v8395_v10 = vsel %vm1596_vm9, %v1335_v44, %v1724_v38 }
 0x118   : > { %v1423_v28 = vpop.f32.mrf.mxu2 }
 0x119   : > { %v1512_v30 = vpop.f32.mrf.mxu3  ;;  %v1336_v37 = vpop.f32.mrf.mxu1  ;;  %v1424_v17 = vadd.f32 %v1423_v28, %v8351_v33 }
 0x11a   : > { %v1337_v56 = vadd.f32 %v1336_v37, %v8323_v36  ;;  %v1513_v34 = vadd.f32 %v1512_v30, %v8354_v60 }
 0x11b   : > { %v1725_v11 = vmul.f32 0.2, %v1424_v17  ;;  %vm1597_vm11 = vcmp.gt.f32.partialorder %v1424_v17, 0.0 }
 0x11c   : > { %vm1600_vm10 = vcmp.gt.f32.partialorder %v1337_v56, 0.0  ;;  %v1728_v59 = vmul.f32 0.2, %v1337_v56  ;;  %v1726_v54 = vmul.f32 0.2, %v1513_v34  ;;  %vm1598_vm12 = vcmp.gt.f32.partialorder %v1513_v34, 0.0 }
 0x11d   : > { %v8408_v38 = vsel %vm1597_vm11, %v1424_v17, %v1725_v11 }
 0x11e   : > { %v8397_v58 = vsel %vm1600_vm10, %v1337_v56, %v1728_v59 }
 0x120   : > { %v1425_v12 = vpop.f32.mrf.mxu2  ;;  %2328 = vmatmul.bf16.gmra.mxu0 %v1991_v26 }
 0x121   : > { %v1514_v55 = vpop.f32.mrf.mxu3  ;;  %v1426_v37 = vadd.f32 %v1425_v12, %v8351_v33  ;;  %v1339_v4 = vpop.f32.mrf.mxu1 }
 0x122   : > { %v1515_v28 = vadd.f32 %v1514_v55, %v8354_v60  ;;  %v8422_v55 = vsel %vm1598_vm12, %v1513_v34, %v1726_v54  ;;  %v1340_v56 = vadd.f32 %v1339_v4, %v8323_v36  ;;  %v7306_v4 = vld [vmem:[%s11970_s4 + $0x48] sm:$0xff] }
 0x123   : > { %vm1601_vm13 = vcmp.gt.f32.partialorder %v1426_v37, 0.0  ;;  %v1729_v44 = vmul.f32 0.2, %v1426_v37  ;;  %2390 = vmatpush.bf16.msra.mxu1 %v7306_v4 }
 0x124   : > { %vm1602_vm14 = vcmp.gt.f32.partialorder %v1515_v28, 0.0  ;;  %v1730_v30 = vmul.f32 0.2, %v1515_v28  ;;  %6509 = vmatmul.msk.bf16.gmra.mxu1 %vm1182_vm0, %v8080_v46  ;;  %v1732_v42 = vmul.f32 0.2, %v1340_v56  ;;  %vm1604_vm15 = vcmp.gt.f32.partialorder %v1340_v56, 0.0 }
 0x125   : > { %6525 = vmatmul.msk.bf16.gmra.mxu2 %vm1182_vm0, %v8080_v46  ;;  %v8420_v26 = vsel %vm1601_vm13, %v1426_v37, %v1729_v44 }
 0x126   : > { %6541 = vmatmul.msk.bf16.gmra.mxu3 %vm1182_vm0, %v8080_v46  ;;  %v8424_v12 = vsel %vm1602_vm14, %v1515_v28, %v1730_v30  ;;  %v8437_v44 = vsel %vm1604_vm15, %v1340_v56, %v1732_v42 }
 0x128   : > { %v1428_v59 = vpop.f32.mrf.mxu2 }
 0x129   : > { %v1517_v11 = vpop.f32.mrf.mxu3  ;;  %v1341_v13 = vpop.f32.mrf.mxu1  ;;  %v1429_v54 = vadd.f32 %v1428_v59, %v8351_v33 }
 0x12a   : > { %v1342_v37 = vadd.f32 %v1341_v13, %v8323_v36  ;;  %v1518_v28 = vadd.f32 %v1517_v11, %v8354_v60 }
 0x12b   : > { %v1733_v13 = vmul.f32 0.2, %v1429_v54  ;;  %vm1605_vm2 = vcmp.gt.f32.partialorder %v1429_v54, 0.0 }
 0x12c   : > { %vm1608_vm1 = vcmp.gt.f32.partialorder %v1342_v37, 0.0  ;;  %v1736_v34 = vmul.f32 0.2, %v1342_v37  ;;  %v1734_v59 = vmul.f32 0.2, %v1518_v28  ;;  %vm1606_vm3 = vcmp.gt.f32.partialorder %v1518_v28, 0.0 }
 0x12d   : > { %v8450_v11 = vsel %vm1605_vm2, %v1429_v54, %v1733_v13 }
 0x12e   : > { %v8439_v30 = vsel %vm1608_vm1, %v1342_v37, %v1736_v34  ;;  %v8458_v18 = vsel %vm1606_vm3, %v1518_v28, %v1734_v59 }
 0x130   : > { %v1430_v24 = vpop.f32.mrf.mxu2  ;;  %2333 = vmatmul.bf16.gmra.mxu0 %v1995_v21 }
 0x131   : > { %v1519_v46 = vpop.f32.mrf.mxu3  ;;  %v1431_v17 = vadd.f32 %v1430_v24, %v8351_v33  ;;  %v1344_v15 = vpop.f32.mrf.mxu1 }
 0x132   : > { %v1520_v41 = vadd.f32 %v1519_v46, %v8354_v60  ;;  %v1345_v21 = vadd.f32 %v1344_v15, %v8323_v36 }
 0x133   : > { %vm1609_vm4 = vcmp.gt.f32.partialorder %v1431_v17, 0.0  ;;  %v1737_v42 = vmul.f32 0.2, %v1431_v17 }
 0x134   : > { %vm1610_vm5 = vcmp.gt.f32.partialorder %v1520_v41, 0.0  ;;  %v1738_v56 = vmul.f32 0.2, %v1520_v41  ;;  %6510 = vmatmul.msk.bf16.gmra.mxu1 %vm1182_vm0, %v8110_v61  ;;  %v1740_v24 = vmul.f32 0.2, %v1345_v21  ;;  %vm1612_vm6 = vcmp.gt.f32.partialorder %v1345_v21, 0.0 }
 0x135   : > { %6526 = vmatmul.msk.bf16.gmra.mxu2 %vm1182_vm0, %v8110_v61  ;;  %v8456_v46 = vsel %vm1609_vm4, %v1431_v17, %v1737_v42 }
 0x136   : > { %6542 = vmatmul.msk.bf16.gmra.mxu3 %vm1182_vm0, %v8110_v61  ;;  %v8460_v19 = vsel %vm1610_vm5, %v1520_v41, %v1738_v56  ;;  %v8470_v15 = vsel %vm1612_vm6, %v1345_v21, %v1740_v24 }
 0x138   : > { %v1433_v34 = vpop.f32.mrf.mxu2 }
 0x139   : > { %v1522_v4 = vpop.f32.mrf.mxu3  ;;  %v1346_v13 = vpop.f32.mrf.mxu1  ;;  %v1434_v17 = vadd.f32 %v1433_v34, %v8351_v33 }
 0x13a   : > { %v1347_v61 = vadd.f32 %v1346_v13, %v8323_v36  ;;  %v1523_v28 = vadd.f32 %v1522_v4, %v8354_v60 }
 0x13b   : > { %v1741_v56 = vmul.f32 0.2, %v1434_v17  ;;  %vm1613_vm8 = vcmp.gt.f32.partialorder %v1434_v17, 0.0 }
 0x13c   : > { %vm1616_vm7 = vcmp.gt.f32.partialorder %v1347_v61, 0.0  ;;  %v1744_v41 = vmul.f32 0.2, %v1347_v61  ;;  %v1742_v23 = vmul.f32 0.2, %v1523_v28  ;;  %vm1614_vm9 = vcmp.gt.f32.partialorder %v1523_v28, 0.0 }
 0x13d   : > { %v8483_v24 = vsel %vm1613_vm8, %v1434_v17, %v1741_v56 }
 0x13e   : > { %v8472_v59 = vsel %vm1616_vm7, %v1347_v61, %v1744_v41 }
 0x140   : > { %v1435_v54 = vpop.f32.mrf.mxu2  ;;  %2338 = vmatmul.bf16.gmra.mxu0 %v1999_v27  ;;  %v8494_v27 = vsel %vm1614_vm9, %v1523_v28, %v1742_v23 }
 0x141   : > { %v1524_v37 = vpop.f32.mrf.mxu3  ;;  %v1436_v13 = vadd.f32 %v1435_v54, %v8351_v33  ;;  %v1349_v9 = vpop.f32.mrf.mxu1 }
 0x142   : > { %v1525_v34 = vadd.f32 %v1524_v37, %v8354_v60  ;;  %v1350_v54 = vadd.f32 %v1349_v9, %v8323_v36 }
 0x143   : > { %vm1617_vm10 = vcmp.gt.f32.partialorder %v1436_v13, 0.0  ;;  %v1745_v21 = vmul.f32 0.2, %v1436_v13 }
 0x144   : > { %vm1618_vm11 = vcmp.gt.f32.partialorder %v1525_v34, 0.0  ;;  %v1746_v4 = vmul.f32 0.2, %v1525_v34  ;;  %6511 = vmatmul.msk.bf16.gmra.mxu1 %vm1182_vm0, %v8039_v16  ;;  %v1748_v23 = vmul.f32 0.2, %v1350_v54  ;;  %vm1620_vm12 = vcmp.gt.f32.partialorder %v1350_v54, 0.0 }
 0x145   : > { %6527 = vmatmul.msk.bf16.gmra.mxu2 %vm1182_vm0, %v8039_v16  ;;  %v8492_v22 = vsel %vm1617_vm10, %v1436_v13, %v1745_v21  ;;  %v7305_v21 = vld [vmem:[%s11970_s4 + $0x40] sm:$0xff] }
 0x146   : > { %6543 = vmatmul.msk.bf16.gmra.mxu3 %vm1182_vm0, %v8039_v16  ;;  %v8496_v37 = vsel %vm1618_vm11, %v1525_v34, %v1746_v4  ;;  %v7321_v16 = vld [vmem:[%s11970_s4 + $0xc0] sm:$0xff]  ;;  %2391 = vmatpush.bf16.msra.mxu1 %v7305_v21  ;;  %v8512_v20 = vsel %vm1620_vm12, %v1350_v54, %v1748_v23 }
 0x147   : > { %2569 = vmatpush.bf16.msra.mxu3 %v7321_v16 }
 0x148   : > { %v1438_v41 = vpop.f32.mrf.mxu2 }
 0x149   : > { %v1527_v56 = vpop.f32.mrf.mxu3  ;;  %v1351_v13 = vpop.f32.mrf.mxu1  ;;  %v1439_v9 = vadd.f32 %v1438_v41, %v8351_v33 }
 0x14a   : > { %v1352_v28 = vadd.f32 %v1351_v13, %v8323_v36  ;;  %v1528_v4 = vadd.f32 %v1527_v56, %v8354_v60  ;;  %v12102_v56 = vpack.c.bf16 %v8225_v0, %v8219_v63 }
 0x14b   : > { %v1749_v13 = vmul.f32 0.2, %v1439_v9  ;;  %vm1621_vm14 = vcmp.gt.f32.partialorder %v1439_v9, 0.0 }
 0x14c   : > { %vm1624_vm13 = vcmp.gt.f32.partialorder %v1352_v28, 0.0  ;;  %v1752_v34 = vmul.f32 0.2, %v1352_v28  ;;  %v1750_v41 = vmul.f32 0.2, %v1528_v4  ;;  %vm1622_vm15 = vcmp.gt.f32.partialorder %v1528_v4, 0.0 }
 0x14e   : > { %v8514_v17 = vsel %vm1624_vm13, %v1352_v28, %v1752_v34  ;;  %v8525_v28 = vsel %vm1621_vm14, %v1439_v9, %v1749_v13  ;;  %v8533_v63 = vsel %vm1622_vm15, %v1528_v4, %v1750_v41 }
 0x14f   : > { %12103 = vst [vmem:[#allocation19_spill] sm:$0xff] %v8533_v63 }
 0x150   : > { %v1440_v61 = vpop.f32.mrf.mxu2  ;;  %2343 = vmatmul.bf16.gmra.mxu0 %v12102_v56 }
 0x151   : > { %v1529_v42 = vpop.f32.mrf.mxu3  ;;  %v1441_v53 = vadd.f32 %v1440_v61, %v8351_v33  ;;  %v1354_v3 = vpop.f32.mrf.mxu1 }
 0x152   : > { %v1530_v52 = vadd.f32 %v1529_v42, %v8354_v60  ;;  %v1355_v61 = vadd.f32 %v1354_v3, %v8323_v36 }
 0x153   : > { %vm1625_vm1 = vcmp.gt.f32.partialorder %v1441_v53, 0.0  ;;  %v1753_v54 = vmul.f32 0.2, %v1441_v53 }
 0x154   : > { %vm1626_vm2 = vcmp.gt.f32.partialorder %v1530_v52, 0.0  ;;  %v1754_v23 = vmul.f32 0.2, %v1530_v52  ;;  %6512 = vmatmul.msk.bf16.gmra.mxu1 %vm1182_vm0, %v8061_v35  ;;  %v1756_v16 = vmul.f32 0.2, %v1355_v61  ;;  %vm1628_vm3 = vcmp.gt.f32.partialorder %v1355_v61, 0.0 }
 0x155   : > { %6528 = vmatmul.msk.bf16.gmra.mxu2 %vm1182_vm0, %v8061_v35  ;;  %v8531_v42 = vsel %vm1625_vm1, %v1441_v53, %v1753_v54 }
 0x156   : > { %6544 = vmatmul.msk.bf16.gmra.mxu3 %vm1182_vm0, %v8061_v35  ;;  %v8535_v0 = vsel %vm1626_vm2, %v1530_v52, %v1754_v23  ;;  %v8545_v3 = vsel %vm1628_vm3, %v1355_v61, %v1756_v16 }
 0x157   : > { %12104 = vst [vmem:[#allocation20_spill] sm:$0xff] %v8535_v0 }
 0x158   : > { %v1443_v21 = vpop.f32.mrf.mxu2  ;;  %12105 = vst [vmem:[#allocation21_spill] sm:$0xff] %v8545_v3 }
 0x159   : > { %v1532_v13 = vpop.f32.mrf.mxu3  ;;  %v1356_v56 = vpop.f32.mrf.mxu1  ;;  %v1444_v53 = vadd.f32 %v1443_v21, %v8351_v33 }
 0x15a   : > { %v1357_v35 = vadd.f32 %v1356_v56, %v8323_v36  ;;  %v1533_v4 = vadd.f32 %v1532_v13, %v8354_v60  ;;  %v12106_v13 = vpack.c.bf16 %v8258_v48, %v8256_v43 }
 0x15b   : > { %v1757_v23 = vmul.f32 0.2, %v1444_v53  ;;  %vm1629_vm5 = vcmp.gt.f32.partialorder %v1444_v53, 0.0 }
 0x15c   : > { %vm1632_vm4 = vcmp.gt.f32.partialorder %v1357_v35, 0.0  ;;  %v1760_v52 = vmul.f32 0.2, %v1357_v35  ;;  %v1758_v63 = vmul.f32 0.2, %v1533_v4  ;;  %vm1630_vm6 = vcmp.gt.f32.partialorder %v1533_v4, 0.0 }
 0x15e   : > { %v8547_v41 = vsel %vm1632_vm4, %v1357_v35, %v1760_v52  ;;  %v8558_v35 = vsel %vm1629_vm5, %v1444_v53, %v1757_v23  ;;  %v8566_v43 = vsel %vm1630_vm6, %v1533_v4, %v1758_v63 }
 0x15f   : > { %12107 = vst [vmem:[#allocation22_spill] sm:$0xff] %v8566_v43 }
 0x160   : > { %v1445_v9 = vpop.f32.mrf.mxu2  ;;  %2348 = vmatmul.bf16.gmra.mxu0 %v12106_v13 }
 0x161   : > { %v1534_v34 = vpop.f32.mrf.mxu3  ;;  %v1446_v56 = vadd.f32 %v1445_v9, %v8351_v33  ;;  %v1359_v0 = vpop.f32.mrf.mxu1 }
 0x162   : > { %v1535_v21 = vadd.f32 %v1534_v34, %v8354_v60  ;;  %v1360_v9 = vadd.f32 %v1359_v0, %v8323_v36 }
 0x163   : > { %vm1633_vm7 = vcmp.gt.f32.partialorder %v1446_v56, 0.0  ;;  %v1761_v16 = vmul.f32 0.2, %v1446_v56 }
 0x164   : > { %vm1634_vm8 = vcmp.gt.f32.partialorder %v1535_v21, 0.0  ;;  %v1762_v61 = vmul.f32 0.2, %v1535_v21  ;;  %6513 = vmatmul.msk.bf16.gmra.mxu1 %vm1182_vm0, %v8082_v47  ;;  %v1764_v3 = vmul.f32 0.2, %v1360_v9  ;;  %vm1636_vm9 = vcmp.gt.f32.partialorder %v1360_v9, 0.0 }
 0x165   : > { %6529 = vmatmul.msk.bf16.gmra.mxu2 %vm1182_vm0, %v8082_v47  ;;  %v8564_v34 = vsel %vm1633_vm7, %v1446_v56, %v1761_v16 }
 0x166   : > { %6545 = vmatmul.msk.bf16.gmra.mxu3 %vm1182_vm0, %v8082_v47  ;;  %v8568_v48 = vsel %vm1634_vm8, %v1535_v21, %v1762_v61  ;;  %v8578_v0 = vsel %vm1636_vm9, %v1360_v9, %v1764_v3 }
 0x167   : > { %12108 = vst [vmem:[#allocation23_spill] sm:$0xff] %v8568_v48 }
 0x168   : > { %v1448_v23 = vpop.f32.mrf.mxu2  ;;  %12109 = vst [vmem:[#allocation24_spill] sm:$0xff] %v8578_v0 }
 0x169   : > { %v1537_v13 = vpop.f32.mrf.mxu3  ;;  %v1361_v54 = vpop.f32.mrf.mxu1  ;;  %v1449_v63 = vadd.f32 %v1448_v23, %v8351_v33 }
 0x16a   : > { %v1362_v47 = vadd.f32 %v1361_v54, %v8323_v36  ;;  %v1538_v56 = vadd.f32 %v1537_v13, %v8354_v60  ;;  %v12110_v13 = vpack.c.bf16 %v8300_v40, %v8294_v39 }
 0x16b   : > { %v1765_v61 = vmul.f32 0.2, %v1449_v63  ;;  %vm1637_vm11 = vcmp.gt.f32.partialorder %v1449_v63, 0.0 }
 0x16c   : > { %vm1640_vm10 = vcmp.gt.f32.partialorder %v1362_v47, 0.0  ;;  %v1768_v4 = vmul.f32 0.2, %v1362_v47  ;;  %v1766_v43 = vmul.f32 0.2, %v1538_v56  ;;  %vm1638_vm12 = vcmp.gt.f32.partialorder %v1538_v56, 0.0 }
 0x16e   : > { %v8580_v21 = vsel %vm1640_vm10, %v1362_v47, %v1768_v4  ;;  %v8591_v47 = vsel %vm1637_vm11, %v1449_v63, %v1765_v61  ;;  %v8599_v39 = vsel %vm1638_vm12, %v1538_v56, %v1766_v43 }
 0x16f   : > { %12111 = vst [vmem:[#allocation25_spill] sm:$0xff] %v8599_v39 }
 0x170   : > { %v1450_v53 = vpop.f32.mrf.mxu2  ;;  %2353 = vmatmul.bf16.gmra.mxu0 %v12110_v13 }
 0x171   : > { %v1539_v52 = vpop.f32.mrf.mxu3  ;;  %v1451_v54 = vadd.f32 %v1450_v53, %v8351_v33  ;;  %v1364_v48 = vpop.f32.mrf.mxu1 }
 0x172   : > { %v1540_v23 = vadd.f32 %v1539_v52, %v8354_v60  ;;  %v1365_v53 = vadd.f32 %v1364_v48, %v8323_v36 }
 0x173   : > { %vm1641_vm13 = vcmp.gt.f32.partialorder %v1451_v54, 0.0  ;;  %v1769_v3 = vmul.f32 0.2, %v1451_v54 }
 0x174   : > { %vm1642_vm14 = vcmp.gt.f32.partialorder %v1540_v23, 0.0  ;;  %v1770_v9 = vmul.f32 0.2, %v1540_v23  ;;  %6514 = vmatmul.msk.bf16.gmra.mxu1 %vm1182_vm0, %v8112_v62  ;;  %v1772_v0 = vmul.f32 0.2, %v1365_v53 }
 0x175   : > { %6530 = vmatmul.msk.bf16.gmra.mxu2 %vm1182_vm0, %v8112_v62  ;;  %v8597_v52 = vsel %vm1641_vm13, %v1451_v54, %v1769_v3  ;;  %v8609_v54 = vpop.f32.mrf.mxu0 }
 0x176   : > { %6546 = vmatmul.msk.bf16.gmra.mxu3 %vm1182_vm0, %v8112_v62  ;;  %v8601_v40 = vsel %vm1642_vm14, %v1540_v23, %v1770_v9  ;;  %12113 = vst [vmem:[#allocation27_spill] sm:$0xff] %v8609_v54  ;;  %vm1644_vm0 = vcmp.gt.f32.partialorder %v1365_v53, 0.0 }
 0x177   : > { %12112 = vst [vmem:[#allocation26_spill] sm:$0xff] %v8601_v40  ;;  %v8613_v23 = vsel %vm1644_vm0, %v1365_v53, %v1772_v0 }
 0x178   : > { %v1453_v61 = vpop.f32.mrf.mxu2 }
 0x179   : > { %v1542_v13 = vpop.f32.mrf.mxu3  ;;  %v1366_v16 = vpop.f32.mrf.mxu1  ;;  %v1454_v43 = vadd.f32 %v1453_v61, %v8351_v33 }
 0x17a   : > { %v1367_v62 = vadd.f32 %v1366_v16, %v8323_v36  ;;  %v1543_v48 = vadd.f32 %v1542_v13, %v8354_v60  ;;  %v12114_v13 = vpack.c.bf16 %v8339_v6, %v8327_v57  ;;  %v12117_v57 = vpack.c.bf16 %v8381_v8, %v8377_v25 }
 0x17b   : > { %v1773_v63 = vmul.f32 0.2, %v1454_v43  ;;  %vm1645_vm1 = vcmp.gt.f32.partialorder %v1454_v43, 0.0 }
 0x17c   : > { %vm1648_vm15 = vcmp.gt.f32.partialorder %v1367_v62, 0.0  ;;  %v1776_v56 = vmul.f32 0.2, %v1367_v62  ;;  %v1774_v16 = vmul.f32 0.2, %v1543_v48  ;;  %vm1646_vm2 = vcmp.gt.f32.partialorder %v1543_v48, 0.0 }
 0x17d   : > { %v8629_v9 = vpop.f32.mrf.mxu0 }
 0x17e   : > { %v8615_v3 = vsel %vm1648_vm15, %v1367_v62, %v1776_v56  ;;  %v12115_v62 = vpack.c.bf16 %v8364_v32, %v8362_v31  ;;  %v8627_v56 = vsel %vm1645_vm1, %v1454_v43, %v1773_v63 }
 0x180   : > { %v1455_v4 = vpop.f32.mrf.mxu2  ;;  %2358 = vmatmul.bf16.gmra.mxu0 %v12114_v13 }
 0x181   : > { %v1544_v39 = vpop.f32.mrf.mxu3  ;;  %v1456_v54 = vadd.f32 %v1455_v4, %v8351_v33  ;;  %v1369_v40 = vpop.f32.mrf.mxu1  ;;  %v8639_v4 = vsel %vm1646_vm2, %v1543_v48, %v1774_v16 }
 0x182   : > { %v1545_v61 = vadd.f32 %v1544_v39, %v8354_v60  ;;  %v12116_v39 = vpack.c.bf16 %v8379_v29, %v8373_v14  ;;  %v1370_v31 = vadd.f32 %v1369_v40, %v8323_v36 }
 0x183   : > { %vm1649_vm3 = vcmp.gt.f32.partialorder %v1456_v54, 0.0  ;;  %v1777_v0 = vmul.f32 0.2, %v1456_v54 }
 0x184   : > { %vm1650_vm4 = vcmp.gt.f32.partialorder %v1545_v61, 0.0  ;;  %v1778_v53 = vmul.f32 0.2, %v1545_v61  ;;  %2392 = vmatmul.bf16.vlgmr.msra.gmra.mxu1 %v12115_v62  ;;  %v1780_v62 = vmul.f32 0.2, %v1370_v31  ;;  %vm1652_vm5 = vcmp.gt.f32.partialorder %v1370_v31, 0.0 }
 0x185   : > { %2481 = vmatmul.bf16.vlgmr.msra.gmra.mxu2 %v12116_v39  ;;  %v8637_v6 = vsel %vm1649_vm3, %v1456_v54, %v1777_v0 }
 0x186   : > { %2570 = vmatmul.bf16.vlgmr.msra.gmra.mxu3 %v12117_v57  ;;  %v8641_v13 = vsel %vm1650_vm4, %v1545_v61, %v1778_v53  ;;  %v8651_v40 = vsel %vm1652_vm5, %v1370_v31, %v1780_v62  ;;  %v8655_v61 = vpop.f32.mrf.mxu0  ;;  %v12118_v31 = vpack.c.bf16 %v8229_v2, %v8227_v1 }
 0x188   : > { %v1458_v14 = vpop.f32.mrf.mxu2 }
 0x189   : > { %v1547_v29 = vpop.f32.mrf.mxu3  ;;  %v1371_v43 = vpop.f32.mrf.mxu1  ;;  %v1459_v8 = vadd.f32 %v1458_v14, %v8351_v33 }
 0x18a   : > { %v1372_v25 = vadd.f32 %v1371_v43, %v8323_v36  ;;  %v1548_v48 = vadd.f32 %v1547_v29, %v8354_v60 }
 0x18b   : > { %v1781_v53 = vmul.f32 0.2, %v1459_v8  ;;  %vm1653_vm7 = vcmp.gt.f32.partialorder %v1459_v8, 0.0 }
 0x18c   : > { %vm1656_vm6 = vcmp.gt.f32.partialorder %v1372_v25, 0.0  ;;  %v1784_v54 = vmul.f32 0.2, %v1372_v25  ;;  %v1782_v43 = vmul.f32 0.2, %v1548_v48  ;;  %vm1654_vm8 = vcmp.gt.f32.partialorder %v1548_v48, 0.0 }
 0x18e   : > { %v8653_v16 = vsel %vm1656_vm6, %v1372_v25, %v1784_v54  ;;  %v12119_v25 = vpack.c.bf16 %v8397_v58, %v8395_v10  ;;  %v8667_v54 = vsel %vm1653_vm7, %v1459_v8, %v1781_v53  ;;  %v8677_v2 = vsel %vm1654_vm8, %v1548_v48, %v1782_v43  ;;  %v8686_v8 = vpop.f32.mrf.mxu0 }
 0x190   : > { %v1460_v39 = vpop.f32.mrf.mxu2  ;;  %2363 = vmatmul.bf16.gmra.mxu0 %v12118_v31 }
 0x191   : > { %v1549_v57 = vpop.f32.mrf.mxu3  ;;  %v1461_v14 = vadd.f32 %v1460_v39, %v8351_v33  ;;  %v1374_v32 = vpop.f32.mrf.mxu1  ;;  %v12120_v39 = vpack.c.bf16 %v8420_v26, %v8408_v38 }
 0x192   : > { %v1550_v63 = vadd.f32 %v1549_v57, %v8354_v60  ;;  %v12121_v57 = vpack.c.bf16 %v8424_v12, %v8422_v55  ;;  %v1375_v0 = vadd.f32 %v1374_v32, %v8323_v36 }
 0x193   : > { %vm1657_vm9 = vcmp.gt.f32.partialorder %v1461_v14, 0.0  ;;  %v1785_v29 = vmul.f32 0.2, %v1461_v14 }
 0x194   : > { %vm1658_vm10 = vcmp.gt.f32.partialorder %v1550_v63, 0.0  ;;  %v1786_v62 = vmul.f32 0.2, %v1550_v63  ;;  %2397 = vmatmul.bf16.gmra.mxu1 %v12119_v25  ;;  %v1788_v12 = vmul.f32 0.2, %v1375_v0  ;;  %vm1660_vm11 = vcmp.gt.f32.partialorder %v1375_v0, 0.0 }
 0x195   : > { %2486 = vmatmul.bf16.gmra.mxu2 %v12120_v39  ;;  %v8675_v1 = vsel %vm1657_vm9, %v1461_v14, %v1785_v29 }
 0x196   : > { %2575 = vmatmul.bf16.gmra.mxu3 %v12121_v57  ;;  %v8679_v31 = vsel %vm1658_vm10, %v1550_v63, %v1786_v62  ;;  %v8691_v43 = vsel %vm1660_vm11, %v1375_v0, %v1788_v12  ;;  %v8702_v0 = vpop.f32.mrf.mxu0 }
 0x198   : > { %v1463_v38 = vpop.f32.mrf.mxu2 }
 0x199   : > { %v1552_v26 = vpop.f32.mrf.mxu3  ;;  %v1376_v55 = vpop.f32.mrf.mxu1  ;;  %v1464_v63 = vadd.f32 %v1463_v38, %v8351_v33 }
 0x19a   : > { %v1377_v53 = vadd.f32 %v1376_v55, %v8323_v36  ;;  %v1553_v32 = vadd.f32 %v1552_v26, %v8354_v60  ;;  %v12122_v26 = vpack.c.bf16 %v8260_v49, %v8271_v45  ;;  %v12125_v49 = vpack.c.bf16 %v8460_v19, %v8458_v18 }
 0x19b   : > { %v1789_v62 = vmul.f32 0.2, %v1464_v63  ;;  %vm1661_vm13 = vcmp.gt.f32.partialorder %v1464_v63, 0.0 }
 0x19c   : > { %vm1664_vm12 = vcmp.gt.f32.partialorder %v1377_v53, 0.0  ;;  %v1792_v48 = vmul.f32 0.2, %v1377_v53  ;;  %v1790_v57 = vmul.f32 0.2, %v1553_v32  ;;  %vm1662_vm14 = vcmp.gt.f32.partialorder %v1553_v32, 0.0 }
 0x19d   : > { %v8707_v29 = vsel %vm1661_vm13, %v1464_v63, %v1789_v62 }
 0x19e   : > { %v8693_v14 = vsel %vm1664_vm12, %v1377_v53, %v1792_v48  ;;  %v12123_v48 = vpack.c.bf16 %v8439_v30, %v8437_v44 }
 0x1a0   : > { %v1465_v25 = vpop.f32.mrf.mxu2  ;;  %2368 = vmatmul.bf16.gmra.mxu0 %v12122_v26 }
 0x1a1   : > { %v1554_v39 = vpop.f32.mrf.mxu3  ;;  %v1466_v55 = vadd.f32 %v1465_v25, %v8351_v33  ;;  %v1379_v58 = vpop.f32.mrf.mxu1  ;;  %v12124_v25 = vpack.c.bf16 %v8456_v46, %v8450_v11 }
 0x1a2   : > { %v1555_v38 = vadd.f32 %v1554_v39, %v8354_v60  ;;  %v8717_v39 = vsel %vm1662_vm14, %v1553_v32, %v1790_v57  ;;  %v1380_v10 = vadd.f32 %v1379_v58, %v8323_v36  ;;  %v8728_v57 = vpop.f32.mrf.mxu0 }
 0x1a3   : > { %vm1665_vm0 = vcmp.gt.f32.partialorder %v1466_v55, 0.0  ;;  %v1793_v12 = vmul.f32 0.2, %v1466_v55 }
 0x1a4   : > { %vm1666_vm15 = vcmp.gt.f32.partialorder %v1555_v38, 0.0  ;;  %v1794_v53 = vmul.f32 0.2, %v1555_v38  ;;  %2402 = vmatmul.bf16.gmra.mxu1 %v12123_v48  ;;  %v1796_v62 = vmul.f32 0.2, %v1380_v10  ;;  %vm1668_vm1 = vcmp.gt.f32.partialorder %v1380_v10, 0.0 }
 0x1a5   : > { %2491 = vmatmul.bf16.gmra.mxu2 %v12124_v25  ;;  %v8715_v45 = vsel %vm1665_vm0, %v1466_v55, %v1793_v12 }
 0x1a6   : > { %2580 = vmatmul.bf16.gmra.mxu3 %v12125_v49  ;;  %v8719_v26 = vsel %vm1666_vm15, %v1555_v38, %v1794_v53  ;;  %v8731_v55 = vsel %vm1668_vm1, %v1380_v10, %v1796_v62 }
 0x1a8   : > { %v1468_v11 = vpop.f32.mrf.mxu2 }
 0x1a9   : > { %v1557_v46 = vpop.f32.mrf.mxu3  ;;  %v1381_v63 = vpop.f32.mrf.mxu1  ;;  %v1469_v19 = vadd.f32 %v1468_v11, %v8351_v33 }
 0x1aa   : > { %v1382_v18 = vadd.f32 %v1381_v63, %v8323_v36  ;;  %v1558_v58 = vadd.f32 %v1557_v46, %v8354_v60  ;;  %v12126_v46 = vpack.c.bf16 %v8304_v51, %v8302_v50 }
 0x1ab   : > { %v1797_v53 = vmul.f32 0.2, %v1469_v19  ;;  %vm1669_vm3 = vcmp.gt.f32.partialorder %v1469_v19, 0.0 }
 0x1ac   : > { %vm1672_vm2 = vcmp.gt.f32.partialorder %v1382_v18, 0.0  ;;  %v1800_v32 = vmul.f32 0.2, %v1382_v18  ;;  %v1798_v49 = vmul.f32 0.2, %v1558_v58  ;;  %vm1670_vm4 = vcmp.gt.f32.partialorder %v1558_v58, 0.0 }
 0x1ae   : > { %v8733_v38 = vsel %vm1672_vm2, %v1382_v18, %v1800_v32  ;;  %v12127_v18 = vpack.c.bf16 %v8472_v59, %v8470_v15  ;;  %v8745_v32 = vsel %vm1669_vm3, %v1469_v19, %v1797_v53  ;;  %v8755_v51 = vsel %vm1670_vm4, %v1558_v58, %v1798_v49 }
 0x1b0   : > { %v1470_v48 = vpop.f32.mrf.mxu2  ;;  %2373 = vmatmul.bf16.gmra.mxu0 %v12126_v46 }
 0x1b1   : > { %v1559_v25 = vpop.f32.mrf.mxu3  ;;  %v1471_v11 = vadd.f32 %v1470_v48, %v8351_v33  ;;  %v1384_v30 = vpop.f32.mrf.mxu1  ;;  %v12128_v48 = vpack.c.bf16 %v8492_v22, %v8483_v24 }
 0x1b2   : > { %v1560_v63 = vadd.f32 %v1559_v25, %v8354_v60  ;;  %v12129_v25 = vpack.c.bf16 %v8496_v37, %v8494_v27  ;;  %v1385_v12 = vadd.f32 %v1384_v30, %v8323_v36  ;;  %v8764_v24 = vpop.f32.mrf.mxu0 }
 0x1b3   : > { %vm1673_vm5 = vcmp.gt.f32.partialorder %v1471_v11, 0.0  ;;  %v1801_v10 = vmul.f32 0.2, %v1471_v11 }
 0x1b4   : > { %vm1674_vm6 = vcmp.gt.f32.partialorder %v1560_v63, 0.0  ;;  %v1802_v62 = vmul.f32 0.2, %v1560_v63  ;;  %2407 = vmatmul.bf16.gmra.mxu1 %v12127_v18  ;;  %v1804_v37 = vmul.f32 0.2, %v1385_v12  ;;  %vm1676_vm7 = vcmp.gt.f32.partialorder %v1385_v12, 0.0 }
 0x1b5   : > { %2496 = vmatmul.bf16.gmra.mxu2 %v12128_v48  ;;  %v8753_v50 = vsel %vm1673_vm5, %v1471_v11, %v1801_v10  ;;  %v12135_v10 = vld [vmem:[#allocation19_spill] sm:$0xff] }
 0x1b6   : > { %2585 = vmatmul.bf16.gmra.mxu3 %v12129_v25  ;;  %v8757_v46 = vsel %vm1674_vm6, %v1560_v63, %v1802_v62  ;;  %v8769_v11 = vsel %vm1676_vm7, %v1385_v12, %v1804_v37  ;;  %v12131_v12 = vpack.c.bf16 %v8343_v5, %v8341_v7 }
 0x1b8   : > { %v1473_v22 = vpop.f32.mrf.mxu2 }
 0x1b9   : > { %v1562_v19 = vpop.f32.mrf.mxu3  ;;  %v1386_v27 = vpop.f32.mrf.mxu1  ;;  %v1474_v58 = vadd.f32 %v1473_v22, %v8351_v33 }
 0x1ba   : > { %v1387_v53 = vadd.f32 %v1386_v27, %v8323_v36  ;;  %v1563_v30 = vadd.f32 %v1562_v19, %v8354_v60  ;;  %v8775_v25 = vpop.f32.mrf.mxu0 }
 0x1bb   : > { %v1805_v62 = vmul.f32 0.2, %v1474_v58  ;;  %12130 = vst [vmem:[#allocation28_spill] sm:$0xff] %v8775_v25  ;;  %vm1677_vm9 = vcmp.gt.f32.partialorder %v1474_v58, 0.0 }
 0x1bc   : > { %vm1680_vm8 = vcmp.gt.f32.partialorder %v1387_v53, 0.0  ;;  %v1808_v49 = vmul.f32 0.2, %v1387_v53  ;;  %v1806_v27 = vmul.f32 0.2, %v1563_v30  ;;  %vm1678_vm10 = vcmp.gt.f32.partialorder %v1563_v30, 0.0 }
 0x1be   : > { %v8771_v63 = vsel %vm1680_vm8, %v1387_v53, %v1808_v49  ;;  %v12132_v53 = vpack.c.bf16 %v8514_v17, %v8512_v20  ;;  %v8785_v49 = vsel %vm1677_vm9, %v1474_v58, %v1805_v62  ;;  %v8795_v5 = vsel %vm1678_vm10, %v1563_v30, %v1806_v27 }
 0x1bf   : > { %v12142_v20 = vpack.c.bf16 %v8564_v34, %v8558_v35 }
 0x1c0   : > { %v1475_v18 = vpop.f32.mrf.mxu2  ;;  %2378 = vmatmul.bf16.gmra.mxu0 %v12131_v12 }
 0x1c1   : > { %v1564_v48 = vpop.f32.mrf.mxu3  ;;  %v1476_v22 = vadd.f32 %v1475_v18, %v8351_v33  ;;  %v1389_v15 = vpop.f32.mrf.mxu1  ;;  %v12133_v18 = vpack.c.bf16 %v8531_v42, %v8525_v28 }
 0x1c2   : > { %v1565_v59 = vadd.f32 %v1564_v48, %v8354_v60  ;;  %v12134_v48 = vld [vmem:[#allocation20_spill] sm:$0xff]  ;;  %v1390_v25 = vadd.f32 %v1389_v15, %v8323_v36 }
 0x1c3   : > { %vm1681_vm11 = vcmp.gt.f32.partialorder %v1476_v22, 0.0  ;;  %v1809_v19 = vmul.f32 0.2, %v1476_v22  ;;  %v12136_v44 = vpack.c.bf16 %v12134_v48, %v12135_v10  ;;  %12137 = vst [vmem:[#allocation20_spill] sm:$0xff] %v8795_v5 }
 0x1c4   : > { %vm1682_vm12 = vcmp.gt.f32.partialorder %v1565_v59, 0.0  ;;  %v1810_v37 = vmul.f32 0.2, %v1565_v59  ;;  %2412 = vmatmul.bf16.gmra.mxu1 %v12132_v53  ;;  %v1812_v62 = vmul.f32 0.2, %v1390_v25  ;;  %vm1684_vm13 = vcmp.gt.f32.partialorder %v1390_v25, 0.0 }
 0x1c5   : > { %2501 = vmatmul.bf16.gmra.mxu2 %v12133_v18  ;;  %v8793_v7 = vsel %vm1681_vm11, %v1476_v22, %v1809_v19  ;;  %v8820_v22 = vpop.f32.mrf.mxu0 }
 0x1c6   : > { %2590 = vmatmul.bf16.gmra.mxu3 %v12136_v44  ;;  %v8797_v12 = vsel %vm1682_vm12, %v1565_v59, %v1810_v37  ;;  %v8807_v15 = vsel %vm1684_vm13, %v1390_v25, %v1812_v62  ;;  %v12140_v62 = vld [vmem:[#allocation21_spill] sm:$0xff] }
 0x1c7   : > { %12138 = vst [vmem:[#allocation19_spill] sm:$0xff] %v8807_v15 }
 0x1c8   : > { %v1478_v28 = vpop.f32.mrf.mxu2 }
 0x1c9   : > { %v1567_v42 = vpop.f32.mrf.mxu3  ;;  %v1391_v58 = vpop.f32.mrf.mxu1  ;;  %v1479_v30 = vadd.f32 %v1478_v28, %v8351_v33 }
 0x1ca   : > { %v1392_v44 = vadd.f32 %v1391_v58, %v8323_v36  ;;  %v1568_v10 = vadd.f32 %v1567_v42, %v8354_v60 }
 0x1cb   : > { %v1813_v19 = vmul.f32 0.2, %v1479_v30  ;;  %vm1685_vm0 = vcmp.gt.f32.partialorder %v1479_v30, 0.0 }
 0x1cc   : > { %vm1688_vm14 = vcmp.gt.f32.partialorder %v1392_v44, 0.0  ;;  %v1816_v59 = vmul.f32 0.2, %v1392_v44  ;;  %v1814_v18 = vmul.f32 0.2, %v1568_v10  ;;  %vm1686_vm15 = vcmp.gt.f32.partialorder %v1568_v10, 0.0 }
 0x1ce   : > { %v8809_v27 = vsel %vm1688_vm14, %v1392_v44, %v1816_v59  ;;  %v12141_v44 = vpack.c.bf16 %v8547_v41, %v12140_v62  ;;  %v8818_v59 = vsel %vm1685_vm0, %v1479_v30, %v1813_v19 }
 0x1cf   : > { %12139 = vst [vmem:[#allocation29_spill] sm:$0xff] %v8809_v27  ;;  %v8830_v27 = vsel %vm1686_vm15, %v1568_v10, %v1814_v18 }
 0x1d0   : > { %v1480_v37 = vpop.f32.mrf.mxu2  ;;  %12146 = vst [vmem:[#allocation21_spill] sm:$0xff] %v8830_v27 }
 0x1d1   : > { %v1569_v53 = vpop.f32.mrf.mxu3  ;;  %v1481_v48 = vadd.f32 %v1480_v37, %v8351_v33  ;;  %v1394_v58 = vpop.f32.mrf.mxu1  ;;  %v12143_v37 = vld [vmem:[#allocation23_spill] sm:$0xff] }
 0x1d2   : > { %v1570_v28 = vadd.f32 %v1569_v53, %v8354_v60  ;;  %v12144_v53 = vld [vmem:[#allocation22_spill] sm:$0xff]  ;;  %v1395_v41 = vadd.f32 %v1394_v58, %v8323_v36  ;;  %v7343_v58 = vld [vmem:[#allocation6 + $0x30] sm:$0xff] }
 0x1d3   : > { %vm1689_vm1 = vcmp.gt.f32.partialorder %v1481_v48, 0.0  ;;  %v1817_v42 = vmul.f32 0.2, %v1481_v48  ;;  %v12145_v17 = vpack.c.bf16 %v12143_v37, %v12144_v53 }
 0x1d4   : > { %vm1690_vm2 = vcmp.gt.f32.partialorder %v1570_v28, 0.0  ;;  %v1818_v25 = vmul.f32 0.2, %v1570_v28  ;;  %2417 = vmatmul.bf16.gmra.mxu1 %v12141_v44  ;;  %v1820_v62 = vmul.f32 0.2, %v1395_v41  ;;  %vm1692_vm3 = vcmp.gt.f32.partialorder %v1395_v41, 0.0  ;;  %v8846_v44 = vpop.f32.mrf.mxu0 }
 0x1d5   : > { %2506 = vmatmul.bf16.gmra.mxu2 %v12142_v20  ;;  %v8828_v15 = vsel %vm1689_vm1, %v1481_v48, %v1817_v42  ;;  %v7344_v48 = vld [vmem:[#allocation6 + $0x38] sm:$0xff]  ;;  %12150 = vst [vmem:[#allocation31_spill] sm:$0xff] %v8846_v44 }
 0x1d6   : > { %2595 = vmatmul.bf16.gmra.mxu3 %v12145_v17  ;;  %v8832_v5 = vsel %vm1690_vm2, %v1570_v28, %v1818_v25  ;;  %3117 = vmatpush.bf16.msra.mxu0 %v7344_v48  ;;  %v8842_v42 = vsel %vm1692_vm3, %v1395_v41, %v1820_v62  ;;  %v7342_v41 = vld [vmem:[#allocation6 + $0x28] sm:$0xff] }
 0x1d7   : > { %12147 = vst [vmem:[#allocation23_spill] sm:$0xff] %v8832_v5 }
 0x1d8   : > { %v1483_v35 = vpop.f32.mrf.mxu2  ;;  %12148 = vst [vmem:[#allocation22_spill] sm:$0xff] %v8842_v42 }
 0x1d9   : > { %v1572_v34 = vpop.f32.mrf.mxu3  ;;  %v1396_v20 = vpop.f32.mrf.mxu1  ;;  %v1484_v10 = vadd.f32 %v1483_v35, %v8351_v33 }
 0x1da   : > { %v1397_v17 = vadd.f32 %v1396_v20, %v8323_v36  ;;  %v1573_v28 = vadd.f32 %v1572_v34, %v8354_v60  ;;  %3118 = vmatpush.bf16.msra.mxu0 %v7343_v58  ;;  %v12153_v58 = vpack.c.bf16 %v8597_v52, %v8591_v47  ;;  %v7352_v47 = vld [vmem:[#allocation8 + $0x38] sm:$0xff] }
 0x1db   : > { %v1821_v53 = vmul.f32 0.2, %v1484_v10  ;;  %vm1693_vm5 = vcmp.gt.f32.partialorder %v1484_v10, 0.0  ;;  %3423 = vmatpush.bf16.msrb.mxu2 %v7352_v47  ;;  %v12161_v47 = vpack.c.bf16 %v8641_v13, %v8639_v4 }
 0x1dc   : > { %vm1696_vm4 = vcmp.gt.f32.partialorder %v1397_v17, 0.0  ;;  %v1824_v18 = vmul.f32 0.2, %v1397_v17  ;;  %v1822_v35 = vmul.f32 0.2, %v1573_v28  ;;  %vm1694_vm6 = vcmp.gt.f32.partialorder %v1573_v28, 0.0 }
 0x1dd   : > { %v8855_v42 = vsel %vm1693_vm5, %v1484_v10, %v1821_v53 }
 0x1de   : > { %v8844_v25 = vsel %vm1696_vm4, %v1397_v17, %v1824_v18  ;;  %v12151_v18 = vld [vmem:[#allocation24_spill] sm:$0xff]  ;;  %3119 = vmatpush.bf16.msra.mxu0 %v7342_v41  ;;  %v8865_v27 = vsel %vm1694_vm6, %v1573_v28, %v1822_v35  ;;  %v8874_v41 = vpop.f32.mrf.mxu0  ;;  %v7340_v35 = vld [vmem:[#allocation6 + $0x18] sm:$0xff] }
 0x1df   : > { %12149 = vst [vmem:[#allocation30_spill] sm:$0xff] %v8844_v25  ;;  %v12152_v37 = vpack.c.bf16 %v8580_v21, %v12151_v18 }
 0x1e0   : > { %v1485_v20 = vpop.f32.mrf.mxu2 }
 0x1e1   : > { %v1574_v19 = vpop.f32.mrf.mxu3  ;;  %v1486_v48 = vadd.f32 %v1485_v20, %v8351_v33  ;;  %v1399_v30 = vpop.f32.mrf.mxu1  ;;  %v12154_v20 = vld [vmem:[#allocation26_spill] sm:$0xff] }
 0x1e2   : > { %v1575_v34 = vadd.f32 %v1574_v19, %v8354_v60  ;;  %v12155_v19 = vld [vmem:[#allocation25_spill] sm:$0xff]  ;;  %v1400_v21 = vadd.f32 %v1399_v30, %v8323_v36 }
 0x1e3   : > { %vm1697_vm7 = vcmp.gt.f32.partialorder %v1486_v48, 0.0  ;;  %v1825_v62 = vmul.f32 0.2, %v1486_v48  ;;  %v12156_v25 = vpack.c.bf16 %v12154_v20, %v12155_v19 }
 0x1e4   : > { %vm1698_vm8 = vcmp.gt.f32.partialorder %v1575_v34, 0.0  ;;  %v1826_v17 = vmul.f32 0.2, %v1575_v34  ;;  %2422 = vmatmul.bf16.gmra.mxu1 %v12152_v37  ;;  %v7341_v37 = vld [vmem:[#allocation6 + $0x20] sm:$0xff]  ;;  %vm1700_vm9 = vcmp.gt.f32.partialorder %v1400_v21, 0.0 }
 0x1e5   : > { %2511 = vmatmul.bf16.gmra.mxu2 %v12153_v58  ;;  %v8863_v44 = vsel %vm1697_vm7, %v1486_v48, %v1825_v62  ;;  %3120 = vmatpush.bf16.msra.mxu0 %v7341_v37  ;;  %v1828_v48 = vmul.f32 0.2, %v1400_v21 }
 0x1e6   : > { %2600 = vmatmul.bf16.gmra.mxu3 %v12156_v25  ;;  %v8867_v5 = vsel %vm1698_vm8, %v1575_v34, %v1826_v17  ;;  %v7339_v17 = vld [vmem:[#allocation6 + $0x10] sm:$0xff] }
 0x1e7   : > { %v8879_v18 = vsel %vm1700_vm9, %v1400_v21, %v1828_v48 }
 0x1e8   : > { %v1488_v52 = vpop.f32.mrf.mxu2  ;;  %12157 = vst [vmem:[#allocation24_spill] sm:$0xff] %v8879_v18 }
 0x1e9   : > { %v1577_v53 = vpop.f32.mrf.mxu3  ;;  %v1401_v25 = vpop.f32.mrf.mxu1  ;;  %v1489_v30 = vadd.f32 %v1488_v52, %v8351_v33  ;;  %3121 = vmatpush.bf16.msra.mxu0 %v7340_v35  ;;  %v7336_v52 = vld [vmem:[%s11972_s6 + $0x38] sm:$0xff] }
 0x1ea   : > { %v1402_v28 = vadd.f32 %v1401_v25, %v8323_v36  ;;  %v1578_v62 = vadd.f32 %v1577_v53, %v8354_v60  ;;  %3254 = vmatpush.bf16.msrb.mxu1 %v7336_v52 }
 0x1eb   : > { %v1829_v19 = vmul.f32 0.2, %v1489_v30  ;;  %vm1701_vm11 = vcmp.gt.f32.partialorder %v1489_v30, 0.0 }
 0x1ec   : > { %vm1704_vm10 = vcmp.gt.f32.partialorder %v1402_v28, 0.0  ;;  %v1832_v34 = vmul.f32 0.2, %v1402_v28  ;;  %v1830_v35 = vmul.f32 0.2, %v1578_v62  ;;  %vm1702_vm12 = vcmp.gt.f32.partialorder %v1578_v62, 0.0 }
 0x1ed   : > { %3122 = vmatpush.bf16.msra.mxu0 %v7339_v17  ;;  %v12159_v17 = vpack.c.bf16 %v8615_v3, %v8613_v23  ;;  %v7337_v3 = vld [vmem:[#allocation6] sm:$0xff] }
 0x1ee   : > { %v8881_v58 = vsel %vm1704_vm10, %v1402_v28, %v1832_v34  ;;  %v7338_v28 = vld [vmem:[#allocation6 + $0x8] sm:$0xff]  ;;  %v8890_v34 = vpop.f32.mrf.mxu0  ;;  %v8906_v18 = vsel %vm1702_vm12, %v1578_v62, %v1830_v35 }
 0x1ef   : > { %12158 = vst [vmem:[#allocation26_spill] sm:$0xff] %v8881_v58 }
 0x1f0   : > { %v1490_v37 = vpop.f32.mrf.mxu2 }
 0x1f1   : > { %v1579_v25 = vpop.f32.mrf.mxu3  ;;  %v1491_v53 = vadd.f32 %v1490_v37, %v8351_v33  ;;  %v1404_v48 = vpop.f32.mrf.mxu1  ;;  %3123 = vmatpush.bf16.msra.mxu0 %v7338_v28  ;;  %v8896_v37 = vsel %vm1701_vm11, %v1489_v30, %v1829_v19  ;;  %v12163_v28 = vpack.c.bf16 %v8653_v16, %v8651_v40  ;;  %v7347_v40 = vld [vmem:[#allocation8 + $0x10] sm:$0xff] }
 0x1f2   : > { %v1580_v21 = vadd.f32 %v1579_v25, %v8354_v60  ;;  %v12160_v25 = vpack.c.bf16 %v8637_v6, %v8627_v56  ;;  %v1405_v23 = vadd.f32 %v1404_v48, %v8323_v36 }
 0x1f3   : > { %vm1705_vm13 = vcmp.gt.f32.partialorder %v1491_v53, 0.0  ;;  %v1833_v20 = vmul.f32 0.2, %v1491_v53 }
 0x1f4   : > { %vm1706_vm14 = vcmp.gt.f32.partialorder %v1580_v21, 0.0  ;;  %v1834_v10 = vmul.f32 0.2, %v1580_v21  ;;  %2427 = vmatmul.bf16.gmra.mxu1 %v12159_v17  ;;  %v1836_v13 = vmul.f32 0.2, %v1405_v23  ;;  %vm1708_vm0 = vcmp.gt.f32.partialorder %v1405_v23, 0.0 }
 0x1f5   : > { %2516 = vmatmul.bf16.gmra.mxu2 %v12160_v25  ;;  %v8904_v52 = vsel %vm1705_vm13, %v1491_v53, %v1833_v20  ;;  %3124 = vmatpush.bf16.msra.mxu0 %v7337_v3 }
 0x1f6   : > { %2605 = vmatmul.bf16.gmra.mxu3 %v12161_v47  ;;  %v8908_v58 = vsel %vm1706_vm14, %v1580_v21, %v1834_v10  ;;  %v8917_v35 = vpop.f32.mrf.mxu0  ;;  %v8920_v21 = vsel %vm1708_vm0, %v1405_v23, %v1836_v13  ;;  %v8931_v23 = vld [vmem:[%s11971_s5] ss:$0 sm:$0xff] }
 0x1f8   : > { %v1493_v6 = vpop.f32.mrf.mxu2 }
 0x1f9   : > { %v1582_v19 = vpop.f32.mrf.mxu3  ;;  %v1406_v4 = vpop.f32.mrf.mxu1  ;;  %v1494_v10 = vadd.f32 %v1493_v6, %v8351_v33 }
 0x1fa   : > { %v1407_v20 = vadd.f32 %v1406_v4, %v8323_v36  ;;  %v1583_v53 = vadd.f32 %v1582_v19, %v8354_v60 }
 0x1fb   : > { %v1837_v17 = vmul.f32 0.2, %v1494_v10  ;;  %vm1709_vm1 = vcmp.gt.f32.partialorder %v1494_v10, 0.0 }
 0x1fc   : > { %vm1712_vm15 = vcmp.gt.f32.partialorder %v1407_v20, 0.0  ;;  %v1840_v62 = vmul.f32 0.2, %v1407_v20  ;;  %v1838_v36 = vmul.f32 0.2, %v1583_v53  ;;  %vm1710_vm2 = vcmp.gt.f32.partialorder %v1583_v53, 0.0 }
 0x1fe   : > { %v8922_v48 = vsel %vm1712_vm15, %v1407_v20, %v1840_v62  ;;  %v12162_v20 = vld [vmem:[#allocation27_spill] sm:$0xff]  ;;  %v8948_v56 = vsel %vm1710_vm2, %v1583_v53, %v1838_v36 }
 0x1ff   : > { %v2305_v62 = vadd.f32 %v8931_v23, %v12162_v20  ;;  %v7335_v20 = vld [vmem:[%s11972_s6 + $0x30] sm:$0xff] }
 0x200   : > { %v1495_v25 = vpop.f32.mrf.mxu2  ;;  %3255 = vmatpush.bf16.msrb.mxu1 %v7335_v20 }
 0x201   : > { %v1584_v47 = vpop.f32.mrf.mxu3  ;;  %v1496_v3 = vadd.f32 %v1495_v25, %v8351_v33  ;;  %v2393_v4 = vpop.f32.mrf.mxu1  ;;  %v8938_v33 = vsel %vm1709_vm1, %v1494_v10, %v1837_v17  ;;  %v12165_v25 = vpack.c.bf16 %v8679_v31, %v8677_v2  ;;  %v2307_v31 = vadd.f32 %v8931_v23, %v8629_v9 }
 0x202   : > { %v1585_v6 = vadd.f32 %v1584_v47, %v8354_v60  ;;  %v12164_v60 = vpack.c.bf16 %v8675_v1, %v8667_v54  ;;  %v8956_v10 = vpop.f32.mrf.mxu0  ;;  %v2394_v54 = vadd.f32 %v2393_v4, %v2305_v62 }
 0x203   : > { %vm1713_vm3 = vcmp.gt.f32.partialorder %v1496_v3, 0.0  ;;  %v1841_v19 = vmul.f32 0.2, %v1496_v3 }
 0x204   : > { %vm1714_vm4 = vcmp.gt.f32.partialorder %v1585_v6, 0.0  ;;  %v1842_v13 = vmul.f32 0.2, %v1585_v6  ;;  %2432 = vmatmul.bf16.gmra.mxu1 %v12163_v28 }
 0x205   : > { %2521 = vmatmul.bf16.gmra.mxu2 %v12164_v60  ;;  %v8946_v47 = vsel %vm1713_vm3, %v1496_v3, %v1841_v19  ;;  %v12004_v3 = vlaneseq }
 0x206   : > { %2610 = vmatmul.bf16.gmra.mxu3 %v12165_v25  ;;  %v8950_v30 = vsel %vm1714_vm4, %v1585_v6, %v1842_v13  ;;  %v7351_v13 = vld [vmem:[#allocation8 + $0x30] sm:$0xff] }
 0x207   : > { %3424 = vmatpush.bf16.msrb.mxu2 %v7351_v13  ;;  %v8966_v9 = vshrl.u32 %v12004_v3, 7 }
 0x208   : > { %v2482_v1 = vpop.f32.mrf.mxu2 }
 0x209   : > { %v2571_v28 = vpop.f32.mrf.mxu3  ;;  %v2483_v17 = vadd.f32 %v2482_v1, %v2394_v54  ;;  %v2395_v2 = vpop.f32.mrf.mxu1  ;;  %v12166_v1 = vpack.c.bf16 %v8693_v14, %v8691_v43  ;;  %vm2811_vm7 = vcmp.lt.s32.totalorder %v8966_v9, 1  ;;  %vm2940_vm9 = vcmp.lt.s32.totalorder %v8966_v9, 7 }
 0x20a   : > { %v2396_v36 = vadd.f32 %v2395_v2, %v2307_v31  ;;  %v8963_v60 = vpop.f32.mrf.mxu0  ;;  %v12167_v31 = vpack.c.bf16 %v8715_v45, %v8707_v29 }
 0x20b   : > { %v2572_v53 = vadd.f32 %v2571_v28, %v2483_v17  ;;  %v2310_v28 = vadd.f32 %v8931_v23, %v8655_v61 }
 0x20d   : > { %v2683_v4 = vmul.f32 0.2, %v2572_v53  ;;  %vm2651_vm5 = vcmp.gt.f32.partialorder %v2572_v53, 0.0 }
 0x20f   : > { %v8973_v17 = vsel %vm2651_vm5, %v2572_v53, %v2683_v4 }
 0x210   : > { %v2484_v6 = vpop.f32.mrf.mxu2  ;;  %v12006_v14 = vrot.slane %v8973_v17, 7 }
 0x211   : > { %v2573_v19 = vpop.f32.mrf.mxu3  ;;  %v2485_v62 = vadd.f32 %v2484_v6, %v2396_v36  ;;  %v2398_v25 = vpop.f32.mrf.mxu1  ;;  %v12168_v36 = vpack.c.bf16 %v8719_v26, %v8717_v39  ;;  %v2312_v26 = vadd.f32 %v8931_v23, %v8686_v8 }
 0x212   : > { %v2399_v43 = vadd.f32 %v2398_v25, %v2310_v28  ;;  %v8990_v45 = vpop.f32.mrf.mxu0  ;;  %v12005_v28 = vrot.slane %v8973_v17, 1 }
 0x213   : > { %v2574_v54 = vadd.f32 %v2573_v19, %v2485_v62 }
 0x214   : > { %2437 = vmatmul.bf16.gmra.mxu1 %v12166_v1 }
 0x215   : > { %vm2652_vm6 = vcmp.gt.f32.partialorder %v2574_v54, 0.0  ;;  %v2684_v2 = vmul.f32 0.2, %v2574_v54  ;;  %2526 = vmatmul.bf16.gmra.mxu2 %v12167_v31 }
 0x216   : > { %2615 = vmatmul.bf16.gmra.mxu3 %v12168_v36 }
 0x217   : > { %v2716_v6 = vsel %vm2652_vm6, %v2574_v54, %v2684_v2 }
 0x218   : > { %v2780_v19 = vrot.slane %v2716_v6, 7  ;;  %v3037_v61 = vpack.c.bf16 %v2716_v6, %v8973_v17  ;;  %v2487_v53 = vpop.f32.mrf.mxu2  ;;  %v2909_v25 = vrot.slane %v2716_v6, 1 }
 0x219   : > { %v2576_v13 = vpop.f32.mrf.mxu3  ;;  %v2488_v20 = vadd.f32 %v2487_v53, %v2399_v43  ;;  %v2400_v4 = vpop.f32.mrf.mxu1 }
 0x21a   : > { %v8988_v29 = vsel %vm2811_vm7, %v12006_v14, %v2780_v19  ;;  %3125 = vmatmul.bf16.vlgmr.msra.gmra.mxu0 %v3037_v61  ;;  %v2401_v1 = vadd.f32 %v2400_v4, %v2312_v26  ;;  %v9004_v8 = vsel %vm2940_vm9, %v12005_v28, %v2909_v25  ;;  %v2315_v26 = vadd.f32 %v8931_v23, %v8702_v0 }
 0x21b   : > { %v2577_v39 = vadd.f32 %v2576_v13, %v2488_v20 }
 0x21d   : > { %vm2653_vm8 = vcmp.gt.f32.partialorder %v2577_v39, 0.0  ;;  %v2685_v62 = vmul.f32 0.2, %v2577_v39 }
 0x21f   : > { %v2717_v54 = vsel %vm2653_vm8, %v2577_v39, %v2685_v62  ;;  %v12169_v39 = vpack.c.bf16 %v8733_v38, %v8731_v55  ;;  %v9017_v62 = vpop.f32.mrf.mxu0 }
 0x220   : > { %v2781_v2 = vrot.slane %v2717_v54, 7  ;;  %v2910_v31 = vrot.slane %v2717_v54, 1  ;;  %v2489_v36 = vpop.f32.mrf.mxu2 }
 0x221   : > { %v2578_v43 = vpop.f32.mrf.mxu3  ;;  %v2490_v61 = vadd.f32 %v2489_v36, %v2401_v1  ;;  %v2403_v53 = vpop.f32.mrf.mxu1  ;;  %v12170_v1 = vpack.c.bf16 %v8753_v50, %v8745_v32 }
 0x222   : > { %v8998_v13 = vsel %vm2940_vm9, %v2909_v25, %v2910_v31  ;;  %v9008_v6 = vsel %vm2811_vm7, %v2780_v19, %v2781_v2  ;;  %v12171_v19 = vpack.c.bf16 %v8757_v46, %v8755_v51  ;;  %v2404_v36 = vadd.f32 %v2403_v53, %v2315_v26  ;;  %v7350_v53 = vld [vmem:[#allocation8 + $0x28] sm:$0xff] }
 0x223   : > { %v2579_v20 = vadd.f32 %v2578_v43, %v2490_v61  ;;  %v2317_v46 = vadd.f32 %v8931_v23, %v8728_v57  ;;  %3425 = vmatpush.bf16.msrb.mxu2 %v7350_v53 }
 0x224   : > { %2442 = vmatmul.bf16.gmra.mxu1 %v12169_v39 }
 0x225   : > { %vm2654_vm10 = vcmp.gt.f32.partialorder %v2579_v20, 0.0  ;;  %v2686_v25 = vmul.f32 0.2, %v2579_v20  ;;  %2531 = vmatmul.bf16.gmra.mxu2 %v12170_v1 }
 0x226   : > { %2620 = vmatmul.bf16.gmra.mxu3 %v12171_v19 }
 0x227   : > { %v2718_v43 = vsel %vm2654_vm10, %v2579_v20, %v2686_v25 }
 0x228   : > { %v2492_v61 = vpop.f32.mrf.mxu2  ;;  %v2782_v38 = vrot.slane %v2718_v43, 7  ;;  %v2911_v39 = vrot.slane %v2718_v43, 1  ;;  %v3038_v3 = vpack.c.bf16 %v2718_v43, %v2717_v54 }
 0x229   : > { %v2581_v55 = vpop.f32.mrf.mxu3  ;;  %v2493_v0 = vadd.f32 %v2492_v61, %v2404_v36  ;;  %v2405_v28 = vpop.f32.mrf.mxu1 }
 0x22a   : > { %3130 = vmatmul.bf16.gmra.mxu0 %v3038_v3  ;;  %v9027_v14 = vsel %vm2940_vm9, %v2910_v31, %v2911_v39  ;;  %v9031_v32 = vsel %vm2811_vm7, %v2781_v2, %v2782_v38  ;;  %v7334_v3 = vld [vmem:[%s11972_s6 + $0x28] sm:$0xff]  ;;  %v9040_v31 = vpop.f32.mrf.mxu0  ;;  %v2406_v26 = vadd.f32 %v2405_v28, %v2317_v46 }
 0x22b   : > { %v2582_v50 = vadd.f32 %v2581_v55, %v2493_v0  ;;  %3256 = vmatpush.bf16.msrb.mxu1 %v7334_v3  ;;  %v12172_v0 = vpack.c.bf16 %v8771_v63, %v8769_v11 }
 0x22d   : > { %vm2655_vm11 = vcmp.gt.f32.partialorder %v2582_v50, 0.0  ;;  %v2687_v54 = vmul.f32 0.2, %v2582_v50 }
 0x22f   : > { %v2719_v20 = vsel %vm2655_vm11, %v2582_v50, %v2687_v54  ;;  %v2320_v50 = vadd.f32 %v8931_v23, %v8764_v24 }
 0x230   : > { %v2783_v2 = vrot.slane %v2719_v20, 7  ;;  %v2912_v25 = vrot.slane %v2719_v20, 1  ;;  %v2494_v1 = vpop.f32.mrf.mxu2 }
 0x231   : > { %v2583_v19 = vpop.f32.mrf.mxu3  ;;  %v2495_v36 = vadd.f32 %v2494_v1, %v2406_v26  ;;  %v2408_v43 = vpop.f32.mrf.mxu1 }
 0x232   : > { %v9044_v57 = vsel %vm2940_vm9, %v2911_v39, %v2912_v25  ;;  %v9048_v61 = vsel %vm2811_vm7, %v2782_v38, %v2783_v2  ;;  %v12173_v39 = vpack.c.bf16 %v8793_v7, %v8785_v49  ;;  %v12174_v38 = vld [vmem:[#allocation20_spill] sm:$0xff]  ;;  %v2409_v53 = vadd.f32 %v2408_v43, %v2320_v50 }
 0x233   : > { %v2584_v55 = vadd.f32 %v2583_v19, %v2495_v36  ;;  %v12175_v54 = vpack.c.bf16 %v8797_v12, %v12174_v38  ;;  %v9063_v36 = vpop.f32.mrf.mxu0 }
 0x234   : > { %2447 = vmatmul.bf16.gmra.mxu1 %v12172_v0 }
 0x235   : > { %vm2656_vm12 = vcmp.gt.f32.partialorder %v2584_v55, 0.0  ;;  %v2688_v46 = vmul.f32 0.2, %v2584_v55  ;;  %2536 = vmatmul.bf16.gmra.mxu2 %v12173_v39 }
 0x236   : > { %2625 = vmatmul.bf16.gmra.mxu3 %v12175_v54 }
 0x237   : > { %v2720_v3 = vsel %vm2656_vm12, %v2584_v55, %v2688_v46  ;;  %v12176_v55 = vld [vmem:[#allocation28_spill] sm:$0xff] }
 0x238   : > { %v2497_v26 = vpop.f32.mrf.mxu2  ;;  %v2784_v19 = vrot.slane %v2720_v3, 7  ;;  %v2913_v11 = vrot.slane %v2720_v3, 1  ;;  %v3039_v63 = vpack.c.bf16 %v2720_v3, %v2719_v20  ;;  %v2322_v20 = vadd.f32 %v8931_v23, %v12176_v55  ;;  %v12178_v55 = vld [vmem:[#allocation19_spill] sm:$0xff] }
 0x239   : > { %v2586_v1 = vpop.f32.mrf.mxu3  ;;  %v2498_v24 = vadd.f32 %v2497_v26, %v2409_v53  ;;  %v2410_v0 = vpop.f32.mrf.mxu1 }
 0x23a   : > { %3135 = vmatmul.bf16.gmra.mxu0 %v3039_v63  ;;  %v9067_v49 = vsel %vm2940_vm9, %v2912_v25, %v2913_v11  ;;  %v9071_v7 = vsel %vm2811_vm7, %v2783_v2, %v2784_v19  ;;  %v2411_v39 = vadd.f32 %v2410_v0, %v2322_v20 }
 0x23b   : > { %v2587_v12 = vadd.f32 %v2586_v1, %v2498_v24  ;;  %v9085_v63 = vpop.f32.mrf.mxu0 }
 0x23d   : > { %vm2657_vm13 = vcmp.gt.f32.partialorder %v2587_v12, 0.0  ;;  %v2689_v50 = vmul.f32 0.2, %v2587_v12 }
 0x23f   : > { %v2721_v46 = vsel %vm2657_vm13, %v2587_v12, %v2689_v50  ;;  %v12177_v12 = vld [vmem:[#allocation29_spill] sm:$0xff]  ;;  %v2325_v50 = vadd.f32 %v8931_v23, %v8820_v22 }
 0x240   : > { %v2785_v38 = vrot.slane %v2721_v46, 7  ;;  %v2914_v54 = vrot.slane %v2721_v46, 1  ;;  %v2499_v53 = vpop.f32.mrf.mxu2  ;;  %v12179_v20 = vpack.c.bf16 %v12177_v12, %v12178_v55 }
 0x241   : > { %v2588_v25 = vpop.f32.mrf.mxu3  ;;  %v2500_v3 = vadd.f32 %v2499_v53, %v2411_v39  ;;  %v2413_v26 = vpop.f32.mrf.mxu1  ;;  %v12180_v39 = vpack.c.bf16 %v8828_v15, %v8818_v59  ;;  %v12182_v53 = vld [vmem:[#allocation21_spill] sm:$0xff] }
 0x242   : > { %v9079_v2 = vsel %vm2940_vm9, %v2913_v11, %v2914_v54  ;;  %v9083_v1 = vsel %vm2811_vm7, %v2784_v19, %v2785_v38  ;;  %v12181_v19 = vld [vmem:[#allocation23_spill] sm:$0xff] }
 0x243   : > { %v2589_v24 = vadd.f32 %v2588_v25, %v2500_v3  ;;  %v12183_v43 = vpack.c.bf16 %v12181_v19, %v12182_v53  ;;  %v2414_v25 = vadd.f32 %v2413_v26, %v2325_v50  ;;  %v12184_v26 = vld [vmem:[#allocation31_spill] sm:$0xff]  ;;  %v9112_v50 = vpop.f32.mrf.mxu0 }
 0x244   : > { %2452 = vmatmul.bf16.gmra.mxu1 %v12179_v20 }
 0x245   : > { %vm2658_vm14 = vcmp.gt.f32.partialorder %v2589_v24, 0.0  ;;  %v2690_v11 = vmul.f32 0.2, %v2589_v24  ;;  %2541 = vmatmul.bf16.gmra.mxu2 %v12180_v39 }
 0x246   : > { %2630 = vmatmul.bf16.gmra.mxu3 %v12183_v43 }
 0x247   : > { %v2722_v3 = vsel %vm2658_vm14, %v2589_v24, %v2690_v11  ;;  %v2327_v24 = vadd.f32 %v8931_v23, %v12184_v26 }
 0x248   : > { %v2502_v51 = vpop.f32.mrf.mxu2  ;;  %v2786_v28 = vrot.slane %v2722_v3, 7  ;;  %v2915_v12 = vrot.slane %v2722_v3, 1  ;;  %v3040_v55 = vpack.c.bf16 %v2722_v3, %v2721_v46  ;;  %v7349_v46 = vld [vmem:[#allocation8 + $0x20] sm:$0xff] }
 0x249   : > { %v2591_v0 = vpop.f32.mrf.mxu3  ;;  %v2503_v20 = vadd.f32 %v2502_v51, %v2414_v25  ;;  %v2415_v4 = vpop.f32.mrf.mxu1  ;;  %3426 = vmatpush.bf16.msrb.mxu2 %v7349_v46  ;;  %v2330_v46 = vadd.f32 %v8931_v23, %v8874_v41 }
 0x24a   : > { %3140 = vmatmul.bf16.gmra.mxu0 %v3040_v55  ;;  %v9102_v22 = vsel %vm2940_vm9, %v2914_v54, %v2915_v12  ;;  %v9106_v15 = vsel %vm2811_vm7, %v2785_v38, %v2786_v28  ;;  %v7333_v54 = vld [vmem:[%s11972_s6 + $0x20] sm:$0xff]  ;;  %v2416_v11 = vadd.f32 %v2415_v4, %v2327_v24 }
 0x24b   : > { %v2592_v59 = vadd.f32 %v2591_v0, %v2503_v20  ;;  %3257 = vmatpush.bf16.msrb.mxu1 %v7333_v54  ;;  %v12186_v24 = vld [vmem:[#allocation22_spill] sm:$0xff] }
 0x24d   : > { %vm2659_vm0 = vcmp.gt.f32.partialorder %v2592_v59, 0.0  ;;  %v2691_v51 = vmul.f32 0.2, %v2592_v59 }
 0x24f   : > { %v2723_v39 = vsel %vm2659_vm0, %v2592_v59, %v2691_v51  ;;  %v12185_v59 = vld [vmem:[#allocation30_spill] sm:$0xff] }
 0x250   : > { %v2504_v38 = vpop.f32.mrf.mxu2  ;;  %v2787_v19 = vrot.slane %v2723_v39, 7  ;;  %v2916_v53 = vrot.slane %v2723_v39, 1  ;;  %v12187_v51 = vpack.c.bf16 %v12185_v59, %v12186_v24 }
 0x251   : > { %v2593_v0 = vpop.f32.mrf.mxu3  ;;  %v2505_v25 = vadd.f32 %v2504_v38, %v2416_v11  ;;  %v2418_v3 = vpop.f32.mrf.mxu1  ;;  %v7348_v11 = vld [vmem:[#allocation8 + $0x18] sm:$0xff] }
 0x252   : > { %v9119_v55 = vsel %vm2940_vm9, %v2915_v12, %v2916_v53  ;;  %v9123_v20 = vsel %vm2811_vm7, %v2786_v28, %v2787_v19  ;;  %v12188_v12 = vpack.c.bf16 %v8863_v44, %v8855_v42  ;;  %v12189_v28 = vpack.c.bf16 %v8867_v5, %v8865_v27  ;;  %v9138_v38 = vpop.f32.mrf.mxu0  ;;  %3427 = vmatpush.bf16.msrb.mxu2 %v7348_v11  ;;  %v7345_v11 = vld [vmem:[#allocation8] sm:$0xff] }
 0x253   : > { %v2594_v26 = vadd.f32 %v2593_v0, %v2505_v25  ;;  %v2419_v0 = vadd.f32 %v2418_v3, %v2330_v46 }
 0x254   : > { %2457 = vmatmul.bf16.gmra.mxu1 %v12187_v51 }
 0x255   : > { %vm2660_vm15 = vcmp.gt.f32.partialorder %v2594_v26, 0.0  ;;  %v2692_v54 = vmul.f32 0.2, %v2594_v26  ;;  %2546 = vmatmul.bf16.gmra.mxu2 %v12188_v12 }
 0x256   : > { %2635 = vmatmul.bf16.gmra.mxu3 %v12189_v28  ;;  %3428 = vmatpush.bf16.msrb.mxu2 %v7347_v40 }
 0x257   : > { %v2724_v25 = vsel %vm2660_vm15, %v2594_v26, %v2692_v54  ;;  %v7346_v26 = vld [vmem:[#allocation8 + $0x8] sm:$0xff] }
 0x258   : > { %v2507_v59 = vpop.f32.mrf.mxu2  ;;  %v2788_v51 = vrot.slane %v2724_v25, 7  ;;  %v2917_v41 = vrot.slane %v2724_v25, 1  ;;  %v3041_v43 = vpack.c.bf16 %v2724_v25, %v2723_v39  ;;  %v2332_v39 = vadd.f32 %v8931_v23, %v8890_v34 }
 0x259   : > { %v2596_v24 = vpop.f32.mrf.mxu3  ;;  %v2508_v4 = vadd.f32 %v2507_v59, %v2419_v0  ;;  %v2420_v16 = vpop.f32.mrf.mxu1  ;;  %v12190_v59 = vld [vmem:[#allocation26_spill] sm:$0xff] }
 0x25a   : > { %3145 = vmatmul.bf16.gmra.mxu0 %v3041_v43  ;;  %v9142_v42 = vsel %vm2940_vm9, %v2916_v53, %v2917_v41  ;;  %v9146_v5 = vsel %vm2811_vm7, %v2787_v19, %v2788_v51  ;;  %v2421_v43 = vadd.f32 %v2420_v16, %v2332_v39  ;;  %3429 = vmatpush.bf16.msrb.mxu2 %v7346_v26  ;;  %v9152_v19 = vpop.f32.mrf.mxu0 }
 0x25b   : > { %v2597_v27 = vadd.f32 %v2596_v24, %v2508_v4  ;;  %v12191_v24 = vld [vmem:[#allocation24_spill] sm:$0xff]  ;;  %v2335_v39 = vadd.f32 %v8931_v23, %v8917_v35 }
 0x25d   : > { %vm2661_vm1 = vcmp.gt.f32.partialorder %v2597_v27, 0.0  ;;  %v2693_v3 = vmul.f32 0.2, %v2597_v27 }
 0x25e   : > { %3430 = vmatpush.bf16.msrb.mxu2 %v7345_v11 }
 0x25f   : > { %v2725_v46 = vsel %vm2661_vm1, %v2597_v27, %v2693_v3  ;;  %v12192_v27 = vpack.c.bf16 %v12190_v59, %v12191_v24 }
 0x260   : > { %v2509_v53 = vpop.f32.mrf.mxu2  ;;  %v2789_v12 = vrot.slane %v2725_v46, 7  ;;  %v2918_v28 = vrot.slane %v2725_v46, 1 }
 0x261   : > { %v2598_v54 = vpop.f32.mrf.mxu3  ;;  %v2510_v4 = vadd.f32 %v2509_v53, %v2421_v43  ;;  %v2423_v40 = vpop.f32.mrf.mxu1 }
 0x262   : > { %v9156_v0 = vsel %vm2940_vm9, %v2917_v41, %v2918_v28  ;;  %v9160_v34 = vsel %vm2811_vm7, %v2788_v51, %v2789_v12  ;;  %v12193_v41 = vpack.c.bf16 %v8904_v52, %v8896_v37  ;;  %v12194_v51 = vpack.c.bf16 %v8908_v58, %v8906_v18  ;;  %v9183_v18 = vpop.f32.mrf.mxu0 }
 0x263   : > { %v2599_v16 = vadd.f32 %v2598_v54, %v2510_v4  ;;  %v2424_v26 = vadd.f32 %v2423_v40, %v2335_v39 }
 0x264   : > { %2462 = vmatmul.bf16.gmra.mxu1 %v12192_v27 }
 0x265   : > { %vm2662_vm2 = vcmp.gt.f32.partialorder %v2599_v16, 0.0  ;;  %v2694_v3 = vmul.f32 0.2, %v2599_v16  ;;  %2551 = vmatmul.bf16.gmra.mxu2 %v12193_v41 }
 0x266   : > { %2640 = vmatmul.bf16.gmra.mxu3 %v12194_v51 }
 0x267   : > { %v2726_v43 = vsel %vm2662_vm2, %v2599_v16, %v2694_v3 }
 0x268   : > { %v2512_v53 = vpop.f32.mrf.mxu2  ;;  %v2790_v4 = vrot.slane %v2726_v43, 7  ;;  %v2919_v11 = vrot.slane %v2726_v43, 1  ;;  %v3042_v59 = vpack.c.bf16 %v2726_v43, %v2725_v46  ;;  %v2337_v46 = vadd.f32 %v8931_v23, %v8956_v10 }
 0x269   : > { %v2601_v54 = vpop.f32.mrf.mxu3  ;;  %v2513_v24 = vadd.f32 %v2512_v53, %v2424_v26  ;;  %v2425_v27 = vpop.f32.mrf.mxu1 }
 0x26a   : > { %3150 = vmatmul.bf16.gmra.mxu0 %v3042_v59  ;;  %v9177_v35 = vsel %vm2940_vm9, %v2918_v28, %v2919_v11  ;;  %v9181_v37 = vsel %vm2811_vm7, %v2789_v12, %v2790_v4  ;;  %v7332_v28 = vld [vmem:[%s11972_s6 + $0x18] sm:$0xff]  ;;  %v2426_v16 = vadd.f32 %v2425_v27, %v2337_v46  ;;  %v2340_v27 = vadd.f32 %v8931_v23, %v8963_v60 }
 0x26b   : > { %v2602_v58 = vadd.f32 %v2601_v54, %v2513_v24  ;;  %3258 = vmatpush.bf16.msrb.mxu1 %v7332_v28  ;;  %v12195_v24 = vpack.c.bf16 %v8922_v48, %v8920_v21  ;;  %v12196_v46 = vpack.c.bf16 %v8946_v47, %v8938_v33  ;;  %v3595_v21 = vld [vmem:[%s11976_s10 + $0x78] sm:$0xff] }
 0x26c   : > { %3596 = vmatpush.msrb.mxu3 %v3595_v21 }
 0x26d   : > { %vm2663_vm3 = vcmp.gt.f32.partialorder %v2602_v58, 0.0  ;;  %v2695_v40 = vmul.f32 0.2, %v2602_v58 }
 0x26f   : > { %v2727_v39 = vsel %vm2663_vm3, %v2602_v58, %v2695_v40  ;;  %v9207_v58 = vpop.f32.mrf.mxu0 }
 0x270   : > { %v2514_v12 = vpop.f32.mrf.mxu2  ;;  %v2791_v41 = vrot.slane %v2727_v39, 7  ;;  %v2920_v51 = vrot.slane %v2727_v39, 1 }
 0x271   : > { %v2603_v3 = vpop.f32.mrf.mxu3  ;;  %v2515_v26 = vadd.f32 %v2514_v12, %v2426_v16  ;;  %v2428_v43 = vpop.f32.mrf.mxu1 }
 0x272   : > { %v9194_v53 = vsel %vm2940_vm9, %v2919_v11, %v2920_v51  ;;  %v9198_v10 = vsel %vm2811_vm7, %v2790_v4, %v2791_v41  ;;  %v12197_v4 = vpack.c.bf16 %v8950_v30, %v8948_v56  ;;  %v2429_v48 = vadd.f32 %v2428_v43, %v2340_v27 }
 0x273   : > { %v2604_v54 = vadd.f32 %v2603_v3, %v2515_v26  ;;  %v2342_v43 = vadd.f32 %v8931_v23, %v8990_v45 }
 0x274   : > { %2467 = vmatmul.bf16.gmra.mxu1 %v12195_v24 }
 0x275   : > { %vm2664_vm4 = vcmp.gt.f32.partialorder %v2604_v54, 0.0  ;;  %v2696_v11 = vmul.f32 0.2, %v2604_v54  ;;  %2556 = vmatmul.bf16.gmra.mxu2 %v12196_v46 }
 0x276   : > { %2645 = vmatmul.bf16.gmra.mxu3 %v12197_v4 }
 0x277   : > { %v2728_v40 = vsel %vm2664_vm4, %v2604_v54, %v2696_v11  ;;  %v9230_v54 = vpop.f32.mrf.mxu0 }
 0x278   : > { %v2517_v60 = vpop.f32.mrf.mxu2  ;;  %v2792_v16 = vrot.slane %v2728_v40, 7  ;;  %v2921_v12 = vrot.slane %v2728_v40, 1  ;;  %v3043_v3 = vpack.c.bf16 %v2728_v40, %v2727_v39 }
 0x279   : > { %v2606_v28 = vpop.f32.mrf.mxu3  ;;  %v2518_v26 = vadd.f32 %v2517_v60, %v2429_v48  ;;  %v2430_v24 = vpop.f32.mrf.mxu1 }
 0x27a   : > { %3155 = vmatmul.bf16.gmra.mxu0 %v3043_v3  ;;  %v9220_v33 = vsel %vm2940_vm9, %v2920_v51, %v2921_v12  ;;  %v9224_v30 = vsel %vm2811_vm7, %v2791_v41, %v2792_v16  ;;  %v2431_v27 = vadd.f32 %v2430_v24, %v2342_v43  ;;  %v2345_v3 = vadd.f32 %v8931_v23, %v9017_v62 }
 0x27b   : > { %v2607_v56 = vadd.f32 %v2606_v28, %v2518_v26  ;;  %v12198_v24 = vpack.c.bf16 %v8998_v13, %v9004_v8 }
 0x27d   : > { %vm2665_vm5 = vcmp.gt.f32.partialorder %v2607_v56, 0.0  ;;  %v2697_v39 = vmul.f32 0.2, %v2607_v56 }
 0x27f   : > { %v2729_v11 = vsel %vm2665_vm5, %v2607_v56, %v2697_v39 }
 0x280   : > { %v2519_v46 = vpop.f32.mrf.mxu2  ;;  %v2793_v4 = vrot.slane %v2729_v11, 7  ;;  %v2922_v21 = vrot.slane %v2729_v11, 1 }
 0x281   : > { %v2608_v51 = vpop.f32.mrf.mxu3  ;;  %v2520_v48 = vadd.f32 %v2519_v46, %v2431_v27  ;;  %v2433_v41 = vpop.f32.mrf.mxu1 }
 0x282   : > { %v9234_v40 = vsel %vm2940_vm9, %v2921_v12, %v2922_v21  ;;  %v9238_v60 = vsel %vm2811_vm7, %v2792_v16, %v2793_v4  ;;  %v3594_v12 = vld [vmem:[%s11976_s10 + $0x70] sm:$0xff]  ;;  %v2434_v16 = vadd.f32 %v2433_v41, %v2345_v3 }
 0x283   : > { %v2609_v45 = vadd.f32 %v2608_v51, %v2520_v48  ;;  %3597 = vmatpush.msrb.mxu3 %v3594_v12  ;;  %v9250_v48 = vpop.f32.mrf.mxu0 }
 0x285   : > { %vm2666_vm6 = vcmp.gt.f32.partialorder %v2609_v45, 0.0  ;;  %v2698_v26 = vmul.f32 0.2, %v2609_v45  ;;  %3431 = vmatmul.bf16.vlgmr.msrb.gmra.mxu2 %v12198_v24 }
 0x287   : > { %v2730_v56 = vsel %vm2666_vm6, %v2609_v45, %v2698_v26  ;;  %v7331_v26 = vld [vmem:[%s11972_s6 + $0x10] sm:$0xff] }
 0x288   : > { %v2522_v43 = vpop.f32.mrf.mxu2  ;;  %v2794_v27 = vrot.slane %v2730_v56, 7  ;;  %v2923_v46 = vrot.slane %v2730_v56, 1  ;;  %v3044_v51 = vpack.c.bf16 %v2730_v56, %v2729_v11  ;;  %v2347_v11 = vadd.f32 %v8931_v23, %v9040_v31  ;;  %3259 = vmatpush.bf16.msrb.mxu1 %v7331_v26 }
 0x289   : > { %v2611_v39 = vpop.f32.mrf.mxu3  ;;  %v2523_v62 = vadd.f32 %v2522_v43, %v2434_v16  ;;  %v2435_v47 = vpop.f32.mrf.mxu1 }
 0x28a   : > { %3160 = vmatmul.bf16.gmra.mxu0 %v3044_v51  ;;  %v9254_v13 = vsel %vm2940_vm9, %v2922_v21, %v2923_v46  ;;  %v9258_v8 = vsel %vm2811_vm7, %v2793_v4, %v2794_v27  ;;  %v2436_v24 = vadd.f32 %v2435_v47, %v2347_v11 }
 0x28b   : > { %v2612_v41 = vadd.f32 %v2611_v39, %v2523_v62  ;;  %v9275_v62 = vpop.f32.mrf.mxu0 }
 0x28d   : > { %vm2667_vm8 = vcmp.gt.f32.partialorder %v2612_v41, 0.0  ;;  %v2699_v3 = vmul.f32 0.2, %v2612_v41 }
 0x28f   : > { %v2731_v21 = vsel %vm2667_vm8, %v2612_v41, %v2699_v3  ;;  %v2350_v41 = vadd.f32 %v8931_v23, %v9063_v36  ;;  %v12199_v3 = vpack.c.bf16 %v9044_v57, %v9027_v14 }
 0x290   : > { %v2524_v12 = vpop.f32.mrf.mxu2  ;;  %v2795_v4 = vrot.slane %v2731_v21, 7  ;;  %v2924_v56 = vrot.slane %v2731_v21, 1 }
 0x291   : > { %v2613_v16 = vpop.f32.mrf.mxu3  ;;  %v2525_v43 = vadd.f32 %v2524_v12, %v2436_v24  ;;  %v2438_v39 = vpop.f32.mrf.mxu1 }
 0x292   : > { %v9269_v51 = vsel %vm2940_vm9, %v2923_v46, %v2924_v56  ;;  %v9273_v31 = vsel %vm2811_vm7, %v2794_v27, %v2795_v4  ;;  %v3593_v27 = vld [vmem:[%s11976_s10 + $0x68] sm:$0xff]  ;;  %v2439_v46 = vadd.f32 %v2438_v39, %v2350_v41  ;;  %v2352_v39 = vadd.f32 %v8931_v23, %v9085_v63 }
 0x293   : > { %v2614_v45 = vadd.f32 %v2613_v16, %v2525_v43  ;;  %3598 = vmatpush.msrb.mxu3 %v3593_v27  ;;  %v9299_v41 = vpop.f32.mrf.mxu0 }
 0x295   : > { %vm2668_vm10 = vcmp.gt.f32.partialorder %v2614_v45, 0.0  ;;  %v2700_v11 = vmul.f32 0.2, %v2614_v45  ;;  %3436 = vmatmul.bf16.gmra.mxu2 %v12199_v3 }
 0x297   : > { %v2732_v26 = vsel %vm2668_vm10, %v2614_v45, %v2700_v11 }
 0x298   : > { %v2527_v24 = vpop.f32.mrf.mxu2  ;;  %v2796_v16 = vrot.slane %v2732_v26, 7  ;;  %v2925_v43 = vrot.slane %v2732_v26, 1  ;;  %v3045_v52 = vpack.c.bf16 %v2732_v26, %v2731_v21 }
 0x299   : > { %v2616_v12 = vpop.f32.mrf.mxu3  ;;  %v2528_v44 = vadd.f32 %v2527_v24, %v2439_v46  ;;  %v2440_v36 = vpop.f32.mrf.mxu1 }
 0x29a   : > { %3165 = vmatmul.bf16.gmra.mxu0 %v3045_v52  ;;  %v9289_v47 = vsel %vm2940_vm9, %v2924_v56, %v2925_v43  ;;  %v9293_v14 = vsel %vm2811_vm7, %v2795_v4, %v2796_v16  ;;  %v2441_v52 = vadd.f32 %v2440_v36, %v2352_v39  ;;  %v2355_v36 = vadd.f32 %v8931_v23, %v9112_v50 }
 0x29b   : > { %v2617_v57 = vadd.f32 %v2616_v12, %v2528_v44  ;;  %v12200_v39 = vpack.c.bf16 %v9079_v2, %v9067_v49 }
 0x29d   : > { %vm2669_vm11 = vcmp.gt.f32.partialorder %v2617_v57, 0.0  ;;  %v2701_v21 = vmul.f32 0.2, %v2617_v57 }
 0x29f   : > { %v2733_v11 = vsel %vm2669_vm11, %v2617_v57, %v2701_v21 }
 0x2a0   : > { %v2529_v3 = vpop.f32.mrf.mxu2  ;;  %v2797_v27 = vrot.slane %v2733_v11, 7  ;;  %v2926_v46 = vrot.slane %v2733_v11, 1 }
 0x2a1   : > { %v2618_v56 = vpop.f32.mrf.mxu3  ;;  %v2530_v26 = vadd.f32 %v2529_v3, %v2441_v52  ;;  %v2443_v4 = vpop.f32.mrf.mxu1 }
 0x2a2   : > { %v9303_v44 = vsel %vm2940_vm9, %v2925_v43, %v2926_v46  ;;  %v9307_v24 = vsel %vm2811_vm7, %v2796_v16, %v2797_v27  ;;  %v3592_v43 = vld [vmem:[%s11976_s10 + $0x60] sm:$0xff]  ;;  %v9319_v16 = vpop.f32.mrf.mxu0  ;;  %v2444_v21 = vadd.f32 %v2443_v4, %v2355_v36  ;;  %v7330_v36 = vld [vmem:[%s11972_s6 + $0x8] sm:$0xff] }
 0x2a3   : > { %v2619_v63 = vadd.f32 %v2618_v56, %v2530_v26  ;;  %3599 = vmatpush.msrb.mxu3 %v3592_v43  ;;  %3260 = vmatpush.bf16.msrb.mxu1 %v7330_v36 }
 0x2a5   : > { %vm2670_vm12 = vcmp.gt.f32.partialorder %v2619_v63, 0.0  ;;  %v2702_v57 = vmul.f32 0.2, %v2619_v63  ;;  %3441 = vmatmul.bf16.gmra.mxu2 %v12200_v39 }
 0x2a7   : > { %v2734_v52 = vsel %vm2670_vm12, %v2619_v63, %v2702_v57  ;;  %v2357_v63 = vadd.f32 %v8931_v23, %v9138_v38  ;;  %vm7826_vm12 = vmmov 1  }
 0x2a8   : > { %v2532_v3 = vpop.f32.mrf.mxu2  ;;  %v2798_v26 = vrot.slane %v2734_v52, 7  ;;  %v2927_v45 = vrot.slane %v2734_v52, 1  ;;  %v3046_v50 = vpack.c.bf16 %v2734_v52, %v2733_v11 }
 0x2a9   : > { %v2621_v56 = vpop.f32.mrf.mxu3  ;;  %v2533_v12 = vadd.f32 %v2532_v3, %v2444_v21  ;;  %v2445_v28 = vpop.f32.mrf.mxu1 }
 0x2aa   : > { %3170 = vmatmul.bf16.gmra.mxu0 %v3046_v50  ;;  %v9323_v49 = vsel %vm2940_vm9, %v2926_v46, %v2927_v45  ;;  %v9327_v2 = vsel %vm2811_vm7, %v2797_v27, %v2798_v26  ;;  %v2446_v57 = vadd.f32 %v2445_v28, %v2357_v63 }
 0x2ab   : > { %v2622_v39 = vadd.f32 %v2621_v56, %v2533_v12  ;;  %v9336_v12 = vpop.f32.mrf.mxu0 }
 0x2ad   : > { %vm2671_vm13 = vcmp.gt.f32.partialorder %v2622_v39, 0.0  ;;  %v2703_v11 = vmul.f32 0.2, %v2622_v39 }
 0x2af   : > { %v2735_v46 = vsel %vm2671_vm13, %v2622_v39, %v2703_v11  ;;  %v2360_v39 = vadd.f32 %v8931_v23, %v9152_v19  ;;  %v12202_v11 = vpack.c.bf16 %v9119_v55, %v9102_v22 }
 0x2b0   : > { %v2534_v43 = vpop.f32.mrf.mxu2  ;;  %v2799_v27 = vrot.slane %v2735_v46, 7  ;;  %v2928_v52 = vrot.slane %v2735_v46, 1 }
 0x2b1   : > { %v2623_v21 = vpop.f32.mrf.mxu3  ;;  %v2535_v3 = vadd.f32 %v2534_v43, %v2446_v57  ;;  %v2448_v56 = vpop.f32.mrf.mxu1 }
 0x2b2   : > { %v9340_v38 = vsel %vm2940_vm9, %v2927_v45, %v2928_v52  ;;  %v9344_v50 = vsel %vm2811_vm7, %v2798_v26, %v2799_v27  ;;  %v3591_v45 = vld [vmem:[%s11976_s10 + $0x58] sm:$0xff]  ;;  %v2449_v26 = vadd.f32 %v2448_v56, %v2360_v39 }
 0x2b3   : > { %12201 = vst [vmem:[#allocation25_spill] sm:$0xff] %v9344_v50  ;;  %v2624_v4 = vadd.f32 %v2623_v21, %v2535_v3  ;;  %3600 = vmatpush.msrb.mxu3 %v3591_v45  ;;  %v9364_v55 = vpop.f32.mrf.mxu0 }
 0x2b5   : > { %vm2672_vm14 = vcmp.gt.f32.partialorder %v2624_v4, 0.0  ;;  %v2704_v63 = vmul.f32 0.2, %v2624_v4  ;;  %3446 = vmatmul.bf16.gmra.mxu2 %v12202_v11 }
 0x2b7   : > { %v2736_v36 = vsel %vm2672_vm14, %v2624_v4, %v2704_v63 }
 0x2b8   : > { %v2537_v57 = vpop.f32.mrf.mxu2  ;;  %v2800_v21 = vrot.slane %v2736_v36, 7  ;;  %v2929_v3 = vrot.slane %v2736_v36, 1  ;;  %v3047_v28 = vpack.c.bf16 %v2736_v36, %v2735_v46  ;;  %v2362_v46 = vadd.f32 %v8931_v23, %v9183_v18 }
 0x2b9   : > { %v2626_v43 = vpop.f32.mrf.mxu3  ;;  %v2538_v59 = vadd.f32 %v2537_v57, %v2449_v26  ;;  %v2450_v19 = vpop.f32.mrf.mxu1 }
 0x2ba   : > { %3175 = vmatmul.bf16.gmra.mxu0 %v3047_v28  ;;  %v9358_v25 = vsel %vm2940_vm9, %v2928_v52, %v2929_v3  ;;  %v9362_v22 = vsel %vm2811_vm7, %v2799_v27, %v2800_v21  ;;  %v2451_v28 = vadd.f32 %v2450_v19, %v2362_v46 }
 0x2bb   : > { %12203 = vst [vmem:[#allocation27_spill] sm:$0xff] %v9362_v22  ;;  %v2627_v56 = vadd.f32 %v2626_v43, %v2538_v59  ;;  %v9378_v43 = vpop.f32.mrf.mxu0 }
 0x2bd   : > { %vm2673_vm0 = vcmp.gt.f32.partialorder %v2627_v56, 0.0  ;;  %v2705_v39 = vmul.f32 0.2, %v2627_v56 }
 0x2bf   : > { %v2737_v63 = vsel %vm2673_vm0, %v2627_v56, %v2705_v39  ;;  %v2365_v56 = vadd.f32 %v8931_v23, %v9207_v58  ;;  %v12205_v39 = vpack.c.bf16 %v9156_v0, %v9142_v42 }
 0x2c0   : > { %v2539_v11 = vpop.f32.mrf.mxu2  ;;  %v2801_v45 = vrot.slane %v2737_v63, 7  ;;  %v2930_v26 = vrot.slane %v2737_v63, 1 }
 0x2c1   : > { %v2628_v52 = vpop.f32.mrf.mxu3  ;;  %v2540_v36 = vadd.f32 %v2539_v11, %v2451_v28  ;;  %v2453_v27 = vpop.f32.mrf.mxu1 }
 0x2c2   : > { %v9372_v57 = vsel %vm2940_vm9, %v2929_v3, %v2930_v26  ;;  %v9376_v59 = vsel %vm2811_vm7, %v2800_v21, %v2801_v45  ;;  %v3590_v21 = vld [vmem:[%s11976_s10 + $0x50] sm:$0xff]  ;;  %v2454_v3 = vadd.f32 %v2453_v27, %v2365_v56 }
 0x2c3   : > { %12204 = vst [vmem:[#allocation20_spill] sm:$0xff] %v9376_v59  ;;  %v2629_v18 = vadd.f32 %v2628_v52, %v2540_v36  ;;  %3601 = vmatpush.msrb.mxu3 %v3590_v21  ;;  %v9402_v56 = vpop.f32.mrf.mxu0 }
 0x2c5   : > { %vm2674_vm15 = vcmp.gt.f32.partialorder %v2629_v18, 0.0  ;;  %v2706_v46 = vmul.f32 0.2, %v2629_v18  ;;  %3451 = vmatmul.bf16.gmra.mxu2 %v12205_v39 }
 0x2c7   : > { %v2738_v28 = vsel %vm2674_vm15, %v2629_v18, %v2706_v46  ;;  %v2367_v18 = vadd.f32 %v8931_v23, %v9230_v54 }
 0x2c8   : > { %v2542_v11 = vpop.f32.mrf.mxu2  ;;  %v2802_v36 = vrot.slane %v2738_v28, 7  ;;  %v2931_v4 = vrot.slane %v2738_v28, 1  ;;  %v3048_v19 = vpack.c.bf16 %v2738_v28, %v2737_v63 }
 0x2c9   : > { %v2631_v52 = vpop.f32.mrf.mxu3  ;;  %v2543_v50 = vadd.f32 %v2542_v11, %v2454_v3  ;;  %v2455_v58 = vpop.f32.mrf.mxu1 }
 0x2ca   : > { %3180 = vmatmul.bf16.gmra.mxu0 %v3048_v19  ;;  %v9392_v22 = vsel %vm2940_vm9, %v2930_v26, %v2931_v4  ;;  %v9396_v42 = vsel %vm2811_vm7, %v2801_v45, %v2802_v36  ;;  %v7329_v26 = vld [vmem:[%s11972_s6] sm:$0xff]  ;;  %v2456_v19 = vadd.f32 %v2455_v58, %v2367_v18 }
 0x2cb   : > { %v2632_v0 = vadd.f32 %v2631_v52, %v2543_v50  ;;  %3261 = vmatpush.bf16.msrb.mxu1 %v7329_v26 }
 0x2cd   : > { %vm2675_vm1 = vcmp.gt.f32.partialorder %v2632_v0, 0.0  ;;  %v2707_v63 = vmul.f32 0.2, %v2632_v0 }
 0x2cf   : > { %v2739_v46 = vsel %vm2675_vm1, %v2632_v0, %v2707_v63  ;;  %v2370_v0 = vadd.f32 %v8931_v23, %v9250_v48  ;;  %v12207_v63 = vpack.c.bf16 %v9194_v53, %v9177_v35 }
 0x2d0   : > { %v2544_v45 = vpop.f32.mrf.mxu2  ;;  %v2803_v50 = vrot.slane %v2739_v46, 7  ;;  %v2932_v21 = vrot.slane %v2739_v46, 1 }
 0x2d1   : > { %v2633_v39 = vpop.f32.mrf.mxu3  ;;  %v2545_v3 = vadd.f32 %v2544_v45, %v2456_v19  ;;  %v2458_v28 = vpop.f32.mrf.mxu1 }
 0x2d2   : > { %v9409_v54 = vsel %vm2940_vm9, %v2931_v4, %v2932_v21  ;;  %v9413_v11 = vsel %vm2811_vm7, %v2802_v36, %v2803_v50  ;;  %v3589_v4 = vld [vmem:[%s11976_s10 + $0x48] sm:$0xff]  ;;  %v9425_v36 = vpop.f32.mrf.mxu0  ;;  %v2459_v26 = vadd.f32 %v2458_v28, %v2370_v0 }
 0x2d3   : > { %12206 = vst [vmem:[#allocation28_spill] sm:$0xff] %v9413_v11  ;;  %v2634_v52 = vadd.f32 %v2633_v39, %v2545_v3  ;;  %3602 = vmatpush.msrb.mxu3 %v3589_v4 }
 0x2d5   : > { %vm2676_vm2 = vcmp.gt.f32.partialorder %v2634_v52, 0.0  ;;  %v2708_v18 = vmul.f32 0.2, %v2634_v52  ;;  %3456 = vmatmul.bf16.gmra.mxu2 %v12207_v63 }
 0x2d7   : > { %v2740_v19 = vsel %vm2676_vm2, %v2634_v52, %v2708_v18  ;;  %v9440_v52 = vld [vmem:[%s11971_s5] ss:$0 sm:$0xff] }
 0x2d8   : > { %v2547_v45 = vpop.f32.mrf.mxu2  ;;  %v2804_v3 = vrot.slane %v2740_v19, 7  ;;  %v2933_v27 = vrot.slane %v2740_v19, 1  ;;  %v3049_v23 = vpack.c.bf16 %v2740_v19, %v2739_v46  ;;  %v2372_v46 = vadd.f32 %v9440_v52, %v9275_v62 }
 0x2d9   : > { %v2636_v39 = vpop.f32.mrf.mxu3  ;;  %v2548_v48 = vadd.f32 %v2547_v45, %v2459_v26  ;;  %v2460_v58 = vpop.f32.mrf.mxu1 }
 0x2da   : > { %3185 = vmatmul.bf16.gmra.mxu0 %v3049_v23  ;;  %v9429_v35 = vsel %vm2940_vm9, %v2932_v21, %v2933_v27  ;;  %v9433_v53 = vsel %vm2811_vm7, %v2803_v50, %v2804_v3  ;;  %v2461_v21 = vadd.f32 %v2460_v58, %v2372_v46  ;;  %v9444_v23 = vpop.f32.mrf.mxu0 }
 0x2db   : > { %12208 = vst [vmem:[#allocation29_spill] sm:$0xff] %v9433_v53  ;;  %v2637_v63 = vadd.f32 %v2636_v39, %v2548_v48 }
 0x2dd   : > { %vm2677_vm3 = vcmp.gt.f32.partialorder %v2637_v63, 0.0  ;;  %v2709_v0 = vmul.f32 0.2, %v2637_v63 }
 0x2df   : > { %v2741_v18 = vsel %vm2677_vm3, %v2637_v63, %v2709_v0  ;;  %v2375_v63 = vadd.f32 %v9440_v52, %v9299_v41  ;;  %v12210_v0 = vpack.c.bf16 %v9234_v40, %v9220_v33 }
 0x2e0   : > { %v2549_v4 = vpop.f32.mrf.mxu2  ;;  %v2805_v50 = vrot.slane %v2741_v18, 7  ;;  %v2934_v19 = vrot.slane %v2741_v18, 1 }
 0x2e1   : > { %v2638_v26 = vpop.f32.mrf.mxu3  ;;  %v2550_v45 = vadd.f32 %v2549_v4, %v2461_v21  ;;  %v2463_v39 = vpop.f32.mrf.mxu1 }
 0x2e2   : > { %v9448_v48 = vsel %vm2940_vm9, %v2933_v27, %v2934_v19  ;;  %v9452_v28 = vsel %vm2811_vm7, %v2804_v3, %v2805_v50  ;;  %v3588_v27 = vld [vmem:[%s11976_s10 + $0x40] sm:$0xff]  ;;  %v2464_v3 = vadd.f32 %v2463_v39, %v2375_v63 }
 0x2e3   : > { %12209 = vst [vmem:[#allocation19_spill] sm:$0xff] %v9452_v28  ;;  %v2639_v62 = vadd.f32 %v2638_v26, %v2550_v45  ;;  %3603 = vmatpush.msrb.mxu3 %v3588_v27 }
 0x2e5   : > { %vm2678_vm4 = vcmp.gt.f32.partialorder %v2639_v62, 0.0  ;;  %v2710_v46 = vmul.f32 0.2, %v2639_v62  ;;  %3461 = vmatmul.bf16.gmra.mxu2 %v12210_v0 }
 0x2e7   : > { %v2742_v21 = vsel %vm2678_vm4, %v2639_v62, %v2710_v46  ;;  %v9474_v62 = vpop.f32.mrf.mxu0 }
 0x2e8   : > { %v2552_v4 = vpop.f32.mrf.mxu2  ;;  %v2806_v45 = vrot.slane %v2742_v21, 7  ;;  %v2935_v58 = vrot.slane %v2742_v21, 1  ;;  %v3050_v11 = vpack.c.bf16 %v2742_v21, %v2741_v18  ;;  %v2377_v18 = vadd.f32 %v9440_v52, %v9319_v16 }
 0x2e9   : > { %v2641_v26 = vpop.f32.mrf.mxu3  ;;  %v2553_v53 = vadd.f32 %v2552_v4, %v2464_v3  ;;  %v2465_v41 = vpop.f32.mrf.mxu1 }
 0x2ea   : > { %3190 = vmatmul.bf16.gmra.mxu0 %v3050_v11  ;;  %v9466_v59 = vsel %vm2940_vm9, %v2934_v19, %v2935_v58  ;;  %v9470_v33 = vsel %vm2811_vm7, %v2805_v50, %v2806_v45  ;;  %v2466_v11 = vadd.f32 %v2465_v41, %v2377_v18 }
 0x2eb   : > { %v2642_v40 = vadd.f32 %v2641_v26, %v2553_v53  ;;  %v3587_v53 = vld [vmem:[%s11976_s10 + $0x38] sm:$0xff] }
 0x2ec   : > { %3604 = vmatpush.msrb.mxu3 %v3587_v53 }
 0x2ed   : > { %vm2679_vm5 = vcmp.gt.f32.partialorder %v2642_v40, 0.0  ;;  %v2711_v63 = vmul.f32 0.2, %v2642_v40 }
 0x2ef   : > { %v2743_v46 = vsel %vm2679_vm5, %v2642_v40, %v2711_v63  ;;  %v2380_v40 = vadd.f32 %v9440_v52, %v9336_v12  ;;  %v12211_v63 = vpack.c.bf16 %v9269_v51, %v9254_v13 }
 0x2f0   : > { %v2554_v0 = vpop.f32.mrf.mxu2  ;;  %v2807_v27 = vrot.slane %v2743_v46, 7  ;;  %v2936_v3 = vrot.slane %v2743_v46, 1 }
 0x2f1   : > { %v2643_v19 = vpop.f32.mrf.mxu3  ;;  %v2555_v50 = vadd.f32 %v2554_v0, %v2466_v11  ;;  %v2468_v21 = vpop.f32.mrf.mxu1 }
 0x2f2   : > { %v9483_v4 = vsel %vm2940_vm9, %v2935_v58, %v2936_v3  ;;  %v9487_v16 = vsel %vm2811_vm7, %v2806_v45, %v2807_v27  ;;  %v9496_v11 = vpop.f32.mrf.mxu0  ;;  %v2469_v58 = vadd.f32 %v2468_v21, %v2380_v40 }
 0x2f3   : > { %v2644_v26 = vadd.f32 %v2643_v19, %v2555_v50 }
 0x2f5   : > { %vm2680_vm6 = vcmp.gt.f32.partialorder %v2644_v26, 0.0  ;;  %v2712_v18 = vmul.f32 0.2, %v2644_v26  ;;  %3466 = vmatmul.bf16.gmra.mxu2 %v12211_v63 }
 0x2f7   : > { %v2744_v0 = vsel %vm2680_vm6, %v2644_v26, %v2712_v18  ;;  %v2382_v26 = vadd.f32 %v9440_v52, %v9364_v55 }
 0x2f8   : > { %v2557_v53 = vpop.f32.mrf.mxu2  ;;  %v2808_v39 = vrot.slane %v2744_v0, 7  ;;  %v2937_v19 = vrot.slane %v2744_v0, 1  ;;  %v3051_v50 = vpack.c.bf16 %v2744_v0, %v2743_v46 }
 0x2f9   : > { %v2646_v45 = vpop.f32.mrf.mxu3  ;;  %v2558_v28 = vadd.f32 %v2557_v53, %v2469_v58  ;;  %v2470_v21 = vpop.f32.mrf.mxu1 }
 0x2fa   : > { %3195 = vmatmul.bf16.gmra.mxu0 %v3051_v50  ;;  %v9500_v12 = vsel %vm2940_vm9, %v2936_v3, %v2937_v19  ;;  %v9504_v41 = vsel %vm2811_vm7, %v2807_v27, %v2808_v39  ;;  %v2471_v40 = vadd.f32 %v2470_v21, %v2382_v26  ;;  %v9510_v63 = vpop.f32.mrf.mxu0  ;;  %v12014_v50 = vand.u32 255, %v8966_v9 }
 0x2fb   : > { %v2647_v13 = vadd.f32 %v2646_v45, %v2558_v28  ;;  %v3019_v51 = vpack.c.bf16 %v9504_v41, %v9487_v16  ;;  %v3586_v28 = vld [vmem:[%s11976_s10 + $0x30] sm:$0xff]  ;;  %v12212_v26 = vpack.c.bf16 %v9303_v44, %v9289_v47  ;;  %v12214_v44 = vrot.slane %v8973_v17, 1 }
 0x2fc   : > { %3605 = vmatpush.msrb.mxu3 %v3586_v28  ;;  %vm7417_vm11 = vcmp.ne.s32.totalorder %v12014_v50, 0  ;;  %v12213_v28 = vrot.slane %v8973_v17, 7  ;;  %v12215_v17 = vpack.c.bf16 %v9340_v38, %v9323_v49  ;;  %v3583_v49 = vld [vmem:[%s11976_s10 + $0x18] sm:$0xff]  ;;  %v12220_v38 = vpack.c.bf16 %v9106_v15, %v9083_v1  ;;  %v3581_v1 = vld [vmem:[%s11976_s10 + $0x8] sm:$0xff] }
 0x2fd   : > { %vm2681_vm8 = vcmp.gt.f32.partialorder %v2647_v13, 0.0  ;;  %v2713_v46 = vmul.f32 0.2, %v2647_v13  ;;  %vm6740_vm13 = vmpackc.low %vm7826_vm12, %vm7417_vm11  ;;  %v12223_v15 = vpack.c.bf16 %v9483_v4, %v9466_v59  ;;  %v12226_v59 = vpack.c.bf16 %v9224_v30, %v9198_v10 }
 0x2fe   : > { %v12228_v30 = vpack.c.bf16 %v9293_v14, %v9273_v31  ;;  %v12229_v14 = vpack.c.bf16 %v9327_v2, %v9307_v24 }
 0x2ff   : > { %v2745_v18 = vsel %vm2681_vm8, %v2647_v13, %v2713_v46 }
 0x300   : > { %v2559_v3 = vpop.f32.mrf.mxu2  ;;  %v2809_v58 = vrot.slane %v2745_v18, 7  ;;  %v2938_v0 = vrot.slane %v2745_v18, 1 }
 0x301   : > { %v2560_v27 = vadd.f32 %v2559_v3, %v2471_v40  ;;  %v2648_v53 = vpop.f32.mrf.mxu3 }
 0x302   : > { %v2942_v45 = vsel %vm2940_vm9, %v2937_v19, %v2938_v0  ;;  %v9519_v55 = vsel %vm2811_vm7, %v2808_v39, %v2809_v58  ;;  %v9528_v39 = vpop.f32.mrf.mxu0 }
 0x303   : > { %v2649_v52 = vadd.f32 %v2648_v53, %v2560_v27  ;;  %v3357_v13 = vpack.c.bf16 %v2942_v45, %v9500_v12 }
 0x305   : > { %vm2682_vm10 = vcmp.gt.f32.partialorder %v2649_v52, 0.0  ;;  %v2714_v21 = vmul.f32 0.2, %v2649_v52  ;;  %3471 = vmatmul.bf16.gmra.mxu2 %v12212_v26  ;;  %v12218_v26 = vpack.c.bf16 %v9071_v7, %v9048_v61  ;;  %v3582_v61 = vld [vmem:[%s11976_s10 + $0x10] sm:$0xff] }
 0x307   : > { %v2746_v46 = vsel %vm2682_vm10, %v2649_v52, %v2714_v21  ;;  %v12217_v21 = vpack.c.bf16 %v9372_v57, %v9358_v25  ;;  %v12221_v25 = vpack.c.bf16 %v9448_v48, %v9429_v35  ;;  %v3580_v35 = vld [vmem:[%s11976_s10] sm:$0xff] }
 0x308   : > { %v2810_v19 = vrot.slane %v2746_v46, 7  ;;  %v2939_v40 = vrot.slane %v2746_v46, 1  ;;  %v3052_v3 = vpack.c.bf16 %v2746_v46, %v2745_v18  ;;  %v3432_v46 = vpop.f32.mrf.mxu2 }
 0x30a   : > { %v2843_v12 = vsel %vm2811_vm7, %v2810_v19, %v12213_v28  ;;  %3200 = vmatmul.bf16.gmra.mxu0 %v3052_v3  ;;  %v2941_v47 = vsel %vm2940_vm9, %v2938_v0, %v2939_v40  ;;  %v2972_v27 = vsel %vm2940_vm9, %v2939_v40, %v12214_v44  ;;  %v9543_v18 = vsel %vm2811_vm7, %v2809_v58, %v2810_v19  ;;  %v3585_v0 = vld [vmem:[%s11976_s10 + $0x28] sm:$0xff]  ;;  %v9613_v3 = vld [vmem:[%s11975_s9] ss:$0 sm:$0xff] }
 0x30b   : > { %v6741_v53 = vpack.c.bf16 %v8988_v29, %v2843_v12  ;;  %v6777_v45 = vpack.c.bf16 %v2972_v27, %v2941_v47  ;;  %v3020_v52 = vpack.c.bf16 %v9543_v18, %v9519_v55  ;;  %3606 = vmatpush.msrb.mxu3 %v3585_v0  ;;  %v12216_v58 = vpack.c.bf16 %v9031_v32, %v9008_v6  ;;  %v3584_v29 = vld [vmem:[%s11976_s10 + $0x20] sm:$0xff]  ;;  %v3146_v27 = vpop.f32.mrf.mxu0 }
 0x30c   : > { %v12219_v6 = vpack.c.bf16 %v9409_v54, %v9392_v22  ;;  %v12222_v22 = vpack.c.bf16 %v9146_v5, %v9123_v20  ;;  %v12224_v19 = vpack.c.bf16 %v9181_v37, %v9160_v34  ;;  %v9597_v5 = vadd.s32 248, %v8966_v9 }
 0x30d   : > { %6742 = vmatmul.msk.bf16.vlgmr.msrb.gmra.mxu1 %vm6740_vm13, %v6741_v53  ;;  %3607 = vmatpush.msrb.mxu3 %v3584_v29  ;;  %v12227_v37 = vpack.c.bf16 %v9258_v8, %v9238_v60 }
 0x30e   : > { %12225 = vst [vmem:[#allocation23_spill] sm:$0xff] %v9597_v5  ;;  %v12013_v40 = vand.u32 255, %v9597_v5 }
 0x30f   : > { %3608 = vmatpush.msrb.mxu3 %v3583_v49 }
 0x310   : > { %v3434_v32 = vpop.f32.mrf.mxu2  ;;  %vm7418_vm7 = vcmp.ne.s32.totalorder %v12013_v40, 255 }
 0x311   : > { %3609 = vmatpush.msrb.mxu3 %v3582_v61  ;;  %vm6776_vm9 = vmpackc.low %vm7418_vm7, %vm7826_vm12 }
 0x313   : > { %3610 = vmatpush.msrb.mxu3 %v3581_v1 }
 0x315   : > { %3476 = vmatmul.bf16.gmra.mxu2 %v12215_v17  ;;  %3611 = vmatpush.msrb.mxu3 %v3580_v35 }
 0x318   : > { %v3437_v7 = vpop.f32.mrf.mxu2 }
 0x31d   : > { %3267 = vmatmul.bf16.gmra.mxu1 %v12216_v58  ;;  %v3148_v58 = vpop.f32.mrf.mxu0 }
 0x320   : > { %v3439_v57 = vpop.f32.mrf.mxu2 }
 0x325   : > { %3481 = vmatmul.bf16.gmra.mxu2 %v12217_v21 }
 0x328   : > { %v3442_v54 = vpop.f32.mrf.mxu2 }
 0x32d   : > { %3272 = vmatmul.bf16.gmra.mxu1 %v12218_v26  ;;  %v12230_v26 = vld [vmem:[#allocation27_spill] sm:$0xff] }
 0x330   : > { %v3444_v20 = vpop.f32.mrf.mxu2 }
 0x335   : > { %3486 = vmatmul.bf16.gmra.mxu2 %v12219_v6 }
 0x338   : > { %v3447_v48 = vpop.f32.mrf.mxu2 }
 0x33d   : > { %3277 = vmatmul.bf16.gmra.mxu1 %v12220_v38 }
 0x340   : > { %v3449_v34 = vpop.f32.mrf.mxu2 }
 0x345   : > { %3491 = vmatmul.bf16.gmra.mxu2 %v12221_v25 }
 0x348   : > { %v3452_v53 = vpop.f32.mrf.mxu2 }
 0x34d   : > { %3282 = vmatmul.bf16.gmra.mxu1 %v12222_v22 }
 0x355   : > { %3496 = vmatmul.bf16.gmra.mxu2 %v12223_v15 }
 0x35d   : > { %3287 = vmatmul.bf16.gmra.mxu1 %v12224_v19 }
 0x365   : > { %3501 = vmatmul.bf16.gmra.mxu2 %v3357_v13 }
 0x36d   : > { %3292 = vmatmul.bf16.gmra.mxu1 %v12226_v59 }
 0x375   : > { %6778 = vmatmul.msk.bf16.gmra.mxu2 %vm6776_vm9, %v6777_v45 }
 0x37d   : > { %3297 = vmatmul.bf16.gmra.mxu1 %v12227_v37 }
 0x38a   : > { %v3263_v4 = vpop.f32.mrf.mxu1 }
 0x38b   : > { %v3264_v13 = vadd.f32 %v3263_v4, %v9378_v43 }
 0x38d   : > { %v3512_v10 = vadd.f32 %v3432_v46, %v3264_v13  ;;  %3302 = vmatmul.bf16.gmra.mxu1 %v12228_v30  ;;  %v12231_v46 = vld [vmem:[#allocation25_spill] sm:$0xff]  ;;  %v12238_v30 = vld [vmem:[#allocation28_spill] sm:$0xff] }
 0x38e   : > { %v12232_v49 = vpack.c.bf16 %v12230_v26, %v12231_v46 }
 0x38f   : > { %v9619_v28 = vadd.f32 %v9613_v3, %v3512_v10  ;;  %v12237_v10 = vld [vmem:[#allocation29_spill] sm:$0xff] }
 0x391   : > { %3612 = vmatmul.f32.vlgmr.msrb.gmra.mxu3 %v9619_v28 }
 0x392   : > { %v3265_v60 = vpop.f32.mrf.mxu1 }
 0x393   : > { %v3266_v8 = vadd.f32 %v3265_v60, %v9402_v56  ;;  %v12239_v60 = vpack.c.bf16 %v12237_v10, %v12238_v30 }
 0x395   : > { %v3513_v12 = vadd.f32 %v3434_v32, %v3266_v8 }
 0x397   : > { %v9624_v43 = vadd.f32 %v9613_v3, %v3513_v12 }
 0x399   : > { %3615 = vmatmul.f32.gmra.mxu3 %v9624_v43 }
 0x39a   : > { %v3268_v47 = vpop.f32.mrf.mxu1 }
 0x39b   : > { %v3269_v44 = vadd.f32 %v3268_v47, %v9425_v36  ;;  %v3454_v36 = vpop.f32.mrf.mxu2 }
 0x39d   : > { %v3514_v31 = vadd.f32 %v3437_v7, %v3269_v44  ;;  %3307 = vmatmul.bf16.gmra.mxu1 %v12229_v14 }
 0x39f   : > { %v9632_v45 = vadd.f32 %v9613_v3, %v3514_v31 }
 0x3a1   : > { %3618 = vmatmul.f32.gmra.mxu3 %v9632_v45 }
 0x3a2   : > { %v3270_v56 = vpop.f32.mrf.mxu1 }
 0x3a3   : > { %v3271_v0 = vadd.f32 %v3270_v56, %v9444_v23  ;;  %v3151_v23 = vpop.f32.mrf.mxu0  ;;  %v3457_v32 = vpop.f32.mrf.mxu2 }
 0x3a5   : > { %v3515_v17 = vadd.f32 %v3439_v57, %v3271_v0 }
 0x3a7   : > { %v9637_v29 = vadd.f32 %v9613_v3, %v3515_v17  ;;  %v12242_v17 = vld [vmem:[#allocation19_spill] sm:$0xff] }
 0x3a9   : > { %3621 = vmatmul.f32.gmra.mxu3 %v9637_v29 }
 0x3aa   : > { %v3273_v21 = vpop.f32.mrf.mxu1 }
 0x3ab   : > { %v3274_v24 = vadd.f32 %v3273_v21, %v9474_v62  ;;  %v3153_v62 = vpop.f32.mrf.mxu0  ;;  %v3459_v1 = vpop.f32.mrf.mxu2  ;;  %v12243_v21 = vpack.c.bf16 %v9470_v33, %v12242_v17 }
 0x3ad   : > { %v3516_v2 = vadd.f32 %v3442_v54, %v3274_v24  ;;  %3312 = vmatmul.bf16.gmra.mxu1 %v12232_v49  ;;  %v12234_v54 = vld [vmem:[#allocation20_spill] sm:$0xff] }
 0x3ae   : > { %v12235_v19 = vpack.c.bf16 %v9396_v42, %v12234_v54 }
 0x3af   : > { %v9645_v6 = vadd.f32 %v9613_v3, %v3516_v2 }
 0x3b1   : > { %3624 = vmatmul.f32.gmra.mxu3 %v9645_v6 }
 0x3b2   : > { %v3275_v38 = vpop.f32.mrf.mxu1 }
 0x3b3   : > { %v3276_v61 = vadd.f32 %v3275_v38, %v9496_v11  ;;  %v3156_v59 = vpop.f32.mrf.mxu0  ;;  %v3462_v4 = vpop.f32.mrf.mxu2 }
 0x3b5   : > { %v3517_v7 = vadd.f32 %v3444_v20, %v3276_v61 }
 0x3b7   : > { %v9650_v25 = vadd.f32 %v9613_v3, %v3517_v7 }
 0x3b9   : > { %12233 = vst [vmem:[#allocation21_spill] sm:$0xff] %v9650_v25  ;;  %3627 = vmatmul.f32.gmra.mxu3 %v9650_v25 }
 0x3ba   : > { %v3278_v57 = vpop.f32.mrf.mxu1 }
 0x3bb   : > { %v3279_v22 = vadd.f32 %v3278_v57, %v9510_v63  ;;  %v3158_v8 = vpop.f32.mrf.mxu0 }
 0x3bd   : > { %v3518_v15 = vadd.f32 %v3447_v48, %v3279_v22  ;;  %3317 = vmatmul.bf16.gmra.mxu1 %v12235_v19 }
 0x3bf   : > { %v9658_v35 = vadd.f32 %v9613_v3, %v3518_v15 }
 0x3c1   : > { %3630 = vmatmul.f32.gmra.mxu3 %v9658_v35 }
 0x3c2   : > { %v3280_v11 = vpop.f32.mrf.mxu1 }
 0x3c3   : > { %v3281_v20 = vadd.f32 %v3280_v11, %v9528_v39  ;;  %v3464_v39 = vpop.f32.mrf.mxu2  ;;  %v3161_v14 = vpop.f32.mrf.mxu0 }
 0x3c5   : > { %v3519_v37 = vadd.f32 %v3449_v34, %v3281_v20 }
 0x3c7   : > { %v9663_v13 = vadd.f32 %v9613_v3, %v3519_v37 }
 0x3c9   : > { %12236 = vst [vmem:[#allocation31_spill] sm:$0xff] %v9663_v13  ;;  %3633 = vmatmul.f32.gmra.mxu3 %v9663_v13 }
 0x3ca   : > { %v3283_v63 = vpop.f32.mrf.mxu1 }
 0x3cb   : > { %v3284_v48 = vadd.f32 %v3283_v63, %v3146_v27  ;;  %v3467_v27 = vpop.f32.mrf.mxu2 }
 0x3cd   : > { %v3520_v42 = vadd.f32 %v3452_v53, %v3284_v48  ;;  %3322 = vmatmul.bf16.gmra.mxu1 %v12239_v60 }
 0x3cf   : > { %v9670_v12 = vadd.f32 %v9613_v3, %v3520_v42 }
 0x3d1   : > { %12240 = vst [vmem:[#allocation30_spill] sm:$0xff] %v9670_v12  ;;  %3636 = vmatmul.f32.gmra.mxu3 %v9670_v12 }
 0x3d2   : > { %v3285_v34 = vpop.f32.mrf.mxu1 }
 0x3d3   : > { %v3286_v47 = vadd.f32 %v3285_v34, %v3148_v58  ;;  %v3163_v58 = vpop.f32.mrf.mxu0  ;;  %v3469_v26 = vpop.f32.mrf.mxu2 }
 0x3d5   : > { %v3521_v44 = vadd.f32 %v3454_v36, %v3286_v47 }
 0x3d7   : > { %v9674_v31 = vadd.f32 %v9613_v3, %v3521_v44 }
 0x3d9   : > { %12241 = vst [vmem:[#allocation22_spill] sm:$0xff] %v9674_v31  ;;  %3639 = vmatmul.f32.gmra.mxu3 %v9674_v31 }
 0x3da   : > { %v3288_v53 = vpop.f32.mrf.mxu1 }
 0x3db   : > { %v3289_v56 = vadd.f32 %v3288_v53, %v3151_v23  ;;  %v3166_v38 = vpop.f32.mrf.mxu0  ;;  %v3472_v61 = vpop.f32.mrf.mxu2 }
 0x3dd   : > { %v3522_v0 = vadd.f32 %v3457_v32, %v3289_v56  ;;  %3327 = vmatmul.bf16.gmra.mxu1 %v12243_v21 }
 0x3df   : > { %v9681_v24 = vadd.f32 %v9613_v3, %v3522_v0 }
 0x3e1   : > { %12244 = vst [vmem:[#allocation26_spill] sm:$0xff] %v9681_v24  ;;  %3642 = vmatmul.f32.gmra.mxu3 %v9681_v24  ;;  %v4452_v24 = vld [vmem:[#allocation9 + $0x18] sm:$0xff] }
 0x3e2   : > { %v3290_v36 = vpop.f32.mrf.mxu1 }
 0x3e3   : > { %v3291_v2 = vadd.f32 %v3290_v36, %v3153_v62  ;;  %v3474_v54 = vpop.f32.mrf.mxu2 }
 0x3e5   : > { %v3523_v46 = vadd.f32 %v3459_v1, %v3291_v2  ;;  %v3168_v1 = vpop.f32.mrf.mxu0 }
 0x3e7   : > { %v9685_v49 = vadd.f32 %v9613_v3, %v3523_v46 }
 0x3e9   : > { %12245 = vst [vmem:[#allocation24_spill] sm:$0xff] %v9685_v49  ;;  %3645 = vmatmul.f32.gmra.mxu3 %v9685_v49  ;;  %v4455_v49 = vld [vmem:[#allocation9 + $0x30] sm:$0xff] }
 0x3ea   : > { %v3293_v23 = vpop.f32.mrf.mxu1 }
 0x3eb   : > { %v3294_v32 = vadd.f32 %v3293_v23, %v3156_v59  ;;  %v3477_v20 = vpop.f32.mrf.mxu2 }
 0x3ed   : > { %v3524_v33 = vadd.f32 %v3462_v4, %v3294_v32  ;;  %3332 = vmatmul.bf16.gmra.mxu1 %v3019_v51  ;;  %v3171_v51 = vpop.f32.mrf.mxu0 }
 0x3ef   : > { %v9692_v7 = vadd.f32 %v9613_v3, %v3524_v33 }
 0x3f1   : > { %12246 = vst [vmem:[#allocation27_spill] sm:$0xff] %v9692_v7  ;;  %3648 = vmatmul.f32.gmra.mxu3 %v9692_v7  ;;  %v4453_v7 = vld [vmem:[#allocation9 + $0x20] sm:$0xff] }
 0x3f2   : > { %v3295_v62 = vpop.f32.mrf.mxu1 }
 0x3f3   : > { %v3296_v57 = vadd.f32 %v3295_v62, %v3158_v8  ;;  %v3479_v55 = vpop.f32.mrf.mxu2  ;;  %v9714_v8 = vld [vmem:[#allocation11] ss:$0 sm:$0xff] }
 0x3f5   : > { %v3525_v22 = vadd.f32 %v3464_v39, %v3296_v57  ;;  %v3173_v48 = vpop.f32.mrf.mxu0 }
 0x3f7   : > { %v9696_v15 = vadd.f32 %v9613_v3, %v3525_v22 }
 0x3f9   : > { %12247 = vst [vmem:[#allocation25_spill] sm:$0xff] %v9696_v15  ;;  %3651 = vmatmul.f32.gmra.mxu3 %v9696_v15  ;;  %v4456_v15 = vld [vmem:[#allocation9 + $0x38] sm:$0xff] }
 0x3fa   : > { %v3298_v19 = vpop.f32.mrf.mxu1 }
 0x3fb   : > { %v3299_v11 = vadd.f32 %v3298_v19, %v3161_v14  ;;  %v3482_v14 = vpop.f32.mrf.mxu2 }
 0x3fd   : > { %v3526_v16 = vadd.f32 %v3467_v27, %v3299_v11  ;;  %3337 = vmatmul.bf16.gmra.mxu1 %v3020_v52  ;;  %v3176_v39 = vpop.f32.mrf.mxu0 }
 0x3ff   : > { %v9703_v41 = vadd.f32 %v9613_v3, %v3526_v16 }
 0x401   : > { %12248 = vst [vmem:[#allocation20_spill] sm:$0xff] %v9703_v41  ;;  %3654 = vmatmul.f32.gmra.mxu3 %v9703_v41 }
 0x402   : > { %v3300_v59 = vpop.f32.mrf.mxu1 }
 0x403   : > { %v3301_v37 = vadd.f32 %v3300_v59, %v3163_v58  ;;  %v3484_v46 = vpop.f32.mrf.mxu2 }
 0x405   : > { %v3527_v4 = vadd.f32 %v3469_v26, %v3301_v37  ;;  %v3178_v36 = vpop.f32.mrf.mxu0 }
 0x407   : > { %v9707_v63 = vadd.f32 %v9613_v3, %v3527_v4 }
 0x409   : > { %12249 = vst [vmem:[#allocation29_spill] sm:$0xff] %v9707_v63  ;;  %3657 = vmatmul.f32.gmra.mxu3 %v9707_v63  ;;  %v4457_v63 = vld [vmem:[#allocation9 + $0x40] sm:$0xff] }
 0x40a   : > { %v3303_v42 = vpop.f32.mrf.mxu1 }
 0x40b   : > { %v3304_v10 = vadd.f32 %v3303_v42, %v3166_v38 }
 0x40d   : > { %v3528_v18 = vadd.f32 %v3472_v61, %v3304_v10  ;;  %v3181_v22 = vpop.f32.mrf.mxu0 }
 0x40f   : > { %v9711_v52 = vadd.f32 %v9613_v3, %v3528_v18 }
 0x411   : > { %12250 = vst [vmem:[#allocation28_spill] sm:$0xff] %v9711_v52  ;;  %3660 = vmatmul.f32.gmra.mxu3 %v9711_v52 }
 0x412   : > { %v3305_v30 = vpop.f32.mrf.mxu1 }
 0x413   : > { %v3306_v60 = vadd.f32 %v3305_v30, %v3168_v1  ;;  %v3487_v1 = vpop.f32.mrf.mxu2 }
 0x414   : > { %v3613_v34 = vpop.f32.mrf.mxu3 }
 0x415   : > { %v3529_v47 = vadd.f32 %v3474_v54, %v3306_v60  ;;  %v3710_v44 = vmul.f32 2.0, %v3613_v34  ;;  %v3183_v37 = vpop.f32.mrf.mxu0 }
 0x417   : > { %v9717_v27 = vadd.f32 %v9613_v3, %v3529_v47  ;;  %v9720_v53 = vsub.f32 %v9714_v8, %v3710_v44 }
 0x419   : > { %12251 = vst [vmem:[#allocation19_spill] sm:$0xff] %v9717_v27  ;;  %3663 = vmatmul.f32.gmra.mxu3 %v9717_v27  ;;  %3777 = vmin.xlane.f32.xlu0 %v9720_v53 }
 0x41a   : > { %v3308_v56 = vpop.f32.mrf.mxu1 }
 0x41b   : > { %v3309_v0 = vadd.f32 %v3308_v56, %v3171_v51  ;;  %v3489_v42 = vpop.f32.mrf.mxu2 }
 0x41c   : > { %v3616_v17 = vpop.f32.mrf.mxu3 }
 0x41d   : > { %v3530_v21 = vadd.f32 %v3477_v20, %v3309_v0  ;;  %v3711_v58 = vmul.f32 2.0, %v3616_v17  ;;  %v3186_v47 = vpop.f32.mrf.mxu0 }
 0x41f   : > { %v9725_v2 = vadd.f32 %v9613_v3, %v3530_v21  ;;  %v9728_v26 = vsub.f32 %v9714_v8, %v3711_v58 }
 0x421   : > { %12252 = vst [vmem:[#allocation32_spill] sm:$0xff] %v9725_v2  ;;  %3666 = vmatmul.f32.gmra.mxu3 %v9725_v2  ;;  %3779 = vmin.xlane.f32.xlu0 %v9728_v26 }
 0x422   : > { %v3310_v23 = vpop.f32.mrf.mxu1 }
 0x423   : > { %v3311_v32 = vadd.f32 %v3310_v23, %v3173_v48  ;;  %v3492_v0 = vpop.f32.mrf.mxu2 }
 0x424   : > { %v3619_v38 = vpop.f32.mrf.mxu3 }
 0x425   : > { %v3531_v33 = vadd.f32 %v3479_v55, %v3311_v32  ;;  %v3712_v61 = vmul.f32 2.0, %v3619_v38  ;;  %v3188_v38 = vpop.f32.mrf.mxu0 }
 0x427   : > { %v9733_v62 = vadd.f32 %v9613_v3, %v3531_v33  ;;  %v9736_v57 = vsub.f32 %v9714_v8, %v3712_v61 }
 0x429   : > { %12253 = vst [vmem:[#allocation33_spill] sm:$0xff] %v9733_v62  ;;  %3669 = vmatmul.f32.gmra.mxu3 %v9733_v62  ;;  %3781 = vmin.xlane.f32.xlu1 %v9736_v57 }
 0x42a   : > { %v3313_v54 = vpop.f32.mrf.mxu1 }
 0x42b   : > { %v3314_v19 = vadd.f32 %v3313_v54, %v3176_v39 }
 0x42c   : > { %v3622_v11 = vpop.f32.mrf.mxu3 }
 0x42d   : > { %v3532_v16 = vadd.f32 %v3482_v14, %v3314_v19  ;;  %v3713_v51 = vmul.f32 2.0, %v3622_v11 }
 0x42f   : > { %v9741_v20 = vadd.f32 %v9613_v3, %v3532_v16  ;;  %v9744_v59 = vsub.f32 %v9714_v8, %v3713_v51  ;;  %v3191_v16 = vpop.f32.mrf.mxu0 }
 0x431   : > { %12254 = vst [vmem:[#allocation34_spill] sm:$0xff] %v9741_v20  ;;  %3672 = vmatmul.f32.gmra.mxu3 %v9741_v20  ;;  %3783 = vmin.xlane.f32.xlu1 %v9744_v59 }
 0x432   : > { %v3315_v4 = vpop.f32.mrf.mxu1 }
 0x433   : > { %v3316_v48 = vadd.f32 %v3315_v4, %v3178_v36 }
 0x434   : > { %v3625_v10 = vpop.f32.mrf.mxu3 }
 0x435   : > { %v3533_v55 = vadd.f32 %v3484_v46, %v3316_v48  ;;  %v3714_v18 = vmul.f32 2.0, %v3625_v10 }
 0x437   : > { %v9749_v30 = vadd.f32 %v9613_v3, %v3533_v55  ;;  %v9752_v60 = vsub.f32 %v9714_v8, %v3714_v18  ;;  %v3193_v10 = vpop.f32.mrf.mxu0 }
 0x439   : > { %12255 = vst [vmem:[#allocation35_spill] sm:$0xff] %v9749_v30  ;;  %3675 = vmatmul.f32.gmra.mxu3 %v9749_v30  ;;  %3785 = vmin.xlane.f32.xlu2 %v9752_v60 }
 0x43a   : > { %v3318_v39 = vpop.f32.mrf.mxu1 }
 0x43b   : > { %v3319_v34 = vadd.f32 %v3318_v39, %v3181_v22  ;;  %v3494_v22 = vpop.f32.mrf.mxu2 }
 0x43c   : > { %v3628_v44 = vpop.f32.mrf.mxu3 }
 0x43d   : > { %v3534_v14 = vadd.f32 %v3487_v1, %v3319_v34  ;;  %v3715_v56 = vmul.f32 2.0, %v3628_v44 }
 0x43f   : > { %v9757_v17 = vadd.f32 %v9613_v3, %v3534_v14  ;;  %v9760_v21 = vsub.f32 %v9714_v8, %v3715_v56 }
 0x441   : > { %12256 = vst [vmem:[#allocation36_spill] sm:$0xff] %v9757_v17  ;;  %3678 = vmatmul.f32.gmra.mxu3 %v9757_v17  ;;  %3787 = vmin.xlane.f32.xlu2 %v9760_v21 }
 0x442   : > { %v3320_v58 = vpop.f32.mrf.mxu1 }
 0x443   : > { %v3321_v36 = vadd.f32 %v3320_v58, %v3183_v37  ;;  %v3497_v51 = vpop.f32.mrf.mxu2 }
 0x444   : > { %v3631_v46 = vpop.f32.mrf.mxu3 }
 0x445   : > { %v3535_v23 = vadd.f32 %v3489_v42, %v3321_v36  ;;  %v3716_v32 = vmul.f32 2.0, %v3631_v46 }
 0x447   : > { %v9765_v33 = vadd.f32 %v9613_v3, %v3535_v23  ;;  %v9768_v61 = vsub.f32 %v9714_v8, %v3716_v32 }
 0x449   : > { %12257 = vst [vmem:[#allocation37_spill] sm:$0xff] %v9765_v33  ;;  %3681 = vmatmul.f32.gmra.mxu3 %v9765_v33  ;;  %3789 = vmin.xlane.f32.xlu1 %v9768_v61 }
 0x44a   : > { %v3323_v1 = vpop.f32.mrf.mxu1 }
 0x44b   : > { %v3324_v54 = vadd.f32 %v3323_v1, %v3186_v47  ;;  %v3499_v39 = vpop.f32.mrf.mxu2 }
 0x44c   : > { %v3634_v44 = vpop.f32.mrf.mxu3 }
 0x44d   : > { %v3536_v19 = vadd.f32 %v3492_v0, %v3324_v54  ;;  %v3196_v0 = vpop.f32.mrf.mxu0 }
 0x44f   : > { %v9773_v11 = vadd.f32 %v9613_v3, %v3536_v19 }
 0x451   : > { %12258 = vst [vmem:[#allocation38_spill] sm:$0xff] %v9773_v11  ;;  %3684 = vmatmul.f32.gmra.mxu3 %v9773_v11  ;;  %v4464_v11 = vld [vmem:[#allocation9 + $0x78] sm:$0xff] }
 0x452   : > { %v3325_v37 = vpop.f32.mrf.mxu1  ;;  %4465 = vmatpush.msrb.mxu0 %v4464_v11 }
 0x453   : > { %v3326_v4 = vadd.f32 %v3325_v37, %v3188_v38  ;;  %v3502_v36 = vpop.f32.mrf.mxu2 }
 0x454   : > { %v3637_v32 = vpop.f32.mrf.mxu3 }
 0x455   : > { %v3537_v48 = vadd.f32 %v3494_v22, %v3326_v4  ;;  %v3198_v1 = vpop.f32.mrf.mxu0 }
 0x457   : > { %v9777_v42 = vadd.f32 %v9613_v3, %v3537_v48 }
 0x459   : > { %12259 = vst [vmem:[#allocation39_spill] sm:$0xff] %v9777_v42  ;;  %3687 = vmatmul.f32.gmra.mxu3 %v9777_v42 }
 0x45a   : > { %v3328_v55 = vpop.f32.mrf.mxu1 }
 0x45b   : > { %v3329_v18 = vadd.f32 %v3328_v55, %v3191_v16  ;;  %v3504_v19 = vpop.f32.mrf.mxu2 }
 0x45c   : > { %v3640_v37 = vpop.f32.mrf.mxu3 }
 0x45d   : > { %v3538_v34 = vadd.f32 %v3497_v51, %v3329_v18 }
 0x45f   : > { %v9781_v47 = vadd.f32 %v9613_v3, %v3538_v34 }
 0x461   : > { %12260 = vst [vmem:[#allocation40_spill] sm:$0xff] %v9781_v47  ;;  %3690 = vmatmul.f32.gmra.mxu3 %v9781_v47 }
 0x462   : > { %v3330_v14 = vpop.f32.mrf.mxu1 }
 0x463   : > { %v3331_v56 = vadd.f32 %v3330_v14, %v3193_v10  ;;  %v3201_v10 = vpop.f32.mrf.mxu0  ;;  %v3507_v55 = vpop.f32.mrf.mxu2 }
 0x464   : > { %v3643_v14 = vpop.f32.mrf.mxu3 }
 0x465   : > { %v3539_v58 = vadd.f32 %v3499_v39, %v3331_v56 }
 0x467   : > { %v9785_v46 = vadd.f32 %v9613_v3, %v3539_v58 }
 0x469   : > { %12261 = vst [vmem:[#allocation41_spill] sm:$0xff] %v9785_v46  ;;  %3693 = vmatmul.f32.gmra.mxu3 %v9785_v46 }
 0x46a   : > { %v3333_v23 = vpop.f32.mrf.mxu1 }
 0x46b   : > { %v3334_v38 = vadd.f32 %v3333_v23, %v3196_v0  ;;  %v3203_v0 = vpop.f32.mrf.mxu0  ;;  %v3509_v23 = vpop.f32.mrf.mxu2 }
 0x46d   : > { %v3540_v22 = vadd.f32 %v3502_v36, %v3334_v38 }
 0x46f   : > { %v9789_v54 = vadd.f32 %v9613_v3, %v3540_v22 }
 0x471   : > { %12262 = vst [vmem:[#allocation42_spill] sm:$0xff] %v9789_v54  ;;  %3696 = vmatmul.f32.gmra.mxu3 %v9789_v54 }
 0x472   : > { %v3335_v16 = vpop.f32.mrf.mxu1 }
 0x473   : > { %v3336_v51 = vadd.f32 %v3335_v16, %v3198_v1  ;;  %v3646_v1 = vpop.f32.mrf.mxu3 }
 0x474   : > { %v3721_v50 = vmul.f32 2.0, %v3646_v1 }
 0x475   : > { %v3541_v4 = vadd.f32 %v3504_v19, %v3336_v51  ;;  %v12266_v19 = vlaneseq }
 0x477   : > { %v9793_v48 = vadd.f32 %v9613_v3, %v3541_v4  ;;  %v9805_v16 = vand.u32 127, %v12266_v19 }
 0x479   : > { %12263 = vst [vmem:[#allocation43_spill] sm:$0xff] %v9793_v48  ;;  %3699 = vmatmul.f32.gmra.mxu3 %v9793_v48 }
 0x47a   : > { %v3338_v18 = vpop.f32.mrf.mxu1  ;;  %12267 = vst [vmem:[#allocation46_spill] sm:$0xff] %v9805_v16 }
 0x47b   : > { %v3339_v39 = vadd.f32 %v3338_v18, %v3201_v10  ;;  %v3649_v18 = vpop.f32.mrf.mxu3 }
 0x47c   : > { %v3722_v48 = vmul.f32 2.0, %v3649_v18 }
 0x47d   : > { %v3542_v34 = vadd.f32 %v3507_v55, %v3339_v39  ;;  %v3717_v39 = vmul.f32 2.0, %v3634_v44 }
 0x47f   : > { %v9797_v56 = vadd.f32 %v9613_v3, %v3542_v34 }
 0x481   : > { %12264 = vst [vmem:[#allocation44_spill] sm:$0xff] %v9797_v56  ;;  %3702 = vmatmul.f32.gmra.mxu3 %v9797_v56 }
 0x482   : > { %v3340_v58 = vpop.f32.mrf.mxu1 }
 0x483   : > { %v3341_v36 = vadd.f32 %v3340_v58, %v3203_v0  ;;  %v9823_v58 = vsub.f32 %v9714_v8, %v3717_v39 }
 0x485   : > { %v3543_v38 = vadd.f32 %v3509_v23, %v3341_v36  ;;  %v3718_v23 = vmul.f32 2.0, %v3637_v32 }
 0x487   : > { %v9801_v22 = vadd.f32 %v9613_v3, %v3543_v38  ;;  %v3652_v38 = vpop.f32.mrf.mxu3 }
 0x489   : > { %12265 = vst [vmem:[#allocation45_spill] sm:$0xff] %v9801_v22  ;;  %3705 = vmatmul.f32.gmra.mxu3 %v9801_v22 }
 0x48c   : > { %v3778_v51 = vpop.xlane.xlu0 %3777 }
 0x48d   : > { %vm3841_vm14 = vcmp.eq.f32.partialorder %v9720_v53, %v3778_v51  ;;  %v9835_v51 = vsub.f32 %v9714_v8, %v3718_v23 }
 0x48e   : > { %v9809_v4 = vsel %vm3841_vm14, %v9805_v16, 128 }
 0x48f   : > { %v3906_v10 = vshra.s32 %v9809_v4, 16  ;;  %v3655_v32 = vpop.f32.mrf.mxu3 }
 0x491   : > { %v9812_v55 = vcvt.s32.f32 %v3906_v10 }
 0x493   : > { %3909 = vmin.xlane.f32.xlu0 %v9812_v55 }
 0x494   : > { %v3780_v3 = vpop.xlane.xlu0 %3779 }
 0x495   : > { %vm3842_vm0 = vcmp.eq.f32.partialorder %v9728_v26, %v3780_v3  ;;  %v3719_v3 = vmul.f32 2.0, %v3640_v37 }
 0x496   : > { %v9817_v34 = vsel %vm3842_vm0, %v9805_v16, 128 }
 0x497   : > { %v3920_v0 = vshra.s32 %v9817_v34, 16 }
 0x499   : > { %v9820_v53 = vcvt.s32.f32 %v3920_v0 }
 0x49b   : > { %3923 = vmin.xlane.f32.xlu2 %v9820_v53  ;;  %3791 = vmin.xlane.f32.xlu0 %v9823_v58 }
 0x49c   : > { %v3782_v36 = vpop.xlane.xlu1 %3781 }
 0x49d   : > { %vm3843_vm15 = vcmp.eq.f32.partialorder %v9736_v57, %v3782_v36  ;;  %v9847_v36 = vsub.f32 %v9714_v8, %v3719_v3 }
 0x49e   : > { %v9829_v26 = vsel %vm3843_vm15, %v9805_v16, 128 }
 0x49f   : > { %v3934_v44 = vshra.s32 %v9829_v26, 16 }
 0x4a1   : > { %v9832_v19 = vcvt.s32.f32 %v3934_v44  ;;  %v3720_v44 = vmul.f32 2.0, %v3643_v14 }
 0x4a3   : > { %3937 = vmin.xlane.f32.xlu1 %v9832_v19  ;;  %3793 = vmin.xlane.f32.xlu2 %v9835_v51 }
 0x4a4   : > { %v3784_v10 = vpop.xlane.xlu1 %3783 }
 0x4a5   : > { %vm3844_vm1 = vcmp.eq.f32.partialorder %v9744_v59, %v3784_v10  ;;  %v3658_v10 = vpop.f32.mrf.mxu3 }
 0x4a6   : > { %v9841_v57 = vsel %vm3844_vm1, %v9805_v16, 128 }
 0x4a7   : > { %v3948_v39 = vshra.s32 %v9841_v57, 16 }
 0x4a9   : > { %v9844_v0 = vcvt.s32.f32 %v3948_v39  ;;  %v9859_v39 = vsub.f32 %v9714_v8, %v3720_v44 }
 0x4ab   : > { %3951 = vmin.xlane.f32.xlu0 %v9844_v0  ;;  %3795 = vmin.xlane.f32.xlu1 %v9847_v36 }
 0x4ac   : > { %v3786_v23 = vpop.xlane.xlu2 %3785 }
 0x4ad   : > { %vm3845_vm2 = vcmp.eq.f32.partialorder %v9752_v60, %v3786_v23  ;;  %v3661_v44 = vpop.f32.mrf.mxu3 }
 0x4ae   : > { %v9853_v59 = vsel %vm3845_vm2, %v9805_v16, 128 }
 0x4af   : > { %v3962_v37 = vshra.s32 %v9853_v59, 16  ;;  %v3961_v2 = vand.u32 65535, %v9853_v59 }
 0x4b1   : > { %v9856_v40 = vcvt.s32.f32 %v3962_v37  ;;  %v9871_v37 = vsub.f32 %v9714_v8, %v3721_v50  ;;  %v3723_v50 = vmul.f32 2.0, %v3652_v38  ;;  %v3726_v38 = vmul.f32 2.0, %v3661_v44 }
 0x4b3   : > { %3965 = vmin.xlane.f32.xlu2 %v9856_v40  ;;  %3797 = vmin.xlane.f32.xlu0 %v9859_v39  ;;  %v9888_v18 = vsub.f32 %v9714_v8, %v3723_v50  ;;  %v9900_v50 = vsub.f32 %v9714_v8, %v3726_v38 }
 0x4b4   : > { %v3788_v3 = vpop.xlane.xlu2 %3787 }
 0x4b5   : > { %vm3846_vm3 = vcmp.eq.f32.partialorder %v9760_v21, %v3788_v3  ;;  %v3664_v22 = vpop.f32.mrf.mxu3 }
 0x4b6   : > { %v9865_v60 = vsel %vm3846_vm3, %v9805_v16, 128 }
 0x4b7   : > { %v3976_v14 = vshra.s32 %v9865_v60, 16 }
 0x4b9   : > { %v9868_v23 = vcvt.s32.f32 %v3976_v14  ;;  %v9883_v14 = vsub.f32 %v9714_v8, %v3722_v48  ;;  %v3725_v48 = vmul.f32 2.0, %v3658_v10 }
 0x4bb   : > { %3979 = vmin.xlane.f32.xlu1 %v9868_v23  ;;  %3799 = vmin.xlane.f32.xlu2 %v9871_v37  ;;  %v9896_v54 = vsub.f32 %v9714_v8, %v3725_v48 }
 0x4bc   : > { %v3790_v56 = vpop.xlane.xlu1 %3789 }
 0x4bd   : > { %vm3847_vm4 = vcmp.eq.f32.partialorder %v9768_v61, %v3790_v56  ;;  %v3724_v61 = vmul.f32 2.0, %v3655_v32  ;;  %v3667_v56 = vpop.f32.mrf.mxu3  ;;  %v3727_v32 = vmul.f32 2.0, %v3664_v22 }
 0x4be   : > { %v9877_v21 = vsel %vm3847_vm4, %v9805_v16, 128  ;;  %v3728_v10 = vmul.f32 2.0, %v3667_v56  ;;  %v4463_v56 = vld [vmem:[#allocation9 + $0x70] sm:$0xff] }
 0x4bf   : > { %v3990_v1 = vshra.s32 %v9877_v21, 16  ;;  %v9892_v46 = vsub.f32 %v9714_v8, %v3724_v61  ;;  %v9904_v61 = vsub.f32 %v9714_v8, %v3727_v32  ;;  %4466 = vmatpush.msrb.mxu0 %v4463_v56  ;;  %v3989_v27 = vand.u32 65535, %v9877_v21 }
 0x4c0   : > { %v9908_v48 = vsub.f32 %v9714_v8, %v3728_v10  ;;  %v3905_v10 = vand.u32 65535, %v9809_v4 }
 0x4c1   : > { %v9880_v3 = vcvt.s32.f32 %v3990_v1 }
 0x4c3   : > { %3993 = vmin.xlane.f32.xlu1 %v9880_v3  ;;  %3801 = vmin.xlane.f32.xlu2 %v9883_v14 }
 0x4c5   : > { %v3670_v1 = vpop.f32.mrf.mxu3 }
 0x4c6   : > { %v3729_v44 = vmul.f32 2.0, %v3670_v1  ;;  %v3907_v1 = vcvt.s32.f32 %v3905_v10 }
 0x4c8   : > { %v9912_v33 = vsub.f32 %v9714_v8, %v3729_v44 }
 0x4cb   : > { %3803 = vmin.xlane.f32.xlu2 %v9888_v18 }
 0x4cd   : > { %v3673_v47 = vpop.f32.mrf.mxu3 }
 0x4ce   : > { %v3730_v22 = vmul.f32 2.0, %v3673_v47 }
 0x4d0   : > { %v9916_v42 = vsub.f32 %v9714_v8, %v3730_v22  ;;  %v3919_v22 = vand.u32 65535, %v9817_v34 }
 0x4d2   : > { %v3921_v17 = vcvt.s32.f32 %v3919_v22 }
 0x4d3   : > { %3805 = vmin.xlane.f32.xlu2 %v9892_v46 }
 0x4d5   : > { %v3676_v5 = vpop.f32.mrf.mxu3 }
 0x4d6   : > { %v3731_v11 = vmul.f32 2.0, %v3676_v5 }
 0x4d8   : > { %v9925_v47 = vsub.f32 %v9714_v8, %v3731_v11 }
 0x4db   : > { %3807 = vmin.xlane.f32.xlu2 %v9896_v54 }
 0x4dd   : > { %v3679_v38 = vpop.f32.mrf.mxu3 }
 0x4de   : > { %v3732_v4 = vmul.f32 2.0, %v3679_v38  ;;  %v4462_v38 = vld [vmem:[#allocation9 + $0x68] sm:$0xff] }
 0x4df   : > { %4467 = vmatpush.msrb.mxu0 %v4462_v38 }
 0x4e0   : > { %v9938_v34 = vsub.f32 %v9714_v8, %v3732_v4 }
 0x4e3   : > { %3809 = vmin.xlane.f32.xlu2 %v9900_v50 }
 0x4e5   : > { %v3682_v32 = vpop.f32.mrf.mxu3 }
 0x4eb   : > { %3811 = vmin.xlane.f32.xlu2 %v9904_v61 }
 0x4ed   : > { %v3685_v20 = vpop.f32.mrf.mxu3 }
 0x4f3   : > { %3813 = vmin.xlane.f32.xlu2 %v9908_v48 }
 0x4fb   : > { %3815 = vmin.xlane.f32.xlu2 %v9912_v33 }
 0x503   : > { %3817 = vmin.xlane.f32.xlu2 %v9916_v42 }
 0x506   : > { %v9920_v30 = vpop.xlane.xlu0 %3909 }
 0x507   : > { %vm3911_vm5 = vcmp.eq.f32.partialorder %v9812_v55, %v9920_v30 }
 0x508   : > { %v3912_v44 = vsel %vm3911_vm5, %v3907_v1, inf  ;;  %v3933_v1 = vand.u32 65535, %v9829_v26 }
 0x509   : > { %3913 = vmin.xlane.f32.xlu0 %v3912_v44  ;;  %v3733_v44 = vmul.f32 2.0, %v3682_v32 }
 0x50b   : > { %3819 = vmin.xlane.f32.xlu2 %v9925_v47 }
 0x50e   : > { %v9929_v56 = vpop.xlane.xlu2 %3923  ;;  %v3792_v5 = vpop.xlane.xlu0 %3791 }
 0x50f   : > { %vm3848_vm6 = vcmp.eq.f32.partialorder %v9823_v58, %v3792_v5  ;;  %vm3925_vm8 = vcmp.eq.f32.partialorder %v9820_v53, %v9929_v56  ;;  %v3688_v53 = vpop.f32.mrf.mxu3  ;;  %v3935_v5 = vcvt.s32.f32 %v3933_v1 }
 0x510   : > { %v9935_v55 = vsel %vm3848_vm6, %v9805_v16, 128  ;;  %v3926_v10 = vsel %vm3925_vm8, %v3921_v17, inf }
 0x511   : > { %3927 = vmin.xlane.f32.xlu0 %v3926_v10  ;;  %v4004_v11 = vshra.s32 %v9935_v55, 16  ;;  %v9955_v10 = vsub.f32 %v9714_v8, %v3733_v44 }
 0x513   : > { %3821 = vmin.xlane.f32.xlu2 %v9938_v34  ;;  %v9943_v58 = vcvt.s32.f32 %v4004_v11  ;;  %v3947_v11 = vand.u32 65535, %v9841_v57 }
 0x515   : > { %4007 = vmin.xlane.f32.xlu1 %v9943_v58 }
 0x516   : > { %v9946_v22 = vpop.xlane.xlu1 %3937  ;;  %v3794_v17 = vpop.xlane.xlu2 %3793 }
 0x517   : > { %vm3849_vm10 = vcmp.eq.f32.partialorder %v9835_v51, %v3794_v17  ;;  %vm3939_vm11 = vcmp.eq.f32.partialorder %v9832_v19, %v9946_v22  ;;  %v3734_v51 = vmul.f32 2.0, %v3685_v20  ;;  %v3949_v17 = vcvt.s32.f32 %v3947_v11  ;;  %v3691_v44 = vpop.f32.mrf.mxu3 }
 0x518   : > { %v9952_v26 = vsel %vm3849_vm10, %v9805_v16, 128  ;;  %v3940_v4 = vsel %vm3939_vm11, %v3935_v5, inf }
 0x519   : > { %3941 = vmin.xlane.f32.xlu0 %v3940_v4  ;;  %v4018_v32 = vshra.s32 %v9952_v26, 16  ;;  %v9972_v4 = vsub.f32 %v9714_v8, %v3734_v51 }
 0x51b   : > { %3823 = vmin.xlane.f32.xlu2 %v9955_v10  ;;  %v9960_v38 = vcvt.s32.f32 %v4018_v32  ;;  %v4461_v32 = vld [vmem:[#allocation9 + $0x60] sm:$0xff] }
 0x51c   : > { %4468 = vmatpush.msrb.mxu0 %v4461_v32 }
 0x51d   : > { %4021 = vmin.xlane.f32.xlu1 %v9960_v38 }
 0x51e   : > { %v9963_v19 = vpop.xlane.xlu0 %3951  ;;  %v3796_v1 = vpop.xlane.xlu1 %3795 }
 0x51f   : > { %vm3850_vm12 = vcmp.eq.f32.partialorder %v9847_v36, %v3796_v1  ;;  %vm3953_vm13 = vcmp.eq.f32.partialorder %v9844_v0, %v9963_v19  ;;  %v3735_v0 = vmul.f32 2.0, %v3688_v53  ;;  %v3694_v32 = vpop.f32.mrf.mxu3 }
 0x520   : > { %v9969_v5 = vsel %vm3850_vm12, %v9805_v16, 128  ;;  %v3954_v57 = vsel %vm3953_vm13, %v3949_v17, inf  ;;  %v3963_v17 = vcvt.s32.f32 %v3961_v2 }
 0x521   : > { %3955 = vmin.xlane.f32.xlu0 %v3954_v57  ;;  %v4032_v20 = vshra.s32 %v9969_v5, 16  ;;  %v9989_v57 = vsub.f32 %v9714_v8, %v3735_v0 }
 0x523   : > { %3825 = vmin.xlane.f32.xlu2 %v9972_v4  ;;  %v9977_v36 = vcvt.s32.f32 %v4032_v20  ;;  %v3975_v20 = vand.u32 65535, %v9865_v60 }
 0x525   : > { %4035 = vmin.xlane.f32.xlu1 %v9977_v36 }
 0x526   : > { %v9980_v11 = vpop.xlane.xlu2 %3965  ;;  %v3798_v1 = vpop.xlane.xlu0 %3797 }
 0x527   : > { %vm3851_vm7 = vcmp.eq.f32.partialorder %v9859_v39, %v3798_v1  ;;  %vm3967_vm9 = vcmp.eq.f32.partialorder %v9856_v40, %v9980_v11  ;;  %v3736_v39 = vmul.f32 2.0, %v3691_v44 }
 0x528   : > { %v9986_v51 = vsel %vm3851_vm7, %v9805_v16, 128  ;;  %v3968_v59 = vsel %vm3967_vm9, %v3963_v17, inf  ;;  %v3977_v17 = vcvt.s32.f32 %v3975_v20  ;;  %v3697_v20 = vpop.f32.mrf.mxu3 }
 0x529   : > { %3969 = vmin.xlane.f32.xlu0 %v3968_v59  ;;  %v4046_v53 = vshra.s32 %v9986_v51, 16  ;;  %v10006_v59 = vsub.f32 %v9714_v8, %v3736_v39 }
 0x52b   : > { %3827 = vmin.xlane.f32.xlu2 %v9989_v57  ;;  %v9994_v2 = vcvt.s32.f32 %v4046_v53  ;;  %v4460_v53 = vld [vmem:[#allocation9 + $0x58] sm:$0xff] }
 0x52c   : > { %4469 = vmatpush.msrb.mxu0 %v4460_v53 }
 0x52d   : > { %4049 = vmin.xlane.f32.xlu1 %v9994_v2 }
 0x52e   : > { %v9997_v40 = vpop.xlane.xlu1 %3979  ;;  %v3800_v1 = vpop.xlane.xlu2 %3799 }
 0x52f   : > { %vm3852_vm14 = vcmp.eq.f32.partialorder %v9871_v37, %v3800_v1  ;;  %vm3981_vm0 = vcmp.eq.f32.partialorder %v9868_v23, %v9997_v40  ;;  %v3737_v23 = vmul.f32 2.0, %v3694_v32 }
 0x530   : > { %v10003_v0 = vsel %vm3852_vm14, %v9805_v16, 128  ;;  %v3982_v60 = vsel %vm3981_vm0, %v3977_v17, inf }
 0x531   : > { %3983 = vmin.xlane.f32.xlu0 %v3982_v60  ;;  %v4060_v44 = vshra.s32 %v10003_v0, 16  ;;  %v3991_v60 = vcvt.s32.f32 %v3989_v27  ;;  %v3738_v27 = vmul.f32 2.0, %v3697_v20 }
 0x533   : > { %3829 = vmin.xlane.f32.xlu2 %v10006_v59  ;;  %v10011_v37 = vcvt.s32.f32 %v4060_v44  ;;  %v10023_v44 = vsub.f32 %v9714_v8, %v3737_v23 }
 0x535   : > { %4063 = vmin.xlane.f32.xlu1 %v10011_v37 }
 0x536   : > { %v10014_v1 = vpop.xlane.xlu1 %3993  ;;  %v3802_v17 = vpop.xlane.xlu2 %3801 }
 0x537   : > { %vm3853_vm15 = vcmp.eq.f32.partialorder %v9883_v14, %v3802_v17  ;;  %vm3995_vm1 = vcmp.eq.f32.partialorder %v9880_v3, %v10014_v1  ;;  %v3700_v14 = vpop.f32.mrf.mxu3 }
 0x538   : > { %v10020_v21 = vsel %vm3853_vm15, %v9805_v16, 128  ;;  %v3996_v39 = vsel %vm3995_vm1, %v3991_v60, inf  ;;  %v10035_v60 = vsub.f32 %v9714_v8, %v3738_v27  ;;  %v3739_v20 = vmul.f32 2.0, %v3700_v14 }
 0x539   : > { %3997 = vmin.xlane.f32.xlu0 %v3996_v39  ;;  %v4074_v32 = vshra.s32 %v10020_v21, 16  ;;  %v4459_v39 = vld [vmem:[#allocation9 + $0x50] sm:$0xff] }
 0x53a   : > { %4470 = vmatpush.msrb.mxu0 %v4459_v39  ;;  %v10047_v27 = vsub.f32 %v9714_v8, %v3739_v20 }
 0x53b   : > { %3831 = vmin.xlane.f32.xlu2 %v10023_v44  ;;  %v10027_v53 = vcvt.s32.f32 %v4074_v32 }
 0x53d   : > { %4077 = vmin.xlane.f32.xlu1 %v10027_v53 }
 0x53e   : > { %v3804_v17 = vpop.xlane.xlu2 %3803 }
 0x53f   : > { %vm3854_vm2 = vcmp.eq.f32.partialorder %v9888_v18, %v3804_v17  ;;  %v3703_v18 = vpop.f32.mrf.mxu3 }
 0x540   : > { %v10032_v3 = vsel %vm3854_vm2, %v9805_v16, 128 }
 0x541   : > { %v4088_v23 = vshra.s32 %v10032_v3, 16 }
 0x543   : > { %3833 = vmin.xlane.f32.xlu2 %v10035_v60  ;;  %v10039_v32 = vcvt.s32.f32 %v4088_v23  ;;  %v3740_v23 = vmul.f32 2.0, %v3703_v18 }
 0x545   : > { %4091 = vmin.xlane.f32.xlu1 %v10039_v32  ;;  %v10059_v20 = vsub.f32 %v9714_v8, %v3740_v23  ;;  %v4454_v23 = vld [vmem:[#allocation9 + $0x28] sm:$0xff] }
 0x546   : > { %v3806_v62 = vpop.xlane.xlu2 %3805 }
 0x547   : > { %vm3855_vm3 = vcmp.eq.f32.partialorder %v9892_v46, %v3806_v62  ;;  %v4458_v62 = vld [vmem:[#allocation9 + $0x48] sm:$0xff] }
 0x548   : > { %v10044_v17 = vsel %vm3855_vm3, %v9805_v16, 128  ;;  %4471 = vmatpush.msrb.mxu0 %v4458_v62 }
 0x549   : > { %v4102_v52 = vshra.s32 %v10044_v17, 16 }
 0x54a   : > { %4472 = vmatpush.msrb.mxu0 %v4457_v63 }
 0x54b   : > { %3835 = vmin.xlane.f32.xlu2 %v10047_v27  ;;  %v10051_v39 = vcvt.s32.f32 %v4102_v52  ;;  %v3706_v52 = vpop.f32.mrf.mxu3 }
 0x54c   : > { %4473 = vmatpush.msrb.mxu0 %v4456_v15 }
 0x54d   : > { %4105 = vmin.xlane.f32.xlu1 %v10051_v39 }
 0x54e   : > { %v3808_v14 = vpop.xlane.xlu2 %3807  ;;  %4474 = vmatpush.msrb.mxu0 %v4455_v49  ;;  %v4451_v49 = vld [vmem:[#allocation9 + $0x10] sm:$0xff] }
 0x54f   : > { %vm3856_vm4 = vcmp.eq.f32.partialorder %v9896_v54, %v3808_v14  ;;  %v3741_v54 = vmul.f32 2.0, %v3706_v52  ;;  %v4450_v52 = vld [vmem:[#allocation9 + $0x8] sm:$0xff] }
 0x550   : > { %v10056_v46 = vsel %vm3856_vm4, %v9805_v16, 128  ;;  %4475 = vmatpush.msrb.mxu0 %v4454_v23 }
 0x551   : > { %v4116_v41 = vshra.s32 %v10056_v46, 16  ;;  %v10071_v63 = vsub.f32 %v9714_v8, %v3741_v54 }
 0x552   : > { %4476 = vmatpush.msrb.mxu0 %v4453_v7  ;;  %v4449_v7 = vld [vmem:[#allocation9] sm:$0xff] }
 0x553   : > { %3837 = vmin.xlane.f32.xlu2 %v10059_v20  ;;  %v10063_v18 = vcvt.s32.f32 %v4116_v41 }
 0x554   : > { %4477 = vmatpush.msrb.mxu0 %v4452_v24 }
 0x555   : > { %4119 = vmin.xlane.f32.xlu1 %v10063_v18 }
 0x556   : > { %v3810_v14 = vpop.xlane.xlu2 %3809  ;;  %4478 = vmatpush.msrb.mxu0 %v4451_v49 }
 0x557   : > { %vm3857_vm5 = vcmp.eq.f32.partialorder %v9900_v50, %v3810_v14 }
 0x558   : > { %v10068_v62 = vsel %vm3857_vm5, %v9805_v16, 128  ;;  %4479 = vmatpush.msrb.mxu0 %v4450_v52 }
 0x559   : > { %v4130_v41 = vshra.s32 %v10068_v62, 16 }
 0x55a   : > { %4480 = vmatpush.msrb.mxu0 %v4449_v7 }
 0x55b   : > { %3839 = vmin.xlane.f32.xlu2 %v10071_v63  ;;  %v10075_v15 = vcvt.s32.f32 %v4130_v41 }
 0x55d   : > { %4133 = vmin.xlane.f32.xlu1 %v10075_v15 }
 0x55e   : > { %v3812_v50 = vpop.xlane.xlu2 %3811 }
 0x55f   : > { %vm3858_vm6 = vcmp.eq.f32.partialorder %v9904_v61, %v3812_v50 }
 0x560   : > { %v10080_v8 = vsel %vm3858_vm6, %v9805_v16, 128 }
 0x561   : > { %v4144_v54 = vshra.s32 %v10080_v8, 16 }
 0x563   : > { %v10083_v14 = vcvt.s32.f32 %v4144_v54 }
 0x565   : > { %4147 = vmin.xlane.f32.xlu1 %v10083_v14 }
 0x566   : > { %v3814_v24 = vpop.xlane.xlu2 %3813 }
 0x567   : > { %vm3859_vm8 = vcmp.eq.f32.partialorder %v9908_v48, %v3814_v24  ;;  %v3916_v24 = vcvt.f32.s32 %v9920_v30 }
 0x568   : > { %v10088_v23 = vsel %vm3859_vm8, %v9805_v16, 128 }
 0x569   : > { %v4158_v61 = vshra.s32 %v10088_v23, 16  ;;  %v3917_v12 = vshll.u32 %v3916_v24, 16 }
 0x56b   : > { %v10091_v41 = vcvt.s32.f32 %v4158_v61 }
 0x56d   : > { %4161 = vmin.xlane.f32.xlu1 %v10091_v41 }
 0x56e   : > { %v3816_v49 = vpop.xlane.xlu2 %3815 }
 0x56f   : > { %vm3860_vm10 = vcmp.eq.f32.partialorder %v9912_v33, %v3816_v49 }
 0x570   : > { %v10096_v50 = vsel %vm3860_vm10, %v9805_v16, 128 }
 0x571   : > { %v4172_v52 = vshra.s32 %v10096_v50, 16 }
 0x573   : > { %v10099_v54 = vcvt.s32.f32 %v4172_v52 }
 0x575   : > { %4175 = vmin.xlane.f32.xlu1 %v10099_v54 }
 0x576   : > { %v3818_v48 = vpop.xlane.xlu2 %3817 }
 0x577   : > { %vm3861_vm11 = vcmp.eq.f32.partialorder %v9916_v42, %v3818_v48  ;;  %v3930_v48 = vcvt.f32.s32 %v9929_v56 }
 0x578   : > { %v10104_v7 = vsel %vm3861_vm11, %v9805_v16, 128 }
 0x579   : > { %v4186_v61 = vshra.s32 %v10104_v7, 16 }
 0x57b   : > { %v10108_v33 = vcvt.s32.f32 %v4186_v61  ;;  %v12044_v61 = vmov 1.0  }
 0x57c   : > { %v3914_v49 = vpop.xlane.xlu0 %3913 }
 0x57d   : > { %v3915_v31 = vcvt.f32.s32 %v3914_v49  ;;  %4189 = vmin.xlane.f32.xlu1 %v10108_v33 }
 0x57e   : > { %v3820_v52 = vpop.xlane.xlu2 %3819 }
 0x57f   : > { %v10111_v13 = vadd.s32 %v3917_v12, %v3915_v31  ;;  %vm3862_vm12 = vcmp.eq.f32.partialorder %v9925_v47, %v3820_v52  ;;  %v3931_v12 = vshll.u32 %v3930_v48, 16  ;;  %v4003_v31 = vand.u32 65535, %v9935_v55 }
 0x580   : > { %v10115_v42 = vsel %vm3862_vm12, %v9805_v16, 128 }
 0x581   : > { %12268 = vst [vmem:[#allocation47_spill] sm:$0xff] %v10111_v13  ;;  %vm4353_vm13 = vcmp.eq.s32.totalorder %v9805_v16, %v10111_v13  ;;  %v4200_v30 = vshra.s32 %v10115_v42, 16  ;;  %v4005_v48 = vcvt.s32.f32 %v4003_v31 }
 0x582   : > { %6811 = vmatmul.msk.f32.vlgmr.msrb.gmra.mxu0 %vm4353_vm13, %v12044_v61 }
 0x583   : > { %v10122_v24 = vcvt.s32.f32 %v4200_v30  ;;  %v3944_v30 = vcvt.f32.s32 %v9946_v22 }
 0x584   : > { %v3928_v49 = vpop.xlane.xlu0 %3927 }
 0x585   : > { %v3929_v47 = vcvt.f32.s32 %v3928_v49  ;;  %4203 = vmin.xlane.f32.xlu1 %v10122_v24 }
 0x586   : > { %v3822_v52 = vpop.xlane.xlu2 %3821 }
 0x587   : > { %v10126_v25 = vadd.s32 %v3931_v12, %v3929_v47  ;;  %vm3863_vm7 = vcmp.eq.f32.partialorder %v9938_v34, %v3822_v52  ;;  %v3945_v47 = vshll.u32 %v3944_v30, 16  ;;  %v4017_v52 = vand.u32 65535, %v9952_v26 }
 0x588   : > { %v10130_v56 = vsel %vm3863_vm7, %v9805_v16, 128  ;;  %v10132_v13 = vpop.xlane.xlu1 %4007  ;;  %v12271_v26 = vmov 1.0  }
 0x589   : > { %12269 = vst [vmem:[#allocation48_spill] sm:$0xff] %v10126_v25  ;;  %vm4354_vm9 = vcmp.eq.s32.totalorder %v9805_v16, %v10126_v25  ;;  %vm4009_vm14 = vcmp.eq.f32.partialorder %v9943_v58, %v10132_v13  ;;  %v4214_v55 = vshra.s32 %v10130_v56, 16  ;;  %v4019_v30 = vcvt.s32.f32 %v4017_v52 }
 0x58a   : > { %6812 = vmatmul.msk.f32.gmra.mxu0 %vm4354_vm9, %v12044_v61  ;;  %v4010_v49 = vsel %vm4009_vm14, %v4005_v48, inf  ;;  %v3958_v48 = vcvt.f32.s32 %v9963_v19 }
 0x58b   : > { %4011 = vmin.xlane.f32.xlu0 %v4010_v49  ;;  %v10141_v12 = vcvt.s32.f32 %v4214_v55 }
 0x58c   : > { %v3942_v34 = vpop.xlane.xlu0 %3941 }
 0x58d   : > { %v3943_v22 = vcvt.f32.s32 %v3942_v34  ;;  %4217 = vmin.xlane.f32.xlu1 %v10141_v12  ;;  %v3959_v34 = vshll.u32 %v3958_v48, 16 }
 0x58e   : > { %v3824_v25 = vpop.xlane.xlu2 %3823 }
 0x58f   : > { %v10145_v31 = vadd.s32 %v3945_v47, %v3943_v22  ;;  %vm3864_vm0 = vcmp.eq.f32.partialorder %v9955_v10, %v3824_v25  ;;  %v4031_v47 = vand.u32 65535, %v9969_v5 }
 0x590   : > { %v10149_v58 = vsel %vm3864_vm0, %v9805_v16, 128  ;;  %v10151_v61 = vpop.xlane.xlu1 %4021 }
 0x591   : > { %12270 = vst [vmem:[#allocation49_spill] sm:$0xff] %v10145_v31  ;;  %vm4355_vm15 = vcmp.eq.s32.totalorder %v9805_v16, %v10145_v31  ;;  %vm4023_vm1 = vcmp.eq.f32.partialorder %v9960_v38, %v10151_v61  ;;  %v4228_v55 = vshra.s32 %v10149_v58, 16  ;;  %v4033_v48 = vcvt.s32.f32 %v4031_v47 }
 0x592   : > { %6813 = vmatmul.msk.f32.gmra.mxu0 %vm4355_vm15, %v12271_v26  ;;  %v4024_v49 = vsel %vm4023_vm1, %v4019_v30, inf  ;;  %v3972_v30 = vcvt.f32.s32 %v9980_v11 }
 0x593   : > { %4025 = vmin.xlane.f32.xlu0 %v4024_v49  ;;  %v10160_v10 = vcvt.s32.f32 %v4228_v55 }
 0x594   : > { %v3956_v25 = vpop.xlane.xlu0 %3955 }
 0x595   : > { %v3957_v19 = vcvt.f32.s32 %v3956_v25  ;;  %4231 = vmin.xlane.f32.xlu1 %v10160_v10  ;;  %v3973_v25 = vshll.u32 %v3972_v30, 16 }
 0x596   : > { %v3826_v22 = vpop.xlane.xlu2 %3825 }
 0x597   : > { %v10164_v52 = vadd.s32 %v3959_v34, %v3957_v19  ;;  %vm3865_vm2 = vcmp.eq.f32.partialorder %v9972_v4, %v3826_v22  ;;  %v4045_v34 = vand.u32 65535, %v9986_v51 }
 0x598   : > { %v10168_v38 = vsel %vm3865_vm2, %v9805_v16, 128  ;;  %v10170_v31 = vpop.xlane.xlu1 %4035 }
 0x599   : > { %12272 = vst [vmem:[#allocation50_spill] sm:$0xff] %v10164_v52  ;;  %vm4356_vm3 = vcmp.eq.s32.totalorder %v9805_v16, %v10164_v52  ;;  %vm4037_vm4 = vcmp.eq.f32.partialorder %v9977_v36, %v10170_v31  ;;  %v4242_v5 = vshra.s32 %v10168_v38, 16  ;;  %v4047_v30 = vcvt.s32.f32 %v4045_v34  ;;  %v7387_v52 = vld [vmem:[#allocation12 + $0x10] sm:$0xff] }
 0x59a   : > { %6814 = vmatmul.msk.f32.gmra.mxu0 %vm4356_vm3, %v12271_v26  ;;  %v4038_v55 = vsel %vm4037_vm4, %v4033_v48, inf  ;;  %v3986_v48 = vcvt.f32.s32 %v9997_v40 }
 0x59b   : > { %4039 = vmin.xlane.f32.xlu0 %v4038_v55  ;;  %v10179_v49 = vcvt.s32.f32 %v4242_v5 }
 0x59c   : > { %v3970_v4 = vpop.xlane.xlu0 %3969 }
 0x59d   : > { %v3971_v11 = vcvt.f32.s32 %v3970_v4  ;;  %4245 = vmin.xlane.f32.xlu1 %v10179_v49  ;;  %v3987_v4 = vshll.u32 %v3986_v48, 16 }
 0x59e   : > { %v3828_v19 = vpop.xlane.xlu2 %3827 }
 0x59f   : > { %v10183_v47 = vadd.s32 %v3973_v25, %v3971_v11  ;;  %vm3866_vm5 = vcmp.eq.f32.partialorder %v9989_v57, %v3828_v19  ;;  %v4059_v25 = vand.u32 65535, %v10003_v0 }
 0x5a0   : > { %v10187_v36 = vsel %vm3866_vm5, %v9805_v16, 128  ;;  %v10189_v22 = vpop.xlane.xlu1 %4049 }
 0x5a1   : > { %12273 = vst [vmem:[#allocation51_spill] sm:$0xff] %v10183_v47  ;;  %vm4357_vm6 = vcmp.eq.s32.totalorder %v9805_v16, %v10183_v47  ;;  %vm4051_vm8 = vcmp.eq.f32.partialorder %v9994_v2, %v10189_v22  ;;  %v4256_v51 = vshra.s32 %v10187_v36, 16  ;;  %v4061_v48 = vcvt.s32.f32 %v4059_v25 }
 0x5a2   : > { %6815 = vmatmul.msk.f32.gmra.mxu0 %vm4357_vm6, %v12271_v26  ;;  %v4052_v5 = vsel %vm4051_vm8, %v4047_v30, inf  ;;  %v4000_v30 = vcvt.f32.s32 %v10014_v1 }
 0x5a3   : > { %4053 = vmin.xlane.f32.xlu0 %v4052_v5  ;;  %v10198_v55 = vcvt.s32.f32 %v4256_v51 }
 0x5a4   : > { %v3984_v57 = vpop.xlane.xlu0 %3983 }
 0x5a5   : > { %v3985_v40 = vcvt.f32.s32 %v3984_v57  ;;  %4259 = vmin.xlane.f32.xlu1 %v10198_v55  ;;  %v4001_v57 = vshll.u32 %v4000_v30, 16  ;;  %v4087_v30 = vand.u32 65535, %v10032_v3  ;;  %v4115_v3 = vand.u32 65535, %v10056_v46  ;;  %v7381_v46 = vld [vmem:[%s12276_s1 + $0xe4] sm:$0xf] }
 0x5a6   : > { %v3830_v11 = vpop.xlane.xlu2 %3829 }
 0x5a7   : > { %v10202_v34 = vadd.s32 %v3987_v4, %v3985_v40  ;;  %vm3867_vm10 = vcmp.eq.f32.partialorder %v10006_v59, %v3830_v11  ;;  %v4073_v4 = vand.u32 65535, %v10020_v21 }
 0x5a8   : > { %v10206_v2 = vsel %vm3867_vm10, %v9805_v16, 128  ;;  %v10208_v19 = vpop.xlane.xlu1 %4063 }
 0x5a9   : > { %12274 = vst [vmem:[#allocation52_spill] sm:$0xff] %v10202_v34  ;;  %vm4358_vm11 = vcmp.eq.s32.totalorder %v9805_v16, %v10202_v34  ;;  %vm4065_vm12 = vcmp.eq.f32.partialorder %v10011_v37, %v10208_v19  ;;  %v4270_v0 = vshra.s32 %v10206_v2, 16  ;;  %v4075_v37 = vcvt.s32.f32 %v4073_v4 }
 0x5aa   : > { %6816 = vmatmul.msk.f32.gmra.mxu0 %vm4358_vm11, %v12271_v26  ;;  %v4066_v51 = vsel %vm4065_vm12, %v4061_v48, inf  ;;  %v4089_v48 = vcvt.s32.f32 %v4087_v30 }
 0x5ab   : > { %4067 = vmin.xlane.f32.xlu0 %v4066_v51  ;;  %v10217_v5 = vcvt.s32.f32 %v4270_v0  ;;  %v4101_v51 = vand.u32 65535, %v10044_v17  ;;  %v7383_v17 = vld [vmem:[%s12276_s1 + $0xec] sm:$0xf0] }
 0x5ac   : > { %v3998_v59 = vpop.xlane.xlu0 %3997 }
 0x5ad   : > { %v3999_v1 = vcvt.f32.s32 %v3998_v59  ;;  %4273 = vmin.xlane.f32.xlu1 %v10217_v5 }
 0x5af   : > { %v10221_v40 = vadd.s32 %v4001_v57, %v3999_v1  ;;  %v4103_v57 = vcvt.s32.f32 %v4101_v51  ;;  %v4117_v1 = vcvt.s32.f32 %v4115_v3 }
 0x5b0   : > { %v10223_v25 = vpop.xlane.xlu1 %4077 }
 0x5b1   : > { %12275 = vst [vmem:[#allocation53_spill] sm:$0xff] %v10221_v40  ;;  %vm4359_vm13 = vcmp.eq.s32.totalorder %v9805_v16, %v10221_v40  ;;  %vm4079_vm7 = vcmp.eq.f32.partialorder %v10027_v53, %v10223_v25 }
 0x5b2   : > { %6817 = vmatmul.msk.f32.gmra.mxu0 %vm4359_vm13, %v12271_v26  ;;  %v4080_v11 = vsel %vm4079_vm7, %v4075_v37, inf }
 0x5b3   : > { %4081 = vmin.xlane.f32.xlu0 %v4080_v11  ;;  %v6959_v11 = vld [vmem:[%s12276_s1 + $0xf0] sm:$0xf0] }
 0x5b4   : > { %v6962_v30 = vor.u32 %v7381_v46, %v6959_v11 }
 0x5b6   : > { %5079 = vmatpush.bf16.msra.mxu2 %v6962_v30  ;;  %v6925_v30 = vld [vmem:[%s12276_s1 + $0xa0] sm:$0xf] }
 0x5b8   : > { %v10231_v21 = vpop.xlane.xlu1 %4091 }
 0x5b9   : > { %vm4093_vm9 = vcmp.eq.f32.partialorder %v10039_v32, %v10231_v21  ;;  %v6957_v32 = vld [vmem:[%s12276_s1 + $0xe0] sm:$0xf] }
 0x5ba   : > { %v4094_v0 = vsel %vm4093_vm9, %v4089_v48, inf  ;;  %v6965_v48 = vld [vmem:[%s12276_s1 + $0xe8] sm:$0xf] }
 0x5bb   : > { %4095 = vmin.xlane.f32.xlu0 %v4094_v0  ;;  %v7384_v0 = vld [vmem:[%s12276_s1 + $0xf4] sm:$0xf0] }
 0x5bc   : > { %v6966_v51 = vor.u32 %v7384_v0, %v6965_v48  ;;  %v7375_v48 = vld [vmem:[%s12276_s1 + $0xac] sm:$0xf0] }
 0x5be   : > { %5168 = vmatpush.bf16.msra.mxu3 %v6966_v51  ;;  %v6926_v51 = vor.u32 %v7375_v48, %v6925_v30  ;;  %v7372_v30 = vld [vmem:[%s12276_s1 + $0x94] sm:$0xf0] }
 0x5c0   : > { %v10236_v59 = vpop.xlane.xlu1 %4105 }
 0x5c1   : > { %vm4107_vm14 = vcmp.eq.f32.partialorder %v10051_v39, %v10236_v59  ;;  %v6958_v39 = vor.u32 %v7383_v17, %v6957_v32  ;;  %v6949_v32 = vld [vmem:[%s12276_s1 + $0xc8] sm:$0xf]  ;;  %v7380_v17 = vld [vmem:[%s12276_s1 + $0xd4] sm:$0xf0] }
 0x5c2   : > { %v4108_v53 = vsel %vm4107_vm14, %v4103_v57, inf  ;;  %v6941_v57 = vld [vmem:[%s12276_s1 + $0xc0] sm:$0xf] }
 0x5c3   : > { %4109 = vmin.xlane.f32.xlu0 %v4108_v53  ;;  %4990 = vmatpush.bf16.msra.mxu1 %v6958_v39  ;;  %v7377_v53 = vld [vmem:[%s12276_s1 + $0xc4] sm:$0xf]  ;;  %v6950_v39 = vor.u32 %v7380_v17, %v6949_v32  ;;  %v6909_v32 = vld [vmem:[%s12276_s1 + $0x80] sm:$0xf] }
 0x5c4   : > { %v7369_v17 = vld [vmem:[%s12276_s1 + $0x84] sm:$0xf] }
 0x5c5   : > { %5169 = vmatpush.bf16.msra.mxu3 %v6950_v39  ;;  %v6911_v39 = vld [vmem:[%s12276_s1 + $0x90] sm:$0xf0] }
 0x5c6   : > { %v6914_v48 = vor.u32 %v7369_v17, %v6911_v39  ;;  %v4157_v17 = vand.u32 65535, %v10088_v23  ;;  %v6877_v39 = vld [vmem:[%s12276_s1 + $0x40] sm:$0xf]  ;;  %v6879_v23 = vld [vmem:[%s12276_s1 + $0x50] sm:$0xf0] }
 0x5c8   : > { %v10241_v4 = vpop.xlane.xlu1 %4119 }
 0x5c9   : > { %vm4121_vm0 = vcmp.eq.f32.partialorder %v10063_v18, %v10241_v4  ;;  %v4129_v18 = vand.u32 65535, %v10068_v62  ;;  %v7379_v62 = vld [vmem:[%s12276_s1 + $0xcc] sm:$0xf0] }
 0x5ca   : > { %v4122_v37 = vsel %vm4121_vm0, %v4117_v1, inf  ;;  %v6942_v3 = vor.u32 %v7379_v62, %v6941_v57  ;;  %v6943_v1 = vld [vmem:[%s12276_s1 + $0xd0] sm:$0xf0]  ;;  %v4143_v57 = vand.u32 65535, %v10080_v8  ;;  %v7371_v8 = vld [vmem:[%s12276_s1 + $0x8c] sm:$0xf0] }
 0x5cb   : > { %4123 = vmin.xlane.f32.xlu0 %v4122_v37  ;;  %v6946_v37 = vor.u32 %v7377_v53, %v6943_v1  ;;  %v4131_v11 = vcvt.s32.f32 %v4129_v18  ;;  %v7373_v18 = vld [vmem:[%s12276_s1 + $0xa4] sm:$0xf]  ;;  %v6933_v53 = vld [vmem:[%s12276_s1 + $0xa8] sm:$0xf] }
 0x5cc   : > { %4991 = vmatpush.bf16.msra.mxu1 %v6942_v3  ;;  %v7376_v3 = vld [vmem:[%s12276_s1 + $0xb4] sm:$0xf0] }
 0x5cd   : > { %5080 = vmatpush.bf16.msra.mxu2 %v6946_v37  ;;  %v6934_v1 = vor.u32 %v7376_v3, %v6933_v53  ;;  %v6910_v37 = vor.u32 %v7371_v8, %v6909_v32  ;;  %v7365_v53 = vld [vmem:[%s12276_s1 + $0x64] sm:$0xf]  ;;  %v7368_v8 = vld [vmem:[%s12276_s1 + $0x74] sm:$0xf0] }
 0x5cf   : > { %5170 = vmatpush.bf16.msra.mxu3 %v6934_v1  ;;  %v6901_v1 = vld [vmem:[%s12276_s1 + $0x68] sm:$0xf] }
 0x5d0   : > { %v10282_v46 = vpop.xlane.xlu1 %4133  ;;  %4992 = vmatpush.bf16.msra.mxu1 %v6926_v51 }
 0x5d1   : > { %vm4135_vm15 = vcmp.eq.f32.partialorder %v10075_v15, %v10282_v46  ;;  %v6927_v15 = vld [vmem:[%s12276_s1 + $0xb0] sm:$0xf0] }
 0x5d2   : > { %v4136_v0 = vsel %vm4135_vm15, %v4131_v11, inf  ;;  %v6930_v62 = vor.u32 %v7373_v18, %v6927_v15  ;;  %v6917_v11 = vld [vmem:[%s12276_s1 + $0x88] sm:$0xf]  ;;  %v4145_v18 = vcvt.s32.f32 %v4143_v57  ;;  %v6893_v15 = vld [vmem:[%s12276_s1 + $0x60] sm:$0xf] }
 0x5d3   : > { %4137 = vmin.xlane.f32.xlu0 %v4136_v0  ;;  %v6918_v0 = vor.u32 %v7372_v30, %v6917_v11  ;;  %v7363_v11 = vld [vmem:[%s12276_s1 + $0x4c] sm:$0xf0]  ;;  %v7361_v30 = vld [vmem:[%s12276_s1 + $0x44] sm:$0xf] }
 0x5d4   : > { %5081 = vmatpush.bf16.msra.mxu2 %v6930_v62  ;;  %4993 = vmatpush.bf16.msra.mxu1 %v6910_v37  ;;  %v7367_v62 = vld [vmem:[%s12276_s1 + $0x6c] sm:$0xf0]  ;;  %v6902_v37 = vor.u32 %v7368_v8, %v6901_v1  ;;  %v7357_v1 = vld [vmem:[%s12276_s1 + $0x24] sm:$0xf] }
 0x5d5   : > { %5171 = vmatpush.bf16.msra.mxu3 %v6918_v0  ;;  %v6894_v57 = vor.u32 %v7367_v62, %v6893_v15  ;;  %v6885_v0 = vld [vmem:[%s12276_s1 + $0x48] sm:$0xf]  ;;  %v6882_v15 = vor.u32 %v7361_v30, %v6879_v23  ;;  %v6845_v23 = vld [vmem:[%s12276_s1] sm:$0xf] }
 0x5d8   : > { %v10323_v51 = vpop.xlane.xlu1 %4147  ;;  %5082 = vmatpush.bf16.msra.mxu2 %v6914_v48  ;;  %4994 = vmatpush.bf16.msra.mxu1 %v6894_v57  ;;  %v6878_v48 = vor.u32 %v7363_v11, %v6877_v39  ;;  %v6861_v57 = vld [vmem:[%s12276_s1 + $0x20] sm:$0xf]  ;;  %v7360_v39 = vld [vmem:[%s12276_s1 + $0x34] sm:$0xf0]  ;;  %v4171_v11 = vand.u32 65535, %v10096_v50 }
 0x5d9   : > { %vm4149_vm1 = vcmp.eq.f32.partialorder %v10083_v14, %v10323_v51  ;;  %v6895_v14 = vld [vmem:[%s12276_s1 + $0x70] sm:$0xf0]  ;;  %5172 = vmatpush.bf16.msra.mxu3 %v6902_v37 }
 0x5da   : > { %v4150_v3 = vsel %vm4149_vm1, %v4145_v18, inf  ;;  %v6898_v32 = vor.u32 %v7365_v53, %v6895_v14  ;;  %v7364_v18 = vld [vmem:[%s12276_s1 + $0x54] sm:$0xf0]  ;;  %v7359_v14 = vld [vmem:[%s12276_s1 + $0x2c] sm:$0xf0] }
 0x5db   : > { %4151 = vmin.xlane.f32.xlu0 %v4150_v3  ;;  %v6886_v62 = vor.u32 %v7364_v18, %v6885_v0  ;;  %v4159_v3 = vcvt.s32.f32 %v4157_v17  ;;  %v6862_v8 = vor.u32 %v7359_v14, %v6861_v57  ;;  %v6869_v17 = vld [vmem:[%s12276_s1 + $0x28] sm:$0xf]  ;;  %v7355_v0 = vld [vmem:[%s12276_s1 + $0xc] sm:$0xf0]  ;;  %v7353_v18 = vld [vmem:[%s12276_s1 + $0x4] sm:$0xf] }
 0x5dc   : > { %5083 = vmatpush.bf16.msra.mxu2 %v6898_v32  ;;  %4995 = vmatpush.bf16.msra.mxu1 %v6878_v48  ;;  %v6870_v30 = vor.u32 %v7360_v39, %v6869_v17  ;;  %v3832_v48 = vpop.xlane.xlu2 %3831  ;;  %v6847_v50 = vld [vmem:[%s12276_s1 + $0x10] sm:$0xf0] }
 0x5dd   : > { %5173 = vmatpush.bf16.msra.mxu3 %v6886_v62  ;;  %v6853_v62 = vld [vmem:[%s12276_s1 + $0x8] sm:$0xf]  ;;  %v6850_v57 = vor.u32 %v7353_v18, %v6847_v50  ;;  %vm3868_vm4 = vcmp.eq.f32.partialorder %v10023_v44, %v3832_v48  ;;  %v6967_v44 = vld [vmem:[%s12276_s1 + $0xf8] sm:$0xf0] }
 0x5e0   : > { %v10364_v53 = vpop.xlane.xlu1 %4161  ;;  %5084 = vmatpush.bf16.msra.mxu2 %v6882_v15  ;;  %4996 = vmatpush.bf16.msra.mxu1 %v6862_v8  ;;  %v6846_v15 = vor.u32 %v7355_v0, %v6845_v23 }
 0x5e1   : > { %vm4163_vm2 = vcmp.eq.f32.partialorder %v10091_v41, %v10364_v53  ;;  %v6863_v41 = vld [vmem:[%s12276_s1 + $0x30] sm:$0xf0]  ;;  %5174 = vmatpush.bf16.msra.mxu3 %v6870_v30  ;;  %v10416_v30 = vsel %vm3868_vm4, %v9805_v16, 128 }
 0x5e2   : > { %v4164_v32 = vsel %vm4163_vm2, %v4159_v3, inf  ;;  %v6866_v37 = vor.u32 %v7357_v1, %v6863_v41  ;;  %v7356_v3 = vld [vmem:[%s12276_s1 + $0x14] sm:$0xf0]  ;;  %v4185_v41 = vand.u32 65535, %v10104_v7  ;;  %v7382_v7 = vld [vmem:[%s12276_s1 + $0xec] sm:$0xf] }
 0x5e3   : > { %4165 = vmin.xlane.f32.xlu0 %v4164_v32  ;;  %v6854_v14 = vor.u32 %v7356_v3, %v6853_v62  ;;  %v4173_v32 = vcvt.s32.f32 %v4171_v11  ;;  %v6970_v48 = vor.u32 %v7382_v7, %v6967_v44  ;;  %v4284_v23 = vshra.s32 %v10416_v30, 16 }
 0x5e4   : > { %5085 = vmatpush.bf16.msra.mxu2 %v6866_v37  ;;  %4997 = vmatpush.bf16.msra.mxu1 %v6846_v15  ;;  %v3834_v17 = vpop.xlane.xlu2 %3833  ;;  %v4187_v39 = vcvt.s32.f32 %v4185_v41  ;;  %v4014_v62 = vcvt.f32.s32 %v10132_v13  ;;  %v4213_v3 = vand.u32 65535, %v10130_v56 }
 0x5e5   : > { %5175 = vmatpush.bf16.msra.mxu3 %v6854_v14  ;;  %vm3869_vm6 = vcmp.eq.f32.partialorder %v10035_v60, %v3834_v17  ;;  %5257 = vmatpush.bf16.msra.mxu0 %v6970_v48  ;;  %v10434_v15 = vcvt.s32.f32 %v4284_v23  ;;  %v683_v60 = vadd.s32 8, %v8966_v9  ;;  %v12278_v48 = vand.u32 255, %v8966_v9 }
 0x5e7   : > { %v727_v41 = vand.u32 255, %v683_v60 }
 0x5e8   : > { %v10405_v1 = vpop.xlane.xlu1 %4175  ;;  %5086 = vmatpush.bf16.msra.mxu2 %v6850_v57 }
 0x5e9   : > { %vm4177_vm3 = vcmp.eq.f32.partialorder %v10099_v54, %v10405_v1  ;;  %v4199_v54 = vand.u32 65535, %v10115_v42  ;;  %v10432_v42 = vsel %vm3869_vm6, %v9805_v16, 128 }
 0x5ea   : > { %v4178_v8 = vsel %vm4177_vm3, %v4173_v32, inf  ;;  %v4298_v57 = vshra.s32 %v10432_v42, 16  ;;  %v4015_v32 = vshll.u32 %v4014_v62, 16 }
 0x5eb   : > { %4179 = vmin.xlane.f32.xlu0 %v4178_v8  ;;  %v4201_v0 = vcvt.s32.f32 %v4199_v54 }
 0x5ec   : > { %v3836_v18 = vpop.xlane.xlu2 %3835  ;;  %v10446_v13 = vcvt.s32.f32 %v4298_v57 }
 0x5ed   : > { %vm3870_vm10 = vcmp.eq.f32.partialorder %v10047_v27, %v3836_v18  ;;  %v4028_v27 = vcvt.f32.s32 %v10151_v61 }
 0x5ee   : > { %v10455_v56 = vsel %vm3870_vm10, %v9805_v16, 128 }
 0x5ef   : > { %v4312_v23 = vshra.s32 %v10455_v56, 16 }
 0x5f0   : > { %v10411_v37 = vpop.xlane.xlu1 %4189 }
 0x5f1   : > { %vm4191_vm5 = vcmp.eq.f32.partialorder %v10108_v33, %v10411_v37 }
 0x5f2   : > { %v4192_v11 = vsel %vm4191_vm5, %v4187_v39, inf  ;;  %v4215_v39 = vcvt.s32.f32 %v4213_v3 }
 0x5f3   : > { %4193 = vmin.xlane.f32.xlu0 %v4192_v11  ;;  %v10448_v11 = vstv %s4706_s11  ;;  %s12372_s11 = sld [smem:[#allocation85_spill]] }
 0x5f4   : > { %v3838_v7 = vpop.xlane.xlu2 %3837  ;;  %vm4708_vm13 = vcmp.lt.s32.totalorder %v12278_v48, %v10448_v11  ;;  %vm4709_vm7 = vcmp.lt.s32.totalorder %v727_v41, %v10448_v11  ;;  %v685_v41 = vadd.s32 24, %v8966_v9 }
 0x5f5   : > { %vm10470_vm9 = vmpackc.low %vm4709_vm7, %vm4708_vm13  ;;  %vm3871_vm14 = vcmp.eq.f32.partialorder %v10059_v20, %v3838_v7  ;;  %v10491_v20 = vcvt.s32.f32 %v4312_v23 }
 0x5f8   : > { %v10427_v33 = vpop.xlane.xlu1 %4203 }
 0x5f9   : > { %vm4205_vm8 = vcmp.eq.f32.partialorder %v10122_v24, %v10427_v33 }
 0x5fa   : > { %v4206_v50 = vsel %vm4205_vm8, %v4201_v0, inf }
 0x5fb   : > { %4207 = vmin.xlane.f32.xlu2 %v4206_v50  ;;  %4287 = vmin.xlane.f32.xlu0 %v10434_v15  ;;  %v4029_v50 = vshll.u32 %v4028_v27, 16 }
 0x5fe   : > { %v4012_v14 = vpop.xlane.xlu0 %4011 }
 0x5ff   : > { %v10441_v24 = vpop.f32.mrf.mxu0  ;;  %v4013_v8 = vcvt.f32.s32 %v4012_v14  ;;  %v4042_v14 = vcvt.f32.s32 %v10170_v31  ;;  %v4241_v31 = vand.u32 65535, %v10168_v38 }
 0x600   : > { %v10444_v17 = vpop.xlane.xlu1 %4217 }
 0x601   : > { %v10450_v54 = vadd.s32 %v4015_v32, %v4013_v8  ;;  %vm4219_vm11 = vcmp.eq.f32.partialorder %v10141_v12, %v10444_v17  ;;  %v4227_v12 = vand.u32 65535, %v10149_v58  ;;  %v10495_v32 = vsel %vm3871_vm14, %v9805_v16, 128 }
 0x602   : > { %v4220_v44 = vsel %vm4219_vm11, %v4215_v39, inf  ;;  %v3840_v39 = vpop.xlane.xlu2 %3839  ;;  %v4326_v7 = vshra.s32 %v10495_v32, 16 }
 0x603   : > { %12277 = vst [vmem:[#allocation54_spill] sm:$0xff] %v10450_v54  ;;  %4301 = vmin.xlane.f32.xlu2 %v10446_v13  ;;  %4221 = vmin.xlane.f32.xlu1 %v4220_v44  ;;  %vm4360_vm12 = vcmp.eq.s32.totalorder %v9805_v16, %v10450_v54  ;;  %v4229_v3 = vcvt.s32.f32 %v4227_v12  ;;  %v4043_v44 = vshll.u32 %v4042_v14, 16  ;;  %vm3872_vm1 = vcmp.eq.f32.partialorder %v10071_v63, %v3840_v39  ;;  %v7378_v63 = vld [vmem:[%s12276_s1 + $0xcc] sm:$0xf] }
 0x604   : > { %6818 = vmatmul.msk.f32.gmra.mxu0 %vm4360_vm12, %v12271_v26  ;;  %v10515_v38 = vcvt.s32.f32 %v4326_v7  ;;  %v10520_v14 = vsel %vm3872_vm1, %v9805_v16, 128 }
 0x606   : > { %v4026_v0 = vpop.xlane.xlu0 %4025 }
 0x607   : > { %v10468_v18 = vpop.f32.mrf.mxu0  ;;  %v4027_v62 = vcvt.f32.s32 %v4026_v0  ;;  %v741_v0 = vand.u32 255, %v685_v41  ;;  %v4340_v41 = vshra.s32 %v10520_v14, 16 }
 0x608   : > { %v10477_v60 = vpack.c.bf16 %v10468_v18, %v10441_v24  ;;  %v10479_v58 = vpop.xlane.xlu1 %4231 }
 0x609   : > { %v10481_v57 = vadd.s32 %v4029_v50, %v4027_v62  ;;  %vm4233_vm0 = vcmp.eq.f32.partialorder %v10160_v10, %v10479_v58  ;;  %v684_v10 = vadd.s32 16, %v8966_v9  ;;  %v4243_v62 = vcvt.s32.f32 %v4241_v31 }
 0x60a   : > { %6973 = vmatmul.msk.bf16.vlgmr.msra.gmra.mxu1 %vm10470_vm9, %v10477_v60  ;;  %7021 = vmatmul.msk.bf16.vlgmr.msra.gmra.mxu2 %vm10470_vm9, %v10477_v60  ;;  %v4234_v8 = vsel %vm4233_vm0, %v4229_v3, inf  ;;  %vm4711_vm5 = vcmp.lt.s32.totalorder %v741_v0, %v10448_v11 }
 0x60b   : > { %12281 = vst [vmem:[#allocation55_spill] sm:$0xff] %v10481_v57  ;;  %7069 = vmatmul.msk.bf16.vlgmr.msra.gmra.mxu3 %vm10470_vm9, %v10477_v60  ;;  %4235 = vmin.xlane.f32.xlu0 %v4234_v8  ;;  %vm4361_vm15 = vcmp.eq.s32.totalorder %v9805_v16, %v10481_v57  ;;  %v734_v23 = vand.u32 255, %v684_v10  ;;  %v4056_v57 = vcvt.f32.s32 %v10189_v22  ;;  %v4255_v22 = vand.u32 65535, %v10187_v36 }
 0x60c   : > { %4315 = vmin.xlane.f32.xlu1 %v10491_v20  ;;  %6819 = vmatmul.msk.f32.gmra.mxu0 %vm4361_vm15, %v12271_v26 }
 0x60d   : > { %vm4710_vm4 = vcmp.lt.s32.totalorder %v734_v23, %v10448_v11  ;;  %v4257_v23 = vcvt.s32.f32 %v4255_v22 }
 0x60e   : > { %v4040_v27 = vpop.xlane.xlu0 %4039  ;;  %vm10539_vm6 = vmpackc.low %vm4711_vm5, %vm4710_vm4 }
 0x60f   : > { %v10508_v48 = vpop.f32.mrf.mxu0  ;;  %v4041_v12 = vcvt.f32.s32 %v4040_v27 }
 0x610   : > { %v10511_v50 = vpop.xlane.xlu1 %4245 }
 0x611   : > { %v10513_v3 = vadd.s32 %v4043_v44, %v4041_v12  ;;  %vm4247_vm2 = vcmp.eq.f32.partialorder %v10179_v49, %v10511_v50  ;;  %v6951_v49 = vld [vmem:[%s12276_s1 + $0xd8] sm:$0xf0]  ;;  %v4057_v44 = vshll.u32 %v4056_v57, 16  ;;  %v10559_v57 = vcvt.s32.f32 %v4340_v41 }
 0x612   : > { %v4248_v8 = vsel %vm4247_vm2, %v4243_v62, inf  ;;  %v6954_v10 = vor.u32 %v7378_v63, %v6951_v49  ;;  %v686_v63 = vadd.s32 32, %v8966_v9  ;;  %v687_v49 = vadd.s32 40, %v8966_v9 }
 0x613   : > { %12282 = vst [vmem:[#allocation56_spill] sm:$0xff] %v10513_v3  ;;  %4329 = vmin.xlane.f32.xlu0 %v10515_v38  ;;  %4249 = vmin.xlane.f32.xlu2 %v4248_v8  ;;  %vm4362_vm3 = vcmp.eq.s32.totalorder %v9805_v16, %v10513_v3  ;;  %v4070_v8 = vcvt.f32.s32 %v10208_v19 }
 0x614   : > { %6820 = vmatmul.msk.f32.gmra.mxu0 %vm4362_vm3, %v12271_v26  ;;  %v748_v19 = vand.u32 255, %v686_v63 }
 0x615   : > { %5258 = vmatpush.bf16.msra.mxu0 %v6954_v10  ;;  %v4071_v41 = vshll.u32 %v4070_v8, 16 }
 0x616   : > { %v4054_v31 = vpop.xlane.xlu0 %4053  ;;  %vm4712_vm13 = vcmp.lt.s32.totalorder %v748_v19, %v10448_v11 }
 0x617   : > { %v10537_v39 = vpop.f32.mrf.mxu0  ;;  %v4055_v27 = vcvt.f32.s32 %v4054_v31 }
 0x618   : > { %v10545_v12 = vpack.c.bf16 %v10537_v39, %v10508_v48  ;;  %v10547_v36 = vpop.xlane.xlu1 %4259 }
 0x619   : > { %v10549_v0 = vadd.s32 %v4057_v44, %v4055_v27  ;;  %vm4261_vm8 = vcmp.eq.f32.partialorder %v10198_v55, %v10547_v36  ;;  %v4269_v55 = vand.u32 65535, %v10206_v2  ;;  %v755_v44 = vand.u32 255, %v687_v49 }
 0x61a   : > { %6976 = vmatmul.msk.bf16.gmra.mxu1 %vm10539_vm6, %v10545_v12  ;;  %7024 = vmatmul.msk.bf16.gmra.mxu2 %vm10539_vm6, %v10545_v12  ;;  %v4262_v62 = vsel %vm4261_vm8, %v4257_v23, inf  ;;  %v4084_v2 = vcvt.f32.s32 %v10223_v25 }
 0x61b   : > { %12285 = vst [vmem:[#allocation57_spill] sm:$0xff] %v10549_v0  ;;  %7072 = vmatmul.msk.bf16.gmra.mxu3 %vm10539_vm6, %v10545_v12  ;;  %4263 = vmin.xlane.f32.xlu1 %v4262_v62  ;;  %vm4363_vm10 = vcmp.eq.s32.totalorder %v9805_v16, %v10549_v0  ;;  %v4271_v23 = vcvt.s32.f32 %v4269_v55  ;;  %vm4713_vm7 = vcmp.lt.s32.totalorder %v755_v44, %v10448_v11 }
 0x61c   : > { %4343 = vmin.xlane.f32.xlu2 %v10559_v57  ;;  %6821 = vmatmul.msk.f32.gmra.mxu0 %vm4363_vm10, %v12271_v26  ;;  %vm10588_vm14 = vmpackc.low %vm4713_vm7, %vm4712_vm13 }
 0x61e   : > { %v4068_v22 = vpop.xlane.xlu0 %4067 }
 0x61f   : > { %v10572_v10 = vpop.f32.mrf.mxu0  ;;  %v4069_v31 = vcvt.f32.s32 %v4068_v22  ;;  %v4098_v22 = vcvt.f32.s32 %v10231_v21  ;;  %v6935_v21 = vld [vmem:[%s12276_s1 + $0xb8] sm:$0xf0] }
 0x620   : > { %v10574_v27 = vpop.xlane.xlu1 %4273 }
 0x621   : > { %v10576_v62 = vadd.s32 %v4071_v41, %v4069_v31  ;;  %vm4275_vm11 = vcmp.eq.f32.partialorder %v10217_v5, %v10574_v27  ;;  %v4085_v5 = vshll.u32 %v4084_v2, 16  ;;  %v4099_v31 = vshll.u32 %v4098_v22, 16  ;;  %v7374_v2 = vld [vmem:[%s12276_s1 + $0xac] sm:$0xf] }
 0x622   : > { %v4276_v0 = vsel %vm4275_vm11, %v4271_v23, inf  ;;  %v4112_v23 = vcvt.f32.s32 %v10236_v59  ;;  %v4126_v59 = vcvt.f32.s32 %v10241_v4 }
 0x623   : > { %12286 = vst [vmem:[#allocation58_spill] sm:$0xff] %v10576_v62  ;;  %4277 = vmin.xlane.f32.xlu0 %v4276_v0  ;;  %vm4364_vm12 = vcmp.eq.s32.totalorder %v9805_v16, %v10576_v62 }
 0x624   : > { %6822 = vmatmul.msk.f32.gmra.mxu0 %vm4364_vm12, %v12271_v26 }
 0x626   : > { %v4082_v8 = vpop.xlane.xlu0 %4081 }
 0x627   : > { %v10586_v63 = vpop.f32.mrf.mxu0  ;;  %v4083_v55 = vcvt.f32.s32 %v4082_v8  ;;  %v6938_v8 = vor.u32 %v7374_v2, %v6935_v21  ;;  %v4140_v2 = vcvt.f32.s32 %v10282_v46 }
 0x628   : > { %v10594_v25 = vpack.c.bf16 %v10586_v63, %v10572_v10 }
 0x629   : > { %v10596_v0 = vadd.s32 %v4085_v5, %v4083_v55  ;;  %5259 = vmatpush.bf16.msra.mxu0 %v6938_v8  ;;  %v4113_v55 = vshll.u32 %v4112_v23, 16  ;;  %v4141_v21 = vshll.u32 %v4140_v2, 16 }
 0x62a   : > { %6979 = vmatmul.msk.bf16.gmra.mxu1 %vm10588_vm14, %v10594_v25  ;;  %7027 = vmatmul.msk.bf16.gmra.mxu2 %vm10588_vm14, %v10594_v25 }
 0x62b   : > { %12289 = vst [vmem:[#allocation59_spill] sm:$0xff] %v10596_v0  ;;  %7075 = vmatmul.msk.bf16.gmra.mxu3 %vm10588_vm14, %v10594_v25  ;;  %vm4365_vm0 = vcmp.eq.s32.totalorder %v9805_v16, %v10596_v0 }
 0x62c   : > { %6823 = vmatmul.msk.f32.gmra.mxu0 %vm4365_vm0, %v12271_v26 }
 0x62e   : > { %v4096_v41 = vpop.xlane.xlu0 %4095 }
 0x62f   : > { %v4097_v19 = vcvt.f32.s32 %v4096_v41 }
 0x631   : > { %v10611_v44 = vadd.s32 %v4099_v31, %v4097_v19  ;;  %v4127_v19 = vshll.u32 %v4126_v59, 16  ;;  %v7370_v59 = vld [vmem:[%s12276_s1 + $0x8c] sm:$0xf] }
 0x633   : > { %12290 = vst [vmem:[#allocation60_spill] sm:$0xff] %v10611_v44  ;;  %vm4366_vm15 = vcmp.eq.s32.totalorder %v9805_v16, %v10611_v44 }
 0x634   : > { %6824 = vmatmul.msk.f32.gmra.mxu0 %vm4366_vm15, %v12271_v26 }
 0x636   : > { %v4110_v5 = vpop.xlane.xlu0 %4109 }
 0x637   : > { %v4111_v22 = vcvt.f32.s32 %v4110_v5  ;;  %v4154_v5 = vcvt.f32.s32 %v10323_v51  ;;  %v4168_v51 = vcvt.f32.s32 %v10364_v53 }
 0x639   : > { %v10623_v41 = vadd.s32 %v4113_v55, %v4111_v22  ;;  %v4155_v55 = vshll.u32 %v4154_v5, 16  ;;  %v4182_v5 = vcvt.f32.s32 %v10405_v1 }
 0x63b   : > { %12291 = vst [vmem:[#allocation61_spill] sm:$0xff] %v10623_v41  ;;  %vm4367_vm1 = vcmp.eq.s32.totalorder %v9805_v16, %v10623_v41  ;;  %v7413_v41 = vld [vmem:[#allocation12 + $0xe0] sm:$0xff] }
 0x63c   : > { %6825 = vmatmul.msk.f32.gmra.mxu0 %vm4367_vm1, %v12271_v26 }
 0x63e   : > { %v4124_v31 = vpop.xlane.xlu0 %4123 }
 0x63f   : > { %v4125_v44 = vcvt.f32.s32 %v4124_v31  ;;  %v6919_v31 = vld [vmem:[%s12276_s1 + $0x98] sm:$0xf0] }
 0x641   : > { %v10629_v0 = vadd.s32 %v4127_v19, %v4125_v44  ;;  %v6922_v19 = vor.u32 %v7370_v59, %v6919_v31  ;;  %v4196_v59 = vcvt.f32.s32 %v10411_v37 }
 0x643   : > { %12292 = vst [vmem:[#allocation62_spill] sm:$0xff] %v10629_v0  ;;  %vm4368_vm2 = vcmp.eq.s32.totalorder %v9805_v16, %v10629_v0  ;;  %5260 = vmatpush.bf16.msra.mxu0 %v6922_v19  ;;  %v7405_v0 = vld [vmem:[#allocation12 + $0xa0] sm:$0xff] }
 0x644   : > { %6826 = vmatmul.msk.f32.gmra.mxu0 %vm4368_vm2, %v12271_v26 }
 0x646   : > { %v4138_v23 = vpop.xlane.xlu0 %4137 }
 0x647   : > { %v4139_v4 = vcvt.f32.s32 %v4138_v23  ;;  %v4169_v23 = vshll.u32 %v4168_v51, 16  ;;  %v4197_v51 = vshll.u32 %v4196_v59, 16 }
 0x649   : > { %v10635_v8 = vadd.s32 %v4141_v21, %v4139_v4 }
 0x64b   : > { %12293 = vst [vmem:[#allocation63_spill] sm:$0xff] %v10635_v8  ;;  %vm4369_vm3 = vcmp.eq.s32.totalorder %v9805_v16, %v10635_v8 }
 0x64c   : > { %6827 = vmatmul.msk.f32.gmra.mxu0 %vm4369_vm3, %v12271_v26 }
 0x64e   : > { %v4152_v44 = vpop.xlane.xlu0 %4151 }
 0x64f   : > { %v4153_v46 = vcvt.f32.s32 %v4152_v44  ;;  %v4183_v44 = vshll.u32 %v4182_v5, 16 }
 0x651   : > { %v10641_v22 = vadd.s32 %v4155_v55, %v4153_v46 }
 0x653   : > { %12294 = vst [vmem:[#allocation64_spill] sm:$0xff] %v10641_v22  ;;  %vm4370_vm4 = vcmp.eq.s32.totalorder %v9805_v16, %v10641_v22  ;;  %v12341_v22 = vld [vmem:[#allocation33_spill] sm:$0xff] }
 0x654   : > { %6828 = vmatmul.msk.f32.gmra.mxu0 %vm4370_vm4, %v12271_v26 }
 0x656   : > { %v4166_v2 = vpop.xlane.xlu0 %4165 }
 0x657   : > { %v4167_v21 = vcvt.f32.s32 %v4166_v2  ;;  %v4283_v2 = vand.u32 65535, %v10416_v30  ;;  %v4297_v30 = vand.u32 65535, %v10432_v42 }
 0x659   : > { %v10653_v4 = vadd.s32 %v4169_v23, %v4167_v21  ;;  %v4210_v23 = vcvt.f32.s32 %v10427_v33  ;;  %v4224_v33 = vcvt.f32.s32 %v10444_v17  ;;  %v688_v17 = vadd.s32 48, %v8966_v9 }
 0x65b   : > { %12295 = vst [vmem:[#allocation65_spill] sm:$0xff] %v10653_v4  ;;  %vm4371_vm5 = vcmp.eq.s32.totalorder %v9805_v16, %v10653_v4  ;;  %v4211_v21 = vshll.u32 %v4210_v23, 16  ;;  %v689_v23 = vadd.s32 56, %v8966_v9 }
 0x65c   : > { %6829 = vmatmul.msk.f32.gmra.mxu0 %vm4371_vm5, %v12271_v26 }
 0x65e   : > { %v4180_v53 = vpop.xlane.xlu0 %4179 }
 0x65f   : > { %v4181_v55 = vcvt.f32.s32 %v4180_v53 }
 0x661   : > { %v10659_v46 = vadd.s32 %v4183_v44, %v4181_v55  ;;  %v4285_v44 = vcvt.s32.f32 %v4283_v2 }
 0x663   : > { %12296 = vst [vmem:[#allocation66_spill] sm:$0xff] %v10659_v46  ;;  %vm4372_vm8 = vcmp.eq.s32.totalorder %v9805_v16, %v10659_v46 }
 0x664   : > { %6830 = vmatmul.msk.f32.gmra.mxu0 %vm4372_vm8, %v12271_v26 }
 0x666   : > { %v4194_v31 = vpop.xlane.xlu0 %4193 }
 0x667   : > { %v4195_v1 = vcvt.f32.s32 %v4194_v31  ;;  %v7366_v31 = vld [vmem:[%s12276_s1 + $0x6c] sm:$0xf] }
 0x669   : > { %v10665_v19 = vadd.s32 %v4197_v51, %v4195_v1  ;;  %v4299_v1 = vcvt.s32.f32 %v4297_v30  ;;  %v4311_v30 = vand.u32 65535, %v10455_v56 }
 0x66b   : > { %12297 = vst [vmem:[#allocation67_spill] sm:$0xff] %v10665_v19  ;;  %vm4373_vm10 = vcmp.eq.s32.totalorder %v9805_v16, %v10665_v19 }
 0x66c   : > { %6831 = vmatmul.msk.f32.gmra.mxu0 %vm4373_vm10, %v12271_v26 }
 0x66e   : > { %v4208_v37 = vpop.xlane.xlu2 %4207  ;;  %v10672_v5 = vpop.xlane.xlu0 %4287 }
 0x66f   : > { %v4209_v53 = vcvt.f32.s32 %v4208_v37  ;;  %vm4289_vm11 = vcmp.eq.f32.partialorder %v10434_v15, %v10672_v5  ;;  %v6903_v15 = vld [vmem:[%s12276_s1 + $0x78] sm:$0xf0]  ;;  %v4225_v37 = vshll.u32 %v4224_v33, 16 }
 0x670   : > { %v4290_v59 = vsel %vm4289_vm11, %v4285_v44, inf  ;;  %v6906_v42 = vor.u32 %v7366_v31, %v6903_v15  ;;  %v10695_v44 = vpop.f32.mrf.mxu0  ;;  %v762_v31 = vand.u32 255, %v688_v17  ;;  %v769_v15 = vand.u32 255, %v689_v23  ;;  %v7389_v23 = vld [vmem:[#allocation12 + $0x20] sm:$0xff] }
 0x671   : > { %v10676_v55 = vadd.s32 %v4211_v21, %v4209_v53  ;;  %4291 = vmin.xlane.f32.xlu1 %v4290_v59 }
 0x672   : > { %5261 = vmatpush.bf16.msra.mxu0 %v6906_v42  ;;  %vm4714_vm0 = vcmp.lt.s32.totalorder %v762_v31, %v10448_v11  ;;  %vm4715_vm15 = vcmp.lt.s32.totalorder %v769_v15, %v10448_v11 }
 0x673   : > { %12298 = vst [vmem:[#allocation68_spill] sm:$0xff] %v10676_v55  ;;  %vm4374_vm12 = vcmp.eq.s32.totalorder %v9805_v16, %v10676_v55  ;;  %v4238_v55 = vcvt.f32.s32 %v10479_v58  ;;  %vm10714_vm2 = vmpackc.low %vm4715_vm15, %vm4714_vm0 }
 0x674   : > { %6832 = vmatmul.msk.f32.gmra.mxu0 %vm4374_vm12, %v12271_v26 }
 0x675   : > { %v4239_v42 = vshll.u32 %v4238_v55, 16  ;;  %v4252_v55 = vcvt.f32.s32 %v10511_v50 }
 0x676   : > { %v10689_v51 = vpop.xlane.xlu2 %4301  ;;  %v4222_v2 = vpop.xlane.xlu1 %4221 }
 0x677   : > { %vm4303_vm13 = vcmp.eq.f32.partialorder %v10446_v13, %v10689_v51  ;;  %v4223_v21 = vcvt.f32.s32 %v4222_v2  ;;  %v4253_v31 = vshll.u32 %v4252_v55, 16 }
 0x678   : > { %v4304_v53 = vsel %vm4303_vm13, %v4299_v1, inf  ;;  %v4313_v1 = vcvt.s32.f32 %v4311_v30  ;;  %v691_v30 = vadd.s32 72, %v8966_v9 }
 0x679   : > { %4305 = vmin.xlane.f32.xlu2 %v4304_v53  ;;  %v10697_v59 = vadd.s32 %v4225_v37, %v4223_v21  ;;  %v4325_v37 = vand.u32 65535, %v10495_v32  ;;  %v690_v53 = vadd.s32 64, %v8966_v9 }
 0x67b   : > { %12299 = vst [vmem:[#allocation69_spill] sm:$0xff] %v10697_v59  ;;  %vm4375_vm7 = vcmp.eq.s32.totalorder %v9805_v16, %v10697_v59  ;;  %v4327_v50 = vcvt.s32.f32 %v4325_v37  ;;  %v4266_v37 = vcvt.f32.s32 %v10547_v36  ;;  %v7391_v59 = vld [vmem:[#allocation12 + $0x30] sm:$0xff] }
 0x67c   : > { %6833 = vmatmul.msk.f32.gmra.mxu0 %vm4375_vm7, %v12271_v26 }
 0x67e   : > { %v4236_v13 = vpop.xlane.xlu0 %4235 }
 0x67f   : > { %v10704_v33 = vpop.xlane.xlu1 %4315  ;;  %v4237_v2 = vcvt.f32.s32 %v4236_v13 }
 0x680   : > { %vm4317_vm1 = vcmp.eq.f32.partialorder %v10491_v20, %v10704_v33 }
 0x681   : > { %v4318_v56 = vsel %vm4317_vm1, %v4313_v1, inf  ;;  %v10710_v58 = vadd.s32 %v4239_v42, %v4237_v2  ;;  %v10712_v17 = vpop.f32.mrf.mxu0  ;;  %v4339_v2 = vand.u32 65535, %v10520_v14 }
 0x682   : > { %4319 = vmin.xlane.f32.xlu0 %v4318_v56  ;;  %v10721_v21 = vpack.c.bf16 %v10712_v17, %v10695_v44  ;;  %v776_v56 = vand.u32 255, %v690_v53 }
 0x683   : > { %12300 = vst [vmem:[#allocation70_spill] sm:$0xff] %v10710_v58  ;;  %vm4376_vm3 = vcmp.eq.s32.totalorder %v9805_v16, %v10710_v58  ;;  %v783_v58 = vand.u32 255, %v691_v30  ;;  %v12345_v30 = vld [vmem:[#allocation34_spill] sm:$0xff] }
 0x684   : > { %6834 = vmatmul.msk.f32.gmra.mxu0 %vm4376_vm3, %v12271_v26  ;;  %6982 = vmatmul.msk.bf16.gmra.mxu1 %vm10714_vm2, %v10721_v21  ;;  %vm4716_vm8 = vcmp.lt.s32.totalorder %v776_v56, %v10448_v11  ;;  %v692_v56 = vadd.s32 80, %v8966_v9 }
 0x685   : > { %7030 = vmatmul.msk.bf16.gmra.mxu2 %vm10714_vm2, %v10721_v21  ;;  %7078 = vmatmul.msk.bf16.gmra.mxu3 %vm10714_vm2, %v10721_v21  ;;  %vm4717_vm10 = vcmp.lt.s32.totalorder %v783_v58, %v10448_v11  ;;  %v7362_v58 = vld [vmem:[%s12276_s1 + $0x4c] sm:$0xf] }
 0x686   : > { %v10736_v20 = vpop.xlane.xlu0 %4329  ;;  %v4250_v32 = vpop.xlane.xlu2 %4249  ;;  %vm10759_vm12 = vmpackc.low %vm4717_vm10, %vm4716_vm8 }
 0x687   : > { %v4251_v15 = vcvt.f32.s32 %v4250_v32  ;;  %vm4331_vm4 = vcmp.eq.f32.partialorder %v10515_v38, %v10736_v20  ;;  %v4341_v38 = vcvt.s32.f32 %v4339_v2 }
 0x688   : > { %v4332_v13 = vsel %vm4331_vm4, %v4327_v50, inf  ;;  %v4267_v50 = vshll.u32 %v4266_v37, 16  ;;  %v693_v37 = vadd.s32 88, %v8966_v9 }
 0x689   : > { %v10742_v1 = vadd.s32 %v4253_v31, %v4251_v15  ;;  %v10744_v42 = vpop.f32.mrf.mxu0  ;;  %4333 = vmin.xlane.f32.xlu1 %v4332_v13  ;;  %v4280_v13 = vcvt.f32.s32 %v10574_v27 }
 0x68b   : > { %12303 = vst [vmem:[#allocation71_spill] sm:$0xff] %v10742_v1  ;;  %vm4377_vm5 = vcmp.eq.s32.totalorder %v9805_v16, %v10742_v1  ;;  %v7392_v1 = vld [vmem:[#allocation12 + $0x38] sm:$0xff] }
 0x68c   : > { %6835 = vmatmul.msk.f32.gmra.mxu0 %vm4377_vm5, %v12271_v26  ;;  %5798 = vmatpush.bf16.msrb.mxu1 %v7392_v1 }
 0x68e   : > { %v4264_v55 = vpop.xlane.xlu1 %4263 }
 0x68f   : > { %v10751_v32 = vpop.xlane.xlu2 %4343  ;;  %v4265_v31 = vcvt.f32.s32 %v4264_v55  ;;  %v4281_v55 = vshll.u32 %v4280_v13, 16 }
 0x690   : > { %vm4345_vm11 = vcmp.eq.f32.partialorder %v10559_v57, %v10751_v32  ;;  %v6887_v57 = vld [vmem:[%s12276_s1 + $0x58] sm:$0xf0]  ;;  %5799 = vmatpush.bf16.msrb.mxu1 %v7391_v59 }
 0x691   : > { %v4346_v14 = vsel %vm4345_vm11, %v4341_v38, inf  ;;  %v10757_v36 = vadd.s32 %v4267_v50, %v4265_v31  ;;  %v4509_v53 = vpop.f32.mrf.mxu0  ;;  %v6890_v2 = vor.u32 %v7362_v58, %v6887_v57  ;;  %v797_v58 = vand.u32 255, %v693_v37  ;;  %v7412_v37 = vld [vmem:[#allocation12 + $0xd8] sm:$0xff] }
 0x692   : > { %4347 = vmin.xlane.f32.xlu2 %v4346_v14  ;;  %v10764_v15 = vpack.c.bf16 %v4509_v53, %v10744_v42  ;;  %v790_v14 = vand.u32 255, %v692_v56 }
 0x693   : > { %12304 = vst [vmem:[#allocation72_spill] sm:$0xff] %v10757_v36  ;;  %vm4378_vm13 = vcmp.eq.s32.totalorder %v9805_v16, %v10757_v36  ;;  %5262 = vmatpush.bf16.msra.mxu0 %v6890_v2  ;;  %vm4719_vm15 = vcmp.lt.s32.totalorder %v797_v58, %v10448_v11  ;;  %v695_v2 = vadd.s32 104, %v8966_v9  ;;  %v7408_v36 = vld [vmem:[#allocation12 + $0xb8] sm:$0xff] }
 0x694   : > { %6836 = vmatmul.msk.f32.gmra.mxu0 %vm4378_vm13, %v12271_v26  ;;  %6985 = vmatmul.msk.bf16.gmra.mxu1 %vm10759_vm12, %v10764_v15  ;;  %vm4718_vm0 = vcmp.lt.s32.totalorder %v790_v14, %v10448_v11 }
 0x695   : > { %7033 = vmatmul.msk.bf16.gmra.mxu2 %vm10759_vm12, %v10764_v15  ;;  %7081 = vmatmul.msk.bf16.gmra.mxu3 %vm10759_vm12, %v10764_v15  ;;  %vm10798_vm1 = vmpackc.low %vm4719_vm15, %vm4718_vm0  ;;  %v811_v56 = vand.u32 255, %v695_v2 }
 0x696   : > { %4578 = vrot.lane.b32.xlu0 %v10441_v24, %s7828_s14  ;;  %v4278_v27 = vpop.xlane.xlu0 %4277  ;;  %5976 = vmatpush.bf16.msrb.mxu3 %v7408_v36 }
 0x697   : > { %v4279_v38 = vcvt.f32.s32 %v4278_v27  ;;  %vm4721_vm4 = vcmp.lt.s32.totalorder %v811_v56, %v10448_v11 }
 0x699   : > { %v10789_v50 = vadd.s32 %v4281_v55, %v4279_v38  ;;  %v4512_v31 = vpop.f32.mrf.mxu0 }
 0x69b   : > { %12307 = vst [vmem:[#allocation73_spill] sm:$0xff] %v10789_v50  ;;  %vm4379_vm7 = vcmp.eq.s32.totalorder %v9805_v16, %v10789_v50  ;;  %v7400_v50 = vld [vmem:[#allocation12 + $0x78] sm:$0xff] }
 0x69c   : > { %6837 = vmatmul.msk.f32.gmra.mxu0 %vm4379_vm7, %v12271_v26  ;;  %5887 = vmatpush.bf16.msrb.mxu2 %v7400_v50  ;;  %v704_v50 = vadd.s32 176, %v8966_v9 }
 0x69e   : > { %4584 = vrot.lane.b32.xlu0 %v10537_v39, %s7828_s14  ;;  %v694_v39 = vadd.s32 96, %v8966_v9 }
 0x6a0   : > { %v804_v27 = vand.u32 255, %v694_v39 }
 0x6a1   : > { %v4515_v24 = vpop.f32.mrf.mxu0 }
 0x6a2   : > { %v10802_v13 = vpack.c.bf16 %v4515_v24, %v4512_v31  ;;  %4580 = vrot.lane.b32.xlu1 %v10468_v18, %s7828_s14  ;;  %vm4720_vm3 = vcmp.lt.s32.totalorder %v804_v27, %v10448_v11 }
 0x6a3   : > { %vm10828_vm5 = vmpackc.low %vm4721_vm4, %vm4720_vm3 }
 0x6a4   : > { %6988 = vmatmul.msk.bf16.gmra.mxu1 %vm10798_vm1, %v10802_v13 }
 0x6a5   : > { %7036 = vmatmul.msk.bf16.gmra.mxu2 %vm10798_vm1, %v10802_v13  ;;  %7084 = vmatmul.msk.bf16.gmra.mxu3 %vm10798_vm1, %v10802_v13 }
 0x6a6   : > { %4590 = vrot.lane.b32.xlu0 %v10695_v44, %s7828_s14 }
 0x6a9   : > { %v4518_v18 = vpop.f32.mrf.mxu0 }
 0x6aa   : > { %4582 = vrot.lane.b32.xlu2 %v10508_v48, %s7828_s14  ;;  %4588 = vrot.lane.b32.xlu1 %v10586_v63, %s7828_s14  ;;  %v7358_v63 = vld [vmem:[%s12276_s1 + $0x2c] sm:$0xf] }
 0x6ae   : > { %4596 = vrot.lane.b32.xlu0 %v4509_v53, %s7828_s14  ;;  %v6871_v53 = vld [vmem:[%s12276_s1 + $0x38] sm:$0xf0] }
 0x6af   : > { %v6874_v55 = vor.u32 %v7358_v63, %v6871_v53 }
 0x6b1   : > { %v4521_v44 = vpop.f32.mrf.mxu0  ;;  %5263 = vmatpush.bf16.msra.mxu0 %v6874_v55 }
 0x6b2   : > { %4586 = vrot.lane.b32.xlu2 %v10572_v10, %s7828_s14  ;;  %v10832_v48 = vpack.c.bf16 %v4521_v44, %v4518_v18  ;;  %4594 = vrot.lane.b32.xlu1 %v10744_v42, %s7828_s14  ;;  %v696_v10 = vadd.s32 112, %v8966_v9  ;;  %v697_v42 = vadd.s32 120, %v8966_v9 }
 0x6b4   : > { %6991 = vmatmul.msk.bf16.gmra.mxu1 %vm10828_vm5, %v10832_v48  ;;  %v818_v14 = vand.u32 255, %v696_v10  ;;  %v825_v58 = vand.u32 255, %v697_v42  ;;  %v6855_v10 = vld [vmem:[%s12276_s1 + $0x18] sm:$0xf0] }
 0x6b5   : > { %7039 = vmatmul.msk.bf16.gmra.mxu2 %vm10828_vm5, %v10832_v48  ;;  %7087 = vmatmul.msk.bf16.gmra.mxu3 %vm10828_vm5, %v10832_v48 }
 0x6b6   : > { %4602 = vrot.lane.b32.xlu0 %v4518_v18, %s7828_s14  ;;  %vm4722_vm8 = vcmp.lt.s32.totalorder %v818_v14, %v10448_v11  ;;  %vm4723_vm10 = vcmp.lt.s32.totalorder %v825_v58, %v10448_v11  ;;  %v701_v14 = vadd.s32 152, %v8966_v9 }
 0x6b7   : > { %vm10860_vm11 = vmpackc.low %vm4723_vm10, %vm4722_vm8 }
 0x6b9   : > { %v4524_v38 = vpop.f32.mrf.mxu0 }
 0x6ba   : > { %4592 = vrot.lane.b32.xlu2 %v10712_v17, %s7828_s14  ;;  %4600 = vrot.lane.b32.xlu1 %v4515_v24, %s7828_s14  ;;  %v698_v17 = vadd.s32 128, %v8966_v9 }
 0x6bc   : > { %v832_v27 = vand.u32 255, %v698_v17  ;;  %v853_v17 = vand.u32 255, %v701_v14  ;;  %v4308_v14 = vcvt.f32.s32 %v10689_v51  ;;  %v4322_v51 = vcvt.f32.s32 %v10704_v33  ;;  %v7416_v33 = vld [vmem:[#allocation12 + $0xf8] sm:$0xff] }
 0x6be   : > { %vm4724_vm13 = vcmp.lt.s32.totalorder %v832_v27, %v10448_v11  ;;  %vm4727_vm3 = vcmp.lt.s32.totalorder %v853_v17, %v10448_v11  ;;  %v4323_v1 = vshll.u32 %v4322_v51, 16 }
 0x6c1   : > { %v4527_v39 = vpop.f32.mrf.mxu0 }
 0x6c2   : > { %4598 = vrot.lane.b32.xlu2 %v4512_v31, %s7828_s14  ;;  %v10864_v18 = vpack.c.bf16 %v4527_v39, %v4524_v38  ;;  %4608 = vrot.lane.b32.xlu0 %v4527_v39, %s7828_s14  ;;  %v699_v31 = vadd.s32 136, %v8966_v9 }
 0x6c3   : > { %4606 = vrot.lane.b32.xlu1 %v4524_v38, %s7828_s14  ;;  %v700_v38 = vadd.s32 144, %v8966_v9 }
 0x6c4   : > { %6994 = vmatmul.msk.bf16.gmra.mxu1 %vm10860_vm11, %v10864_v18  ;;  %v839_v56 = vand.u32 255, %v699_v31  ;;  %v4294_v31 = vcvt.f32.s32 %v10672_v5 }
 0x6c5   : > { %7042 = vmatmul.msk.bf16.gmra.mxu2 %vm10860_vm11, %v10864_v18  ;;  %7090 = vmatmul.msk.bf16.gmra.mxu3 %vm10860_vm11, %v10864_v18  ;;  %v846_v39 = vand.u32 255, %v700_v38 }
 0x6c6   : > { %vm4725_vm7 = vcmp.lt.s32.totalorder %v839_v56, %v10448_v11 }
 0x6c7   : > { %vm10883_vm0 = vmpackc.low %vm4725_vm7, %vm4724_vm13  ;;  %vm4726_vm15 = vcmp.lt.s32.totalorder %v846_v39, %v10448_v11 }
 0x6c8   : > { %vm10911_vm4 = vmpackc.low %vm4727_vm3, %vm4726_vm15 }
 0x6c9   : > { %v4530_v24 = vpop.f32.mrf.mxu0 }
 0x6ca   : > { %4604 = vrot.lane.b32.xlu2 %v4521_v44, %s7828_s14  ;;  %v7354_v44 = vld [vmem:[%s12276_s1 + $0xc] sm:$0xf] }
 0x6cb   : > { %v6858_v42 = vor.u32 %v7354_v44, %v6855_v10  ;;  %v4295_v44 = vshll.u32 %v4294_v31, 16  ;;  %v702_v10 = vadd.s32 160, %v8966_v9 }
 0x6cd   : > { %5264 = vmatpush.bf16.msra.mxu0 %v6858_v42  ;;  %v703_v42 = vadd.s32 168, %v8966_v9  ;;  %v860_v39 = vand.u32 255, %v702_v10 }
 0x6cf   : > { %v867_v17 = vand.u32 255, %v703_v42  ;;  %vm4728_vm10 = vcmp.lt.s32.totalorder %v860_v39, %v10448_v11 }
 0x6d1   : > { %v4533_v63 = vpop.f32.mrf.mxu0  ;;  %vm4729_vm13 = vcmp.lt.s32.totalorder %v867_v17, %v10448_v11  ;;  %6065 = vmatpush.bf16.msrb.mxu0 %v7416_v33  ;;  %v4336_v17 = vcvt.f32.s32 %v10736_v20  ;;  %v4350_v20 = vcvt.f32.s32 %v10751_v32 }
 0x6d2   : > { %4610 = vrot.lane.b32.xlu2 %v4530_v24, %s7828_s14  ;;  %v10887_v55 = vpack.c.bf16 %v4533_v63, %v4530_v24  ;;  %4612 = vrot.lane.b32.xlu1 %v4533_v63, %s7828_s14  ;;  %vm10943_vm15 = vmpackc.low %vm4729_vm13, %vm4728_vm10 }
 0x6d4   : > { %6997 = vmatmul.msk.bf16.gmra.mxu1 %vm10883_vm0, %v10887_v55 }
 0x6d5   : > { %7045 = vmatmul.msk.bf16.gmra.mxu2 %vm10883_vm0, %v10887_v55  ;;  %7093 = vmatmul.msk.bf16.gmra.mxu3 %vm10883_vm0, %v10887_v55 }
 0x6d9   : > { %v4536_v58 = vpop.f32.mrf.mxu0 }
 0x6da   : > { %4614 = vrot.lane.b32.xlu0 %v4536_v58, %s7828_s14 }
 0x6e1   : > { %v4539_v24 = vpop.f32.mrf.mxu0 }
 0x6e2   : > { %v10915_v56 = vpack.c.bf16 %v4539_v24, %v4536_v58  ;;  %4616 = vrot.lane.b32.xlu2 %v4539_v24, %s7828_s14  ;;  %v4309_v24 = vshll.u32 %v4308_v14, 16 }
 0x6e4   : > { %7000 = vmatmul.msk.bf16.gmra.mxu1 %vm10911_vm4, %v10915_v56  ;;  %v4292_v63 = vpop.xlane.xlu1 %4291 }
 0x6e5   : > { %7048 = vmatmul.msk.bf16.gmra.mxu2 %vm10911_vm4, %v10915_v56  ;;  %7096 = vmatmul.msk.bf16.gmra.mxu3 %vm10911_vm4, %v10915_v56  ;;  %v4293_v5 = vcvt.f32.s32 %v4292_v63 }
 0x6e7   : > { %v10929_v38 = vadd.s32 %v4295_v44, %v4293_v5 }
 0x6e9   : > { %12318 = vst [vmem:[#allocation74_spill] sm:$0xff] %v10929_v38  ;;  %v4542_v58 = vpop.f32.mrf.mxu0  ;;  %vm4380_vm8 = vcmp.eq.s32.totalorder %v9805_v16, %v10929_v38  ;;  %v7407_v38 = vld [vmem:[#allocation12 + $0xb0] sm:$0xff] }
 0x6ea   : > { %4618 = vrot.lane.b32.xlu1 %v4542_v58, %s7828_s14  ;;  %6838 = vmatmul.msk.f32.gmra.mxu0 %vm4380_vm8, %v12271_v26 }
 0x6eb   : > { %5977 = vmatpush.bf16.msrb.mxu3 %v7407_v38 }
 0x6ec   : > { %v4306_v31 = vpop.xlane.xlu2 %4305 }
 0x6ed   : > { %v4307_v63 = vcvt.f32.s32 %v4306_v31 }
 0x6ef   : > { %v10936_v44 = vadd.s32 %v4309_v24, %v4307_v63  ;;  %v874_v24 = vand.u32 255, %v704_v50 }
 0x6f1   : > { %12319 = vst [vmem:[#allocation75_spill] sm:$0xff] %v10936_v44  ;;  %vm4381_vm7 = vcmp.eq.s32.totalorder %v9805_v16, %v10936_v44  ;;  %v4545_v5 = vpop.f32.mrf.mxu0  ;;  %vm4730_vm8 = vcmp.lt.s32.totalorder %v874_v24, %v10448_v11  ;;  %v706_v24 = vadd.s32 192, %v8966_v9 }
 0x6f2   : > { %v10947_v42 = vpack.c.bf16 %v4545_v5, %v4542_v58  ;;  %4620 = vrot.lane.b32.xlu0 %v4545_v5, %s7828_s14  ;;  %6839 = vmatmul.msk.f32.gmra.mxu0 %vm4381_vm7, %v12271_v26  ;;  %v705_v58 = vadd.s32 184, %v8966_v9  ;;  %v4337_v5 = vshll.u32 %v4336_v17, 16 }
 0x6f4   : > { %7003 = vmatmul.msk.bf16.gmra.mxu1 %vm10943_vm15, %v10947_v42  ;;  %v881_v63 = vand.u32 255, %v705_v58  ;;  %v4351_v58 = vshll.u32 %v4350_v20, 16  ;;  %v11007_v20 = vpop.f32.mrf.mxu3 }
 0x6f5   : > { %v4320_v14 = vpop.xlane.xlu0 %4319  ;;  %7051 = vmatmul.msk.bf16.gmra.mxu2 %vm10943_vm15, %v10947_v42  ;;  %7099 = vmatmul.msk.bf16.gmra.mxu3 %vm10943_vm15, %v10947_v42 }
 0x6f6   : > { %v4321_v36 = vcvt.f32.s32 %v4320_v14  ;;  %vm4731_vm10 = vcmp.lt.s32.totalorder %v881_v63, %v10448_v11  ;;  %v707_v63 = vadd.s32 200, %v8966_v9 }
 0x6f7   : > { %vm10976_vm7 = vmpackc.low %vm4731_vm10, %vm4730_vm8 }
 0x6f8   : > { %v10962_v39 = vadd.s32 %v4323_v1, %v4321_v36 }
 0x6f9   : > { %v4548_v31 = vpop.f32.mrf.mxu0 }
 0x6fa   : > { %12322 = vst [vmem:[#allocation76_spill] sm:$0xff] %v10962_v39  ;;  %vm4382_vm3 = vcmp.eq.s32.totalorder %v9805_v16, %v10962_v39  ;;  %4622 = vrot.lane.b32.xlu2 %v4548_v31, %s7828_s14  ;;  %v7399_v39 = vld [vmem:[#allocation12 + $0x70] sm:$0xff] }
 0x6fb   : > { %6840 = vmatmul.msk.f32.gmra.mxu0 %vm4382_vm3, %v12271_v26  ;;  %5888 = vmatpush.bf16.msrb.mxu2 %v7399_v39 }
 0x6fc   : > { %v4334_v51 = vpop.xlane.xlu1 %4333  ;;  %v11034_v59 = vpop.f32.mrf.mxu3 }
 0x6fd   : > { %v4335_v14 = vcvt.f32.s32 %v4334_v51  ;;  %v10997_v51 = vpop.f32.mrf.mxu2 }
 0x6ff   : > { %v10971_v1 = vadd.s32 %v4337_v5, %v4335_v14 }
 0x701   : > { %12323 = vst [vmem:[#allocation77_spill] sm:$0xff] %v10971_v1  ;;  %v4551_v36 = vpop.f32.mrf.mxu0  ;;  %vm4383_vm13 = vcmp.eq.s32.totalorder %v9805_v16, %v10971_v1 }
 0x702   : > { %v10980_v50 = vpack.c.bf16 %v4551_v36, %v4548_v31  ;;  %4624 = vrot.lane.b32.xlu1 %v4551_v36, %s7828_s14  ;;  %v10993_v31 = vpop.f32.mrf.mxu1 }
 0x703   : > { %6841 = vmatmul.msk.f32.gmra.mxu0 %vm4383_vm13, %v12271_v26 }
 0x704   : > { %7006 = vmatmul.msk.bf16.gmra.mxu1 %vm10976_vm7, %v10980_v50 }
 0x705   : > { %v4348_v32 = vpop.xlane.xlu2 %4347  ;;  %7054 = vmatmul.msk.bf16.gmra.mxu2 %vm10976_vm7, %v10980_v50  ;;  %7102 = vmatmul.msk.bf16.gmra.mxu3 %vm10976_vm7, %v10980_v50 }
 0x706   : > { %v4349_v17 = vcvt.f32.s32 %v4348_v32 }
 0x708   : > { %v10999_v5 = vadd.s32 %v4351_v58, %v4349_v17  ;;  %v4579_v14 = vpop.permute.xlu0 %4578  ;;  %v888_v58 = vand.u32 255, %v706_v24  ;;  %v895_v17 = vand.u32 255, %v707_v63  ;;  %v11021_v24 = vpop.f32.mrf.mxu2 }
 0x709   : > { %v4642_v36 = vadd.f32 %v4579_v14, %v9619_v28  ;;  %v4554_v32 = vpop.f32.mrf.mxu0 }
 0x70a   : > { %12326 = vst [vmem:[#allocation78_spill] sm:$0xff] %v10999_v5  ;;  %vm4384_vm3 = vcmp.eq.s32.totalorder %v9805_v16, %v10999_v5  ;;  %4626 = vrot.lane.b32.xlu0 %v4554_v32, %s7828_s14  ;;  %vm4732_vm8 = vcmp.lt.s32.totalorder %v888_v58, %v10448_v11  ;;  %vm4733_vm10 = vcmp.lt.s32.totalorder %v895_v17, %v10448_v11  ;;  %v11019_v28 = vpop.f32.mrf.mxu1  ;;  %v12333_v5 = vld [vmem:[#allocation30_spill] sm:$0xff]  ;;  %v7395_v16 = vld [vmem:[#allocation12 + $0x50] sm:$0xff] }
 0x70b   : > { %6842 = vmatmul.msk.f32.gmra.mxu0 %vm4384_vm3, %v12271_v26  ;;  %4674 = vst [vmem:[%s11005_s27] sm:$0xff] %v4642_v36  ;;  %vm11024_vm13 = vmpackc.low %vm4733_vm10, %vm4732_vm8 }
 0x70d   : > { %v4583_v1 = vpop.permute.xlu2 %4582 }
 0x70e   : > { %v4644_v44 = vadd.f32 %v4583_v1, %v9632_v45 }
 0x710   : > { %4676 = vst [vmem:[%s11005_s27 + $0x10] sm:$0xff] %v4644_v44  ;;  %v4585_v26 = vpop.permute.xlu0 %4584  ;;  %v11057_v58 = vpop.f32.mrf.mxu2 }
 0x711   : > { %v4645_v63 = vadd.f32 %v4585_v26, %v9637_v29  ;;  %v4557_v45 = vpop.f32.mrf.mxu0  ;;  %v11060_v26 = vpop.f32.mrf.mxu3 }
 0x712   : > { %v11028_v14 = vpack.c.bf16 %v4557_v45, %v4554_v32  ;;  %4628 = vrot.lane.b32.xlu2 %v4557_v45, %s7828_s14  ;;  %v11055_v32 = vpop.f32.mrf.mxu1 }
 0x713   : > { %7117 = vmatmul.msk.bf16.vlgmr.msra.gmra.mxu0 %vm10470_vm9, %v10477_v60  ;;  %4677 = vst [vmem:[%s11005_s27 + $0x18] sm:$0xff] %v4645_v63  ;;  %v7415_v60 = vld [vmem:[#allocation12 + $0xf0] sm:$0xff] }
 0x714   : > { %v4581_v38 = vpop.permute.xlu1 %4580  ;;  %7009 = vmatmul.msk.bf16.gmra.mxu1 %vm11024_vm13, %v11028_v14  ;;  %6066 = vmatpush.bf16.msrb.mxu0 %v7415_v60  ;;  %v12330_v63 = vld [vmem:[#allocation21_spill] sm:$0xff] }
 0x715   : > { %v4587_v29 = vpop.permute.xlu2 %4586  ;;  %v4643_v44 = vadd.f32 %v4581_v38, %v9624_v43  ;;  %7057 = vmatmul.msk.bf16.gmra.mxu2 %vm11024_vm13, %v11028_v14  ;;  %7105 = vmatmul.msk.bf16.gmra.mxu3 %vm11024_vm13, %v11028_v14  ;;  %v12331_v38 = vld [vmem:[#allocation31_spill] sm:$0xff] }
 0x716   : > { %v4646_v61 = vadd.f32 %v4587_v29, %v9645_v6 }
 0x717   : > { %4675 = vst [vmem:[%s11005_s27 + $0x8] sm:$0xff] %v4643_v44  ;;  %v12332_v44 = vld [vmem:[#allocation22_spill] sm:$0xff] }
 0x718   : > { %4678 = vst [vmem:[%s11005_s27 + $0x20] sm:$0xff] %v4646_v61  ;;  %v4591_v39 = vpop.permute.xlu0 %4590 }
 0x719   : > { %v4648_v36 = vadd.f32 %v4591_v39, %v9658_v35  ;;  %v11051_v43 = vpop.f32.mrf.mxu0 }
 0x71a   : > { %4630 = vrot.lane.b32.xlu1 %v11051_v43, %s7828_s14 }
 0x71b   : > { %4680 = vst [vmem:[%s11005_s27 + $0x30] sm:$0xff] %v4648_v36  ;;  %v11071_v36 = vpop.f32.mrf.mxu1 }
 0x71c   : > { %v4589_v6 = vpop.permute.xlu1 %4588 }
 0x71d   : > { %v4593_v17 = vpop.permute.xlu2 %4592  ;;  %v4647_v45 = vadd.f32 %v4589_v6, %v12330_v63  ;;  %v12334_v63 = vld [vmem:[#allocation26_spill] sm:$0xff] }
 0x71e   : > { %v4649_v35 = vadd.f32 %v4593_v17, %v12331_v38  ;;  %v11075_v17 = vpop.f32.mrf.mxu2 }
 0x71f   : > { %4679 = vst [vmem:[%s11005_s27 + $0x28] sm:$0xff] %v4647_v45  ;;  %v11077_v45 = vpop.f32.mrf.mxu3 }
 0x720   : > { %4681 = vst [vmem:[%s11005_s27 + $0x38] sm:$0xff] %v4649_v35  ;;  %v4597_v29 = vpop.permute.xlu0 %4596  ;;  %v12335_v35 = vld [vmem:[#allocation27_spill] sm:$0xff] }
 0x721   : > { %v4651_v61 = vadd.f32 %v4597_v29, %v12332_v44  ;;  %v7398_v44 = vld [vmem:[#allocation12 + $0x68] sm:$0xff] }
 0x722   : > { %5889 = vmatpush.bf16.msrb.mxu2 %v7398_v44 }
 0x723   : > { %7120 = vmatmul.msk.bf16.gmra.mxu0 %vm10539_vm6, %v10545_v12  ;;  %4683 = vst [vmem:[%s11005_s27 + $0x48] sm:$0xff] %v4651_v61  ;;  %v12336_v61 = vld [vmem:[#allocation24_spill] sm:$0xff]  ;;  %v11085_v4 = vpop.f32.mrf.mxu1 }
 0x724   : > { %v4595_v60 = vpop.permute.xlu1 %4594 }
 0x725   : > { %v4599_v39 = vpop.permute.xlu2 %4598  ;;  %v4650_v6 = vadd.f32 %v4595_v60, %v12333_v5  ;;  %v12337_v5 = vld [vmem:[#allocation25_spill] sm:$0xff] }
 0x726   : > { %v4652_v19 = vadd.f32 %v4599_v39, %v12334_v63  ;;  %v7406_v39 = vld [vmem:[#allocation12 + $0xa8] sm:$0xff] }
 0x727   : > { %4682 = vst [vmem:[%s11005_s27 + $0x40] sm:$0xff] %v4650_v6  ;;  %v7390_v63 = vld [vmem:[#allocation12 + $0x28] sm:$0xff]  ;;  %5978 = vmatpush.bf16.msrb.mxu3 %v7406_v39  ;;  %v11091_v6 = vpop.f32.mrf.mxu3 }
 0x728   : > { %4684 = vst [vmem:[%s11005_s27 + $0x50] sm:$0xff] %v4652_v19  ;;  %v4603_v38 = vpop.permute.xlu0 %4602  ;;  %5800 = vmatpush.bf16.msrb.mxu1 %v7390_v63  ;;  %v11088_v19 = vpop.f32.mrf.mxu2 }
 0x729   : > { %v4654_v7 = vadd.f32 %v4603_v38, %v12335_v35 }
 0x72b   : > { %4686 = vst [vmem:[%s11005_s27 + $0x60] sm:$0xff] %v4654_v7  ;;  %v12338_v7 = vld [vmem:[#allocation29_spill] sm:$0xff]  ;;  %5979 = vmatpush.bf16.msrb.mxu3 %v7405_v0 }
 0x72c   : > { %v4601_v12 = vpop.permute.xlu1 %4600  ;;  %5801 = vmatpush.bf16.msrb.mxu1 %v7389_v23 }
 0x72d   : > { %v4605_v29 = vpop.permute.xlu2 %4604  ;;  %v4653_v46 = vadd.f32 %v4601_v12, %v12336_v61  ;;  %v7414_v61 = vld [vmem:[#allocation12 + $0xe8] sm:$0xff] }
 0x72e   : > { %v4655_v60 = vadd.f32 %v4605_v29, %v12337_v5  ;;  %v12339_v29 = vld [vmem:[#allocation20_spill] sm:$0xff]  ;;  %6067 = vmatpush.bf16.msrb.mxu0 %v7414_v61 }
 0x72f   : > { %4685 = vst [vmem:[%s11005_s27 + $0x58] sm:$0xff] %v4653_v46  ;;  %v12340_v5 = vld [vmem:[#allocation28_spill] sm:$0xff] }
 0x730   : > { %4687 = vst [vmem:[%s11005_s27 + $0x68] sm:$0xff] %v4655_v60  ;;  %v11101_v60 = vpop.f32.mrf.mxu1  ;;  %v11104_v49 = vpop.f32.mrf.mxu2 }
 0x732   : > { %6068 = vmatpush.bf16.msrb.mxu0 %v7413_v41 }
 0x733   : > { %7123 = vmatmul.msk.bf16.gmra.mxu0 %vm10588_vm14, %v10594_v25  ;;  %v11106_v25 = vpop.f32.mrf.mxu3 }
 0x734   : > { %v4609_v38 = vpop.permute.xlu0 %4608 }
 0x735   : > { %v4607_v35 = vpop.permute.xlu1 %4606  ;;  %v4657_v12 = vadd.f32 %v4609_v38, %v12338_v7  ;;  %v4611_v44 = vpop.permute.xlu2 %4610 }
 0x736   : > { %v4656_v46 = vadd.f32 %v4607_v35, %v12339_v29  ;;  %v4658_v39 = vadd.f32 %v4611_v44, %v12340_v5  ;;  %6069 = vmatpush.bf16.msrb.mxu0 %v7412_v37 }
 0x737   : > { %4689 = vst [vmem:[%s11005_s27 + $0x78] sm:$0xff] %v4657_v12 }
 0x738   : > { %4688 = vst [vmem:[%s11005_s27 + $0x70] sm:$0xff] %v4656_v46  ;;  %v11110_v35 = vpop.f32.mrf.mxu1  ;;  %v11112_v7 = vpop.f32.mrf.mxu2  ;;  %v12342_v46 = vld [vmem:[#allocation19_spill] sm:$0xff] }
 0x739   : > { %4690 = vst [vmem:[%s11005_s27 + $0x80] sm:$0xff] %v4658_v39  ;;  %v7397_v39 = vld [vmem:[#allocation12 + $0x60] sm:$0xff] }
 0x73a   : > { %5890 = vmatpush.bf16.msrb.mxu2 %v7397_v39  ;;  %v709_v39 = vadd.s32 216, %v8966_v9 }
 0x73b   : > { %v11117_v12 = vpop.f32.mrf.mxu3 }
 0x73d   : > { %v4617_v63 = vpop.permute.xlu2 %4616 }
 0x73e   : > { %v4661_v38 = vadd.f32 %v4617_v63, %v12341_v22 }
 0x740   : > { %4693 = vst [vmem:[%s11005_s27 + $0x98] sm:$0xff] %v4661_v38  ;;  %v11121_v61 = vpop.f32.mrf.mxu1  ;;  %v11123_v5 = vpop.f32.mrf.mxu2  ;;  %v12343_v38 = vld [vmem:[#allocation32_spill] sm:$0xff] }
 0x743   : > { %7126 = vmatmul.msk.bf16.gmra.mxu0 %vm10714_vm2, %v10721_v21  ;;  %v11125_v63 = vpop.f32.mrf.mxu3 }
 0x744   : > { %v4613_v29 = vpop.permute.xlu1 %4612 }
 0x745   : > { %v4659_v44 = vadd.f32 %v4613_v29, %v12342_v46  ;;  %v12344_v46 = vld [vmem:[#allocation36_spill] sm:$0xff] }
 0x747   : > { %4691 = vst [vmem:[%s11005_s27 + $0x88] sm:$0xff] %v4659_v44 }
 0x748   : > { %v11132_v29 = vpop.f32.mrf.mxu1  ;;  %v11135_v62 = vpop.f32.mrf.mxu2 }
 0x74c   : > { %v4615_v22 = vpop.permute.xlu0 %4614 }
 0x74d   : > { %v4660_v8 = vadd.f32 %v4615_v22, %v12343_v38  ;;  %v11137_v22 = vpop.f32.mrf.mxu3 }
 0x74f   : > { %4692 = vst [vmem:[%s11005_s27 + $0x90] sm:$0xff] %v4660_v8  ;;  %v708_v8 = vadd.s32 208, %v8966_v9 }
 0x750   : > { %v11143_v38 = vpop.f32.mrf.mxu1  ;;  %v11146_v23 = vpop.f32.mrf.mxu2 }
 0x753   : > { %7129 = vmatmul.msk.bf16.gmra.mxu0 %vm10759_vm12, %v10764_v15 }
 0x754   : > { %v4623_v21 = vpop.permute.xlu2 %4622 }
 0x755   : > { %v4664_v44 = vadd.f32 %v4623_v21, %v12344_v46  ;;  %v902_v21 = vand.u32 255, %v708_v8  ;;  %v909_v46 = vand.u32 255, %v709_v39  ;;  %v11148_v3 = vpop.f32.mrf.mxu3 }
 0x757   : > { %4696 = vst [vmem:[%s11005_s27 + $0xb0] sm:$0xff] %v4664_v44  ;;  %vm4734_vm9 = vcmp.lt.s32.totalorder %v902_v21, %v10448_v11  ;;  %vm4735_vm6 = vcmp.lt.s32.totalorder %v909_v46, %v10448_v11  ;;  %v12346_v44 = vld [vmem:[#allocation35_spill] sm:$0xff]  ;;  %v711_v21 = vadd.s32 232, %v8966_v9  ;;  %v7396_v46 = vld [vmem:[#allocation12 + $0x58] sm:$0xff] }
 0x758   : > { %vm11157_vm14 = vmpackc.low %vm4735_vm6, %vm4734_vm9  ;;  %v11165_v57 = vpop.f32.mrf.mxu1  ;;  %5891 = vmatpush.bf16.msrb.mxu2 %v7396_v46 }
 0x759   : > { %v923_v47 = vand.u32 255, %v711_v21  ;;  %v7402_v21 = vld [vmem:[#allocation12 + $0x88] sm:$0xff] }
 0x75b   : > { %vm4737_vm12 = vcmp.lt.s32.totalorder %v923_v47, %v10448_v11 }
 0x75c   : > { %v4619_v0 = vpop.permute.xlu1 %4618  ;;  %5892 = vmatpush.bf16.msrb.mxu2 %v7395_v16 }
 0x75d   : > { %v4662_v15 = vadd.f32 %v4619_v0, %v12345_v30  ;;  %v11175_v39 = vpop.f32.mrf.mxu3 }
 0x75e   : > { %12352 = vst [vmem:[#allocation30_spill] sm:$0xff] %v11175_v39  ;;  %v7403_v39 = vld [vmem:[#allocation12 + $0x90] sm:$0xff] }
 0x75f   : > { %4694 = vst [vmem:[%s11005_s27 + $0xa0] sm:$0xff] %v4662_v15  ;;  %v12347_v15 = vmov 0 }
 0x760   : > { %v12348_v15 = vsel %vm11157_vm14, 4294967295, %v12347_v15  ;;  %v11188_v46 = vpop.f32.mrf.mxu1 }
 0x761   : > { %12349 = vst [vmem:[#allocation21_spill] sm:$0xff] %v12348_v15 }
 0x763   : > { %7132 = vmatmul.msk.bf16.gmra.mxu0 %vm10798_vm1, %v10802_v13  ;;  %v11167_v13 = vpop.f32.mrf.mxu2 }
 0x764   : > { %v4621_v41 = vpop.permute.xlu0 %4620  ;;  %12351 = vst [vmem:[#allocation22_spill] sm:$0xff] %v11167_v13 }
 0x765   : > { %v4663_v0 = vadd.f32 %v4621_v41, %v12346_v44  ;;  %v7404_v41 = vld [vmem:[#allocation12 + $0x98] sm:$0xff]  ;;  %v11194_v16 = vpop.f32.mrf.mxu3 }
 0x766   : > { %5980 = vmatpush.bf16.msrb.mxu3 %v7404_v41 }
 0x767   : > { %4695 = vst [vmem:[%s11005_s27 + $0xa8] sm:$0xff] %v4663_v0  ;;  %v4563_v30 = vpop.f32.mrf.mxu0  ;;  %v7388_v0 = vld [vmem:[#allocation12 + $0x18] sm:$0xff] }
 0x768   : > { %v11162_v8 = vpack.c.bf16 %v4563_v30, %v11051_v43  ;;  %4632 = vrot.lane.b32.xlu0 %v4563_v30, %s7828_s14  ;;  %v710_v43 = vadd.s32 224, %v8966_v9  ;;  %v12353_v30 = vld [vmem:[#allocation39_spill] sm:$0xff]  ;;  %5802 = vmatpush.bf16.msrb.mxu1 %v7388_v0 }
 0x76a   : > { %12350 = vst [vmem:[#allocation31_spill] sm:$0xff] %v11162_v8  ;;  %7012 = vmatmul.msk.bf16.gmra.mxu1 %vm11157_vm14, %v11162_v8  ;;  %7060 = vmatmul.msk.bf16.gmra.mxu2 %vm11157_vm14, %v11162_v8  ;;  %v916_v34 = vand.u32 255, %v710_v43  ;;  %v7394_v43 = vld [vmem:[#allocation12 + $0x48] sm:$0xff] }
 0x76b   : > { %7108 = vmatmul.msk.bf16.gmra.mxu3 %vm11157_vm14, %v11162_v8  ;;  %v11192_v41 = vpop.f32.mrf.mxu2  ;;  %5893 = vmatpush.bf16.msrb.mxu2 %v7394_v43  ;;  %v11215_v43 = vpop.f32.mrf.mxu1 }
 0x76c   : > { %v4629_v44 = vpop.permute.xlu2 %4628  ;;  %5981 = vmatpush.bf16.msrb.mxu3 %v7403_v39  ;;  %5803 = vmatpush.bf16.msrb.mxu1 %v7387_v52  ;;  %vm4736_vm2 = vcmp.lt.s32.totalorder %v916_v34, %v10448_v11  ;;  %v12354_v39 = vld [vmem:[#allocation37_spill] sm:$0xff]  ;;  %v12355_v52 = vmov 0  ;;  %v7385_v34 = vld [vmem:[#allocation12] sm:$0xff]  ;;  %12359 = vst [vmem:[#allocation24_spill] sm:$0xff] %v11215_v43 }
 0x76d   : > { %v4667_v54 = vadd.f32 %v4629_v44, %v12353_v30  ;;  %vm11197_vm1 = vmpackc.low %vm4737_vm12, %vm4736_vm2  ;;  %v7401_v30 = vld [vmem:[#allocation12 + $0x80] sm:$0xff] }
 0x76e   : > { %v12356_v52 = vsel %vm11197_vm1, 4294967295, %v12355_v52 }
 0x76f   : > { %4699 = vst [vmem:[%s11005_s27 + $0xc8] sm:$0xff] %v4667_v54  ;;  %v4566_v40 = vpop.f32.mrf.mxu0  ;;  %v7386_v54 = vld [vmem:[#allocation12 + $0x8] sm:$0xff] }
 0x770   : > { %4634 = vrot.lane.b32.xlu2 %v4566_v40, %s7828_s14  ;;  %5982 = vmatpush.bf16.msrb.mxu3 %v7402_v21  ;;  %12357 = vst [vmem:[#allocation26_spill] sm:$0xff] %v12356_v52  ;;  %v12360_v21 = vld [vmem:[#allocation38_spill] sm:$0xff] }
 0x771   : > { %5804 = vmatpush.bf16.msrb.mxu1 %v7386_v54 }
 0x773   : > { %7135 = vmatmul.msk.bf16.gmra.mxu0 %vm10828_vm5, %v10832_v48  ;;  %v7393_v48 = vld [vmem:[#allocation12 + $0x40] sm:$0xff] }
 0x774   : > { %v4625_v44 = vpop.permute.xlu1 %4624  ;;  %5894 = vmatpush.bf16.msrb.mxu2 %v7393_v48  ;;  %5983 = vmatpush.bf16.msrb.mxu3 %v7401_v30  ;;  %v11231_v48 = vpop.f32.mrf.mxu1 }
 0x775   : > { %v4665_v0 = vadd.f32 %v4625_v44, %v12354_v39  ;;  %5805 = vmatpush.bf16.msrb.mxu1 %v7385_v34  ;;  %v11218_v39 = vpop.f32.mrf.mxu2  ;;  %12365 = vst [vmem:[#allocation20_spill] sm:$0xff] %v11231_v48 }
 0x776   : > { %12361 = vst [vmem:[#allocation25_spill] sm:$0xff] %v11218_v39 }
 0x777   : > { %4697 = vst [vmem:[%s11005_s27 + $0xb8] sm:$0xff] %v4665_v0  ;;  %v11220_v0 = vpop.f32.mrf.mxu3 }
 0x778   : > { %v4569_v47 = vpop.f32.mrf.mxu0  ;;  %12362 = vst [vmem:[#allocation29_spill] sm:$0xff] %v11220_v0 }
 0x779   : > { %v11202_v15 = vpack.c.bf16 %v4569_v47, %v4566_v40  ;;  %4636 = vrot.lane.b32.xlu1 %v4569_v47, %s7828_s14  ;;  %v712_v40 = vadd.s32 240, %v8966_v9  ;;  %v12363_v9 = vld [vmem:[#allocation23_spill] sm:$0xff] }
 0x77a   : > { %v12364_v34 = vand.u32 255, %v12363_v9 }
 0x77b   : > { %12358 = vst [vmem:[#allocation27_spill] sm:$0xff] %v11202_v15  ;;  %7015 = vmatmul.msk.bf16.gmra.mxu1 %vm11197_vm1, %v11202_v15  ;;  %7063 = vmatmul.msk.bf16.gmra.mxu2 %vm11197_vm1, %v11202_v15  ;;  %v930_v47 = vand.u32 255, %v712_v40 }
 0x77c   : > { %7111 = vmatmul.msk.bf16.gmra.mxu3 %vm11197_vm1, %v11202_v15  ;;  %v4627_v54 = vpop.permute.xlu0 %4626  ;;  %vm4739_vm3 = vcmp.lt.s32.totalorder %v12364_v34, %v10448_v11 }
 0x77d   : > { %v4666_v44 = vadd.f32 %v4627_v54, %v12360_v21  ;;  %vm4738_vm5 = vcmp.lt.s32.totalorder %v930_v47, %v10448_v11  ;;  %v12366_v54 = vmov 0  ;;  %v11237_v21 = vpop.f32.mrf.mxu2  ;;  %v4820_v11 = vld [vmem:[%s12372_s11] sm:$0xf] }
 0x77e   : > { %vm11233_vm8 = vmpackc.low %vm4739_vm3, %vm4738_vm5  ;;  %12369 = vst [vmem:[#allocation33_spill] sm:$0xff] %v11237_v21  ;;  %v11257_v47 = vperm.slane %v4820_v11, 0  ;;  %v11259_v9 = vperm.slane %v4820_v11, 1  ;;  %v11261_v34 = vperm.slane %v4820_v11, 2 }
 0x77f   : > { %4698 = vst [vmem:[%s11005_s27 + $0xc0] sm:$0xff] %v4666_v44  ;;  %v12367_v54 = vsel %vm11233_vm8, 4294967295, %v12366_v54  ;;  %v11242_v2 = vpop.f32.mrf.mxu3  ;;  %v12373_v44 = vld [vmem:[#allocation40_spill] sm:$0xff] }
 0x780   : > { %v4572_v37 = vpop.f32.mrf.mxu0  ;;  %12368 = vst [vmem:[#allocation28_spill] sm:$0xff] %v12367_v54  ;;  %v5002_v0 = vadd.f32 %v11019_v28, %v11257_v47  ;;  %v5091_v52 = vadd.f32 %v11021_v24, %v11259_v9  ;;  %v5180_v54 = vadd.f32 %v11034_v59, %v11261_v34  ;;  %v7411_v28 = vld [vmem:[#allocation12 + $0xd0] sm:$0xff]  ;;  %v5178_v24 = vadd.f32 %v11007_v20, %v11261_v34 }
 0x781   : > { %4638 = vrot.lane.b32.xlu0 %v4572_v37, %s7828_s14  ;;  %12371 = vst [vmem:[#allocation32_spill] sm:$0xff] %v11242_v2  ;;  %6070 = vmatpush.bf16.msrb.mxu0 %v7411_v28 }
 0x782   : > { %v5351_v39 = vmax.f32 %v5091_v52, 0.0 }
 0x783   : > { %7138 = vmatmul.msk.bf16.gmra.mxu0 %vm10860_vm11, %v10864_v18 }
 0x785   : > { %v11276_v15 = vpop.f32.mrf.mxu2 }
 0x786   : > { %12375 = vst [vmem:[#allocation34_spill] sm:$0xff] %v11276_v15 }
 0x787   : > { %v11285_v59 = vpop.f32.mrf.mxu3 }
 0x788   : > { %v4575_v30 = vpop.f32.mrf.mxu0 }
 0x789   : > { %v11239_v40 = vpack.c.bf16 %v4575_v30, %v4572_v37  ;;  %4640 = vrot.lane.b32.xlu2 %v4575_v30, %s7828_s14  ;;  %s12399_s14 = sld [smem:[#allocation87_spill]] }
 0x78b   : > { %12370 = vst [vmem:[#allocation19_spill] sm:$0xff] %v11239_v40  ;;  %7018 = vmatmul.msk.bf16.gmra.mxu1 %vm11233_vm8, %v11239_v40  ;;  %7066 = vmatmul.msk.bf16.gmra.mxu2 %vm11233_vm8, %v11239_v40 }
 0x78c   : > { %7114 = vmatmul.msk.bf16.gmra.mxu3 %vm11233_vm8, %v11239_v40  ;;  %v4631_v18 = vpop.permute.xlu1 %4630  ;;  %v11270_v40 = vpop.f32.mrf.mxu1 }
 0x78d   : > { %v4668_v37 = vadd.f32 %v4631_v18, %v12373_v44  ;;  %12374 = vst [vmem:[#allocation36_spill] sm:$0xff] %v11270_v40  ;;  %v5000_v18 = vadd.f32 %v10993_v31, %v11257_v47  ;;  %v5089_v44 = vadd.f32 %v10997_v51, %v11259_v9  ;;  %v5350_v40 = vmax.f32 %v5002_v0, 0.0  ;;  %v11291_v52 = vpop.f32.mrf.mxu2 }
 0x78e   : > { %v5352_v31 = vmax.f32 %v5180_v54, 0.0 }
 0x78f   : > { %4700 = vst [vmem:[%s11005_s27 + $0xd0] sm:$0xff] %v4668_v37  ;;  %v11278_v37 = vperm.slane %v4820_v11, 3  ;;  %v5346_v43 = vmax.f32 %v5000_v18, 0.0  ;;  %v5347_v51 = vmax.f32 %v5089_v44, 0.0  ;;  %v5348_v11 = vmax.f32 %v5178_v24, 0.0  ;;  %v11295_v54 = vpop.f32.mrf.mxu3  ;;  %s11739_s17 = scalar_lea.vmem %s12399_s14, %s8017_s0 }
 0x790   : > { %v5266_v30 = vpop.f32.mrf.mxu0 }
 0x791   : > { %v5267_v15 = vadd.f32 %v5266_v30, %v11278_v37  ;;  %v5474_v21 = vpack.c.bf16 %v5350_v40, %v5346_v43  ;;  %v5475_v48 = vpack.c.bf16 %v5351_v39, %v5347_v51  ;;  %v5007_v43 = vadd.f32 %v11071_v36, %v11257_v47 }
 0x792   : > { %v5096_v39 = vadd.f32 %v11075_v17, %v11259_v9 }
 0x793   : > { %7141 = vmatmul.msk.bf16.gmra.mxu0 %vm10883_vm0, %v10887_v55  ;;  %v5476_v55 = vpack.c.bf16 %v5352_v31, %v5348_v11  ;;  %v5349_v8 = vmax.f32 %v5267_v15, 0.0  ;;  %v5185_v15 = vadd.f32 %v11077_v45, %v11261_v34  ;;  %v5358_v36 = vmax.f32 %v5007_v43, 0.0 }
 0x794   : > { %v11289_v20 = vpop.f32.mrf.mxu1  ;;  %v5101_v43 = vadd.f32 %v11104_v49, %v11259_v9  ;;  %v5188_v49 = vadd.f32 %v11091_v6, %v11261_v34 }
 0x795   : > { %v5360_v40 = vmax.f32 %v5185_v15, 0.0  ;;  %v11314_v18 = vpop.f32.mrf.mxu2  ;;  %v5190_v15 = vadd.f32 %v11106_v25, %v11261_v34 }
 0x797   : > { %v5368_v25 = vmax.f32 %v5190_v15, 0.0  ;;  %v5104_v15 = vadd.f32 %v11112_v7, %v11259_v9 }
 0x798   : > { %v5268_v2 = vpop.f32.mrf.mxu0 }
 0x799   : > { %v5269_v53 = vadd.f32 %v5268_v2, %v11278_v37 }
 0x79b   : > { %v5353_v13 = vmax.f32 %v5269_v53, 0.0  ;;  %5806 = vmatmul.bf16.vlgmr.msrb.gmra.mxu1 %v5474_v21  ;;  %5895 = vmatmul.bf16.vlgmr.msrb.gmra.mxu2 %v5475_v48  ;;  %v5005_v48 = vadd.f32 %v11055_v32, %v11257_v47  ;;  %v5094_v21 = vadd.f32 %v11057_v58, %v11259_v9  ;;  %v11317_v58 = vpop.f32.mrf.mxu3 }
 0x79c   : > { %5984 = vmatmul.bf16.vlgmr.msrb.gmra.mxu3 %v5476_v55  ;;  %v11312_v17 = vpop.f32.mrf.mxu1 }
 0x79d   : > { %v11293_v0 = vpack.c.bf16 %v5353_v13, %v5349_v8  ;;  %v5183_v8 = vadd.f32 %v11060_v26, %v11261_v34  ;;  %v5359_v13 = vmax.f32 %v5096_v39, 0.0  ;;  %v5354_v2 = vmax.f32 %v5005_v48, 0.0  ;;  %v11328_v39 = vpop.f32.mrf.mxu2 }
 0x79e   : > { %v5355_v45 = vmax.f32 %v5094_v21, 0.0  ;;  %v5010_v21 = vadd.f32 %v11085_v4, %v11257_v47  ;;  %v5364_v4 = vmax.f32 %v5188_v49, 0.0 }
 0x79f   : > { %v5356_v44 = vmax.f32 %v5183_v8, 0.0  ;;  %v5099_v8 = vadd.f32 %v11088_v19, %v11259_v9 }
 0x7a0   : > { %v5271_v30 = vpop.f32.mrf.mxu0  ;;  %v5479_v24 = vpack.c.bf16 %v5359_v13, %v5355_v45  ;;  %v5367_v13 = vmax.f32 %v5101_v43, 0.0  ;;  %v5015_v43 = vadd.f32 %v11110_v35, %v11257_v47 }
 0x7a1   : > { %v5272_v32 = vadd.f32 %v5271_v30, %v11278_v37  ;;  %v5480_v26 = vpack.c.bf16 %v5360_v40, %v5356_v44  ;;  %v5012_v30 = vadd.f32 %v11101_v60, %v11257_v47  ;;  %v7410_v60 = vld [vmem:[#allocation12 + $0xc8] sm:$0xff]  ;;  %v5362_v40 = vmax.f32 %v5010_v21, 0.0 }
 0x7a2   : > { %6071 = vmatpush.bf16.msrb.mxu0 %v7410_v60  ;;  %v5193_v21 = vadd.f32 %v11117_v12, %v11261_v34  ;;  %v5370_v35 = vmax.f32 %v5015_v43, 0.0  ;;  %v5109_v43 = vadd.f32 %v11135_v62, %v11259_v9 }
 0x7a3   : > { %7144 = vmatmul.msk.bf16.gmra.mxu0 %vm10911_vm4, %v10915_v56  ;;  %v5478_v56 = vpack.c.bf16 %v5358_v36, %v5354_v2  ;;  %v5357_v31 = vmax.f32 %v5272_v32, 0.0  ;;  %v11332_v48 = vpop.f32.mrf.mxu3  ;;  %v5366_v36 = vmax.f32 %v5012_v30, 0.0  ;;  %v5363_v2 = vmax.f32 %v5099_v8, 0.0 }
 0x7a4   : > { %v11322_v53 = vpop.f32.mrf.mxu1  ;;  %v5195_v30 = vadd.f32 %v11125_v63, %v11261_v34 }
 0x7a5   : > { %v5482_v44 = vpack.c.bf16 %v5366_v36, %v5362_v40  ;;  %v5371_v36 = vmax.f32 %v5104_v15, 0.0  ;;  %v7409_v15 = vld [vmem:[#allocation12 + $0xc0] sm:$0xff] }
 0x7a6   : > { %v5376_v63 = vmax.f32 %v5195_v30, 0.0  ;;  %v5020_v30 = vadd.f32 %v11132_v29, %v11257_v47  ;;  %6072 = vmatpush.bf16.msrb.mxu0 %v7409_v15  ;;  %v12385_v15 = vld [vmem:[#allocation33_spill] sm:$0xff] }
 0x7a8   : > { %v5273_v28 = vpop.f32.mrf.mxu0 }
 0x7a9   : > { %v5274_v27 = vadd.f32 %v5273_v28, %v11278_v37  ;;  %v5483_v28 = vpack.c.bf16 %v5367_v13, %v5363_v2  ;;  %v5372_v13 = vmax.f32 %v5193_v21, 0.0 }
 0x7ab   : > { %v5361_v51 = vmax.f32 %v5274_v27, 0.0  ;;  %5811 = vmatmul.bf16.gmra.mxu1 %v5478_v56  ;;  %5900 = vmatmul.bf16.gmra.mxu2 %v5479_v24  ;;  %v11347_v27 = vpop.f32.mrf.mxu2  ;;  %v11349_v24 = vpop.f32.mrf.mxu3  ;;  %v5488_v40 = vpack.c.bf16 %v5376_v63, %v5372_v13 }
 0x7ac   : > { %5989 = vmatmul.bf16.gmra.mxu3 %v5480_v26  ;;  %v11345_v10 = vpop.f32.mrf.mxu1 }
 0x7ad   : > { %v11320_v11 = vpack.c.bf16 %v5361_v51, %v5357_v31  ;;  %v5017_v51 = vadd.f32 %v11121_v61, %v11257_v47 }
 0x7af   : > { %v5374_v8 = vmax.f32 %v5017_v51, 0.0  ;;  %v5111_v51 = vadd.f32 %v11146_v23, %v11259_v9 }
 0x7b0   : > { %v5276_v55 = vpop.f32.mrf.mxu0 }
 0x7b1   : > { %v5277_v45 = vadd.f32 %v5276_v55, %v11278_v37  ;;  %v5106_v55 = vadd.f32 %v11123_v5, %v11259_v9 }
 0x7b3   : > { %7147 = vmatmul.msk.bf16.gmra.mxu0 %vm10943_vm15, %v10947_v42  ;;  %v5484_v42 = vpack.c.bf16 %v5368_v25, %v5364_v4  ;;  %v5365_v6 = vmax.f32 %v5277_v45, 0.0  ;;  %v5375_v5 = vmax.f32 %v5106_v55, 0.0  ;;  %v11370_v60 = vpop.f32.mrf.mxu2  ;;  %v11372_v49 = vpop.f32.mrf.mxu3  ;;  %v5486_v25 = vpack.c.bf16 %v5374_v8, %v5370_v35 }
 0x7b4   : > { %v11368_v61 = vpop.f32.mrf.mxu1  ;;  %v5200_v55 = vadd.f32 %v11148_v3, %v11261_v34  ;;  %v5383_v8 = vmax.f32 %v5111_v51, 0.0  ;;  %v5379_v3 = vmax.f32 %v5109_v43, 0.0  ;;  %v12378_v51 = vld [vmem:[#allocation22_spill] sm:$0xff]  ;;  %v12379_v43 = vld [vmem:[#allocation31_spill] sm:$0xff] }
 0x7b5   : > { %v5487_v12 = vpack.c.bf16 %v5375_v5, %v5371_v36  ;;  %v5378_v5 = vmax.f32 %v5020_v30, 0.0 }
 0x7b6   : > { %v5384_v23 = vmax.f32 %v5200_v55, 0.0  ;;  %v5114_v55 = vadd.f32 %v12378_v51, %v11259_v9 }
 0x7b8   : > { %v5278_v32 = vpop.f32.mrf.mxu0 }
 0x7b9   : > { %v5279_v19 = vadd.f32 %v5278_v32, %v11278_v37  ;;  %v12376_v32 = vld [vmem:[#allocation42_spill] sm:$0xff] }
 0x7bb   : > { %v5369_v56 = vmax.f32 %v5279_v19, 0.0  ;;  %5816 = vmatmul.bf16.gmra.mxu1 %v5482_v44  ;;  %5905 = vmatmul.bf16.gmra.mxu2 %v5483_v28 }
 0x7bc   : > { %5994 = vmatmul.bf16.gmra.mxu3 %v5484_v42  ;;  %v11379_v28 = vpop.f32.mrf.mxu1  ;;  %v11382_v42 = vpop.f32.mrf.mxu2 }
 0x7bd   : > { %v11351_v26 = vpack.c.bf16 %v5369_v56, %v5365_v6  ;;  %v11384_v6 = vpop.f32.mrf.mxu3 }
 0x7c0   : > { %v5281_v31 = vpop.f32.mrf.mxu0 }
 0x7c1   : > { %v5282_v7 = vadd.f32 %v5281_v31, %v11278_v37  ;;  %v5022_v31 = vadd.f32 %v11143_v38, %v11257_v47  ;;  %v5198_v38 = vadd.f32 %v11137_v22, %v11261_v34 }
 0x7c3   : > { %7150 = vmatmul.msk.bf16.gmra.mxu0 %vm10976_vm7, %v10980_v50  ;;  %v5373_v2 = vmax.f32 %v5282_v7, 0.0  ;;  %v5382_v21 = vmax.f32 %v5022_v31, 0.0  ;;  %v5380_v29 = vmax.f32 %v5198_v38, 0.0  ;;  %v5491_v7 = vpack.c.bf16 %v5383_v8, %v5379_v3 }
 0x7c4   : > { %v11402_v35 = vpop.f32.mrf.mxu1  ;;  %v11404_v36 = vpop.f32.mrf.mxu2  ;;  %v5025_v31 = vadd.f32 %v11165_v57, %v11257_v47 }
 0x7c5   : > { %v11407_v22 = vpop.f32.mrf.mxu3  ;;  %v5492_v13 = vpack.c.bf16 %v5384_v23, %v5380_v29 }
 0x7c6   : > { %v5386_v3 = vmax.f32 %v5025_v31, 0.0 }
 0x7c8   : > { %v5283_v33 = vpop.f32.mrf.mxu0 }
 0x7c9   : > { %v5284_v50 = vadd.f32 %v5283_v33, %v11278_v37 }
 0x7ca   : > { %v4635_v4 = vpop.permute.xlu2 %4634 }
 0x7cb   : > { %v5377_v45 = vmax.f32 %v5284_v50, 0.0  ;;  %5821 = vmatmul.bf16.gmra.mxu1 %v5486_v25  ;;  %5910 = vmatmul.bf16.gmra.mxu2 %v5487_v12  ;;  %v4670_v19 = vadd.f32 %v4635_v4, %v12376_v32  ;;  %v12377_v12 = vld [vmem:[#allocation41_spill] sm:$0xff]  ;;  %v5027_v4 = vadd.f32 %v11188_v46, %v11257_v47  ;;  %v5116_v32 = vadd.f32 %v11192_v41, %v11259_v9  ;;  %v12381_v41 = vld [vmem:[#allocation30_spill] sm:$0xff] }
 0x7cc   : > { %5999 = vmatmul.bf16.gmra.mxu3 %v5488_v40  ;;  %v11425_v30 = vpop.f32.mrf.mxu2  ;;  %v5203_v38 = vadd.f32 %v12381_v41, %v11261_v34  ;;  %v12386_v41 = vld [vmem:[#allocation32_spill] sm:$0xff] }
 0x7cd   : > { %v11377_v44 = vpack.c.bf16 %v5377_v45, %v5373_v2  ;;  %4702 = vst [vmem:[%s11005_s27 + $0xe0] sm:$0xff] %v4670_v19  ;;  %v5205_v19 = vadd.f32 %v11194_v16, %v11261_v34  ;;  %v12382_v16 = vld [vmem:[#allocation45_spill] sm:$0xff]  ;;  %v5390_v23 = vmax.f32 %v5027_v4, 0.0 }
 0x7cf   : > { %v5392_v57 = vmax.f32 %v5205_v19, 0.0 }
 0x7d0   : > { %v5286_v56 = vpop.f32.mrf.mxu0 }
 0x7d1   : > { %v5287_v63 = vadd.f32 %v5286_v56, %v11278_v37  ;;  %v11419_v56 = vpop.f32.mrf.mxu1 }
 0x7d3   : > { %7153 = vmatmul.msk.bf16.gmra.mxu0 %vm11024_vm13, %v11028_v14  ;;  %v5490_v14 = vpack.c.bf16 %v5382_v21, %v5378_v5  ;;  %v5381_v33 = vmax.f32 %v5287_v63, 0.0  ;;  %v11432_v21 = vpop.f32.mrf.mxu3  ;;  %v5391_v5 = vmax.f32 %v5116_v32, 0.0  ;;  %v5387_v63 = vmax.f32 %v5114_v55, 0.0  ;;  %v12384_v55 = vld [vmem:[#allocation20_spill] sm:$0xff] }
 0x7d4   : > { %v11441_v19 = vpop.f32.mrf.mxu2 }
 0x7d8   : > { %v5288_v62 = vpop.f32.mrf.mxu0 }
 0x7d9   : > { %v5289_v1 = vadd.f32 %v5288_v62, %v11278_v37  ;;  %v5388_v62 = vmax.f32 %v5203_v38, 0.0  ;;  %v11439_v32 = vpop.f32.mrf.mxu1  ;;  %v5210_v38 = vadd.f32 %v12386_v41, %v11261_v34 }
 0x7da   : > { %v4633_v25 = vpop.permute.xlu0 %4632 }
 0x7db   : > { %v5385_v50 = vmax.f32 %v5289_v1, 0.0  ;;  %5826 = vmatmul.bf16.gmra.mxu1 %v5490_v14  ;;  %5915 = vmatmul.bf16.gmra.mxu2 %v5491_v7  ;;  %v4669_v40 = vadd.f32 %v4633_v25, %v12377_v12  ;;  %v5494_v7 = vpack.c.bf16 %v5390_v23, %v5386_v3  ;;  %v11445_v31 = vpop.f32.mrf.mxu3  ;;  %v12388_v23 = vld [vmem:[#allocation25_spill] sm:$0xff]  ;;  %v12389_v3 = vld [vmem:[#allocation27_spill] sm:$0xff] }
 0x7dc   : > { %6004 = vmatmul.bf16.gmra.mxu3 %v5492_v13  ;;  %v5495_v13 = vpack.c.bf16 %v5391_v5, %v5387_v63  ;;  %v5119_v5 = vadd.f32 %v12388_v23, %v11259_v9 }
 0x7dd   : > { %v11410_v2 = vpack.c.bf16 %v5385_v50, %v5381_v33  ;;  %4701 = vst [vmem:[%s11005_s27 + $0xd8] sm:$0xff] %v4669_v40  ;;  %v5496_v33 = vpack.c.bf16 %v5392_v57, %v5388_v62  ;;  %v12383_v40 = vld [vmem:[#allocation43_spill] sm:$0xff] }
 0x7e0   : > { %v5291_v45 = vpop.f32.mrf.mxu0 }
 0x7e1   : > { %v5292_v29 = vadd.f32 %v5291_v45, %v11278_v37 }
 0x7e3   : > { %7156 = vmatmul.msk.bf16.gmra.mxu0 %vm11157_vm14, %v12379_v43  ;;  %v4641_v46 = vpop.permute.xlu2 %4640  ;;  %v5389_v50 = vmax.f32 %v5292_v29, 0.0  ;;  %v5032_v43 = vadd.f32 %v12384_v55, %v11257_v47  ;;  %v12391_v29 = vld [vmem:[#allocation29_spill] sm:$0xff] }
 0x7e4   : > { %v4673_v8 = vadd.f32 %v4641_v46, %v12382_v16  ;;  %v5121_v46 = vadd.f32 %v12385_v15, %v11259_v9  ;;  %v12387_v16 = vld [vmem:[#allocation24_spill] sm:$0xff]  ;;  %v5208_v62 = vadd.f32 %v12391_v29, %v11261_v34  ;;  %v11470_v15 = vpop.f32.mrf.mxu3 }
 0x7e6   : > { %4705 = vst [vmem:[%s11005_s27 + $0xf8] sm:$0xff] %v4673_v8  ;;  %v5030_v8 = vadd.f32 %v12387_v16, %v11257_v47  ;;  %v5396_v55 = vmax.f32 %v5208_v62, 0.0  ;;  %v5215_v62 = vadd.f32 %v11295_v54, %v11261_v34 }
 0x7e8   : > { %v5293_v1 = vpop.f32.mrf.mxu0 }
 0x7e9   : > { %v5294_v14 = vadd.f32 %v5293_v1, %v11278_v37  ;;  %v12392_v1 = vld [vmem:[#allocation44_spill] sm:$0xff] }
 0x7eb   : > { %v5393_v25 = vmax.f32 %v5294_v14, 0.0  ;;  %v4637_v12 = vpop.permute.xlu1 %4636  ;;  %5831 = vmatmul.bf16.gmra.mxu1 %v5494_v7  ;;  %5920 = vmatmul.bf16.gmra.mxu2 %v5495_v13  ;;  %v5398_v7 = vmax.f32 %v5032_v43, 0.0  ;;  %v5399_v13 = vmax.f32 %v5121_v46, 0.0 }
 0x7ec   : > { %v4671_v4 = vadd.f32 %v4637_v12, %v12383_v40  ;;  %6009 = vmatmul.bf16.gmra.mxu3 %v5496_v33  ;;  %v5400_v33 = vmax.f32 %v5210_v38, 0.0  ;;  %v11465_v12 = vpop.f32.mrf.mxu1  ;;  %v11467_v40 = vpop.f32.mrf.mxu2 }
 0x7ed   : > { %v11443_v45 = vpack.c.bf16 %v5393_v25, %v5389_v50  ;;  %v5394_v50 = vmax.f32 %v5030_v8, 0.0  ;;  %v5395_v25 = vmax.f32 %v5119_v5, 0.0 }
 0x7ee   : > { %4703 = vst [vmem:[%s11005_s27 + $0xe8] sm:$0xff] %v4671_v4  ;;  %v5500_v43 = vpack.c.bf16 %v5400_v33, %v5396_v55  ;;  %v5408_v55 = vmax.f32 %v5215_v62, 0.0 }
 0x7ef   : > { %v5498_v23 = vpack.c.bf16 %v5398_v7, %v5394_v50  ;;  %v12395_v50 = vld [vmem:[#allocation19_spill] sm:$0xff] }
 0x7f0   : > { %v5296_v51 = vpop.f32.mrf.mxu0 }
 0x7f1   : > { %v5297_v4 = vadd.f32 %v5296_v51, %v11278_v37  ;;  %v5037_v51 = vadd.f32 %v11289_v20, %v11257_v47  ;;  %v5220_v20 = vadd.f32 %v11332_v48, %v11261_v34 }
 0x7f3   : > { %v4639_v57 = vpop.permute.xlu0 %4638  ;;  %7159 = vmatmul.msk.bf16.gmra.mxu0 %vm11197_vm1, %v12389_v3  ;;  %v5397_v46 = vmax.f32 %v5297_v4, 0.0  ;;  %v5126_v3 = vadd.f32 %v11291_v52, %v11259_v9  ;;  %v5213_v52 = vadd.f32 %v11285_v59, %v11261_v34  ;;  %v5416_v48 = vmax.f32 %v5220_v20, 0.0 }
 0x7f4   : > { %v4672_v14 = vadd.f32 %v4639_v57, %v12392_v1  ;;  %v5499_v57 = vpack.c.bf16 %v5399_v13, %v5395_v25  ;;  %v11479_v63 = vpop.f32.mrf.mxu1  ;;  %v11481_v29 = vpop.f32.mrf.mxu2  ;;  %v12394_v13 = vld [vmem:[#allocation34_spill] sm:$0xff]  ;;  %v5406_v25 = vmax.f32 %v5037_v51, 0.0  ;;  %v5047_v20 = vadd.f32 %v11368_v61, %v11257_v47 }
 0x7f5   : > { %v11485_v1 = vpop.f32.mrf.mxu3  ;;  %v5124_v33 = vadd.f32 %v12394_v13, %v11259_v9  ;;  %v5407_v4 = vmax.f32 %v5126_v3, 0.0 }
 0x7f6   : > { %4704 = vst [vmem:[%s11005_s27 + $0xf0] sm:$0xff] %v4672_v14  ;;  %v12393_v14 = vld [vmem:[#allocation36_spill] sm:$0xff] }
 0x7f7   : > { %v5035_v7 = vadd.f32 %v12393_v14, %v11257_v47  ;;  %v5403_v54 = vmax.f32 %v5124_v33, 0.0  ;;  %v5131_v33 = vadd.f32 %v11328_v39, %v11259_v9 }
 0x7f8   : > { %v5298_v41 = vpop.f32.mrf.mxu0 }
 0x7f9   : > { %v5299_v16 = vadd.f32 %v5298_v41, %v11278_v37  ;;  %v5402_v41 = vmax.f32 %v5035_v7, 0.0  ;;  %v5503_v13 = vpack.c.bf16 %v5407_v4, %v5403_v54  ;;  %v5042_v7 = vadd.f32 %v11322_v53, %v11257_v47 }
 0x7fa   : > { %v5218_v53 = vadd.f32 %v11317_v58, %v11261_v34  ;;  %v5415_v54 = vmax.f32 %v5131_v33, 0.0 }
 0x7fb   : > { %v5401_v38 = vmax.f32 %v5299_v16, 0.0  ;;  %5836 = vmatmul.bf16.gmra.mxu1 %v5498_v23  ;;  %5925 = vmatmul.bf16.gmra.mxu2 %v5499_v57  ;;  %v5404_v23 = vmax.f32 %v5213_v52, 0.0  ;;  %v5502_v14 = vpack.c.bf16 %v5406_v25, %v5402_v41  ;;  %v5040_v52 = vadd.f32 %v11312_v17, %v11257_v47 }
 0x7fc   : > { %6014 = vmatmul.bf16.gmra.mxu3 %v5500_v43  ;;  %v11497_v43 = vpop.f32.mrf.mxu1  ;;  %v5129_v25 = vadd.f32 %v11314_v18, %v11259_v9  ;;  %v5414_v39 = vmax.f32 %v5042_v7, 0.0 }
 0x7fd   : > { %v11473_v8 = vpack.c.bf16 %v5401_v38, %v5397_v46  ;;  %v11499_v46 = vpop.f32.mrf.mxu2  ;;  %v5504_v59 = vpack.c.bf16 %v5408_v55, %v5404_v23 }
 0x7fe   : > { %v5411_v23 = vmax.f32 %v5129_v25, 0.0  ;;  %v5225_v25 = vadd.f32 %v11372_v49, %v11261_v34 }
 0x800   : > { %v5301_v5 = vpop.f32.mrf.mxu0  ;;  %v5424_v61 = vmax.f32 %v5225_v25, 0.0 }
 0x801   : > { %v5302_v16 = vadd.f32 %v5301_v5, %v11278_v37 }
 0x803   : > { %7162 = vmatmul.msk.bf16.gmra.mxu0 %vm11233_vm8, %v12395_v50  ;;  %v11502_v50 = vpop.f32.mrf.mxu3  ;;  %v5405_v51 = vmax.f32 %v5302_v16, 0.0  ;;  %v5410_v16 = vmax.f32 %v5040_v52, 0.0  ;;  %v5136_v52 = vadd.f32 %v11370_v60, %v11259_v9 }
 0x804   : > { %v11516_v4 = vpop.f32.mrf.mxu1 }
 0x805   : > { %v11518_v55 = vpop.f32.mrf.mxu2 }
 0x808   : > { %v5303_v57 = vpop.f32.mrf.mxu0 }
 0x809   : > { %v5304_v38 = vadd.f32 %v5303_v57, %v11278_v37  ;;  %v5412_v57 = vmax.f32 %v5218_v53, 0.0  ;;  %v5045_v53 = vadd.f32 %v11345_v10, %v11257_v47 }
 0x80b   : > { %v5409_v3 = vmax.f32 %v5304_v38, 0.0  ;;  %5841 = vmatmul.bf16.gmra.mxu1 %v5502_v14  ;;  %5930 = vmatmul.bf16.gmra.mxu2 %v5503_v13  ;;  %v11523_v41 = vpop.f32.mrf.mxu3  ;;  %v5506_v14 = vpack.c.bf16 %v5414_v39, %v5410_v16  ;;  %v5507_v13 = vpack.c.bf16 %v5415_v54, %v5411_v23  ;;  %v5134_v39 = vadd.f32 %v11347_v27, %v11259_v9 }
 0x80c   : > { %6019 = vmatmul.bf16.gmra.mxu3 %v5504_v59  ;;  %v5508_v59 = vpack.c.bf16 %v5416_v48, %v5412_v57  ;;  %v11527_v58 = vpop.f32.mrf.mxu1  ;;  %v5223_v54 = vadd.f32 %v11349_v24, %v11261_v34  ;;  %v5422_v48 = vmax.f32 %v5047_v20, 0.0  ;;  %v5423_v16 = vmax.f32 %v5136_v52, 0.0 }
 0x80d   : > { %v11504_v62 = vpack.c.bf16 %v5409_v3, %v5405_v51  ;;  %v11529_v3 = vpop.f32.mrf.mxu2  ;;  %v5418_v23 = vmax.f32 %v5045_v53, 0.0  ;;  %v5141_v20 = vadd.f32 %v11404_v36, %v11259_v9  ;;  %v5230_v53 = vadd.f32 %v11407_v22, %v11261_v34 }
 0x80e   : > { %v5420_v10 = vmax.f32 %v5223_v54, 0.0  ;;  %v5050_v54 = vadd.f32 %v11379_v28, %v11257_v47 }
 0x810   : > { %v5306_v5 = vpop.f32.mrf.mxu0  ;;  %v5512_v24 = vpack.c.bf16 %v5424_v61, %v5420_v10  ;;  %v5432_v61 = vmax.f32 %v5230_v53, 0.0  ;;  %v5055_v53 = vadd.f32 %v11419_v56, %v11257_v47 }
 0x811   : > { %v5307_v17 = vadd.f32 %v5306_v5, %v11278_v37 }
 0x813   : > { %6073 = vmatmul.bf16.vlgmr.msrb.gmra.mxu0 %v11293_v0  ;;  %v5413_v0 = vmax.f32 %v5307_v17, 0.0  ;;  %v11533_v33 = vpop.f32.mrf.mxu3  ;;  %v5419_v17 = vmax.f32 %v5134_v39, 0.0 }
 0x814   : > { %v11548_v60 = vpop.f32.mrf.mxu1 }
 0x815   : > { %v11550_v57 = vpop.f32.mrf.mxu2 }
 0x818   : > { %v5308_v18 = vpop.f32.mrf.mxu0 }
 0x819   : > { %v5309_v38 = vadd.f32 %v5308_v18, %v11278_v37 }
 0x81b   : > { %v5417_v51 = vmax.f32 %v5309_v38, 0.0  ;;  %5846 = vmatmul.bf16.gmra.mxu1 %v5506_v14  ;;  %5935 = vmatmul.bf16.gmra.mxu2 %v5507_v13  ;;  %v11553_v18 = vpop.f32.mrf.mxu3  ;;  %v5510_v38 = vpack.c.bf16 %v5422_v48, %v5418_v23  ;;  %v5511_v14 = vpack.c.bf16 %v5423_v16, %v5419_v17  ;;  %v5139_v48 = vadd.f32 %v11382_v42, %v11259_v9 }
 0x81c   : > { %6024 = vmatmul.bf16.gmra.mxu3 %v5508_v59  ;;  %v11562_v52 = vpop.f32.mrf.mxu1  ;;  %v5431_v16 = vmax.f32 %v5141_v20, 0.0  ;;  %v5426_v23 = vmax.f32 %v5050_v54, 0.0  ;;  %v5235_v20 = vadd.f32 %v11445_v31, %v11261_v34  ;;  %v5144_v54 = vadd.f32 %v11425_v30, %v11259_v9 }
 0x81d   : > { %v11531_v7 = vpack.c.bf16 %v5417_v51, %v5413_v0  ;;  %v11564_v25 = vpop.f32.mrf.mxu2  ;;  %v5427_v17 = vmax.f32 %v5139_v48, 0.0  ;;  %v5233_v48 = vadd.f32 %v11432_v21, %v11261_v34  ;;  %v5434_v31 = vmax.f32 %v5055_v53, 0.0 }
 0x81e   : > { %v5149_v53 = vadd.f32 %v11467_v40, %v11259_v9 }
 0x820   : > { %v5311_v5 = vpop.f32.mrf.mxu0 }
 0x821   : > { %v5312_v49 = vadd.f32 %v5311_v5, %v11278_v37  ;;  %v5052_v5 = vadd.f32 %v11402_v35, %v11257_v47  ;;  %v5228_v35 = vadd.f32 %v11384_v6, %v11261_v34 }
 0x823   : > { %6078 = vmatmul.bf16.gmra.mxu0 %v11320_v11  ;;  %v5421_v13 = vmax.f32 %v5312_v49, 0.0  ;;  %v11568_v39 = vpop.f32.mrf.mxu3  ;;  %v5430_v36 = vmax.f32 %v5052_v5, 0.0  ;;  %v5428_v49 = vmax.f32 %v5228_v35, 0.0  ;;  %v5146_v5 = vadd.f32 %v11441_v19, %v11259_v9 }
 0x824   : > { %v11579_v42 = vpop.f32.mrf.mxu1  ;;  %v5440_v19 = vmax.f32 %v5235_v20, 0.0  ;;  %v5060_v20 = vadd.f32 %v11465_v12, %v11257_v47 }
 0x825   : > { %v5514_v28 = vpack.c.bf16 %v5430_v36, %v5426_v23  ;;  %v5439_v36 = vmax.f32 %v5146_v5, 0.0  ;;  %v5435_v23 = vmax.f32 %v5144_v54, 0.0  ;;  %v5240_v5 = vadd.f32 %v11485_v1, %v11261_v34 }
 0x826   : > { %v5238_v54 = vadd.f32 %v11470_v15, %v11261_v34 }
 0x828   : > { %v5313_v27 = vpop.f32.mrf.mxu0 }
 0x829   : > { %v5314_v11 = vadd.f32 %v5313_v27, %v11278_v37 }
 0x82b   : > { %v5425_v59 = vmax.f32 %v5314_v11, 0.0  ;;  %5851 = vmatmul.bf16.gmra.mxu1 %v5510_v38  ;;  %5940 = vmatmul.bf16.gmra.mxu2 %v5511_v14  ;;  %v5515_v11 = vpack.c.bf16 %v5431_v16, %v5427_v17  ;;  %v5516_v38 = vpack.c.bf16 %v5432_v61, %v5428_v49  ;;  %v5436_v17 = vmax.f32 %v5233_v48, 0.0 }
 0x82c   : > { %6029 = vmatmul.bf16.gmra.mxu3 %v5512_v24  ;;  %v11583_v24 = vpop.f32.mrf.mxu3  ;;  %v5519_v49 = vpack.c.bf16 %v5439_v36, %v5435_v23  ;;  %v5442_v36 = vmax.f32 %v5060_v20, 0.0 }
 0x82d   : > { %v11556_v0 = vpack.c.bf16 %v5425_v59, %v5421_v13  ;;  %v5520_v21 = vpack.c.bf16 %v5440_v19, %v5436_v17  ;;  %v5443_v19 = vmax.f32 %v5149_v53, 0.0 }
 0x830   : > { %v5316_v51 = vpop.f32.mrf.mxu0 }
 0x831   : > { %v5317_v22 = vadd.f32 %v5316_v51, %v11278_v37  ;;  %v5057_v51 = vadd.f32 %v11439_v32, %v11257_v47  ;;  %v11600_v32 = vpop.f32.mrf.mxu1 }
 0x833   : > { %6083 = vmatmul.bf16.gmra.mxu0 %v11351_v26  ;;  %v11581_v26 = vpop.f32.mrf.mxu2  ;;  %v5429_v14 = vmax.f32 %v5317_v22, 0.0  ;;  %v5438_v35 = vmax.f32 %v5057_v51, 0.0  ;;  %v5151_v51 = vadd.f32 %v11481_v29, %v11259_v9 }
 0x834   : > { %v11604_v61 = vpop.f32.mrf.mxu3 }
 0x835   : > { %v5518_v22 = vpack.c.bf16 %v5438_v35, %v5434_v31  ;;  %v5447_v35 = vmax.f32 %v5151_v51, 0.0  ;;  %v5444_v31 = vmax.f32 %v5238_v54, 0.0 }
 0x838   : > { %v5318_v10 = vpop.f32.mrf.mxu0 }
 0x839   : > { %v5319_v27 = vadd.f32 %v5318_v10, %v11278_v37 }
 0x83b   : > { %v5433_v6 = vmax.f32 %v5319_v27, 0.0  ;;  %5856 = vmatmul.bf16.gmra.mxu1 %v5514_v28  ;;  %5945 = vmatmul.bf16.gmra.mxu2 %v5515_v11  ;;  %v11602_v16 = vpop.f32.mrf.mxu2  ;;  %v11610_v11 = vpop.f32.mrf.mxu1 }
 0x83c   : > { %6034 = vmatmul.bf16.gmra.mxu3 %v5516_v38 }
 0x83d   : > { %v11585_v13 = vpack.c.bf16 %v5433_v6, %v5429_v14  ;;  %v11614_v14 = vpop.f32.mrf.mxu3 }
 0x840   : > { %v5321_v59 = vpop.f32.mrf.mxu0 }
 0x841   : > { %v5322_v56 = vadd.f32 %v5321_v59, %v11278_v37  ;;  %v5062_v59 = vadd.f32 %v11479_v63, %v11257_v47  ;;  %v5448_v63 = vmax.f32 %v5240_v5, 0.0 }
 0x843   : > { %6088 = vmatmul.bf16.gmra.mxu0 %v11377_v44  ;;  %v5437_v10 = vmax.f32 %v5322_v56, 0.0  ;;  %v11612_v38 = vpop.f32.mrf.mxu2  ;;  %v5446_v48 = vmax.f32 %v5062_v59, 0.0  ;;  %v11630_v23 = vpop.f32.mrf.mxu1  ;;  %v5524_v15 = vpack.c.bf16 %v5448_v63, %v5444_v31  ;;  %v5154_v59 = vadd.f32 %v11499_v46, %v11259_v9 }
 0x845   : > { %v5522_v56 = vpack.c.bf16 %v5446_v48, %v5442_v36  ;;  %v11635_v17 = vpop.f32.mrf.mxu3  ;;  %v5451_v48 = vmax.f32 %v5154_v59, 0.0 }
 0x848   : > { %v5323_v30 = vpop.f32.mrf.mxu0 }
 0x849   : > { %v5324_v44 = vadd.f32 %v5323_v30, %v11278_v37 }
 0x84b   : > { %v5441_v27 = vmax.f32 %v5324_v44, 0.0  ;;  %5861 = vmatmul.bf16.gmra.mxu1 %v5518_v22  ;;  %5950 = vmatmul.bf16.gmra.mxu2 %v5519_v49  ;;  %v11632_v12 = vpop.f32.mrf.mxu2  ;;  %v11649_v51 = vpop.f32.mrf.mxu1 }
 0x84c   : > { %6039 = vmatmul.bf16.gmra.mxu3 %v5520_v21  ;;  %v5067_v21 = vadd.f32 %v11516_v4, %v11257_v47  ;;  %v5243_v4 = vadd.f32 %v11502_v50, %v11261_v34 }
 0x84d   : > { %v11608_v28 = vpack.c.bf16 %v5441_v27, %v5437_v10  ;;  %v5156_v10 = vadd.f32 %v11518_v55, %v11259_v9  ;;  %v5245_v27 = vadd.f32 %v11523_v41, %v11261_v34  ;;  %v11656_v20 = vpop.f32.mrf.mxu3 }
 0x84e   : > { %v5454_v55 = vmax.f32 %v5067_v21, 0.0  ;;  %v5159_v21 = vadd.f32 %v11529_v3, %v11259_v9 }
 0x84f   : > { %v5455_v53 = vmax.f32 %v5156_v10, 0.0  ;;  %v5456_v41 = vmax.f32 %v5245_v27, 0.0  ;;  %v5248_v10 = vadd.f32 %v11533_v33, %v11261_v34 }
 0x850   : > { %v5326_v6 = vpop.f32.mrf.mxu0 }
 0x851   : > { %v5327_v29 = vadd.f32 %v5326_v6, %v11278_v37  ;;  %v5065_v6 = vadd.f32 %v11497_v43, %v11257_v47 }
 0x853   : > { %6093 = vmatmul.bf16.gmra.mxu0 %v11410_v2  ;;  %v5523_v2 = vpack.c.bf16 %v5447_v35, %v5443_v19  ;;  %v5445_v30 = vmax.f32 %v5327_v29, 0.0  ;;  %v11651_v5 = vpop.f32.mrf.mxu2  ;;  %v5450_v54 = vmax.f32 %v5065_v6, 0.0  ;;  %v5452_v35 = vmax.f32 %v5243_v4, 0.0  ;;  %v11660_v50 = vpop.f32.mrf.mxu1 }
 0x854   : > { %v5527_v19 = vpack.c.bf16 %v5455_v53, %v5451_v48  ;;  %v5459_v4 = vmax.f32 %v5159_v21, 0.0 }
 0x855   : > { %v5526_v36 = vpack.c.bf16 %v5454_v55, %v5450_v54  ;;  %v5528_v29 = vpack.c.bf16 %v5456_v41, %v5452_v35 }
 0x858   : > { %v5328_v1 = vpop.f32.mrf.mxu0 }
 0x859   : > { %v5329_v40 = vadd.f32 %v5328_v1, %v11278_v37 }
 0x85b   : > { %v5449_v44 = vmax.f32 %v5329_v40, 0.0  ;;  %5866 = vmatmul.bf16.gmra.mxu1 %v5522_v56  ;;  %5955 = vmatmul.bf16.gmra.mxu2 %v5523_v2  ;;  %v11662_v1 = vpop.f32.mrf.mxu2  ;;  %v11666_v56 = vpop.f32.mrf.mxu3 }
 0x85c   : > { %6044 = vmatmul.bf16.gmra.mxu3 %v5524_v15  ;;  %v5072_v15 = vadd.f32 %v11548_v60, %v11257_v47 }
 0x85d   : > { %v11637_v22 = vpack.c.bf16 %v5449_v44, %v5445_v30  ;;  %v5161_v30 = vadd.f32 %v11550_v57, %v11259_v9  ;;  %v5250_v44 = vadd.f32 %v11553_v18, %v11261_v34  ;;  %v11681_v57 = vpop.f32.mrf.mxu1 }
 0x85e   : > { %v5462_v27 = vmax.f32 %v5072_v15, 0.0  ;;  %v5164_v15 = vadd.f32 %v11564_v25, %v11259_v9 }
 0x85f   : > { %v5463_v6 = vmax.f32 %v5161_v30, 0.0  ;;  %v5464_v60 = vmax.f32 %v5250_v44, 0.0  ;;  %v11710_v44 = vld [vmem:[#allocation14] ss:$0 sm:$0xff] }
 0x860   : > { %v5331_v49 = vpop.f32.mrf.mxu0 }
 0x861   : > { %v5332_v43 = vadd.f32 %v5331_v49, %v11278_v37  ;;  %v5070_v49 = vadd.f32 %v11527_v58, %v11257_v47  ;;  %v5460_v58 = vmax.f32 %v5248_v10, 0.0  ;;  %v5531_v54 = vpack.c.bf16 %v5463_v6, %v5459_v4 }
 0x863   : > { %6098 = vmatmul.bf16.gmra.mxu0 %v11443_v45  ;;  %v5453_v45 = vmax.f32 %v5332_v43, 0.0  ;;  %v5458_v59 = vmax.f32 %v5070_v49, 0.0  ;;  %v11683_v55 = vpop.f32.mrf.mxu2  ;;  %v11686_v53 = vpop.f32.mrf.mxu3  ;;  %v5532_v33 = vpack.c.bf16 %v5464_v60, %v5460_v58 }
 0x865   : > { %v5530_v41 = vpack.c.bf16 %v5462_v27, %v5458_v59 }
 0x868   : > { %v5333_v46 = vpop.f32.mrf.mxu0 }
 0x869   : > { %v5334_v63 = vadd.f32 %v5333_v46, %v11278_v37 }
 0x86b   : > { %v5457_v31 = vmax.f32 %v5334_v63, 0.0  ;;  %5871 = vmatmul.bf16.gmra.mxu1 %v5526_v36  ;;  %5960 = vmatmul.bf16.gmra.mxu2 %v5527_v19  ;;  %v5077_v63 = vadd.f32 %v11579_v42, %v11257_v47  ;;  %v5166_v36 = vadd.f32 %v11581_v26, %v11259_v9  ;;  %v11695_v19 = vpop.f32.mrf.mxu1  ;;  %v5253_v42 = vadd.f32 %v11568_v39, %v11261_v34 }
 0x86c   : > { %6049 = vmatmul.bf16.gmra.mxu3 %v5528_v29  ;;  %v11697_v29 = vpop.f32.mrf.mxu2 }
 0x86d   : > { %v11664_v40 = vpack.c.bf16 %v5457_v31, %v5453_v45  ;;  %v5255_v45 = vadd.f32 %v11583_v24, %v11261_v34  ;;  %v11701_v31 = vpop.f32.mrf.mxu3  ;;  %v5470_v26 = vmax.f32 %v5077_v63, 0.0  ;;  %v5471_v30 = vmax.f32 %v5166_v36, 0.0 }
 0x86e   : > { %v5467_v24 = vmax.f32 %v5164_v15, 0.0  ;;  %v5468_v27 = vmax.f32 %v5253_v42, 0.0 }
 0x86f   : > { %v5472_v49 = vmax.f32 %v5255_v45, 0.0  ;;  %v12400_v45 = vld [vmem:[#allocation48_spill] sm:$0xff] }
 0x870   : > { %v5336_v2 = vpop.f32.mrf.mxu0 }
 0x871   : > { %v5337_v18 = vadd.f32 %v5336_v2, %v11278_v37  ;;  %v5075_v2 = vadd.f32 %v11562_v52, %v11257_v47  ;;  %v5808_v47 = vadd.f32 %v11710_v44, %v11600_v32  ;;  %v5535_v52 = vpack.c.bf16 %v5471_v30, %v5467_v24 }
 0x872   : > { %v5536_v25 = vpack.c.bf16 %v5472_v49, %v5468_v27 }
 0x873   : > { %6103 = vmatmul.bf16.gmra.mxu0 %v11473_v8  ;;  %v5461_v48 = vmax.f32 %v5337_v18, 0.0  ;;  %v5466_v21 = vmax.f32 %v5075_v2, 0.0  ;;  %v5897_v34 = vadd.f32 %v11602_v16, %v5808_v47  ;;  %v11717_v39 = vpop.f32.mrf.mxu1  ;;  %v5810_v16 = vadd.f32 %v11710_v44, %v11610_v11 }
 0x874   : > { %v11719_v60 = vpop.f32.mrf.mxu2  ;;  %v6188_v2 = vcvt.s32.f32 %v12400_v45  ;;  %v5818_v47 = vadd.f32 %v11710_v44, %v11660_v50 }
 0x875   : > { %v11721_v18 = vpop.f32.mrf.mxu3 }
 0x878   : > { %v5338_v3 = vpop.f32.mrf.mxu0 }
 0x879   : > { %v5339_v8 = vadd.f32 %v5338_v3, %v11278_v37 }
 0x87b   : > { %v5465_v43 = vmax.f32 %v5339_v8, 0.0  ;;  %5876 = vmatmul.bf16.gmra.mxu1 %v5530_v41  ;;  %5965 = vmatmul.bf16.gmra.mxu2 %v5531_v54  ;;  %v5899_v8 = vadd.f32 %v11612_v38, %v5810_v16  ;;  %v12397_v54 = vld [vmem:[#allocation46_spill] sm:$0xff]  ;;  %v5813_v38 = vadd.f32 %v11710_v44, %v11630_v23  ;;  %v5815_v23 = vadd.f32 %v11710_v44, %v11649_v51 }
 0x87c   : > { %6054 = vmatmul.bf16.gmra.mxu3 %v5532_v33  ;;  %vm6186_vm11 = vcmp.eq.s32.totalorder %v12397_v54, 16  ;;  %v12398_v33 = vld [vmem:[#allocation47_spill] sm:$0xff] }
 0x87d   : > { %v11689_v35 = vpack.c.bf16 %v5465_v43, %v5461_v48  ;;  %v5988_v41 = vadd.f32 %v11614_v14, %v5899_v8  ;;  %v6187_v48 = vcvt.s32.f32 %v12398_v33  ;;  %v11733_v43 = vpop.f32.mrf.mxu1  ;;  %v11743_v14 = vpop.f32.mrf.mxu2  ;;  %v5902_v63 = vadd.f32 %v11632_v12, %v5813_v38 }
 0x87e   : > { %v11751_v15 = vpop.f32.mrf.mxu3 }
 0x87f   : > { %v5991_v36 = vadd.f32 %v11635_v17, %v5902_v63 }
 0x880   : > { %v5341_v46 = vpop.f32.mrf.mxu0 }
 0x881   : > { %v5342_v10 = vadd.f32 %v5341_v46, %v11278_v37 }
 0x883   : > { %6108 = vmatmul.bf16.gmra.mxu0 %v11504_v62  ;;  %v5534_v62 = vpack.c.bf16 %v5470_v26, %v5466_v21  ;;  %v5469_v59 = vmax.f32 %v5342_v10, 0.0  ;;  %v5904_v21 = vadd.f32 %v11651_v5, %v5815_v23  ;;  %v12401_v10 = vld [vmem:[#allocation49_spill] sm:$0xff] }
 0x884   : > { %v6189_v27 = vcvt.s32.f32 %v12401_v10  ;;  %v5828_v10 = vadd.f32 %v11710_v44, %v11733_v43 }
 0x885   : > { %v11755_v49 = vpop.f32.mrf.mxu1  ;;  %v11762_v17 = vpop.f32.mrf.mxu2  ;;  %v5993_v24 = vadd.f32 %v11656_v20, %v5904_v21 }
 0x886   : > { %v5830_v43 = vadd.f32 %v11710_v44, %v11755_v49 }
 0x888   : > { %v5343_v6 = vpop.f32.mrf.mxu0 }
 0x889   : > { %v5344_v9 = vadd.f32 %v5343_v6, %v11278_v37  ;;  %v5986_v37 = vadd.f32 %v11604_v61, %v5897_v34  ;;  %v12402_v34 = vld [vmem:[#allocation50_spill] sm:$0xff] }
 0x88b   : > { %v5473_v4 = vmax.f32 %v5344_v9, 0.0  ;;  %5881 = vmatmul.bf16.gmra.mxu1 %v5534_v62  ;;  %5970 = vmatmul.bf16.gmra.mxu2 %v5535_v52  ;;  %v11768_v62 = vpop.f32.mrf.mxu3 }
 0x88c   : > { %6059 = vmatmul.bf16.gmra.mxu3 %v5536_v25 }
 0x88d   : > { %v11723_v32 = vpack.c.bf16 %v5473_v4, %v5469_v59  ;;  %v11774_v52 = vpop.f32.mrf.mxu1  ;;  %v11776_v20 = vpop.f32.mrf.mxu2  ;;  %v6190_v59 = vcvt.s32.f32 %v12402_v34 }
 0x890   : > { %v6074_v58 = vpop.f32.mrf.mxu0 }
 0x891   : > { %v6075_v3 = vadd.f32 %v6074_v58, %v5986_v37  ;;  %v5820_v37 = vadd.f32 %v11710_v44, %v11681_v57 }
 0x893   : > { %7514 = vtanh.f32 %v6075_v3  ;;  %6113 = vmatmul.bf16.gmra.mxu0 %v11531_v7  ;;  %v11787_v3 = vpop.f32.mrf.mxu3 }
 0x895   : > { %v11793_v57 = vpop.f32.mrf.mxu2 }
 0x898   : > { %v6076_v61 = vpop.f32.mrf.mxu0 }
 0x899   : > { %v7515_v11 = vpop.eup %7514  ;;  %v6077_v7 = vadd.f32 %v6076_v61, %v5988_v41  ;;  %v12403_v41 = vld [vmem:[#allocation51_spill] sm:$0xff] }
 0x89a   : > { %v6219_v46 = vsel %vm6186_vm11, %v6187_v48, %v7515_v11  ;;  %v6191_v33 = vcvt.s32.f32 %v12403_v41  ;;  %v5823_v11 = vadd.f32 %v11710_v44, %v11695_v19  ;;  %v5825_v19 = vadd.f32 %v11710_v44, %v11717_v39 }
 0x89b   : > { %6251 = vst [vmem:[%s11739_s17] sm:$0xff] %v6219_v46  ;;  %7516 = vtanh.f32 %v6077_v7  ;;  %v11801_v7 = vpop.f32.mrf.mxu3  ;;  %v12404_v46 = vld [vmem:[#allocation52_spill] sm:$0xff] }
 0x89c   : > { %v5912_v38 = vadd.f32 %v11697_v29, %v5823_v11  ;;  %v6192_v63 = vcvt.s32.f32 %v12404_v46  ;;  %v5914_v23 = vadd.f32 %v11719_v60, %v5825_v19 }
 0x8a0   : > { %v6079_v42 = vpop.f32.mrf.mxu0 }
 0x8a1   : > { %v7517_v26 = vpop.eup %7516  ;;  %v6080_v30 = vadd.f32 %v6079_v42, %v5991_v36 }
 0x8a2   : > { %v6220_v12 = vsel %vm6186_vm11, %v6188_v2, %v7517_v26  ;;  %v11809_v26 = vpop.f32.mrf.mxu2 }
 0x8a3   : > { %6252 = vst [vmem:[%s11739_s17 + $0x8] sm:$0xff] %v6220_v12  ;;  %7518 = vtanh.f32 %v6080_v30  ;;  %6118 = vmatmul.bf16.gmra.mxu0 %v11556_v0  ;;  %v5907_v0 = vadd.f32 %v11662_v1, %v5818_v47  ;;  %v5909_v1 = vadd.f32 %v11683_v55, %v5820_v37  ;;  %v12405_v30 = vld [vmem:[#allocation53_spill] sm:$0xff]  ;;  %v6015_v21 = vpop.f32.mrf.mxu3  ;;  %v12406_v47 = vld [vmem:[#allocation54_spill] sm:$0xff]  ;;  %v12407_v37 = vld [vmem:[#allocation55_spill] sm:$0xff] }
 0x8a4   : > { %v6193_v12 = vcvt.s32.f32 %v12405_v30 }
 0x8a5   : > { %v5996_v25 = vadd.f32 %v11666_v56, %v5907_v0  ;;  %v11789_v56 = vpop.f32.mrf.mxu1  ;;  %v5998_v8 = vadd.f32 %v11686_v53, %v5909_v1  ;;  %v6001_v53 = vadd.f32 %v11701_v31, %v5912_v38  ;;  %v6003_v31 = vadd.f32 %v11721_v18, %v5914_v23 }
 0x8a6   : > { %v5833_v1 = vadd.f32 %v11710_v44, %v11774_v52  ;;  %v5835_v52 = vadd.f32 %v11710_v44, %v11789_v56 }
 0x8a8   : > { %v6081_v51 = vpop.f32.mrf.mxu0  ;;  %v5922_v41 = vadd.f32 %v11776_v20, %v5833_v1  ;;  %v5924_v20 = vadd.f32 %v11793_v57, %v5835_v52 }
 0x8a9   : > { %v7519_v6 = vpop.eup %7518  ;;  %v6082_v9 = vadd.f32 %v6081_v51, %v5993_v24 }
 0x8aa   : > { %v6221_v5 = vsel %vm6186_vm11, %v6189_v27, %v7519_v6  ;;  %v5917_v6 = vadd.f32 %v11743_v14, %v5828_v10  ;;  %v5919_v14 = vadd.f32 %v11762_v17, %v5830_v43  ;;  %v6013_v46 = vadd.f32 %v11801_v7, %v5924_v20  ;;  %v12410_v7 = vld [vmem:[#allocation58_spill] sm:$0xff] }
 0x8ab   : > { %6253 = vst [vmem:[%s11739_s17 + $0x10] sm:$0xff] %v6221_v5  ;;  %7520 = vtanh.f32 %v6082_v9  ;;  %v6194_v9 = vcvt.s32.f32 %v12406_v47  ;;  %v6017_v34 = vpop.f32.mrf.mxu3  ;;  %v6198_v30 = vcvt.s32.f32 %v12410_v7 }
 0x8ac   : > { %v6006_v18 = vadd.f32 %v11751_v15, %v5917_v6 }
 0x8ad   : > { %v11805_v36 = vpop.f32.mrf.mxu1 }
 0x8ae   : > { %v5838_v56 = vadd.f32 %v11710_v44, %v11805_v36 }
 0x8b0   : > { %v6084_v50 = vpop.f32.mrf.mxu0 }
 0x8b1   : > { %v7521_v4 = vpop.eup %7520  ;;  %v6085_v58 = vadd.f32 %v6084_v50, %v5996_v25 }
 0x8b2   : > { %v6222_v16 = vsel %vm6186_vm11, %v6190_v59, %v7521_v4  ;;  %v6008_v4 = vadd.f32 %v11768_v62, %v5919_v14  ;;  %v6011_v62 = vadd.f32 %v11787_v3, %v5922_v41  ;;  %v12413_v41 = vld [vmem:[#allocation61_spill] sm:$0xff] }
 0x8b3   : > { %6254 = vst [vmem:[%s11739_s17 + $0x18] sm:$0xff] %v6222_v16  ;;  %7522 = vtanh.f32 %v6085_v58  ;;  %6123 = vmatmul.bf16.gmra.mxu0 %v11585_v13  ;;  %v6195_v58 = vcvt.s32.f32 %v12407_v37 }
 0x8b5   : > { %v5839_v51 = vpop.f32.mrf.mxu1 }
 0x8b6   : > { %v5840_v10 = vadd.f32 %v11710_v44, %v5839_v51 }
 0x8b8   : > { %v6086_v48 = vpop.f32.mrf.mxu0 }
 0x8b9   : > { %v7523_v61 = vpop.eup %7522  ;;  %v6087_v55 = vadd.f32 %v6086_v48, %v5998_v8  ;;  %v12408_v48 = vld [vmem:[#allocation56_spill] sm:$0xff] }
 0x8ba   : > { %v6223_v13 = vsel %vm6186_vm11, %v6191_v33, %v7523_v61  ;;  %v6196_v61 = vcvt.s32.f32 %v12408_v48 }
 0x8bb   : > { %6255 = vst [vmem:[%s11739_s17 + $0x20] sm:$0xff] %v6223_v13  ;;  %7524 = vtanh.f32 %v6087_v55 }
 0x8bd   : > { %v5842_v15 = vpop.f32.mrf.mxu1 }
 0x8c0   : > { %v6089_v45 = vpop.f32.mrf.mxu0 }
 0x8c1   : > { %v7525_v2 = vpop.eup %7524  ;;  %v6090_v42 = vadd.f32 %v6089_v45, %v6001_v53 }
 0x8c2   : > { %v6224_v29 = vsel %vm6186_vm11, %v6192_v63, %v7525_v2  ;;  %v12409_v63 = vld [vmem:[#allocation57_spill] sm:$0xff] }
 0x8c3   : > { %6256 = vst [vmem:[%s11739_s17 + $0x28] sm:$0xff] %v6224_v29  ;;  %7526 = vtanh.f32 %v6090_v42  ;;  %6128 = vmatmul.bf16.gmra.mxu0 %v11608_v28  ;;  %v5928_v28 = vpop.f32.mrf.mxu2  ;;  %v6197_v45 = vcvt.s32.f32 %v12409_v63 }
 0x8c4   : > { %v5929_v6 = vadd.f32 %v5928_v28, %v5840_v10 }
 0x8c5   : > { %v5844_v33 = vpop.f32.mrf.mxu1 }
 0x8c8   : > { %v6091_v24 = vpop.f32.mrf.mxu0 }
 0x8c9   : > { %v7527_v39 = vpop.eup %7526  ;;  %v6092_v27 = vadd.f32 %v6091_v24, %v6003_v31  ;;  %v5927_v31 = vadd.f32 %v11809_v26, %v5838_v56 }
 0x8ca   : > { %v6225_v60 = vsel %vm6186_vm11, %v6193_v12, %v7527_v39 }
 0x8cb   : > { %6257 = vst [vmem:[%s11739_s17 + $0x30] sm:$0xff] %v6225_v60  ;;  %7528 = vtanh.f32 %v6092_v27  ;;  %v5931_v50 = vpop.f32.mrf.mxu2 }
 0x8cd   : > { %v5847_v2 = vpop.f32.mrf.mxu1 }
 0x8d0   : > { %v6094_v5 = vpop.f32.mrf.mxu0 }
 0x8d1   : > { %v7529_v0 = vpop.eup %7528  ;;  %v6095_v25 = vadd.f32 %v6094_v5, %v6006_v18  ;;  %v12411_v18 = vld [vmem:[#allocation59_spill] sm:$0xff] }
 0x8d2   : > { %v6226_v59 = vsel %vm6186_vm11, %v6194_v9, %v7529_v0  ;;  %v6199_v47 = vcvt.s32.f32 %v12411_v18  ;;  %v5843_v0 = vadd.f32 %v11710_v44, %v5842_v15 }
 0x8d3   : > { %6258 = vst [vmem:[%s11739_s17 + $0x38] sm:$0xff] %v6226_v59  ;;  %7530 = vtanh.f32 %v6095_v25  ;;  %6133 = vmatmul.bf16.gmra.mxu0 %v11637_v22  ;;  %v6020_v22 = vpop.f32.mrf.mxu3  ;;  %v5933_v11 = vpop.f32.mrf.mxu2 }
 0x8d4   : > { %v5932_v59 = vadd.f32 %v5931_v50, %v5843_v0 }
 0x8d5   : > { %v5849_v36 = vpop.f32.mrf.mxu1 }
 0x8d6   : > { %v5850_v63 = vadd.f32 %v11710_v44, %v5849_v36  ;;  %v12416_v36 = vld [vmem:[#allocation64_spill] sm:$0xff] }
 0x8d8   : > { %v6096_v16 = vpop.f32.mrf.mxu0 }
 0x8d9   : > { %v7531_v49 = vpop.eup %7530  ;;  %v6097_v8 = vadd.f32 %v6096_v16, %v6008_v4  ;;  %v12412_v4 = vld [vmem:[#allocation60_spill] sm:$0xff]  ;;  %v5845_v16 = vadd.f32 %v11710_v44, %v5844_v33  ;;  %v5848_v33 = vadd.f32 %v11710_v44, %v5847_v2 }
 0x8da   : > { %v6227_v17 = vsel %vm6186_vm11, %v6195_v58, %v7531_v49 }
 0x8db   : > { %6259 = vst [vmem:[%s11739_s17 + $0x40] sm:$0xff] %v6227_v17  ;;  %7532 = vtanh.f32 %v6097_v8  ;;  %v6022_v3 = vpop.f32.mrf.mxu3  ;;  %v5936_v23 = vpop.f32.mrf.mxu2  ;;  %v5934_v1 = vadd.f32 %v5933_v11, %v5845_v16 }
 0x8dc   : > { %v5937_v11 = vadd.f32 %v5936_v23, %v5848_v33 }
 0x8dd   : > { %v5852_v28 = vpop.f32.mrf.mxu1  ;;  %v6023_v17 = vadd.f32 %v6022_v3, %v5934_v1 }
 0x8de   : > { %v5853_v7 = vadd.f32 %v11710_v44, %v5852_v28 }
 0x8e0   : > { %v6099_v55 = vpop.f32.mrf.mxu0 }
 0x8e1   : > { %v7533_v13 = vpop.eup %7532  ;;  %v6100_v38 = vadd.f32 %v6099_v55, %v6011_v62 }
 0x8e2   : > { %v6228_v53 = vsel %vm6186_vm11, %v6196_v61, %v7533_v13 }
 0x8e3   : > { %6260 = vst [vmem:[%s11739_s17 + $0x48] sm:$0xff] %v6228_v53  ;;  %7534 = vtanh.f32 %v6100_v38  ;;  %6138 = vmatmul.bf16.gmra.mxu0 %v11664_v40  ;;  %v6016_v40 = vadd.f32 %v6015_v21, %v5927_v31  ;;  %v6025_v12 = vpop.f32.mrf.mxu3  ;;  %v5938_v26 = vpop.f32.mrf.mxu2  ;;  %v6018_v21 = vadd.f32 %v6017_v34, %v5929_v6  ;;  %v6200_v34 = vcvt.s32.f32 %v12412_v4  ;;  %v12414_v38 = vld [vmem:[#allocation62_spill] sm:$0xff] }
 0x8e4   : > { %v6202_v53 = vcvt.s32.f32 %v12414_v38 }
 0x8e5   : > { %v5854_v8 = vpop.f32.mrf.mxu1 }
 0x8e8   : > { %v6101_v19 = vpop.f32.mrf.mxu0 }
 0x8e9   : > { %v7535_v42 = vpop.eup %7534  ;;  %v6102_v29 = vadd.f32 %v6101_v19, %v6013_v46 }
 0x8ea   : > { %v6229_v57 = vsel %vm6186_vm11, %v6197_v45, %v7535_v42  ;;  %v5939_v42 = vadd.f32 %v5938_v26, %v5850_v63 }
 0x8eb   : > { %6261 = vst [vmem:[%s11739_s17 + $0x50] sm:$0xff] %v6229_v57  ;;  %7536 = vtanh.f32 %v6102_v29  ;;  %v6027_v43 = vpop.f32.mrf.mxu3  ;;  %v5941_v14 = vpop.f32.mrf.mxu2  ;;  %v12415_v29 = vld [vmem:[#allocation63_spill] sm:$0xff] }
 0x8ec   : > { %v6028_v56 = vadd.f32 %v6027_v43, %v5939_v42  ;;  %v6203_v23 = vcvt.s32.f32 %v12415_v29 }
 0x8ed   : > { %v5857_v20 = vpop.f32.mrf.mxu1 }
 0x8f0   : > { %v6104_v24 = vpop.f32.mrf.mxu0 }
 0x8f1   : > { %v7537_v39 = vpop.eup %7536  ;;  %v6105_v27 = vadd.f32 %v6104_v24, %v6016_v40 }
 0x8f2   : > { %v6230_v60 = vsel %vm6186_vm11, %v6198_v30, %v7537_v39  ;;  %v5942_v39 = vadd.f32 %v5941_v14, %v5853_v7 }
 0x8f3   : > { %6262 = vst [vmem:[%s11739_s17 + $0x58] sm:$0xff] %v6230_v60  ;;  %7538 = vtanh.f32 %v6105_v27  ;;  %6143 = vmatmul.bf16.gmra.mxu0 %v11689_v35  ;;  %v6021_v35 = vadd.f32 %v6020_v22, %v5932_v59  ;;  %v6030_v50 = vpop.f32.mrf.mxu3  ;;  %v6201_v22 = vcvt.s32.f32 %v12413_v41  ;;  %v5943_v62 = vpop.f32.mrf.mxu2  ;;  %v6204_v60 = vcvt.s32.f32 %v12416_v36 }
 0x8f4   : > { %v6031_v27 = vadd.f32 %v6030_v50, %v5942_v39 }
 0x8f8   : > { %v6106_v9 = vpop.f32.mrf.mxu0 }
 0x8f9   : > { %v7539_v5 = vpop.eup %7538  ;;  %v6107_v51 = vadd.f32 %v6106_v9, %v6018_v21  ;;  %v5855_v21 = vadd.f32 %v11710_v44, %v5854_v8 }
 0x8fa   : > { %v6231_v25 = vsel %vm6186_vm11, %v6199_v47, %v7539_v5 }
 0x8fb   : > { %6263 = vst [vmem:[%s11739_s17 + $0x60] sm:$0xff] %v6231_v25  ;;  %7540 = vtanh.f32 %v6107_v51  ;;  %v6032_v52 = vpop.f32.mrf.mxu3  ;;  %v5946_v2 = vpop.f32.mrf.mxu2  ;;  %v5944_v5 = vadd.f32 %v5943_v62, %v5855_v21  ;;  %v12417_v25 = vld [vmem:[#allocation65_spill] sm:$0xff] }
 0x8fc   : > { %v6205_v59 = vcvt.s32.f32 %v12417_v25 }
 0x8fd   : > { %v6033_v43 = vadd.f32 %v6032_v52, %v5944_v5 }
 0x900   : > { %v6109_v37 = vpop.f32.mrf.mxu0 }
 0x901   : > { %v7541_v58 = vpop.eup %7540  ;;  %v6110_v49 = vadd.f32 %v6109_v37, %v6021_v35  ;;  %v5858_v35 = vadd.f32 %v11710_v44, %v5857_v20 }
 0x902   : > { %v6232_v15 = vsel %vm6186_vm11, %v6200_v34, %v7541_v58 }
 0x903   : > { %6264 = vst [vmem:[%s11739_s17 + $0x68] sm:$0xff] %v6232_v15  ;;  %7542 = vtanh.f32 %v6110_v49  ;;  %6148 = vmatmul.bf16.gmra.mxu0 %v11723_v32  ;;  %v6026_v32 = vadd.f32 %v6025_v12, %v5937_v11  ;;  %v6035_v57 = vpop.f32.mrf.mxu3  ;;  %v5859_v12 = vpop.f32.mrf.mxu1  ;;  %v5947_v37 = vadd.f32 %v5946_v2, %v5858_v35  ;;  %v12418_v15 = vld [vmem:[#allocation66_spill] sm:$0xff] }
 0x904   : > { %v5948_v10 = vpop.f32.mrf.mxu2  ;;  %v6206_v1 = vcvt.s32.f32 %v12418_v15  ;;  %v5860_v41 = vadd.f32 %v11710_v44, %v5859_v12  ;;  %v12421_v12 = vld [vmem:[#allocation69_spill] sm:$0xff] }
 0x905   : > { %v6036_v49 = vadd.f32 %v6035_v57, %v5947_v37 }
 0x908   : > { %v6111_v48 = vpop.f32.mrf.mxu0 }
 0x909   : > { %v7543_v61 = vpop.eup %7542  ;;  %v6112_v55 = vadd.f32 %v6111_v48, %v6023_v17  ;;  %v5949_v48 = vadd.f32 %v5948_v10, %v5860_v41 }
 0x90a   : > { %v6233_v13 = vsel %vm6186_vm11, %v6201_v22, %v7543_v61 }
 0x90b   : > { %6265 = vst [vmem:[%s11739_s17 + $0x70] sm:$0xff] %v6233_v13  ;;  %7544 = vtanh.f32 %v6112_v55  ;;  %v6037_v47 = vpop.f32.mrf.mxu3  ;;  %v5862_v0 = vpop.f32.mrf.mxu1  ;;  %v12419_v55 = vld [vmem:[#allocation67_spill] sm:$0xff] }
 0x90c   : > { %v5951_v51 = vpop.f32.mrf.mxu2  ;;  %v6038_v33 = vadd.f32 %v6037_v47, %v5949_v48  ;;  %v6207_v13 = vcvt.s32.f32 %v12419_v55  ;;  %v5863_v38 = vadd.f32 %v11710_v44, %v5862_v0 }
 0x910   : > { %v6114_v3 = vpop.f32.mrf.mxu0 }
 0x911   : > { %v7545_v46 = vpop.eup %7544  ;;  %v6115_v45 = vadd.f32 %v6114_v3, %v6026_v32 }
 0x912   : > { %v6234_v19 = vsel %vm6186_vm11, %v6202_v53, %v7545_v46  ;;  %v5952_v46 = vadd.f32 %v5951_v51, %v5863_v38 }
 0x913   : > { %6266 = vst [vmem:[%s11739_s17 + $0x78] sm:$0xff] %v6234_v19  ;;  %7546 = vtanh.f32 %v6115_v45  ;;  %v6040_v58 = vpop.f32.mrf.mxu3  ;;  %v5864_v16 = vpop.f32.mrf.mxu1  ;;  %v12420_v45 = vld [vmem:[#allocation68_spill] sm:$0xff] }
 0x914   : > { %v5953_v50 = vpop.f32.mrf.mxu2  ;;  %v6041_v63 = vadd.f32 %v6040_v58, %v5952_v46  ;;  %v6208_v2 = vcvt.s32.f32 %v12420_v45  ;;  %v5865_v29 = vadd.f32 %v11710_v44, %v5864_v16 }
 0x918   : > { %v6116_v31 = vpop.f32.mrf.mxu0 }
 0x919   : > { %v7547_v40 = vpop.eup %7546  ;;  %v6117_v30 = vadd.f32 %v6116_v31, %v6028_v56 }
 0x91a   : > { %v6235_v24 = vsel %vm6186_vm11, %v6203_v23, %v7547_v40  ;;  %v5954_v40 = vadd.f32 %v5953_v50, %v5865_v29 }
 0x91b   : > { %6267 = vst [vmem:[%s11739_s17 + $0x80] sm:$0xff] %v6235_v24  ;;  %7548 = vtanh.f32 %v6117_v30  ;;  %v6042_v61 = vpop.f32.mrf.mxu3  ;;  %v5867_v11 = vpop.f32.mrf.mxu1  ;;  %v6209_v24 = vcvt.s32.f32 %v12421_v12 }
 0x91c   : > { %v5956_v20 = vpop.f32.mrf.mxu2  ;;  %v6043_v30 = vadd.f32 %v6042_v61, %v5954_v40 }
 0x920   : > { %v6119_v6 = vpop.f32.mrf.mxu0 }
 0x921   : > { %v7549_v26 = vpop.eup %7548  ;;  %v6120_v18 = vadd.f32 %v6119_v6, %v6031_v27  ;;  %v5868_v27 = vadd.f32 %v11710_v44, %v5867_v11 }
 0x922   : > { %v6236_v9 = vsel %vm6186_vm11, %v6204_v60, %v7549_v26 }
 0x923   : > { %6268 = vst [vmem:[%s11739_s17 + $0x88] sm:$0xff] %v6236_v9  ;;  %7550 = vtanh.f32 %v6120_v18  ;;  %v6045_v19 = vpop.f32.mrf.mxu3  ;;  %v5869_v57 = vpop.f32.mrf.mxu1  ;;  %v5957_v26 = vadd.f32 %v5956_v20, %v5868_v27  ;;  %v12422_v9 = vld [vmem:[#allocation70_spill] sm:$0xff] }
 0x924   : > { %v5958_v7 = vpop.f32.mrf.mxu2  ;;  %v6210_v5 = vcvt.s32.f32 %v12422_v9 }
 0x925   : > { %v6046_v47 = vadd.f32 %v6045_v19, %v5957_v26 }
 0x928   : > { %v6121_v28 = vpop.f32.mrf.mxu0 }
 0x929   : > { %v7551_v14 = vpop.eup %7550  ;;  %v6122_v4 = vadd.f32 %v6121_v28, %v6033_v43  ;;  %v5870_v43 = vadd.f32 %v11710_v44, %v5869_v57  ;;  %v12426_v57 = vld [vmem:[#allocation74_spill] sm:$0xff] }
 0x92a   : > { %v6237_v34 = vsel %vm6186_vm11, %v6205_v59, %v7551_v14 }
 0x92b   : > { %6269 = vst [vmem:[%s11739_s17 + $0x90] sm:$0xff] %v6237_v34  ;;  %7552 = vtanh.f32 %v6122_v4  ;;  %v6047_v60 = vpop.f32.mrf.mxu3  ;;  %v5872_v21 = vpop.f32.mrf.mxu1  ;;  %v5959_v28 = vadd.f32 %v5958_v7, %v5870_v43  ;;  %v12423_v34 = vld [vmem:[#allocation71_spill] sm:$0xff] }
 0x92c   : > { %v5961_v18 = vpop.f32.mrf.mxu2  ;;  %v6211_v37 = vcvt.s32.f32 %v12423_v34  ;;  %v5873_v15 = vadd.f32 %v11710_v44, %v5872_v21 }
 0x92d   : > { %v6048_v4 = vadd.f32 %v6047_v60, %v5959_v28 }
 0x930   : > { %v6124_v8 = vpop.f32.mrf.mxu0 }
 0x931   : > { %v7553_v17 = vpop.eup %7552  ;;  %v6125_v22 = vadd.f32 %v6124_v8, %v6036_v49  ;;  %v5962_v8 = vadd.f32 %v5961_v18, %v5873_v15 }
 0x932   : > { %v6238_v62 = vsel %vm6186_vm11, %v6206_v1, %v7553_v17 }
 0x933   : > { %6270 = vst [vmem:[%s11739_s17 + $0x98] sm:$0xff] %v6238_v62  ;;  %7554 = vtanh.f32 %v6125_v22  ;;  %v6050_v14 = vpop.f32.mrf.mxu3  ;;  %v5874_v35 = vpop.f32.mrf.mxu1  ;;  %v12424_v22 = vld [vmem:[#allocation72_spill] sm:$0xff] }
 0x934   : > { %v5963_v58 = vpop.f32.mrf.mxu2  ;;  %v6051_v41 = vadd.f32 %v6050_v14, %v5962_v8  ;;  %v6212_v62 = vcvt.s32.f32 %v12424_v22  ;;  %v5875_v55 = vadd.f32 %v11710_v44, %v5874_v35 }
 0x938   : > { %v6126_v52 = vpop.f32.mrf.mxu0 }
 0x939   : > { %v7555_v32 = vpop.eup %7554  ;;  %v6127_v53 = vadd.f32 %v6126_v52, %v6038_v33 }
 0x93a   : > { %v6239_v3 = vsel %vm6186_vm11, %v6207_v13, %v7555_v32  ;;  %v5964_v32 = vadd.f32 %v5963_v58, %v5875_v55 }
 0x93b   : > { %6271 = vst [vmem:[%s11739_s17 + $0xa0] sm:$0xff] %v6239_v3  ;;  %7556 = vtanh.f32 %v6127_v53  ;;  %v6052_v17 = vpop.f32.mrf.mxu3  ;;  %v5877_v48 = vpop.f32.mrf.mxu1  ;;  %v12425_v53 = vld [vmem:[#allocation73_spill] sm:$0xff] }
 0x93c   : > { %v5966_v11 = vpop.f32.mrf.mxu2  ;;  %v6053_v38 = vadd.f32 %v6052_v17, %v5964_v32  ;;  %v6213_v20 = vcvt.s32.f32 %v12425_v53  ;;  %v5878_v45 = vadd.f32 %v11710_v44, %v5877_v48 }
 0x940   : > { %v6129_v42 = vpop.f32.mrf.mxu0 }
 0x941   : > { %v7557_v56 = vpop.eup %7556  ;;  %v6130_v23 = vadd.f32 %v6129_v42, %v6041_v63 }
 0x942   : > { %v6240_v31 = vsel %vm6186_vm11, %v6208_v2, %v7557_v56  ;;  %v5967_v56 = vadd.f32 %v5966_v11, %v5878_v45 }
 0x943   : > { %6272 = vst [vmem:[%s11739_s17 + $0xa8] sm:$0xff] %v6240_v31  ;;  %7558 = vtanh.f32 %v6130_v23  ;;  %v6055_v3 = vpop.f32.mrf.mxu3  ;;  %v5879_v19 = vpop.f32.mrf.mxu1  ;;  %v6214_v31 = vcvt.s32.f32 %v12426_v57 }
 0x944   : > { %v5968_v29 = vpop.f32.mrf.mxu2  ;;  %v6056_v23 = vadd.f32 %v6055_v3, %v5967_v56 }
 0x948   : > { %v6131_v39 = vpop.f32.mrf.mxu0 }
 0x949   : > { %v7559_v10 = vpop.eup %7558  ;;  %v6132_v36 = vadd.f32 %v6131_v39, %v6043_v30  ;;  %v5880_v30 = vadd.f32 %v11710_v44, %v5879_v19 }
 0x94a   : > { %v6241_v6 = vsel %vm6186_vm11, %v6209_v24, %v7559_v10 }
 0x94b   : > { %6273 = vst [vmem:[%s11739_s17 + $0xb0] sm:$0xff] %v6241_v6  ;;  %7560 = vtanh.f32 %v6132_v36  ;;  %v6057_v24 = vpop.f32.mrf.mxu3  ;;  %v5969_v10 = vadd.f32 %v5968_v29, %v5880_v30  ;;  %v5882_v27 = vpop.f32.mrf.mxu1  ;;  %v12427_v6 = vld [vmem:[#allocation75_spill] sm:$0xff] }
 0x94c   : > { %v5971_v36 = vpop.f32.mrf.mxu2  ;;  %v6215_v26 = vcvt.s32.f32 %v12427_v6 }
 0x94d   : > { %v6058_v60 = vadd.f32 %v6057_v24, %v5969_v10 }
 0x950   : > { %v6134_v0 = vpop.f32.mrf.mxu0 }
 0x951   : > { %v7561_v51 = vpop.eup %7560  ;;  %v6135_v25 = vadd.f32 %v6134_v0, %v6046_v47  ;;  %v5883_v47 = vadd.f32 %v11710_v44, %v5882_v27 }
 0x952   : > { %v6242_v59 = vsel %vm6186_vm11, %v6210_v5, %v7561_v51 }
 0x953   : > { %6274 = vst [vmem:[%s11739_s17 + $0xb8] sm:$0xff] %v6242_v59  ;;  %7562 = vtanh.f32 %v6135_v25  ;;  %v5972_v0 = vadd.f32 %v5971_v36, %v5883_v47  ;;  %v6060_v51 = vpop.f32.mrf.mxu3  ;;  %v5884_v43 = vpop.f32.mrf.mxu1  ;;  %v12428_v59 = vld [vmem:[#allocation76_spill] sm:$0xff] }
 0x954   : > { %v6216_v28 = vcvt.s32.f32 %v12428_v59  ;;  %v5973_v14 = vpop.f32.mrf.mxu2  ;;  %v5885_v34 = vadd.f32 %v11710_v44, %v5884_v43  ;;  %v12430_v44 = vld [vmem:[#allocation78_spill] sm:$0xff] }
 0x955   : > { %v6061_v25 = vadd.f32 %v6060_v51, %v5972_v0 }
 0x958   : > { %v6136_v16 = vpop.f32.mrf.mxu0 }
 0x959   : > { %v7563_v49 = vpop.eup %7562  ;;  %v6137_v1 = vadd.f32 %v6136_v16, %v6048_v4  ;;  %v5974_v16 = vadd.f32 %v5973_v14, %v5885_v34 }
 0x95a   : > { %v6243_v50 = vsel %vm6186_vm11, %v6211_v37, %v7563_v49 }
 0x95b   : > { %6275 = vst [vmem:[%s11739_s17 + $0xc0] sm:$0xff] %v6243_v50  ;;  %7564 = vtanh.f32 %v6137_v1  ;;  %v6062_v49 = vpop.f32.mrf.mxu3  ;;  %v12429_v1 = vld [vmem:[#allocation77_spill] sm:$0xff] }
 0x95c   : > { %v6063_v15 = vadd.f32 %v6062_v49, %v5974_v16  ;;  %v6217_v50 = vcvt.s32.f32 %v12429_v1 }
 0x960   : > { %v6139_v61 = vpop.f32.mrf.mxu0 }
 0x961   : > { %v7565_v33 = vpop.eup %7564  ;;  %v6140_v13 = vadd.f32 %v6139_v61, %v6051_v41 }
 0x962   : > { %v6244_v52 = vsel %vm6186_vm11, %v6212_v62, %v7565_v33  ;;  %v6218_v62 = vcvt.s32.f32 %v12430_v44 }
 0x963   : > { %6276 = vst [vmem:[%s11739_s17 + $0xc8] sm:$0xff] %v6244_v52  ;;  %7566 = vtanh.f32 %v6140_v13 }
 0x968   : > { %v6141_v46 = vpop.f32.mrf.mxu0 }
 0x969   : > { %v7567_v63 = vpop.eup %7566  ;;  %v6142_v2 = vadd.f32 %v6141_v46, %v6053_v38 }
 0x96a   : > { %v6245_v42 = vsel %vm6186_vm11, %v6213_v20, %v7567_v63 }
 0x96b   : > { %6277 = vst [vmem:[%s11739_s17 + $0xd0] sm:$0xff] %v6245_v42  ;;  %7568 = vtanh.f32 %v6142_v2 }
 0x970   : > { %v6144_v40 = vpop.f32.mrf.mxu0 }
 0x971   : > { %v7569_v7 = vpop.eup %7568  ;;  %v6145_v12 = vadd.f32 %v6144_v40, %v6056_v23 }
 0x972   : > { %v6246_v39 = vsel %vm6186_vm11, %v6214_v31, %v7569_v7 }
 0x973   : > { %6278 = vst [vmem:[%s11739_s17 + $0xd8] sm:$0xff] %v6246_v39  ;;  %7570 = vtanh.f32 %v6145_v12 }
 0x978   : > { %v6146_v21 = vpop.f32.mrf.mxu0 }
 0x979   : > { %v7571_v18 = vpop.eup %7570  ;;  %v6147_v9 = vadd.f32 %v6146_v21, %v6058_v60 }
 0x97a   : > { %v6247_v5 = vsel %vm6186_vm11, %v6215_v26, %v7571_v18 }
 0x97b   : > { %6279 = vst [vmem:[%s11739_s17 + $0xe0] sm:$0xff] %v6247_v5  ;;  %7572 = vtanh.f32 %v6147_v9 }
 0x980   : > { %v6149_v35 = vpop.f32.mrf.mxu0 }
 0x981   : > { %v7573_v4 = vpop.eup %7572  ;;  %v6150_v37 = vadd.f32 %v6149_v35, %v6061_v25 }
 0x982   : > { %v6248_v58 = vsel %vm6186_vm11, %v6216_v28, %v7573_v4 }
 0x983   : > { %6280 = vst [vmem:[%s11739_s17 + $0xe8] sm:$0xff] %v6248_v58  ;;  %7574 = vtanh.f32 %v6150_v37 }
 0x988   : > { %v6151_v8 = vpop.f32.mrf.mxu0 }
 0x989   : > { %v7575_v17 = vpop.eup %7574  ;;  %v6152_v41 = vadd.f32 %v6151_v8, %v6063_v15 }
 0x98a   : > { %v6249_v22 = vsel %vm6186_vm11, %v6217_v50, %v7575_v17 }
 0x98b   : > { %6281 = vst [vmem:[%s11739_s17 + $0xf0] sm:$0xff] %v6249_v22  ;;  %7576 = vtanh.f32 %v6152_v41 }
 0x991   : > { %v7577_v48 = vpop.eup %7576 }
 0x992   : > { %v6250_v61 = vsel %vm6186_vm11, %v6218_v62, %v7577_v48 }
 0x993   : > { %6282 = vst [vmem:[%s11739_s17 + $0xf8] sm:$0xff] %v6250_v61 }
 0x994 PF: > { %s34_s30 = sadd.s32 1, %s7811_s30  }
 0x995   : > { %p31_p7 = scmp.ge.s32.totalorder %s34_s30, 4  }
 0x997   :  { %33 = sbr.rel (!%p31_p7) target bundleno = 21 (0x15), region = 155 }
 0x99c   :  { %6322 = vsyncpa [#allocation5], 1 }
 0x99d   :  { %6324 = vsyncpa [#allocation5 + $0x1], 1 }
 0x99e   :  { %6325 = vsyncpa [#allocation7], 1 }
 0x99f   :  { %6326 = vsyncpa [#allocation10], 1 }
 0x9a0   :  { %6327 = vsyncpa [#allocation13], 1 }

</bundles_post_ra>
